<compile_context>
chip_gen: v5e
topology: v5e:2x2
jax: 0.10.0
libtpu: 0.0.40
codegen_flags: <defaults>
</compile_context>

<pallas_src>
import functools

import jax
import jax.numpy as jnp
from jax.experimental import pallas as pl
from jax.experimental.pallas import tpu as pltpu

BN_EPS = 1e-5


def _fold_bn(gamma, beta, mean, var, eps=BN_EPS):
    scale = gamma / jnp.sqrt(var + eps)
    bias = beta - mean * scale
    return scale[None, :], bias[None, :]          # (1, C) for row-broadcast in-kernel


# ---------------------------------------------------------------------------
# Fused kernel: BN1 -> conv3x3 -> BN2 -> ReLU -> conv3x3 -> BN3 -> +shortcut
# (one image per grid step; everything stays in VMEM)
# ---------------------------------------------------------------------------
def _basic_block_kernel(x_ref, s1_ref, b1_ref, w1_ref, b2_ref, w2_ref, b3_ref,
                        ml_ref, mr_ref, o_ref, pad1_ref, pad2_ref, acc_ref, *, width):
    f32 = jnp.float32
    HW, Cin = x_ref.shape
    P = o_ref.shape[-1]
    W = width
    PAD = W + 1                                   # zero halo rows around flat interior

    m_left = ml_ref[...]                          # (HW,1): 0 where w == 0     (dx==0)
    m_right = mr_ref[...]                         # (HW,1): 0 where w == W - 1 (dx==2)
    masks = (m_left, None, m_right)

    x = x_ref[...].astype(f32)                    # (HW, Cin); also the residual shortcut

    def conv3x3(pad_ref, w_ref, src):
        """3x3 conv of `src` (HW, C) -> accumulated into acc_ref (HW, P)."""
        C = pad_ref.shape[-1]
        # zero halo + interior write (all in VMEM)
        pad_ref[0:PAD, :] = jnp.zeros((PAD, C), f32)
        pad_ref[PAD + HW:PAD + HW + PAD, :] = jnp.zeros((PAD, C), f32)
        pad_ref[PAD:PAD + HW, :] = src
        acc_ref[...] = jnp.zeros_like(acc_ref)
        for dy in range(3):
            for dx in range(3):
                start = dy * W + dx               # flat row shift of tap (dy, dx)
                # Production note: operands could be cast to bf16 here for the MXU
                # native rate; kept f32 for exactness of the reference check.
                tap = jnp.dot(pad_ref[start:start + HW, :], w_ref[dy, dx, :, :],
                              preferred_element_type=f32)
                if masks[dx] is not None:
                    tap = tap * masks[dx]
                acc_ref[...] += tap

    # BN1 -> conv1 (BN2 scale pre-folded into w1)
    conv3x3(pad1_ref, w1_ref, x * s1_ref[...] + b1_ref[...])
    # BN2 bias + ReLU -> conv2 (BN3 scale pre-folded into w2)
    conv3x3(pad2_ref, w2_ref, jnp.maximum(acc_ref[...] + b2_ref[...], 0.0))
    # BN3 bias + zero-channel-padded identity shortcut (no HBM zero padding)
    out = acc_ref[...] + b3_ref[...]
    o_ref[:, 0:Cin] = (out[:, 0:Cin] + x).astype(o_ref.dtype)
    if Cin < P:
        o_ref[:, Cin:P] = out[:, Cin:P].astype(o_ref.dtype)


def basic_block_forward(x_nchw, params, stride=1, downsample=None):
    """Pallas implementation of BasicBlock.forward (stride=1, downsample=None)."""
    assert stride == 1 and downsample is None, "only stride=1 / downsample=None supported"
    # TODO(synk): stride>1 + downsample (avg-pool) shortcut path of PRN not implemented.

    f32 = jnp.float32
    N, Cin, H, W = x_nchw.shape
    P = params["w1"].shape[-1]
    assert Cin <= P, "BasicBlock only widens channels"
    HW = H * W
    PAD = W + 1
    BFLAT = HW + 2 * PAD

    s1, b1 = _fold_bn(*params["bn1"])             # (1, Cin)
    s2, b2 = _fold_bn(*params["bn2"])             # (1, P)
    s3, b3 = _fold_bn(*params["bn3"])             # (1, P)
    # Fold post-conv BN scales into the conv weights (exact: conv is linear).
    w1f = params["w1"].astype(f32) * s2[0]        # (3, 3, Cin, P)
    w2f = params["w2"].astype(f32) * s3[0]        # (3, 3, P,   P)

    # NCHW -> flat NHWC rows; activations go through HBM as bf16 (interface glue).
    x_rows = (jnp.transpose(x_nchw, (0, 2, 3, 1))
              .reshape(N, HW, Cin).astype(jnp.bfloat16))

    # column masks for the horizontal taps that would wrap across image rows
    col = jnp.arange(HW, dtype=jnp.int32).reshape(HW, 1) % W
    m_left = (col != 0).astype(f32)
    m_right = (col != W - 1).astype(f32)

    # explicit VMEM budget: double-buffered blocks + scratch + headroom (capped for v7x)
    est = (2 * HW * Cin * 2 + 2 * HW * P * 4
           + 2 * 9 * (Cin * P + P * P) * 4
           + (BFLAT * (Cin + P) + HW * P) * 4)
    vmem_limit = int(min(max(4 * est, 16 * 2**20), 48 * 2**20))

    kernel = functools.partial(_basic_block_kernel, width=W)

    out_rows = pl.pallas_call(
        kernel,
        out_shape=jax.ShapeDtypeStruct((N, HW, P), f32),
        grid=(N,),
        in_specs=[
            pl.BlockSpec((None, HW, Cin), lambda n: (n, 0, 0)),      # x (one image)
            pl.BlockSpec((1, Cin), lambda n: (0, 0)),                # BN1 scale
            pl.BlockSpec((1, Cin), lambda n: (0, 0)),                # BN1 bias
            pl.BlockSpec((3, 3, Cin, P), lambda n: (0, 0, 0, 0)),    # w1 * s2
            pl.BlockSpec((1, P), lambda n: (0, 0)),                  # BN2 bias
            pl.BlockSpec((3, 3, P, P), lambda n: (0, 0, 0, 0)),      # w2 * s3
            pl.BlockSpec((1, P), lambda n: (0, 0)),                  # BN3 bias
            pl.BlockSpec((HW, 1), lambda n: (0, 0)),                 # mask dx=0
            pl.BlockSpec((HW, 1), lambda n: (0, 0)),                 # mask dx=2
        ],
        out_specs=pl.BlockSpec((None, HW, P), lambda n: (n, 0, 0)),
        scratch_shapes=[
            pltpu.VMEM((BFLAT, Cin), f32),   # zero-haloed bn1(x)
            pltpu.VMEM((BFLAT, P), f32),     # zero-haloed relu(bn2(conv1))
            pltpu.VMEM((HW, P), f32),        # conv accumulator
        ],
        compiler_params=pltpu.CompilerParams(
            dimension_semantics=("parallel",),
            vmem_limit_bytes=vmem_limit),
    )(x_rows, s1, b1, w1f, b2, w2f, b3, m_left, m_right)

    # TODO(synk): for very large feature maps add an H-tile grid axis (2-row halo) and a
    # lane-dense (>=128) packed bf16 output layout.
    out = out_rows.reshape(N, H, W, P)
    return jnp.transpose(out, (0, 3, 1, 2))       # back to NCHW (interface glue)


# ---------------------------------------------------------------------------
# Deterministic parameter construction (mirrors BasicBlock.__init__ shapes)
# ---------------------------------------------------------------------------
def make_params(key, inplanes, planes):
    ks = jax.random.split(key, 5)

    def bn(k, c):
        kk = jax.random.split(k, 4)
        gamma = 1.0 + 0.1 * jax.random.normal(kk[0], (c,), jnp.float32)
        beta = 0.1 * jax.random.normal(kk[1], (c,), jnp.float32)
        mean = 0.1 * jax.random.normal(kk[2], (c,), jnp.float32)
        var = jnp.abs(1.0 + 0.1 * jax.random.normal(kk[3], (c,), jnp.float32))
        return gamma, beta, mean, var

    # conv weights stored HWIO:  torch (out, in, 3, 3)  ->  (3, 3, in, out)
    return {
        "bn1": bn(ks[0], inplanes),
        "w1": 0.1 * jax.random.normal(ks[1], (3, 3, inplanes, planes), jnp.float32),
        "bn2": bn(ks[2], planes),
        "w2": 0.1 * jax.random.normal(ks[3], (3, 3, planes, planes), jnp.float32),
        "bn3": bn(ks[4], planes),
    }


# ---------------------------------------------------------------------------
# Pure-JAX reference (for correctness check)
# ---------------------------------------------------------------------------
def basic_block_ref(x_nchw, params):
    def bn(x, p):
        g, b, m, v = p
        return (x - m) / jnp.sqrt(v + BN_EPS) * g + b

    x = jnp.transpose(x_nchw, (0, 2, 3, 1)).astype(jnp.float32)
    h = bn(x, params["bn1"])
    h = jax.lax.conv_general_dilated(h, params["w1"], (1, 1), ((1, 1), (1, 1)),
                                     dimension_numbers=("NHWC", "HWIO", "NHWC"))
    h = jax.nn.relu(bn(h, params["bn2"]))
    h = jax.lax.conv_general_dilated(h, params["w2"], (1, 1), ((1, 1), (1, 1)),
                                     dimension_numbers=("NHWC", "HWIO", "NHWC"))
    h = bn(h, params["bn3"])
    cout, cin = h.shape[-1], x.shape[-1]
    sc = jnp.pad(x, ((0, 0), (0, 0), (0, 0), (0, cout - cin))) if cout != cin else x
    return jnp.transpose(h + sc, (0, 3, 1, 2))


if __name__ == "__main__":
    key = jax.random.PRNGKey(0)
    k_x, k_p = jax.random.split(key)

    N, inplanes, planes, Hs, Ws = 2, 4, 8, 16, 16   # inplanes < planes exercises the
    # zero-channel-padded shortcut path of BasicBlock.

    x = jax.random.normal(k_x, (N, inplanes, Hs, Ws), jnp.float32)   # NCHW like PyTorch
    params = make_params(k_p, inplanes, planes)

    out = jax.jit(basic_block_forward)(x, params)
    out = jax.block_until_ready(out)

    # The reference sees the same bf16-rounded activations the kernel reads from HBM.
    x_q = x.astype(jnp.bfloat16).astype(jnp.float32)
    ref = basic_block_ref(x_q, params)

    assert out.shape == (N, planes, Hs, Ws), out.shape
    err = float(jnp.max(jnp.abs(out - ref)))
    assert jnp.allclose(out, ref, rtol=2e-3, atol=2e-3), err

    print("KERNEL_OK")
</pallas_src>

<mosaic_0001>
module attributes {stable_mosaic.version = 11 : i64} {
  func.func @_basic_block_kernel(%arg0: i32, %arg1: memref<1x256x4xbf16, #tpu.memory_space<vmem>>, %arg2: memref<1x4xf32, #tpu.memory_space<vmem>>, %arg3: memref<1x4xf32, #tpu.memory_space<vmem>>, %arg4: memref<3x3x4x8xf32, #tpu.memory_space<vmem>>, %arg5: memref<1x8xf32, #tpu.memory_space<vmem>>, %arg6: memref<3x3x8x8xf32, #tpu.memory_space<vmem>>, %arg7: memref<1x8xf32, #tpu.memory_space<vmem>>, %arg8: memref<256x1xf32, #tpu.memory_space<vmem>>, %arg9: memref<256x1xf32, #tpu.memory_space<vmem>>, %arg10: memref<1x256x8xf32, #tpu.memory_space<vmem>>, %arg11: memref<290x4xf32, #tpu.memory_space<vmem>>, %arg12: memref<290x8xf32, #tpu.memory_space<vmem>>, %arg13: memref<256x8xf32, #tpu.memory_space<vmem>>) attributes {dimension_semantics = [#tpu.dimension_semantics<parallel>], iteration_bounds = array<i64: 2>, scalar_prefetch = 0 : i64, scratch_operands = 3 : i64, tpu.core_type = #tpu.core_type<tc>, window_params = [{transform_indices = @transform_0, window_bounds = array<i64: 1, 256, 4>}, {pipeline_mode = #tpu.pipeline_mode<synchronous>, transform_indices = @transform_1, window_bounds = array<i64: 1, 4>}, {pipeline_mode = #tpu.pipeline_mode<synchronous>, transform_indices = @transform_2, window_bounds = array<i64: 1, 4>}, {pipeline_mode = #tpu.pipeline_mode<synchronous>, transform_indices = @transform_3, window_bounds = array<i64: 3, 3, 4, 8>}, {pipeline_mode = #tpu.pipeline_mode<synchronous>, transform_indices = @transform_4, window_bounds = array<i64: 1, 8>}, {pipeline_mode = #tpu.pipeline_mode<synchronous>, transform_indices = @transform_5, window_bounds = array<i64: 3, 3, 8, 8>}, {pipeline_mode = #tpu.pipeline_mode<synchronous>, transform_indices = @transform_6, window_bounds = array<i64: 1, 8>}, {pipeline_mode = #tpu.pipeline_mode<synchronous>, transform_indices = @transform_7, window_bounds = array<i64: 256, 1>}, {pipeline_mode = #tpu.pipeline_mode<synchronous>, transform_indices = @transform_8, window_bounds = array<i64: 256, 1>}, {transform_indices = @transform_9, window_bounds = array<i64: 1, 256, 8>}]} {
    %c0 = arith.constant 0 : index
    %c0_0 = arith.constant 0 : index
    %0 = vector.load %arg8[%c0, %c0_0] : memref<256x1xf32, #tpu.memory_space<vmem>>, vector<256x1xf32>
    %c0_1 = arith.constant 0 : index
    %c0_2 = arith.constant 0 : index
    %1 = vector.load %arg9[%c0_1, %c0_2] : memref<256x1xf32, #tpu.memory_space<vmem>>, vector<256x1xf32>
    %c0_3 = arith.constant 0 : index
    %c0_4 = arith.constant 0 : index
    %c0_5 = arith.constant 0 : index
    %2 = vector.load %arg1[%c0_3, %c0_4, %c0_5] : memref<1x256x4xbf16, #tpu.memory_space<vmem>>, vector<1x256x4xbf16>
    %3 = vector.shape_cast %2 : vector<1x256x4xbf16> to vector<256x4xbf16>
    %4 = arith.extf %3 : vector<256x4xbf16> to vector<256x4xf32>
    %c0_6 = arith.constant 0 : index
    %c0_7 = arith.constant 0 : index
    %5 = vector.load %arg2[%c0_6, %c0_7] : memref<1x4xf32, #tpu.memory_space<vmem>>, vector<1x4xf32>
    %6 = vector.broadcast %5 : vector<1x4xf32> to vector<256x4xf32>
    %7 = arith.mulf %4, %6 : vector<256x4xf32>
    %c0_8 = arith.constant 0 : index
    %c0_9 = arith.constant 0 : index
    %8 = vector.load %arg3[%c0_8, %c0_9] : memref<1x4xf32, #tpu.memory_space<vmem>>, vector<1x4xf32>
    %9 = vector.broadcast %8 : vector<1x4xf32> to vector<256x4xf32>
    %10 = arith.addf %7, %9 : vector<256x4xf32>
    %cst = arith.constant 0.000000e+00 : f32
    %11 = vector.broadcast %cst : f32 to vector<17x4xf32>
    %c0_10 = arith.constant 0 : index
    %c0_11 = arith.constant 0 : index
    %12 = vector.load %arg11[%c0_10, %c0_11] : memref<290x4xf32, #tpu.memory_space<vmem>>, vector<17x4xf32>
    tpu.vector_store %arg11[%c0_10, %c0_11], %11 {strides = array<i32>} : memref<290x4xf32, #tpu.memory_space<vmem>>, vector<17x4xf32>,
    %cst_12 = arith.constant 0.000000e+00 : f32
    %13 = vector.broadcast %cst_12 : f32 to vector<17x4xf32>
    %c273 = arith.constant 273 : index
    %c0_13 = arith.constant 0 : index
    %14 = vector.load %arg11[%c273, %c0_13] : memref<290x4xf32, #tpu.memory_space<vmem>>, vector<17x4xf32>
    tpu.vector_store %arg11[%c273, %c0_13], %13 {strides = array<i32>} : memref<290x4xf32, #tpu.memory_space<vmem>>, vector<17x4xf32>,
    %c17 = arith.constant 17 : index
    %c0_14 = arith.constant 0 : index
    %15 = vector.load %arg11[%c17, %c0_14] : memref<290x4xf32, #tpu.memory_space<vmem>>, vector<256x4xf32>
    tpu.vector_store %arg11[%c17, %c0_14], %10 {strides = array<i32>} : memref<290x4xf32, #tpu.memory_space<vmem>>, vector<256x4xf32>,
    %cst_15 = arith.constant 0.000000e+00 : f32
    %16 = vector.broadcast %cst_15 : f32 to vector<256x8xf32>
    %c0_16 = arith.constant 0 : index
    %c0_17 = arith.constant 0 : index
    %17 = vector.load %arg13[%c0_16, %c0_17] : memref<256x8xf32, #tpu.memory_space<vmem>>, vector<256x8xf32>
    tpu.vector_store %arg13[%c0_16, %c0_17], %16 {strides = array<i32>} : memref<256x8xf32, #tpu.memory_space<vmem>>, vector<256x8xf32>,
    %c0_18 = arith.constant 0 : index
    %c0_19 = arith.constant 0 : index
    %18 = vector.load %arg11[%c0_18, %c0_19] : memref<290x4xf32, #tpu.memory_space<vmem>>, vector<256x4xf32>
    %c0_20 = arith.constant 0 : index
    %c0_21 = arith.constant 0 : index
    %c0_22 = arith.constant 0 : index
    %c0_23 = arith.constant 0 : index
    %19 = vector.load %arg4[%c0_20, %c0_21, %c0_22, %c0_23] : memref<3x3x4x8xf32, #tpu.memory_space<vmem>>, vector<1x1x4x8xf32>
    %20 = vector.shape_cast %19 : vector<1x1x4x8xf32> to vector<4x8xf32>
    %cst_24 = arith.constant dense<0.000000e+00> : vector<256x8xf32>
    %21 = tpu.matmul %18, %20, %cst_24 {dimension_numbers = #tpu.dot_dimension_numbers<[1], [0], [0], [1], [0, 0, 1, 1], [], []>} : vector<256x4xf32>, vector<4x8xf32>, vector<256x8xf32> -> vector<256x8xf32>
    %22 = vector.broadcast %0 : vector<256x1xf32> to vector<256x8xf32>
    %23 = arith.mulf %21, %22 : vector<256x8xf32>
    %c0_25 = arith.constant 0 : index
    %c0_26 = arith.constant 0 : index
    %24 = vector.load %arg13[%c0_25, %c0_26] : memref<256x8xf32, #tpu.memory_space<vmem>>, vector<256x8xf32>
    %25 = arith.addf %24, %23 : vector<256x8xf32>
    %c0_27 = arith.constant 0 : index
    %c0_28 = arith.constant 0 : index
    %26 = vector.load %arg13[%c0_27, %c0_28] : memref<256x8xf32, #tpu.memory_space<vmem>>, vector<256x8xf32>
    tpu.vector_store %arg13[%c0_27, %c0_28], %25 {strides = array<i32>} : memref<256x8xf32, #tpu.memory_space<vmem>>, vector<256x8xf32>,
    %c1 = arith.constant 1 : index
    %c0_29 = arith.constant 0 : index
    %27 = vector.load %arg11[%c1, %c0_29] : memref<290x4xf32, #tpu.memory_space<vmem>>, vector<256x4xf32>
    %c0_30 = arith.constant 0 : index
    %c1_31 = arith.constant 1 : index
    %c0_32 = arith.constant 0 : index
    %c0_33 = arith.constant 0 : index
    %28 = vector.load %arg4[%c0_30, %c1_31, %c0_32, %c0_33] : memref<3x3x4x8xf32, #tpu.memory_space<vmem>>, vector<1x1x4x8xf32>
    %29 = vector.shape_cast %28 : vector<1x1x4x8xf32> to vector<4x8xf32>
    %cst_34 = arith.constant dense<0.000000e+00> : vector<256x8xf32>
    %30 = tpu.matmul %27, %29, %cst_34 {dimension_numbers = #tpu.dot_dimension_numbers<[1], [0], [0], [1], [0, 0, 1, 1], [], []>} : vector<256x4xf32>, vector<4x8xf32>, vector<256x8xf32> -> vector<256x8xf32>
    %c0_35 = arith.constant 0 : index
    %c0_36 = arith.constant 0 : index
    %31 = vector.load %arg13[%c0_35, %c0_36] : memref<256x8xf32, #tpu.memory_space<vmem>>, vector<256x8xf32>
    %32 = arith.addf %31, %30 : vector<256x8xf32>
    %c0_37 = arith.constant 0 : index
    %c0_38 = arith.constant 0 : index
    %33 = vector.load %arg13[%c0_37, %c0_38] : memref<256x8xf32, #tpu.memory_space<vmem>>, vector<256x8xf32>
    tpu.vector_store %arg13[%c0_37, %c0_38], %32 {strides = array<i32>} : memref<256x8xf32, #tpu.memory_space<vmem>>, vector<256x8xf32>,
    %c2 = arith.constant 2 : index
    %c0_39 = arith.constant 0 : index
    %34 = vector.load %arg11[%c2, %c0_39] : memref<290x4xf32, #tpu.memory_space<vmem>>, vector<256x4xf32>
    %c0_40 = arith.constant 0 : index
    %c2_41 = arith.constant 2 : index
    %c0_42 = arith.constant 0 : index
    %c0_43 = arith.constant 0 : index
    %35 = vector.load %arg4[%c0_40, %c2_41, %c0_42, %c0_43] : memref<3x3x4x8xf32, #tpu.memory_space<vmem>>, vector<1x1x4x8xf32>
    %36 = vector.shape_cast %35 : vector<1x1x4x8xf32> to vector<4x8xf32>
    %cst_44 = arith.constant dense<0.000000e+00> : vector<256x8xf32>
    %37 = tpu.matmul %34, %36, %cst_44 {dimension_numbers = #tpu.dot_dimension_numbers<[1], [0], [0], [1], [0, 0, 1, 1], [], []>} : vector<256x4xf32>, vector<4x8xf32>, vector<256x8xf32> -> vector<256x8xf32>
    %38 = vector.broadcast %1 : vector<256x1xf32> to vector<256x8xf32>
    %39 = arith.mulf %37, %38 : vector<256x8xf32>
    %c0_45 = arith.constant 0 : index
    %c0_46 = arith.constant 0 : index
    %40 = vector.load %arg13[%c0_45, %c0_46] : memref<256x8xf32, #tpu.memory_space<vmem>>, vector<256x8xf32>
    %41 = arith.addf %40, %39 : vector<256x8xf32>
    %c0_47 = arith.constant 0 : index
    %c0_48 = arith.constant 0 : index
    %42 = vector.load %arg13[%c0_47, %c0_48] : memref<256x8xf32, #tpu.memory_space<vmem>>, vector<256x8xf32>
    tpu.vector_store %arg13[%c0_47, %c0_48], %41 {strides = array<i32>} : memref<256x8xf32, #tpu.memory_space<vmem>>, vector<256x8xf32>,
    %c16 = arith.constant 16 : index
    %c0_49 = arith.constant 0 : index
    %43 = vector.load %arg11[%c16, %c0_49] : memref<290x4xf32, #tpu.memory_space<vmem>>, vector<256x4xf32>
    %c1_50 = arith.constant 1 : index
    %c0_51 = arith.constant 0 : index
    %c0_52 = arith.constant 0 : index
    %c0_53 = arith.constant 0 : index
    %44 = vector.load %arg4[%c1_50, %c0_51, %c0_52, %c0_53] : memref<3x3x4x8xf32, #tpu.memory_space<vmem>>, vector<1x1x4x8xf32>
    %45 = vector.shape_cast %44 : vector<1x1x4x8xf32> to vector<4x8xf32>
    %cst_54 = arith.constant dense<0.000000e+00> : vector<256x8xf32>
    %46 = tpu.matmul %43, %45, %cst_54 {dimension_numbers = #tpu.dot_dimension_numbers<[1], [0], [0], [1], [0, 0, 1, 1], [], []>} : vector<256x4xf32>, vector<4x8xf32>, vector<256x8xf32> -> vector<256x8xf32>
    %47 = vector.broadcast %0 : vector<256x1xf32> to vector<256x8xf32>
    %48 = arith.mulf %46, %47 : vector<256x8xf32>
    %c0_55 = arith.constant 0 : index
    %c0_56 = arith.constant 0 : index
    %49 = vector.load %arg13[%c0_55, %c0_56] : memref<256x8xf32, #tpu.memory_space<vmem>>, vector<256x8xf32>
    %50 = arith.addf %49, %48 : vector<256x8xf32>
    %c0_57 = arith.constant 0 : index
    %c0_58 = arith.constant 0 : index
    %51 = vector.load %arg13[%c0_57, %c0_58] : memref<256x8xf32, #tpu.memory_space<vmem>>, vector<256x8xf32>
    tpu.vector_store %arg13[%c0_57, %c0_58], %50 {strides = array<i32>} : memref<256x8xf32, #tpu.memory_space<vmem>>, vector<256x8xf32>,
    %c17_59 = arith.constant 17 : index
    %c0_60 = arith.constant 0 : index
    %52 = vector.load %arg11[%c17_59, %c0_60] : memref<290x4xf32, #tpu.memory_space<vmem>>, vector<256x4xf32>
    %c1_61 = arith.constant 1 : index
    %c1_62 = arith.constant 1 : index
    %c0_63 = arith.constant 0 : index
    %c0_64 = arith.constant 0 : index
    %53 = vector.load %arg4[%c1_61, %c1_62, %c0_63, %c0_64] : memref<3x3x4x8xf32, #tpu.memory_space<vmem>>, vector<1x1x4x8xf32>
    %54 = vector.shape_cast %53 : vector<1x1x4x8xf32> to vector<4x8xf32>
    %cst_65 = arith.constant dense<0.000000e+00> : vector<256x8xf32>
    %55 = tpu.matmul %52, %54, %cst_65 {dimension_numbers = #tpu.dot_dimension_numbers<[1], [0], [0], [1], [0, 0, 1, 1], [], []>} : vector<256x4xf32>, vector<4x8xf32>, vector<256x8xf32> -> vector<256x8xf32>
    %c0_66 = arith.constant 0 : index
    %c0_67 = arith.constant 0 : index
    %56 = vector.load %arg13[%c0_66, %c0_67] : memref<256x8xf32, #tpu.memory_space<vmem>>, vector<256x8xf32>
    %57 = arith.addf %56, %55 : vector<256x8xf32>
    %c0_68 = arith.constant 0 : index
    %c0_69 = arith.constant 0 : index
    %58 = vector.load %arg13[%c0_68, %c0_69] : memref<256x8xf32, #tpu.memory_space<vmem>>, vector<256x8xf32>
    tpu.vector_store %arg13[%c0_68, %c0_69], %57 {strides = array<i32>} : memref<256x8xf32, #tpu.memory_space<vmem>>, vector<256x8xf32>,
    %c18 = arith.constant 18 : index
    %c0_70 = arith.constant 0 : index
    %59 = vector.load %arg11[%c18, %c0_70] : memref<290x4xf32, #tpu.memory_space<vmem>>, vector<256x4xf32>
    %c1_71 = arith.constant 1 : index
    %c2_72 = arith.constant 2 : index
    %c0_73 = arith.constant 0 : index
    %c0_74 = arith.constant 0 : index
    %60 = vector.load %arg4[%c1_71, %c2_72, %c0_73, %c0_74] : memref<3x3x4x8xf32, #tpu.memory_space<vmem>>, vector<1x1x4x8xf32>
    %61 = vector.shape_cast %60 : vector<1x1x4x8xf32> to vector<4x8xf32>
    %cst_75 = arith.constant dense<0.000000e+00> : vector<256x8xf32>
    %62 = tpu.matmul %59, %61, %cst_75 {dimension_numbers = #tpu.dot_dimension_numbers<[1], [0], [0], [1], [0, 0, 1, 1], [], []>} : vector<256x4xf32>, vector<4x8xf32>, vector<256x8xf32> -> vector<256x8xf32>
    %63 = vector.broadcast %1 : vector<256x1xf32> to vector<256x8xf32>
    %64 = arith.mulf %62, %63 : vector<256x8xf32>
    %c0_76 = arith.constant 0 : index
    %c0_77 = arith.constant 0 : index
    %65 = vector.load %arg13[%c0_76, %c0_77] : memref<256x8xf32, #tpu.memory_space<vmem>>, vector<256x8xf32>
    %66 = arith.addf %65, %64 : vector<256x8xf32>
    %c0_78 = arith.constant 0 : index
    %c0_79 = arith.constant 0 : index
    %67 = vector.load %arg13[%c0_78, %c0_79] : memref<256x8xf32, #tpu.memory_space<vmem>>, vector<256x8xf32>
    tpu.vector_store %arg13[%c0_78, %c0_79], %66 {strides = array<i32>} : memref<256x8xf32, #tpu.memory_space<vmem>>, vector<256x8xf32>,
    %c32 = arith.constant 32 : index
    %c0_80 = arith.constant 0 : index
    %68 = vector.load %arg11[%c32, %c0_80] : memref<290x4xf32, #tpu.memory_space<vmem>>, vector<256x4xf32>
    %c2_81 = arith.constant 2 : index
    %c0_82 = arith.constant 0 : index
    %c0_83 = arith.constant 0 : index
    %c0_84 = arith.constant 0 : index
    %69 = vector.load %arg4[%c2_81, %c0_82, %c0_83, %c0_84] : memref<3x3x4x8xf32, #tpu.memory_space<vmem>>, vector<1x1x4x8xf32>
    %70 = vector.shape_cast %69 : vector<1x1x4x8xf32> to vector<4x8xf32>
    %cst_85 = arith.constant dense<0.000000e+00> : vector<256x8xf32>
    %71 = tpu.matmul %68, %70, %cst_85 {dimension_numbers = #tpu.dot_dimension_numbers<[1], [0], [0], [1], [0, 0, 1, 1], [], []>} : vector<256x4xf32>, vector<4x8xf32>, vector<256x8xf32> -> vector<256x8xf32>
    %72 = vector.broadcast %0 : vector<256x1xf32> to vector<256x8xf32>
    %73 = arith.mulf %71, %72 : vector<256x8xf32>
    %c0_86 = arith.constant 0 : index
    %c0_87 = arith.constant 0 : index
    %74 = vector.load %arg13[%c0_86, %c0_87] : memref<256x8xf32, #tpu.memory_space<vmem>>, vector<256x8xf32>
    %75 = arith.addf %74, %73 : vector<256x8xf32>
    %c0_88 = arith.constant 0 : index
    %c0_89 = arith.constant 0 : index
    %76 = vector.load %arg13[%c0_88, %c0_89] : memref<256x8xf32, #tpu.memory_space<vmem>>, vector<256x8xf32>
    tpu.vector_store %arg13[%c0_88, %c0_89], %75 {strides = array<i32>} : memref<256x8xf32, #tpu.memory_space<vmem>>, vector<256x8xf32>,
    %c33 = arith.constant 33 : index
    %c0_90 = arith.constant 0 : index
    %77 = vector.load %arg11[%c33, %c0_90] : memref<290x4xf32, #tpu.memory_space<vmem>>, vector<256x4xf32>
    %c2_91 = arith.constant 2 : index
    %c1_92 = arith.constant 1 : index
    %c0_93 = arith.constant 0 : index
    %c0_94 = arith.constant 0 : index
    %78 = vector.load %arg4[%c2_91, %c1_92, %c0_93, %c0_94] : memref<3x3x4x8xf32, #tpu.memory_space<vmem>>, vector<1x1x4x8xf32>
    %79 = vector.shape_cast %78 : vector<1x1x4x8xf32> to vector<4x8xf32>
    %cst_95 = arith.constant dense<0.000000e+00> : vector<256x8xf32>
    %80 = tpu.matmul %77, %79, %cst_95 {dimension_numbers = #tpu.dot_dimension_numbers<[1], [0], [0], [1], [0, 0, 1, 1], [], []>} : vector<256x4xf32>, vector<4x8xf32>, vector<256x8xf32> -> vector<256x8xf32>
    %c0_96 = arith.constant 0 : index
    %c0_97 = arith.constant 0 : index
    %81 = vector.load %arg13[%c0_96, %c0_97] : memref<256x8xf32, #tpu.memory_space<vmem>>, vector<256x8xf32>
    %82 = arith.addf %81, %80 : vector<256x8xf32>
    %c0_98 = arith.constant 0 : index
    %c0_99 = arith.constant 0 : index
    %83 = vector.load %arg13[%c0_98, %c0_99] : memref<256x8xf32, #tpu.memory_space<vmem>>, vector<256x8xf32>
    tpu.vector_store %arg13[%c0_98, %c0_99], %82 {strides = array<i32>} : memref<256x8xf32, #tpu.memory_space<vmem>>, vector<256x8xf32>,
    %c34 = arith.constant 34 : index
    %c0_100 = arith.constant 0 : index
    %84 = vector.load %arg11[%c34, %c0_100] : memref<290x4xf32, #tpu.memory_space<vmem>>, vector<256x4xf32>
    %c2_101 = arith.constant 2 : index
    %c2_102 = arith.constant 2 : index
    %c0_103 = arith.constant 0 : index
    %c0_104 = arith.constant 0 : index
    %85 = vector.load %arg4[%c2_101, %c2_102, %c0_103, %c0_104] : memref<3x3x4x8xf32, #tpu.memory_space<vmem>>, vector<1x1x4x8xf32>
    %86 = vector.shape_cast %85 : vector<1x1x4x8xf32> to vector<4x8xf32>
    %cst_105 = arith.constant dense<0.000000e+00> : vector<256x8xf32>
    %87 = tpu.matmul %84, %86, %cst_105 {dimension_numbers = #tpu.dot_dimension_numbers<[1], [0], [0], [1], [0, 0, 1, 1], [], []>} : vector<256x4xf32>, vector<4x8xf32>, vector<256x8xf32> -> vector<256x8xf32>
    %88 = vector.broadcast %1 : vector<256x1xf32> to vector<256x8xf32>
    %89 = arith.mulf %87, %88 : vector<256x8xf32>
    %c0_106 = arith.constant 0 : index
    %c0_107 = arith.constant 0 : index
    %90 = vector.load %arg13[%c0_106, %c0_107] : memref<256x8xf32, #tpu.memory_space<vmem>>, vector<256x8xf32>
    %91 = arith.addf %90, %89 : vector<256x8xf32>
    %c0_108 = arith.constant 0 : index
    %c0_109 = arith.constant 0 : index
    %92 = vector.load %arg13[%c0_108, %c0_109] : memref<256x8xf32, #tpu.memory_space<vmem>>, vector<256x8xf32>
    tpu.vector_store %arg13[%c0_108, %c0_109], %91 {strides = array<i32>} : memref<256x8xf32, #tpu.memory_space<vmem>>, vector<256x8xf32>,
    %c0_110 = arith.constant 0 : index
    %c0_111 = arith.constant 0 : index
    %93 = vector.load %arg13[%c0_110, %c0_111] : memref<256x8xf32, #tpu.memory_space<vmem>>, vector<256x8xf32>
    %c0_112 = arith.constant 0 : index
    %c0_113 = arith.constant 0 : index
    %94 = vector.load %arg5[%c0_112, %c0_113] : memref<1x8xf32, #tpu.memory_space<vmem>>, vector<1x8xf32>
    %95 = vector.broadcast %94 : vector<1x8xf32> to vector<256x8xf32>
    %96 = arith.addf %93, %95 : vector<256x8xf32>
    %cst_114 = arith.constant 0.000000e+00 : f32
    %97 = vector.broadcast %cst_114 : f32 to vector<256x8xf32>
    %98 = arith.maximumf %96, %97 : vector<256x8xf32>
    %cst_115 = arith.constant 0.000000e+00 : f32
    %99 = vector.broadcast %cst_115 : f32 to vector<17x8xf32>
    %c0_116 = arith.constant 0 : index
    %c0_117 = arith.constant 0 : index
    %100 = vector.load %arg12[%c0_116, %c0_117] : memref<290x8xf32, #tpu.memory_space<vmem>>, vector<17x8xf32>
    tpu.vector_store %arg12[%c0_116, %c0_117], %99 {strides = array<i32>} : memref<290x8xf32, #tpu.memory_space<vmem>>, vector<17x8xf32>,
    %cst_118 = arith.constant 0.000000e+00 : f32
    %101 = vector.broadcast %cst_118 : f32 to vector<17x8xf32>
    %c273_119 = arith.constant 273 : index
    %c0_120 = arith.constant 0 : index
    %102 = vector.load %arg12[%c273_119, %c0_120] : memref<290x8xf32, #tpu.memory_space<vmem>>, vector<17x8xf32>
    tpu.vector_store %arg12[%c273_119, %c0_120], %101 {strides = array<i32>} : memref<290x8xf32, #tpu.memory_space<vmem>>, vector<17x8xf32>,
    %c17_121 = arith.constant 17 : index
    %c0_122 = arith.constant 0 : index
    %103 = vector.load %arg12[%c17_121, %c0_122] : memref<290x8xf32, #tpu.memory_space<vmem>>, vector<256x8xf32>
    tpu.vector_store %arg12[%c17_121, %c0_122], %98 {strides = array<i32>} : memref<290x8xf32, #tpu.memory_space<vmem>>, vector<256x8xf32>,
    %cst_123 = arith.constant 0.000000e+00 : f32
    %104 = vector.broadcast %cst_123 : f32 to vector<256x8xf32>
    %c0_124 = arith.constant 0 : index
    %c0_125 = arith.constant 0 : index
    %105 = vector.load %arg13[%c0_124, %c0_125] : memref<256x8xf32, #tpu.memory_space<vmem>>, vector<256x8xf32>
    tpu.vector_store %arg13[%c0_124, %c0_125], %104 {strides = array<i32>} : memref<256x8xf32, #tpu.memory_space<vmem>>, vector<256x8xf32>,
    %c0_126 = arith.constant 0 : index
    %c0_127 = arith.constant 0 : index
    %106 = vector.load %arg12[%c0_126, %c0_127] : memref<290x8xf32, #tpu.memory_space<vmem>>, vector<256x8xf32>
    %c0_128 = arith.constant 0 : index
    %c0_129 = arith.constant 0 : index
    %c0_130 = arith.constant 0 : index
    %c0_131 = arith.constant 0 : index
    %107 = vector.load %arg6[%c0_128, %c0_129, %c0_130, %c0_131] : memref<3x3x8x8xf32, #tpu.memory_space<vmem>>, vector<1x1x8x8xf32>
    %108 = vector.shape_cast %107 : vector<1x1x8x8xf32> to vector<8x8xf32>
    %cst_132 = arith.constant dense<0.000000e+00> : vector<256x8xf32>
    %109 = tpu.matmul %106, %108, %cst_132 {dimension_numbers = #tpu.dot_dimension_numbers<[1], [0], [0], [1], [0, 0, 1, 1], [], []>} : vector<256x8xf32>, vector<8x8xf32>, vector<256x8xf32> -> vector<256x8xf32>
    %110 = vector.broadcast %0 : vector<256x1xf32> to vector<256x8xf32>
    %111 = arith.mulf %109, %110 : vector<256x8xf32>
    %c0_133 = arith.constant 0 : index
    %c0_134 = arith.constant 0 : index
    %112 = vector.load %arg13[%c0_133, %c0_134] : memref<256x8xf32, #tpu.memory_space<vmem>>, vector<256x8xf32>
    %113 = arith.addf %112, %111 : vector<256x8xf32>
    %c0_135 = arith.constant 0 : index
    %c0_136 = arith.constant 0 : index
    %114 = vector.load %arg13[%c0_135, %c0_136] : memref<256x8xf32, #tpu.memory_space<vmem>>, vector<256x8xf32>
    tpu.vector_store %arg13[%c0_135, %c0_136], %113 {strides = array<i32>} : memref<256x8xf32, #tpu.memory_space<vmem>>, vector<256x8xf32>,
    %c1_137 = arith.constant 1 : index
    %c0_138 = arith.constant 0 : index
    %115 = vector.load %arg12[%c1_137, %c0_138] : memref<290x8xf32, #tpu.memory_space<vmem>>, vector<256x8xf32>
    %c0_139 = arith.constant 0 : index
    %c1_140 = arith.constant 1 : index
    %c0_141 = arith.constant 0 : index
    %c0_142 = arith.constant 0 : index
    %116 = vector.load %arg6[%c0_139, %c1_140, %c0_141, %c0_142] : memref<3x3x8x8xf32, #tpu.memory_space<vmem>>, vector<1x1x8x8xf32>
    %117 = vector.shape_cast %116 : vector<1x1x8x8xf32> to vector<8x8xf32>
    %cst_143 = arith.constant dense<0.000000e+00> : vector<256x8xf32>
    %118 = tpu.matmul %115, %117, %cst_143 {dimension_numbers = #tpu.dot_dimension_numbers<[1], [0], [0], [1], [0, 0, 1, 1], [], []>} : vector<256x8xf32>, vector<8x8xf32>, vector<256x8xf32> -> vector<256x8xf32>
    %c0_144 = arith.constant 0 : index
    %c0_145 = arith.constant 0 : index
    %119 = vector.load %arg13[%c0_144, %c0_145] : memref<256x8xf32, #tpu.memory_space<vmem>>, vector<256x8xf32>
    %120 = arith.addf %119, %118 : vector<256x8xf32>
    %c0_146 = arith.constant 0 : index
    %c0_147 = arith.constant 0 : index
    %121 = vector.load %arg13[%c0_146, %c0_147] : memref<256x8xf32, #tpu.memory_space<vmem>>, vector<256x8xf32>
    tpu.vector_store %arg13[%c0_146, %c0_147], %120 {strides = array<i32>} : memref<256x8xf32, #tpu.memory_space<vmem>>, vector<256x8xf32>,
    %c2_148 = arith.constant 2 : index
    %c0_149 = arith.constant 0 : index
    %122 = vector.load %arg12[%c2_148, %c0_149] : memref<290x8xf32, #tpu.memory_space<vmem>>, vector<256x8xf32>
    %c0_150 = arith.constant 0 : index
    %c2_151 = arith.constant 2 : index
    %c0_152 = arith.constant 0 : index
    %c0_153 = arith.constant 0 : index
    %123 = vector.load %arg6[%c0_150, %c2_151, %c0_152, %c0_153] : memref<3x3x8x8xf32, #tpu.memory_space<vmem>>, vector<1x1x8x8xf32>
    %124 = vector.shape_cast %123 : vector<1x1x8x8xf32> to vector<8x8xf32>
    %cst_154 = arith.constant dense<0.000000e+00> : vector<256x8xf32>
    %125 = tpu.matmul %122, %124, %cst_154 {dimension_numbers = #tpu.dot_dimension_numbers<[1], [0], [0], [1], [0, 0, 1, 1], [], []>} : vector<256x8xf32>, vector<8x8xf32>, vector<256x8xf32> -> vector<256x8xf32>
    %126 = vector.broadcast %1 : vector<256x1xf32> to vector<256x8xf32>
    %127 = arith.mulf %125, %126 : vector<256x8xf32>
    %c0_155 = arith.constant 0 : index
    %c0_156 = arith.constant 0 : index
    %128 = vector.load %arg13[%c0_155, %c0_156] : memref<256x8xf32, #tpu.memory_space<vmem>>, vector<256x8xf32>
    %129 = arith.addf %128, %127 : vector<256x8xf32>
    %c0_157 = arith.constant 0 : index
    %c0_158 = arith.constant 0 : index
    %130 = vector.load %arg13[%c0_157, %c0_158] : memref<256x8xf32, #tpu.memory_space<vmem>>, vector<256x8xf32>
    tpu.vector_store %arg13[%c0_157, %c0_158], %129 {strides = array<i32>} : memref<256x8xf32, #tpu.memory_space<vmem>>, vector<256x8xf32>,
    %c16_159 = arith.constant 16 : index
    %c0_160 = arith.constant 0 : index
    %131 = vector.load %arg12[%c16_159, %c0_160] : memref<290x8xf32, #tpu.memory_space<vmem>>, vector<256x8xf32>
    %c1_161 = arith.constant 1 : index
    %c0_162 = arith.constant 0 : index
    %c0_163 = arith.constant 0 : index
    %c0_164 = arith.constant 0 : index
    %132 = vector.load %arg6[%c1_161, %c0_162, %c0_163, %c0_164] : memref<3x3x8x8xf32, #tpu.memory_space<vmem>>, vector<1x1x8x8xf32>
    %133 = vector.shape_cast %132 : vector<1x1x8x8xf32> to vector<8x8xf32>
    %cst_165 = arith.constant dense<0.000000e+00> : vector<256x8xf32>
    %134 = tpu.matmul %131, %133, %cst_165 {dimension_numbers = #tpu.dot_dimension_numbers<[1], [0], [0], [1], [0, 0, 1, 1], [], []>} : vector<256x8xf32>, vector<8x8xf32>, vector<256x8xf32> -> vector<256x8xf32>
    %135 = vector.broadcast %0 : vector<256x1xf32> to vector<256x8xf32>
    %136 = arith.mulf %134, %135 : vector<256x8xf32>
    %c0_166 = arith.constant 0 : index
    %c0_167 = arith.constant 0 : index
    %137 = vector.load %arg13[%c0_166, %c0_167] : memref<256x8xf32, #tpu.memory_space<vmem>>, vector<256x8xf32>
    %138 = arith.addf %137, %136 : vector<256x8xf32>
    %c0_168 = arith.constant 0 : index
    %c0_169 = arith.constant 0 : index
    %139 = vector.load %arg13[%c0_168, %c0_169] : memref<256x8xf32, #tpu.memory_space<vmem>>, vector<256x8xf32>
    tpu.vector_store %arg13[%c0_168, %c0_169], %138 {strides = array<i32>} : memref<256x8xf32, #tpu.memory_space<vmem>>, vector<256x8xf32>,
    %c17_170 = arith.constant 17 : index
    %c0_171 = arith.constant 0 : index
    %140 = vector.load %arg12[%c17_170, %c0_171] : memref<290x8xf32, #tpu.memory_space<vmem>>, vector<256x8xf32>
    %c1_172 = arith.constant 1 : index
    %c1_173 = arith.constant 1 : index
    %c0_174 = arith.constant 0 : index
    %c0_175 = arith.constant 0 : index
    %141 = vector.load %arg6[%c1_172, %c1_173, %c0_174, %c0_175] : memref<3x3x8x8xf32, #tpu.memory_space<vmem>>, vector<1x1x8x8xf32>
    %142 = vector.shape_cast %141 : vector<1x1x8x8xf32> to vector<8x8xf32>
    %cst_176 = arith.constant dense<0.000000e+00> : vector<256x8xf32>
    %143 = tpu.matmul %140, %142, %cst_176 {dimension_numbers = #tpu.dot_dimension_numbers<[1], [0], [0], [1], [0, 0, 1, 1], [], []>} : vector<256x8xf32>, vector<8x8xf32>, vector<256x8xf32> -> vector<256x8xf32>
    %c0_177 = arith.constant 0 : index
    %c0_178 = arith.constant 0 : index
    %144 = vector.load %arg13[%c0_177, %c0_178] : memref<256x8xf32, #tpu.memory_space<vmem>>, vector<256x8xf32>
    %145 = arith.addf %144, %143 : vector<256x8xf32>
    %c0_179 = arith.constant 0 : index
    %c0_180 = arith.constant 0 : index
    %146 = vector.load %arg13[%c0_179, %c0_180] : memref<256x8xf32, #tpu.memory_space<vmem>>, vector<256x8xf32>
    tpu.vector_store %arg13[%c0_179, %c0_180], %145 {strides = array<i32>} : memref<256x8xf32, #tpu.memory_space<vmem>>, vector<256x8xf32>,
    %c18_181 = arith.constant 18 : index
    %c0_182 = arith.constant 0 : index
    %147 = vector.load %arg12[%c18_181, %c0_182] : memref<290x8xf32, #tpu.memory_space<vmem>>, vector<256x8xf32>
    %c1_183 = arith.constant 1 : index
    %c2_184 = arith.constant 2 : index
    %c0_185 = arith.constant 0 : index
    %c0_186 = arith.constant 0 : index
    %148 = vector.load %arg6[%c1_183, %c2_184, %c0_185, %c0_186] : memref<3x3x8x8xf32, #tpu.memory_space<vmem>>, vector<1x1x8x8xf32>
    %149 = vector.shape_cast %148 : vector<1x1x8x8xf32> to vector<8x8xf32>
    %cst_187 = arith.constant dense<0.000000e+00> : vector<256x8xf32>
    %150 = tpu.matmul %147, %149, %cst_187 {dimension_numbers = #tpu.dot_dimension_numbers<[1], [0], [0], [1], [0, 0, 1, 1], [], []>} : vector<256x8xf32>, vector<8x8xf32>, vector<256x8xf32> -> vector<256x8xf32>
    %151 = vector.broadcast %1 : vector<256x1xf32> to vector<256x8xf32>
    %152 = arith.mulf %150, %151 : vector<256x8xf32>
    %c0_188 = arith.constant 0 : index
    %c0_189 = arith.constant 0 : index
    %153 = vector.load %arg13[%c0_188, %c0_189] : memref<256x8xf32, #tpu.memory_space<vmem>>, vector<256x8xf32>
    %154 = arith.addf %153, %152 : vector<256x8xf32>
    %c0_190 = arith.constant 0 : index
    %c0_191 = arith.constant 0 : index
    %155 = vector.load %arg13[%c0_190, %c0_191] : memref<256x8xf32, #tpu.memory_space<vmem>>, vector<256x8xf32>
    tpu.vector_store %arg13[%c0_190, %c0_191], %154 {strides = array<i32>} : memref<256x8xf32, #tpu.memory_space<vmem>>, vector<256x8xf32>,
    %c32_192 = arith.constant 32 : index
    %c0_193 = arith.constant 0 : index
    %156 = vector.load %arg12[%c32_192, %c0_193] : memref<290x8xf32, #tpu.memory_space<vmem>>, vector<256x8xf32>
    %c2_194 = arith.constant 2 : index
    %c0_195 = arith.constant 0 : index
    %c0_196 = arith.constant 0 : index
    %c0_197 = arith.constant 0 : index
    %157 = vector.load %arg6[%c2_194, %c0_195, %c0_196, %c0_197] : memref<3x3x8x8xf32, #tpu.memory_space<vmem>>, vector<1x1x8x8xf32>
    %158 = vector.shape_cast %157 : vector<1x1x8x8xf32> to vector<8x8xf32>
    %cst_198 = arith.constant dense<0.000000e+00> : vector<256x8xf32>
    %159 = tpu.matmul %156, %158, %cst_198 {dimension_numbers = #tpu.dot_dimension_numbers<[1], [0], [0], [1], [0, 0, 1, 1], [], []>} : vector<256x8xf32>, vector<8x8xf32>, vector<256x8xf32> -> vector<256x8xf32>
    %160 = vector.broadcast %0 : vector<256x1xf32> to vector<256x8xf32>
    %161 = arith.mulf %159, %160 : vector<256x8xf32>
    %c0_199 = arith.constant 0 : index
    %c0_200 = arith.constant 0 : index
    %162 = vector.load %arg13[%c0_199, %c0_200] : memref<256x8xf32, #tpu.memory_space<vmem>>, vector<256x8xf32>
    %163 = arith.addf %162, %161 : vector<256x8xf32>
    %c0_201 = arith.constant 0 : index
    %c0_202 = arith.constant 0 : index
    %164 = vector.load %arg13[%c0_201, %c0_202] : memref<256x8xf32, #tpu.memory_space<vmem>>, vector<256x8xf32>
    tpu.vector_store %arg13[%c0_201, %c0_202], %163 {strides = array<i32>} : memref<256x8xf32, #tpu.memory_space<vmem>>, vector<256x8xf32>,
    %c33_203 = arith.constant 33 : index
    %c0_204 = arith.constant 0 : index
    %165 = vector.load %arg12[%c33_203, %c0_204] : memref<290x8xf32, #tpu.memory_space<vmem>>, vector<256x8xf32>
    %c2_205 = arith.constant 2 : index
    %c1_206 = arith.constant 1 : index
    %c0_207 = arith.constant 0 : index
    %c0_208 = arith.constant 0 : index
    %166 = vector.load %arg6[%c2_205, %c1_206, %c0_207, %c0_208] : memref<3x3x8x8xf32, #tpu.memory_space<vmem>>, vector<1x1x8x8xf32>
    %167 = vector.shape_cast %166 : vector<1x1x8x8xf32> to vector<8x8xf32>
    %cst_209 = arith.constant dense<0.000000e+00> : vector<256x8xf32>
    %168 = tpu.matmul %165, %167, %cst_209 {dimension_numbers = #tpu.dot_dimension_numbers<[1], [0], [0], [1], [0, 0, 1, 1], [], []>} : vector<256x8xf32>, vector<8x8xf32>, vector<256x8xf32> -> vector<256x8xf32>
    %c0_210 = arith.constant 0 : index
    %c0_211 = arith.constant 0 : index
    %169 = vector.load %arg13[%c0_210, %c0_211] : memref<256x8xf32, #tpu.memory_space<vmem>>, vector<256x8xf32>
    %170 = arith.addf %169, %168 : vector<256x8xf32>
    %c0_212 = arith.constant 0 : index
    %c0_213 = arith.constant 0 : index
    %171 = vector.load %arg13[%c0_212, %c0_213] : memref<256x8xf32, #tpu.memory_space<vmem>>, vector<256x8xf32>
    tpu.vector_store %arg13[%c0_212, %c0_213], %170 {strides = array<i32>} : memref<256x8xf32, #tpu.memory_space<vmem>>, vector<256x8xf32>,
    %c34_214 = arith.constant 34 : index
    %c0_215 = arith.constant 0 : index
    %172 = vector.load %arg12[%c34_214, %c0_215] : memref<290x8xf32, #tpu.memory_space<vmem>>, vector<256x8xf32>
    %c2_216 = arith.constant 2 : index
    %c2_217 = arith.constant 2 : index
    %c0_218 = arith.constant 0 : index
    %c0_219 = arith.constant 0 : index
    %173 = vector.load %arg6[%c2_216, %c2_217, %c0_218, %c0_219] : memref<3x3x8x8xf32, #tpu.memory_space<vmem>>, vector<1x1x8x8xf32>
    %174 = vector.shape_cast %173 : vector<1x1x8x8xf32> to vector<8x8xf32>
    %cst_220 = arith.constant dense<0.000000e+00> : vector<256x8xf32>
    %175 = tpu.matmul %172, %174, %cst_220 {dimension_numbers = #tpu.dot_dimension_numbers<[1], [0], [0], [1], [0, 0, 1, 1], [], []>} : vector<256x8xf32>, vector<8x8xf32>, vector<256x8xf32> -> vector<256x8xf32>
    %176 = vector.broadcast %1 : vector<256x1xf32> to vector<256x8xf32>
    %177 = arith.mulf %175, %176 : vector<256x8xf32>
    %c0_221 = arith.constant 0 : index
    %c0_222 = arith.constant 0 : index
    %178 = vector.load %arg13[%c0_221, %c0_222] : memref<256x8xf32, #tpu.memory_space<vmem>>, vector<256x8xf32>
    %179 = arith.addf %178, %177 : vector<256x8xf32>
    %c0_223 = arith.constant 0 : index
    %c0_224 = arith.constant 0 : index
    %180 = vector.load %arg13[%c0_223, %c0_224] : memref<256x8xf32, #tpu.memory_space<vmem>>, vector<256x8xf32>
    tpu.vector_store %arg13[%c0_223, %c0_224], %179 {strides = array<i32>} : memref<256x8xf32, #tpu.memory_space<vmem>>, vector<256x8xf32>,
    %c0_225 = arith.constant 0 : index
    %c0_226 = arith.constant 0 : index
    %181 = vector.load %arg13[%c0_225, %c0_226] : memref<256x8xf32, #tpu.memory_space<vmem>>, vector<256x8xf32>
    %c0_227 = arith.constant 0 : index
    %c0_228 = arith.constant 0 : index
    %182 = vector.load %arg7[%c0_227, %c0_228] : memref<1x8xf32, #tpu.memory_space<vmem>>, vector<1x8xf32>
    %183 = vector.broadcast %182 : vector<1x8xf32> to vector<256x8xf32>
    %184 = arith.addf %181, %183 : vector<256x8xf32>
    %185 = vector.extract_strided_slice %184 {offsets = [0, 0], sizes = [256, 4], strides = [1, 1]} : vector<256x8xf32> to vector<256x4xf32>
    %186 = arith.addf %185, %4 : vector<256x4xf32>
    %c0_229 = arith.constant 0 : index
    %c0_230 = arith.constant 0 : index
    %c0_231 = arith.constant 0 : index
    %187 = vector.load %arg10[%c0_229, %c0_230, %c0_231] : memref<1x256x8xf32, #tpu.memory_space<vmem>>, vector<1x256x4xf32>
    %188 = vector.shape_cast %187 : vector<1x256x4xf32> to vector<256x4xf32>
    %189 = vector.shape_cast %186 : vector<256x4xf32> to vector<1x256x4xf32>
    tpu.vector_store %arg10[%c0_229, %c0_230, %c0_231], %189 {strides = array<i32>} : memref<1x256x8xf32, #tpu.memory_space<vmem>>, vector<1x256x4xf32>,
    %190 = vector.extract_strided_slice %184 {offsets = [0, 4], sizes = [256, 4], strides = [1, 1]} : vector<256x8xf32> to vector<256x4xf32>
    %c0_232 = arith.constant 0 : index
    %c0_233 = arith.constant 0 : index
    %c4 = arith.constant 4 : index
    %191 = vector.load %arg10[%c0_232, %c0_233, %c4] : memref<1x256x8xf32, #tpu.memory_space<vmem>>, vector<1x256x4xf32>
    %192 = vector.shape_cast %191 : vector<1x256x4xf32> to vector<256x4xf32>
    %193 = vector.shape_cast %190 : vector<256x4xf32> to vector<1x256x4xf32>
    tpu.vector_store %arg10[%c0_232, %c0_233, %c4], %193 {strides = array<i32>} : memref<1x256x8xf32, #tpu.memory_space<vmem>>, vector<1x256x4xf32>,
    return
  }
  func.func @transform_0(%arg0: i32) -> (i32, i32, i32) {
    %c0_i32 = arith.constant 0 : i32
    %c0_i32_0 = arith.constant 0 : i32
    %c0_i32_1 = arith.constant 0 : i32
    return %arg0, %c0_i32, %c0_i32_0 : i32, i32, i32
  }
  func.func @transform_1(%arg0: i32) -> (i32, i32) {
    %c0_i32 = arith.constant 0 : i32
    %c0_i32_0 = arith.constant 0 : i32
    %c0_i32_1 = arith.constant 0 : i32
    return %c0_i32, %c0_i32_0 : i32, i32
  }
  func.func @transform_2(%arg0: i32) -> (i32, i32) {
    %c0_i32 = arith.constant 0 : i32
    %c0_i32_0 = arith.constant 0 : i32
    %c0_i32_1 = arith.constant 0 : i32
    return %c0_i32, %c0_i32_0 : i32, i32
  }
  func.func @transform_3(%arg0: i32) -> (i32, i32, i32, i32) {
    %c0_i32 = arith.constant 0 : i32
    %c0_i32_0 = arith.constant 0 : i32
    %c0_i32_1 = arith.constant 0 : i32
    %c0_i32_2 = arith.constant 0 : i32
    %c0_i32_3 = arith.constant 0 : i32
    return %c0_i32, %c0_i32_0, %c0_i32_1, %c0_i32_2 : i32, i32, i32, i32
  }
  func.func @transform_4(%arg0: i32) -> (i32, i32) {
    %c0_i32 = arith.constant 0 : i32
    %c0_i32_0 = arith.constant 0 : i32
    %c0_i32_1 = arith.constant 0 : i32
    return %c0_i32, %c0_i32_0 : i32, i32
  }
  func.func @transform_5(%arg0: i32) -> (i32, i32, i32, i32) {
    %c0_i32 = arith.constant 0 : i32
    %c0_i32_0 = arith.constant 0 : i32
    %c0_i32_1 = arith.constant 0 : i32
    %c0_i32_2 = arith.constant 0 : i32
    %c0_i32_3 = arith.constant 0 : i32
    return %c0_i32, %c0_i32_0, %c0_i32_1, %c0_i32_2 : i32, i32, i32, i32
  }
  func.func @transform_6(%arg0: i32) -> (i32, i32) {
    %c0_i32 = arith.constant 0 : i32
    %c0_i32_0 = arith.constant 0 : i32
    %c0_i32_1 = arith.constant 0 : i32
    return %c0_i32, %c0_i32_0 : i32, i32
  }
  func.func @transform_7(%arg0: i32) -> (i32, i32) {
    %c0_i32 = arith.constant 0 : i32
    %c0_i32_0 = arith.constant 0 : i32
    %c0_i32_1 = arith.constant 0 : i32
    return %c0_i32, %c0_i32_0 : i32, i32
  }
  func.func @transform_8(%arg0: i32) -> (i32, i32) {
    %c0_i32 = arith.constant 0 : i32
    %c0_i32_0 = arith.constant 0 : i32
    %c0_i32_1 = arith.constant 0 : i32
    return %c0_i32, %c0_i32_0 : i32, i32
  }
  func.func @transform_9(%arg0: i32) -> (i32, i32, i32) {
    %c0_i32 = arith.constant 0 : i32
    %c0_i32_0 = arith.constant 0 : i32
    %c0_i32_1 = arith.constant 0 : i32
    return %arg0, %c0_i32, %c0_i32_0 : i32, i32, i32
  }
}

</mosaic_0001>

<bundles_post_ra>
// kernel: basic_block_forward.1
= control target key start
LH: loop header
LB: loop body
LE: loop exit
PB: predicated region body
PF: predicated region fallthrough
CT: control target
= control target key end

     0   :  { %s8606_s30 = smov 0   ;;  %s12312_s0 = inlined_call_operand.vmem [shape: bf16[2,256,4], index: 0, kind: input, shape index: {}]   ;;  %s12313_s1 = inlined_call_operand.vmem [shape: f32[1,4], index: 1, kind: input, shape index: {}]   ;;  %s12314_s2 = inlined_call_operand.vmem [shape: f32[1,4], index: 2, kind: input, shape index: {}]   ;;  %s12315_s3 = inlined_call_operand.vmem [shape: f32[3,3,4,8], index: 3, kind: input, shape index: {}]   ;;  %s12316_s4 = inlined_call_operand.vmem [shape: f32[1,8], index: 4, kind: input, shape index: {}]   ;;  %s12317_s5 = inlined_call_operand.vmem [shape: f32[3,3,8,8], index: 5, kind: input, shape index: {}]   ;;  %s12318_s6 = inlined_call_operand.vmem [shape: f32[1,8], index: 6, kind: input, shape index: {}]   ;;  %s12319_s7 = inlined_call_operand.vmem [shape: f32[256,1], index: 7, kind: input, shape index: {}]   ;;  %s12320_s8 = inlined_call_operand.vmem [shape: f32[256,1], index: 8, kind: input, shape index: {}]   ;;  %s12321_s9 = inlined_call_operand.vmem [shape: f32[2,256,8], index: 9, kind: output, shape index: {}]  }
   0x1 LB: > { %s7829_s10 = sadd.s32 4294967295, %s8552_s30   ;;  %p7833_p0 = scmp.ge.s32.totalorder %s8552_s30, 1  ;;  %s8552_s30 = sphi %s8606_s30, %s19_s30  }
   0x2   : > { %p287_p1 = scmp.lt.s32.totalorder %s8552_s30, 3 }
   0x4   : > { %p288_p2 = pnand %p7833_p0, %p287_p1 }
   0x6   : > { %291 = sbr.rel (%p288_p2) target bundleno = 1484 (0x5cc), region = 56 }
   0xb   : > { %v336_v0 = vld [vmem:[%s12319_s7 + $0x18] sm:$0xff]  ;;  %v335_v1 = vld [vmem:[%s12319_s7 + $0x10] sm:$0xff]  ;;  %v333_v2 = vld [vmem:[%s12319_s7] sm:$0xff]  ;;  %vm533_vm0 = vcmask 31744   ;;  %v8554_v3 = vmov 0   ;;  %vm735_vm1 = vcmask 1043456  }
   0xc   : > { %8536 = vset.pattern.permute.xlu2 %v8554_v3  ;;  %8535 = vset.pattern.permute.xlu1 %v8554_v3  ;;  %v638_v4 = vld [vmem:[%s12315_s3] sm:$0xf]  ;;  %v7871_v5 = vld [vmem:[%s12315_s3 + $0x4] sm:$0xf]  ;;  %v12358_v6 = vmov 0.0   ;;  %p323_p3 = scmp.lt.s32.totalorder %s7829_s10, 1 }
   0xd   : > { %8534 = vset.pattern.permute.xlu0 %v8554_v3  ;;  %869 = vperm.xlu2 %8536, %v336_v0   ;;  %534 = vst.msk [vmem:[#allocation2] sm:$0xff] %vm533_vm0, %v12358_v6  ;;  %vm536_vm2 = vcmask 24576   ;;  %v366_v7 = vld [vmem:[%s12320_s8 + $0x8] sm:$0xff]  ;;  %v365_v9 = vld [vmem:[%s12320_s8] sm:$0xff]  ;;  %v367_v51 = vld [vmem:[%s12320_s8 + $0x10] sm:$0xff]  ;;  %vm573_vm3 = vcmask 64512  }
   0xe   : > { %864 = vperm.xlu1 %8535, %v335_v1   ;;  %854 = vperm.xlu0 %8534, %v333_v2   ;;  %535 = vst.msk [vmem:[#allocation2 + $0x8] sm:$0xff] %vm533_vm0, %v12358_v6  ;;  %s12785_s10 = smov (!%p323_p3, %s7829_s10), 1  ;;  %v7905_v8 = vld [vmem:[%s12315_s3 + $0x8] sm:$0xf]  ;;  %v8658_v10 = vld [vmem:[%s12313_s1] ss:$0 sm:$0xff] }
   0xf   : > { %7838 = vmatpush.msk.msra.mxu0 %vm735_vm1, %v638_v4  ;;  %7872 = vmatpush.msk.msra.mxu1 %vm735_vm1, %v7871_v5  ;;  %538 = vst.msk [vmem:[#allocation2 + $0x111] sm:$0xff] %vm533_vm0, %v12358_v6  ;;  %s8441_s27 = sshll.u32 %s12785_s10, 7  ;;  %v334_v11 = vld [vmem:[%s12319_s7 + $0x8] sm:$0xff]  ;;  %v8674_v12 = vld [vmem:[%s12314_s2] ss:$0 sm:$0xff]  ;;  %vm4298_vm4 = vcmask 57344  }
  0x10   : > { %539 = vst.msk [vmem:[#allocation2 + $0x119] sm:$0xff] %vm533_vm0, %v12358_v6  ;;  %8522 = vmatpush.msk.msra.mxu2 %vm735_vm1, %v638_v4  ;;  %8523 = vmatpush.msk.msra.mxu3 %vm735_vm1, %v7871_v5  ;;  %s8669_s15 = scalar_lea.vmem %s12312_s0, %s8441_s27  ;;  %v7939_v13 = vld [vmem:[%s12315_s3 + $0xc] sm:$0xf]  ;;  %v7973_v53 = vld [vmem:[%s12315_s3 + $0x10] sm:$0xf]  ;;  %v337_v54 = vld [vmem:[%s12319_s7 + $0x20] sm:$0xff] }
  0x11   : > { %537 = vst.msk [vmem:[#allocation2 + $0x10] sm:$0x1] %vm536_vm2, %v12358_v6  ;;  %v8680_v14 = vld [vmem:[%s8669_s15 + $0x30] sm:$0xff]   ;;  %v8683_v15 = vld [vmem:[%s8669_s15 + $0x38] sm:$0xff]   ;;  %v8686_v16 = vld [vmem:[%s8669_s15] sm:$0xff]   ;;  %7974 = vmatpush.msk.msrb.mxu0 %vm735_vm1, %v7973_v53  ;;  %s8442_s28 = sshll.u32 %s12785_s10, 8 }
  0x12   : > { %7906 = vmatpush.msk.msrb.mxu2 %vm735_vm1, %v7905_v8  ;;  %540 = vst.msk [vmem:[#allocation2 + $0x121] sm:$0x1] %vm536_vm2, %v12358_v6  ;;  %7940 = vmatpush.msk.msrb.mxu3 %vm735_vm1, %v7939_v13  ;;  %v12338_v18 = vunpack.c.h.bf16 %v8680_v14  ;;  %v12337_v19 = vunpack.c.l.bf16 %v8683_v15  ;;  %v12351_v20 = vunpack.c.l.bf16 %v8686_v16  ;;  %v12335_v21 = vunpack.c.h.bf16 %v8683_v15  ;;  %v8694_v22 = vld [vmem:[%s8669_s15 + $0x40] sm:$0xff]   ;;  %v8697_v23 = vld [vmem:[%s8669_s15 + $0x8] sm:$0xff]   ;;  %v8734_v41 = vld [vmem:[%s8669_s15 + $0x10] sm:$0xff]   ;;  %s11933_s10 = scalar_lea.vmem %s12321_s9, %s8442_s28 }
  0x13   : > { %12514 = vst [vmem:[#allocation5_spill] sm:$0xff] %v8680_v14  ;;  %v12350_v25 = vunpack.c.h.bf16 %v8686_v16  ;;  %v12334_v26 = vunpack.c.l.bf16 %v8694_v22  ;;  %v12349_v27 = vunpack.c.l.bf16 %v8697_v23  ;;  %v12333_v28 = vunpack.c.h.bf16 %v8694_v22  ;;  %v8725_v36 = vld [vmem:[%s8669_s15 + $0x48] sm:$0xff]   ;;  %v369_v4 = vld [vmem:[%s12320_s8 + $0x20] sm:$0xff]  ;;  %v339_v8 = vld [vmem:[%s12319_s7 + $0x30] sm:$0xff] }
  0x14   : > { %12515 = vst [vmem:[#allocation6_spill] sm:$0xff] %v8683_v15  ;;  %v606_v17 = vld [vmem:[#allocation2] sm:$0xff]  ;;  %v478_v29 = vmul.f32 %v8658_v10, %v12338_v18  ;;  %v479_v30 = vmul.f32 %v8658_v10, %v12337_v19  ;;  %v465_v31 = vmul.f32 %v8658_v10, %v12351_v20  ;;  %v12348_v32 = vunpack.c.h.bf16 %v8697_v23  ;;  %v338_v45 = vld [vmem:[%s12319_s7 + $0x28] sm:$0xff]  ;;  %v8809_v13 = vld [vmem:[%s8669_s15 + $0x50] sm:$0xff]  }
  0x15   : > { %12516 = vst [vmem:[#allocation7_spill] sm:$0xff] %v8686_v16  ;;  %7839 = vmatmul.msk.f32.vlgmr.msra.gmra.mxu0 %vm533_vm0, %v606_v17  ;;  %v1140_v24 = vld [vmem:[#allocation2 + $0x1] sm:$0xff]  ;;  %1735 = vperm.xlu2 %8536, %v366_v7   ;;  %v480_v33 = vmul.f32 %v8658_v10, %v12335_v21  ;;  %v466_v34 = vmul.f32 %v8658_v10, %v12350_v25  ;;  %v12331_v48 = vunpack.c.l.bf16 %v8725_v36  ;;  %v12347_v49 = vunpack.c.l.bf16 %v8734_v41 }
  0x16   : > { %12517 = vst [vmem:[#allocation8_spill] sm:$0xff] %v8694_v22  ;;  %7873 = vmatmul.msk.f32.vlgmr.msra.gmra.mxu1 %vm533_vm0, %v1140_v24  ;;  %1730 = vperm.xlu1 %8535, %v365_v9   ;;  %v481_v35 = vmul.f32 %v8658_v10, %v12334_v26  ;;  %v514_v37 = vadd.f32 %v8674_v12, %v478_v29  ;;  %v607_v44 = vld [vmem:[#allocation2 + $0x8] sm:$0xff]  ;;  %v12330_v59 = vunpack.c.h.bf16 %v8725_v36  ;;  %v12346_v1 = vunpack.c.h.bf16 %v8734_v41 }
  0x17   : > { %12518 = vst [vmem:[#allocation9_spill] sm:$0xff] %v8697_v23  ;;  %859 = vperm.xlu0 %8534, %v334_v11   ;;  %v515_v38 = vadd.f32 %v8674_v12, %v479_v30  ;;  %v501_v39 = vadd.f32 %v8674_v12, %v465_v31  ;;  %v467_v40 = vmul.f32 %v8658_v10, %v12349_v27  ;;  %v368_v11 = vld [vmem:[%s12320_s8 + $0x18] sm:$0xff]  ;;  %v12329_v24 = vunpack.c.l.bf16 %v8809_v13  ;;  %v1482_v15 = vld [vmem:[#allocation2 + $0x2] sm:$0xff] }
  0x18   : > { %12519 = vst [vmem:[#allocation10_spill] sm:$0xff] %v8725_v36  ;;  %v516_v42 = vadd.f32 %v8674_v12, %v480_v33  ;;  %v482_v43 = vmul.f32 %v8658_v10, %v12333_v28  ;;  %v502_v46 = vadd.f32 %v8674_v12, %v466_v34  ;;  %v468_v47 = vmul.f32 %v8658_v10, %v12348_v32  ;;  %v1141_v50 = vld [vmem:[#allocation2 + $0x9] sm:$0xff]  ;;  %v8824_v34 = vld [vmem:[%s8669_s15 + $0x18] sm:$0xff]  }
  0x19   : > { %12520 = vst [vmem:[#allocation11_spill] sm:$0xff] %v8734_v41  ;;  %v517_v52 = vadd.f32 %v8674_v12, %v481_v35  ;;  %v503_v55 = vadd.f32 %v8674_v12, %v467_v40  ;;  %v483_v56 = vmul.f32 %v8658_v10, %v12331_v48  ;;  %v469_v57 = vmul.f32 %v8658_v10, %v12347_v49  ;;  %v370_v40 = vld [vmem:[%s12320_s8 + $0x28] sm:$0xff] }
  0x1a   : > { %554 = vst.msk [vmem:[#allocation2 + $0x79] sm:$0xff] %vm533_vm0, %v514_v37  ;;  %v518_v58 = vadd.f32 %v8674_v12, %v482_v43  ;;  %v504_v60 = vadd.f32 %v8674_v12, %v468_v47  ;;  %v484_v62 = vmul.f32 %v8658_v10, %v12330_v59  ;;  %v470_v9 = vmul.f32 %v8658_v10, %v12346_v1  ;;  %v341_v37 = vld [vmem:[%s12319_s7 + $0x40] sm:$0xff]  ;;  %v358_v1 = vld [vmem:[%s12319_s7 + $0xc8] sm:$0xff] }
  0x1b   : > { %555 = vst.msk [vmem:[#allocation2 + $0x81] sm:$0xff] %vm533_vm0, %v515_v38  ;;  %v519_v61 = vadd.f32 %v8674_v12, %v483_v56  ;;  %v505_v63 = vadd.f32 %v8674_v12, %v469_v57  ;;  %v485_v29 = vmul.f32 %v8658_v10, %v12329_v24  ;;  %v12345_v38 = vunpack.c.l.bf16 %v8824_v34  ;;  %v342_v56 = vld [vmem:[%s12319_s7 + $0x48] sm:$0xff] }
  0x1c   : > { %541 = vst.msk [vmem:[#allocation2 + $0x11] sm:$0xff] %vm533_vm0, %v501_v39  ;;  %v520_v0 = vadd.f32 %v8674_v12, %v484_v62  ;;  %v506_v17 = vadd.f32 %v8674_v12, %v470_v9  ;;  %vm7741_vm5 = vcmask 64544  }
  0x1d   : > { %7840 = vmatmul.msk.f32.gmra.mxu0 %vm533_vm0, %v607_v44  ;;  %879 = vperm.xlu2 %8536, %v338_v45   ;;  %556 = vst.msk [vmem:[#allocation2 + $0x89] sm:$0xff] %vm533_vm0, %v516_v42  ;;  %v521_v33 = vadd.f32 %v8674_v12, %v485_v29  ;;  %v340_v42 = vld [vmem:[%s12319_s7 + $0x38] sm:$0xff]  ;;  %v471_v43 = vmul.f32 %v8658_v10, %v12345_v38  ;;  %v12327_v44 = vunpack.c.h.bf16 %v8809_v13  ;;  %v373_v29 = vld [vmem:[%s12320_s8 + $0x40] sm:$0xff] }
  0x1e   : > { %7874 = vmatmul.msk.f32.gmra.mxu1 %vm533_vm0, %v1141_v50  ;;  %1740 = vperm.xlu1 %8535, %v367_v51   ;;  %542 = vst.msk [vmem:[#allocation2 + $0x19] sm:$0xff] %vm533_vm0, %v502_v46  ;;  %v388_v38 = vld [vmem:[%s12320_s8 + $0xb8] sm:$0xff] }
  0x1f   : > { %874 = vperm.xlu0 %8534, %v337_v54   ;;  %557 = vst.msk [vmem:[#allocation2 + $0x91] sm:$0xff] %vm533_vm0, %v517_v52  ;;  %v507_v45 = vadd.f32 %v8674_v12, %v471_v43  ;;  %v486_v46 = vmul.f32 %v8658_v10, %v12327_v44  ;;  %v12344_v52 = vunpack.c.h.bf16 %v8824_v34  ;;  %v372_v54 = vld [vmem:[%s12320_s8 + $0x38] sm:$0xff] }
  0x20   : > { %543 = vst.msk [vmem:[#allocation2 + $0x21] sm:$0xff] %vm533_vm0, %v503_v55 }
  0x21   : > { %558 = vst.msk [vmem:[#allocation2 + $0x99] sm:$0xff] %vm533_vm0, %v518_v58  ;;  %v522_v51 = vadd.f32 %v8674_v12, %v486_v46  ;;  %v472_v57 = vmul.f32 %v8658_v10, %v12344_v52  ;;  %v371_v58 = vld [vmem:[%s12320_s8 + $0x30] sm:$0xff]  ;;  %v9248_v52 = vld [vmem:[#allocation2 + $0x79] sm:$0xff] }
  0x22   : > { %v622_v2 = vld [vmem:[#allocation2 + $0x80] sm:$0xff]  ;;  %544 = vst.msk [vmem:[#allocation2 + $0x29] sm:$0xff] %vm533_vm0, %v504_v60  ;;  %v8878_v60 = vld [vmem:[%s8669_s15 + $0x58] sm:$0xff]  }
  0x23   : > { %v1156_v3 = vld [vmem:[#allocation2 + $0x81] sm:$0xff]  ;;  %7855 = vmatmul.msk.f32.vlgmr.msra.gmra.mxu2 %vm533_vm0, %v622_v2  ;;  %v8793_v5 = vld [vmem:[#allocation2 + $0x10] sm:$0xff]  ;;  %559 = vst.msk [vmem:[#allocation2 + $0xa1] sm:$0xff] %vm533_vm0, %v519_v61  ;;  %v508_v61 = vadd.f32 %v8674_v12, %v472_v57  ;;  %v12326_v62 = vunpack.c.l.bf16 %v8878_v60 }
  0x24   : > { %7889 = vmatmul.msk.f32.vlgmr.msra.gmra.mxu3 %vm533_vm0, %v1156_v3  ;;  %v8795_v7 = vld [vmem:[#allocation2 + $0x11] sm:$0xff]  ;;  %545 = vst.msk [vmem:[#allocation2 + $0x31] sm:$0xff] %vm533_vm0, %v505_v63  ;;  %v623_v30 = vld [vmem:[#allocation2 + $0x88] sm:$0xff]  ;;  %v8891_v3 = vld [vmem:[%s8669_s15 + $0x20] sm:$0xff]  }
  0x25   : > { %12521 = vst [vmem:[#allocation12_spill] sm:$0xff] %v8809_v13  ;;  %7841 = vmatmul.msk.f32.gmra.mxu0 %vm533_vm0, %v8793_v5  ;;  %1750 = vperm.xlu2 %8536, %v369_v4   ;;  %v1157_v31 = vld [vmem:[#allocation2 + $0x89] sm:$0xff]  ;;  %v8826_v35 = vld [vmem:[#allocation2 + $0x18] sm:$0xff]  ;;  %v487_v63 = vmul.f32 %v8658_v10, %v12326_v62  ;;  %v12342_v46 = vunpack.c.h.bf16 %v8891_v3 }
  0x26   : > { %560 = vst.msk [vmem:[#allocation2 + $0xa9] sm:$0xff] %vm533_vm0, %v520_v0  ;;  %7875 = vmatmul.msk.f32.gmra.mxu1 %vm533_vm0, %v8795_v7  ;;  %884 = vperm.xlu1 %8535, %v339_v8   ;;  %v8834_v39 = vld [vmem:[#allocation2 + $0x19] sm:$0xff]  ;;  %v624_v47 = vld [vmem:[#allocation2 + $0x90] sm:$0xff]  ;;  %v12343_v8 = vunpack.c.l.bf16 %v8891_v3  ;;  %v374_v57 = vld [vmem:[%s12320_s8 + $0x48] sm:$0xff] }
  0x27   : > { %1745 = vperm.xlu0 %8534, %v368_v11   ;;  %546 = vst.msk [vmem:[#allocation2 + $0x39] sm:$0xff] %vm533_vm0, %v506_v17  ;;  %v1158_v50 = vld [vmem:[#allocation2 + $0x91] sm:$0xff]  ;;  %v8858_v53 = vld [vmem:[#allocation2 + $0x20] sm:$0xff]  ;;  %v523_v4 = vadd.f32 %v8674_v12, %v487_v63 }
  0x28   : > { %12522 = vst [vmem:[#allocation13_spill] sm:$0xff] %v8824_v34  ;;  %v8865_v55 = vld [vmem:[#allocation2 + $0x21] sm:$0xff]  ;;  %v625_v0 = vld [vmem:[#allocation2 + $0x98] sm:$0xff]  ;;  %v391_v13 = vld [vmem:[%s12320_s8 + $0xd0] sm:$0xff] }
  0x29   : > { %561 = vst.msk [vmem:[#allocation2 + $0xb1] sm:$0xff] %vm533_vm0, %v521_v33  ;;  %v1159_v2 = vld [vmem:[#allocation2 + $0x99] sm:$0xff]  ;;  %v8895_v9 = vld [vmem:[#allocation2 + $0x28] sm:$0xff] }
  0x2a   : > { %547 = vst.msk [vmem:[#allocation2 + $0x41] sm:$0xff] %vm533_vm0, %v507_v45  ;;  %v344_v11 = vld [vmem:[%s12319_s7 + $0x58] sm:$0xff]  ;;  %v8902_v17 = vld [vmem:[#allocation2 + $0x29] sm:$0xff]  ;;  %v1160_v43 = vld [vmem:[#allocation2 + $0xa1] sm:$0xff] }
  0x2b   : > { %7856 = vmatmul.msk.f32.gmra.mxu2 %vm533_vm0, %v623_v30  ;;  %562 = vst.msk [vmem:[#allocation2 + $0xb9] sm:$0xff] %vm533_vm0, %v522_v51  ;;  %v473_v30 = vmul.f32 %v8658_v10, %v12343_v8  ;;  %v8933_v51 = vld [vmem:[#allocation2 + $0x31] sm:$0xff] }
  0x2c   : > { %7890 = vmatmul.msk.f32.gmra.mxu3 %vm533_vm0, %v1157_v31  ;;  %12523 = vst [vmem:[#allocation14_spill] sm:$0xff] %v8878_v60  ;;  %v343_v31 = vld [vmem:[%s12319_s7 + $0x50] sm:$0xff] }
  0x2d   : > { %7842 = vmatmul.msk.f32.gmra.mxu0 %vm533_vm0, %v8826_v35  ;;  %894 = vperm.xlu2 %8536, %v341_v37   ;;  %548 = vst.msk [vmem:[#allocation2 + $0x49] sm:$0xff] %vm533_vm0, %v508_v61  ;;  %v509_v33 = vadd.f32 %v8674_v12, %v473_v30  ;;  %v12324_v37 = vunpack.c.h.bf16 %v8878_v60  ;;  %v359_v8 = vld [vmem:[%s12319_s7 + $0xd0] sm:$0xff]  ;;  %v9327_v60 = vld [vmem:[#allocation2 + $0x1a] sm:$0xff] }
  0x2e   : > { %7876 = vmatmul.msk.f32.gmra.mxu1 %vm533_vm0, %v8834_v39  ;;  %1755 = vperm.xlu1 %8535, %v370_v40   ;;  %12524 = vst [vmem:[#allocation15_spill] sm:$0xff] %v8891_v3  ;;  %v9290_v20 = vld [vmem:[#allocation2 + $0x12] sm:$0xff] }
  0x2f   : > { %889 = vperm.xlu0 %8534, %v340_v42   ;;  %563 = vst.msk [vmem:[#allocation2 + $0xc1] sm:$0xff] %vm533_vm0, %v523_v4  ;;  %v488_v40 = vmul.f32 %v8658_v10, %v12324_v37  ;;  %v626_v42 = vld [vmem:[#allocation2 + $0xa0] sm:$0xff]  ;;  %v1161_v4 = vld [vmem:[#allocation2 + $0xa9] sm:$0xff] }
  0x30   : > { %549 = vst.msk [vmem:[#allocation2 + $0x51] sm:$0xff] %vm533_vm0, %v509_v33  ;;  %v347_v33 = vld [vmem:[%s12319_s7 + $0x70] sm:$0xff]  ;;  %v350_v37 = vld [vmem:[%s12319_s7 + $0x88] sm:$0xff] }
  0x31   : > { %v524_v45 = vadd.f32 %v8674_v12, %v488_v40  ;;  %v8970_v40 = vld [vmem:[#allocation2 + $0x39] sm:$0xff]  ;;  %574 = vst.msk [vmem:[#allocation4] sm:$0xff] %vm573_vm3, %v12358_v6 }
  0x32   : > { %575 = vst.msk [vmem:[#allocation4 + $0x8] sm:$0xff] %vm573_vm3, %v12358_v6 }
  0x33   : > { %7857 = vmatmul.msk.f32.gmra.mxu2 %vm533_vm0, %v624_v47  ;;  %v8926_v47 = vld [vmem:[#allocation2 + $0x30] sm:$0xff]  ;;  %564 = vst.msk [vmem:[#allocation2 + $0xc9] sm:$0xff] %vm533_vm0, %v524_v45  ;;  %v346_v45 = vld [vmem:[%s12319_s7 + $0x68] sm:$0xff] }
  0x34   : > { %7891 = vmatmul.msk.f32.gmra.mxu3 %vm533_vm0, %v1158_v50  ;;  %v375_v50 = vld [vmem:[%s12320_s8 + $0x50] sm:$0xff]  ;;  %576 = vst.msk [vmem:[#allocation4 + $0x10] sm:$0xff] %vm573_vm3, %v12358_v6 }
  0x35   : > { %7843 = vmatmul.msk.f32.gmra.mxu0 %vm533_vm0, %v8858_v53  ;;  %1765 = vperm.xlu2 %8536, %v372_v54   ;;  %v345_v54 = vld [vmem:[%s12319_s7 + $0x60] sm:$0xff]  ;;  %577 = vst.msk [vmem:[#allocation4 + $0x18] sm:$0xff] %vm573_vm3, %v12358_v6 }
  0x36   : > { %7877 = vmatmul.msk.f32.gmra.mxu1 %vm533_vm0, %v8865_v55  ;;  %899 = vperm.xlu1 %8535, %v342_v56   ;;  %v474_v56 = vmul.f32 %v8658_v10, %v12342_v46  ;;  %v1164_v62 = vld [vmem:[#allocation2 + $0xc1] sm:$0xff]  ;;  %578 = vst.msk [vmem:[#allocation4 + $0x20] sm:$0xff] %vm573_vm3, %v12358_v6 }
  0x37   : > { %1760 = vperm.xlu0 %8534, %v371_v58   ;;  %v8946_v58 = vld [vmem:[%s8669_s15 + $0x60] sm:$0xff]   ;;  %v9058_v44 = vld [vmem:[#allocation2 + $0x50] sm:$0xff]  ;;  %579 = vst.msk [vmem:[#allocation4 + $0x28] sm:$0xff] %vm573_vm3, %v12358_v6 }
  0x38   : > { %12525 = vst [vmem:[#allocation16_spill] sm:$0xff] %v8946_v58  ;;  %v510_v61 = vadd.f32 %v8674_v12, %v474_v56  ;;  %v12323_v63 = vunpack.c.l.bf16 %v8946_v58  ;;  %v1044_v32 = vld [vmem:[#allocation4] sm:$0xff] }
  0x39   : > { %580 = vst.msk [vmem:[#allocation4 + $0x30] sm:$0xff] %vm573_vm3, %v12358_v6 }
  0x3a   : > { %550 = vst.msk [vmem:[#allocation2 + $0x59] sm:$0xff] %vm533_vm0, %v510_v61  ;;  %v1162_v61 = vld [vmem:[#allocation2 + $0xb1] sm:$0xff]  ;;  %v1165_v24 = vld [vmem:[#allocation2 + $0xc9] sm:$0xff] }
  0x3b   : > { %7858 = vmatmul.msk.f32.gmra.mxu2 %vm533_vm0, %v625_v0  ;;  %v489_v0 = vmul.f32 %v8658_v10, %v12323_v63  ;;  %581 = vst.msk [vmem:[#allocation4 + $0x38] sm:$0xff] %vm573_vm3, %v12358_v6 }
  0x3c   : > { %7892 = vmatmul.msk.f32.gmra.mxu3 %vm533_vm0, %v1159_v2  ;;  %v627_v2 = vld [vmem:[#allocation2 + $0xa8] sm:$0xff]  ;;  %582 = vst.msk [vmem:[#allocation4 + $0x40] sm:$0xff] %vm573_vm3, %v12358_v6 }
  0x3d   : > { %7844 = vmatmul.msk.f32.gmra.mxu0 %vm533_vm0, %v8895_v9  ;;  %909 = vperm.xlu2 %8536, %v344_v11   ;;  %v8959_v11 = vld [vmem:[%s8669_s15 + $0x28] sm:$0xff]   ;;  %583 = vst.msk [vmem:[#allocation4 + $0x48] sm:$0xff] %vm573_vm3, %v12358_v6 }
  0x3e   : > { %7878 = vmatmul.msk.f32.gmra.mxu1 %vm533_vm0, %v8902_v17  ;;  %1770 = vperm.xlu1 %8535, %v373_v29   ;;  %12526 = vst [vmem:[#allocation17_spill] sm:$0xff] %v8959_v11  ;;  %v525_v29 = vadd.f32 %v8674_v12, %v489_v0  ;;  %v12341_v30 = vunpack.c.l.bf16 %v8959_v11  ;;  %v1047_v34 = vld [vmem:[#allocation4 + $0x18] sm:$0xff] }
  0x3f   : > { %904 = vperm.xlu0 %8534, %v343_v31   ;;  %v8963_v31 = vld [vmem:[#allocation2 + $0x38] sm:$0xff]  ;;  %584 = vst.msk [vmem:[#allocation4 + $0x50] sm:$0xff] %vm573_vm3, %v12358_v6 }
  0x40   : > { %565 = vst.msk [vmem:[#allocation2 + $0xd1] sm:$0xff] %vm533_vm0, %v525_v29  ;;  %v378_v29 = vld [vmem:[%s12320_s8 + $0x68] sm:$0xff] }
  0x41   : > { %v9088_v48 = vld [vmem:[#allocation2 + $0x58] sm:$0xff]  ;;  %585 = vst.msk [vmem:[#allocation4 + $0x58] sm:$0xff] %vm573_vm3, %v12358_v6 }
  0x42   : > { %586 = vst.msk [vmem:[#allocation4 + $0x60] sm:$0xff] %vm573_vm3, %v12358_v6 }
  0x43   : > { %7859 = vmatmul.msk.f32.gmra.mxu2 %vm533_vm0, %v626_v42  ;;  %v376_v42 = vld [vmem:[%s12320_s8 + $0x58] sm:$0xff]  ;;  %587 = vst.msk [vmem:[#allocation4 + $0x68] sm:$0xff] %vm573_vm3, %v12358_v6 }
  0x44   : > { %7893 = vmatmul.msk.f32.gmra.mxu3 %vm533_vm0, %v1160_v43  ;;  %v475_v43 = vmul.f32 %v8658_v10, %v12341_v30  ;;  %588 = vst.msk [vmem:[#allocation4 + $0x70] sm:$0xff] %vm573_vm3, %v12358_v6 }
  0x45   : > { %7845 = vmatmul.msk.f32.gmra.mxu0 %vm533_vm0, %v8926_v47  ;;  %1780 = vperm.xlu2 %8536, %v375_v50   ;;  %589 = vst.msk [vmem:[#allocation4 + $0x78] sm:$0xff] %vm573_vm3, %v12358_v6 }
  0x46   : > { %7879 = vmatmul.msk.f32.gmra.mxu1 %vm533_vm0, %v8933_v51  ;;  %914 = vperm.xlu1 %8535, %v345_v54   ;;  %v511_v50 = vadd.f32 %v8674_v12, %v475_v43  ;;  %v12322_v54 = vunpack.c.h.bf16 %v8946_v58  ;;  %590 = vst.msk [vmem:[#allocation4 + $0x80] sm:$0xff] %vm573_vm3, %v12358_v6 }
  0x47   : > { %1775 = vperm.xlu0 %8534, %v374_v57   ;;  %v628_v57 = vld [vmem:[#allocation2 + $0xb0] sm:$0xff]  ;;  %591 = vst.msk [vmem:[#allocation4 + $0x88] sm:$0xff] %vm573_vm3, %v12358_v6 }
  0x48   : > { %551 = vst.msk [vmem:[#allocation2 + $0x61] sm:$0xff] %vm533_vm0, %v511_v50  ;;  %v490_v56 = vmul.f32 %v8658_v10, %v12322_v54  ;;  %v9014_v50 = vld [vmem:[%s8669_s15 + $0x68] sm:$0xff]   ;;  %v1163_v54 = vld [vmem:[#allocation2 + $0xb9] sm:$0xff]  ;;  %v1166_v28 = vld [vmem:[#allocation2 + $0xd1] sm:$0xff] }
  0x49   : > { %12527 = vst [vmem:[#allocation18_spill] sm:$0xff] %v9014_v50 }
  0x4a   : > { %v526_v0 = vadd.f32 %v8674_v12, %v490_v56  ;;  %592 = vst.msk [vmem:[#allocation4 + $0x90] sm:$0xff] %vm573_vm3, %v12358_v6 }
  0x4b   : > { %7860 = vmatmul.msk.f32.gmra.mxu2 %vm533_vm0, %v627_v2  ;;  %v12340_v2 = vunpack.c.h.bf16 %v8959_v11  ;;  %593 = vst.msk [vmem:[#allocation4 + $0x98] sm:$0xff] %vm573_vm3, %v12358_v6 }
  0x4c   : > { %7894 = vmatmul.msk.f32.gmra.mxu3 %vm533_vm0, %v1161_v4  ;;  %v8994_v4 = vld [vmem:[#allocation2 + $0x40] sm:$0xff]  ;;  %566 = vst.msk [vmem:[#allocation2 + $0xd9] sm:$0xff] %vm533_vm0, %v526_v0  ;;  %v629_v0 = vld [vmem:[#allocation2 + $0xb8] sm:$0xff] }
  0x4d   : > { %7846 = vmatmul.msk.f32.gmra.mxu0 %vm533_vm0, %v8963_v31  ;;  %924 = vperm.xlu2 %8536, %v347_v33   ;;  %v9001_v33 = vld [vmem:[#allocation2 + $0x41] sm:$0xff]  ;;  %v476_v43 = vmul.f32 %v8658_v10, %v12340_v2  ;;  %594 = vst.msk [vmem:[#allocation4 + $0xa0] sm:$0xff] %vm573_vm3, %v12358_v6 }
  0x4e   : > { %7880 = vmatmul.msk.f32.gmra.mxu1 %vm533_vm0, %v8970_v40  ;;  %1785 = vperm.xlu1 %8535, %v376_v42   ;;  %v348_v42 = vld [vmem:[%s12319_s7 + $0x78] sm:$0xff]  ;;  %v386_v2 = vld [vmem:[%s12320_s8 + $0xa8] sm:$0xff]  ;;  %595 = vst.msk [vmem:[#allocation4 + $0xa8] sm:$0xff] %vm573_vm3, %v12358_v6 }
  0x4f   : > { %919 = vperm.xlu0 %8534, %v346_v45   ;;  %v377_v45 = vld [vmem:[%s12320_s8 + $0x60] sm:$0xff]  ;;  %v512_v56 = vadd.f32 %v8674_v12, %v476_v43  ;;  %v9028_v43 = vld [vmem:[#allocation2 + $0x48] sm:$0xff]  ;;  %596 = vst.msk [vmem:[#allocation4 + $0xb0] sm:$0xff] %vm573_vm3, %v12358_v6 }
  0x50   : > { %v9115_v21 = vld [vmem:[#allocation2 + $0x60] sm:$0xff]  ;;  %597 = vst.msk [vmem:[#allocation4 + $0xb8] sm:$0xff] %vm573_vm3, %v12358_v6 }
  0x51   : > { %552 = vst.msk [vmem:[#allocation2 + $0x69] sm:$0xff] %vm533_vm0, %v512_v56 }
  0x52   : > { %598 = vst.msk [vmem:[#allocation4 + $0xc0] sm:$0xff] %vm573_vm3, %v12358_v6 }
  0x53   : > { %7861 = vmatmul.msk.f32.gmra.mxu2 %vm533_vm0, %v628_v57  ;;  %v12325_v57 = vunpack.c.l.bf16 %v9014_v50  ;;  %599 = vst.msk [vmem:[#allocation4 + $0xc8] sm:$0xff] %vm573_vm3, %v12358_v6 }
  0x54   : > { %7895 = vmatmul.msk.f32.gmra.mxu3 %vm533_vm0, %v1162_v61  ;;  %600 = vst.msk [vmem:[#allocation4 + $0xd0] sm:$0xff] %vm573_vm3, %v12358_v6 }
  0x55   : > { %7847 = vmatmul.msk.f32.gmra.mxu0 %vm533_vm0, %v8994_v4  ;;  %1795 = vperm.xlu2 %8536, %v378_v29   ;;  %v491_v61 = vmul.f32 %v8658_v10, %v12325_v57  ;;  %v12339_v29 = vunpack.c.l.bf16 %v8680_v14  ;;  %v630_v57 = vld [vmem:[#allocation2 + $0xc0] sm:$0xff]  ;;  %601 = vst.msk [vmem:[#allocation4 + $0xd8] sm:$0xff] %vm573_vm3, %v12358_v6 }
  0x56   : > { %7881 = vmatmul.msk.f32.gmra.mxu1 %vm533_vm0, %v9001_v33  ;;  %929 = vperm.xlu1 %8535, %v348_v42   ;;  %v9035_v42 = vld [vmem:[#allocation2 + $0x49] sm:$0xff]  ;;  %602 = vst.msk [vmem:[#allocation4 + $0xe0] sm:$0xff] %vm573_vm3, %v12358_v6 }
  0x57   : > { %1790 = vperm.xlu0 %8534, %v377_v45   ;;  %v527_v63 = vadd.f32 %v8674_v12, %v491_v61  ;;  %v379_v45 = vld [vmem:[%s12320_s8 + $0x70] sm:$0xff]  ;;  %v477_v56 = vmul.f32 %v8658_v10, %v12339_v29  ;;  %v349_v61 = vld [vmem:[%s12319_s7 + $0x80] sm:$0xff]  ;;  %603 = vst.msk [vmem:[#allocation4 + $0xe8] sm:$0xff] %vm573_vm3, %v12358_v6 }
  0x58   : > { %v357_v29 = vld [vmem:[%s12319_s7 + $0xc0] sm:$0xff]  ;;  %604 = vst.msk [vmem:[#allocation4 + $0xf0] sm:$0xff] %vm573_vm3, %v12358_v6 }
  0x59   : > { %567 = vst.msk [vmem:[#allocation2 + $0xe1] sm:$0xff] %vm533_vm0, %v527_v63 }
  0x5a   : > { %605 = vst.msk [vmem:[#allocation4 + $0xf8] sm:$0xff] %vm573_vm3, %v12358_v6 }
  0x5b   : > { %7862 = vmatmul.msk.f32.gmra.mxu2 %vm533_vm0, %v629_v0  ;;  %v12328_v0 = vunpack.c.h.bf16 %v9014_v50  ;;  %4296 = vst.msk [vmem:[#allocation3] sm:$0xff] %vm573_vm3, %v12358_v6  ;;  %v8075_v50 = vld [vmem:[%s12315_s3 + $0x1c] sm:$0xf] }
  0x5c   : > { %7896 = vmatmul.msk.f32.gmra.mxu3 %vm533_vm0, %v1163_v54  ;;  %v513_v54 = vadd.f32 %v8674_v12, %v477_v56  ;;  %v381_v56 = vld [vmem:[%s12320_s8 + $0x80] sm:$0xff]  ;;  %4297 = vst.msk [vmem:[#allocation3 + $0x8] sm:$0xff] %vm573_vm3, %v12358_v6 }
  0x5d   : > { %7848 = vmatmul.msk.f32.gmra.mxu0 %vm533_vm0, %v9028_v43  ;;  %939 = vperm.xlu2 %8536, %v350_v37   ;;  %v492_v63 = vmul.f32 %v8658_v10, %v12328_v0  ;;  %v631_v0 = vld [vmem:[#allocation2 + $0xc8] sm:$0xff]  ;;  %4300 = vst.msk [vmem:[#allocation3 + $0x111] sm:$0xff] %vm573_vm3, %v12358_v6 }
  0x5e   : > { %7882 = vmatmul.msk.f32.gmra.mxu1 %vm533_vm0, %v9035_v42  ;;  %1800 = vperm.xlu1 %8535, %v379_v45   ;;  %553 = vst.msk [vmem:[#allocation2 + $0x71] sm:$0xff] %vm533_vm0, %v513_v54  ;;  %v9065_v45 = vld [vmem:[#allocation2 + $0x51] sm:$0xff] }
  0x5f   : > { %934 = vperm.xlu0 %8534, %v349_v61   ;;  %v528_v37 = vadd.f32 %v8674_v12, %v492_v63  ;;  %v351_v61 = vld [vmem:[%s12319_s7 + $0x90] sm:$0xff]  ;;  %v380_v54 = vld [vmem:[%s12320_s8 + $0x78] sm:$0xff]  ;;  %4301 = vst.msk [vmem:[#allocation3 + $0x119] sm:$0xff] %vm573_vm3, %v12358_v6  ;;  %8076 = vmatpush.msk.msra.mxu3 %vm735_vm1, %v8075_v50  ;;  %v361_v50 = vld [vmem:[%s12319_s7 + $0xe0] sm:$0xff] }
  0x60   : > { %v9075_v63 = vld [vmem:[%s8669_s15 + $0x70] sm:$0xff]   ;;  %v1168_v19 = vld [vmem:[#allocation2 + $0xe1] sm:$0xff] }
  0x61   : > { %568 = vst.msk [vmem:[#allocation2 + $0xe9] sm:$0xff] %vm533_vm0, %v528_v37 }
  0x62   : > { %12528 = vst [vmem:[#allocation19_spill] sm:$0xff] %v9075_v63 }
  0x63   : > { %7863 = vmatmul.msk.f32.gmra.mxu2 %vm533_vm0, %v630_v57 }
  0x64   : > { %7897 = vmatmul.msk.f32.gmra.mxu3 %vm533_vm0, %v1164_v62  ;;  %v12332_v62 = vunpack.c.l.bf16 %v9075_v63 }
  0x65   : > { %7849 = vmatmul.msk.f32.gmra.mxu0 %vm533_vm0, %v9058_v44  ;;  %1810 = vperm.xlu2 %8536, %v381_v56   ;;  %v353_v56 = vld [vmem:[%s12319_s7 + $0xa0] sm:$0xff]  ;;  %v9203_v18 = vld [vmem:[#allocation2 + $0x71] sm:$0xff] }
  0x66   : > { %7883 = vmatmul.msk.f32.gmra.mxu1 %vm533_vm0, %v9065_v45  ;;  %944 = vperm.xlu1 %8535, %v351_v61   ;;  %v493_v37 = vmul.f32 %v8658_v10, %v12332_v62  ;;  %v9095_v61 = vld [vmem:[#allocation2 + $0x59] sm:$0xff]  ;;  %v632_v62 = vld [vmem:[#allocation2 + $0xd0] sm:$0xff] }
  0x67   : > { %1805 = vperm.xlu0 %8534, %v380_v54   ;;  %v9082_v57 = vpop.permute.xlu2 %869  ;;  %v382_v54 = vld [vmem:[%s12320_s8 + $0x88] sm:$0xff] }
  0x68   : > { %12529 = vst [vmem:[#allocation20_spill] sm:$0xff] %v9082_v57  ;;  %v529_v59 = vadd.f32 %v8674_v12, %v493_v37  ;;  %v352_v37 = vld [vmem:[%s12319_s7 + $0x98] sm:$0xff]  ;;  %v635_v30 = vld [vmem:[#allocation2 + $0xe8] sm:$0xff] }
  0x69   : > { %v1169_v46 = vld [vmem:[#allocation2 + $0xe9] sm:$0xff] }
  0x6a   : > { %569 = vst.msk [vmem:[#allocation2 + $0xf1] sm:$0xff] %vm533_vm0, %v529_v59 }
  0x6b   : > { %7864 = vmatmul.msk.f32.gmra.mxu2 %vm533_vm0, %v631_v0  ;;  %v12336_v0 = vunpack.c.h.bf16 %v9075_v63  ;;  %v360_v63 = vld [vmem:[%s12319_s7 + $0xd8] sm:$0xff] }
  0x6c   : > { %7898 = vmatmul.msk.f32.gmra.mxu3 %vm533_vm0, %v1165_v24 }
  0x6d   : > { %7850 = vmatmul.msk.f32.gmra.mxu0 %vm533_vm0, %v9088_v48  ;;  %954 = vperm.xlu2 %8536, %v353_v56   ;;  %v494_v59 = vmul.f32 %v8658_v10, %v12336_v0  ;;  %v384_v56 = vld [vmem:[%s12320_s8 + $0x98] sm:$0xff]  ;;  %v354_v10 = vld [vmem:[%s12319_s7 + $0xa8] sm:$0xff] }
  0x6e   : > { %7884 = vmatmul.msk.f32.gmra.mxu1 %vm533_vm0, %v9095_v61  ;;  %1815 = vperm.xlu1 %8535, %v382_v54   ;;  %v9122_v54 = vld [vmem:[#allocation2 + $0x61] sm:$0xff] }
  0x6f   : > { %949 = vperm.xlu0 %8534, %v352_v37   ;;  %v9109_v24 = vpop.permute.xlu2 %1735  ;;  %v530_v26 = vadd.f32 %v8674_v12, %v494_v59  ;;  %v383_v12 = vld [vmem:[%s12320_s8 + $0x90] sm:$0xff]  ;;  %v1167_v37 = vld [vmem:[#allocation2 + $0xd9] sm:$0xff]  ;;  %v9153_v59 = vld [vmem:[#allocation2 + $0x68] sm:$0xff] }
  0x70   : > { %12530 = vst [vmem:[#allocation21_spill] sm:$0xff] %v9109_v24 }
  0x71   : > { %570 = vst.msk [vmem:[#allocation2 + $0xf9] sm:$0xff] %vm533_vm0, %v530_v26  ;;  %v1170_v49 = vld [vmem:[#allocation2 + $0xf1] sm:$0xff] }
  0x73   : > { %7865 = vmatmul.msk.f32.gmra.mxu2 %vm533_vm0, %v632_v62  ;;  %v633_v62 = vld [vmem:[#allocation2 + $0xd8] sm:$0xff] }
  0x74   : > { %7899 = vmatmul.msk.f32.gmra.mxu3 %vm533_vm0, %v1166_v28  ;;  %v8007_v28 = vld [vmem:[%s12315_s3 + $0x14] sm:$0xf] }
  0x75   : > { %7851 = vmatmul.msk.f32.gmra.mxu0 %vm533_vm0, %v9115_v21  ;;  %1825 = vperm.xlu2 %8536, %v384_v56   ;;  %v356_v56 = vld [vmem:[%s12319_s7 + $0xb8] sm:$0xff] }
  0x76   : > { %7885 = vmatmul.msk.f32.gmra.mxu1 %vm533_vm0, %v9122_v54  ;;  %959 = vperm.xlu1 %8535, %v354_v10   ;;  %v9162_v10 = vld [vmem:[#allocation2 + $0x69] sm:$0xff] }
  0x77   : > { %1820 = vperm.xlu0 %8534, %v383_v12   ;;  %v9144_v26 = vpop.permute.xlu2 %879  ;;  %8008 = vmatpush.msk.msrb.mxu1 %vm735_vm1, %v8007_v28  ;;  %v385_v12 = vld [vmem:[%s12320_s8 + $0xa0] sm:$0xff]  ;;  %v355_v28 = vld [vmem:[%s12319_s7 + $0xb0] sm:$0xff] }
  0x78   : > { %12531 = vst [vmem:[#allocation22_spill] sm:$0xff] %v9144_v26 }
  0x7b   : > { %7866 = vmatmul.msk.f32.gmra.mxu2 %vm533_vm0, %v633_v62 }
  0x7c   : > { %7900 = vmatmul.msk.f32.gmra.mxu3 %vm533_vm0, %v1167_v37 }
  0x7d   : > { %7852 = vmatmul.msk.f32.gmra.mxu0 %vm533_vm0, %v9153_v59  ;;  %969 = vperm.xlu2 %8536, %v356_v56   ;;  %v634_v56 = vld [vmem:[#allocation2 + $0xe0] sm:$0xff] }
  0x7e   : > { %7886 = vmatmul.msk.f32.gmra.mxu1 %vm533_vm0, %v9162_v10  ;;  %1830 = vperm.xlu1 %8535, %v385_v12   ;;  %v9194_v12 = vld [vmem:[#allocation2 + $0x70] sm:$0xff] }
  0x7f   : > { %964 = vperm.xlu0 %8534, %v355_v28   ;;  %v9182_v62 = vpop.permute.xlu2 %1750  ;;  %v387_v28 = vld [vmem:[%s12320_s8 + $0xb0] sm:$0xff] }
  0x80   : > { %12532 = vst [vmem:[#allocation23_spill] sm:$0xff] %v9182_v62  ;;  %v9186_v37 = vpop.permute.xlu1 %864  ;;  %v9188_v0 = vpop.permute.xlu0 %854 }
  0x81   : > { %12533 = vst [vmem:[#allocation24_spill] sm:$0xff] %v9186_v37 }
  0x82   : > { %12534 = vst [vmem:[#allocation25_spill] sm:$0xff] %v9188_v0 }
  0x83   : > { %7867 = vmatmul.msk.f32.gmra.mxu2 %vm533_vm0, %v634_v56 }
  0x84   : > { %7901 = vmatmul.msk.f32.gmra.mxu3 %vm533_vm0, %v1168_v19 }
  0x85   : > { %7853 = vmatmul.msk.f32.gmra.mxu0 %vm533_vm0, %v9194_v12  ;;  %1840 = vperm.xlu2 %8536, %v387_v28  }
  0x86   : > { %7887 = vmatmul.msk.f32.gmra.mxu1 %vm533_vm0, %v9203_v18  ;;  %974 = vperm.xlu1 %8535, %v357_v29   ;;  %v9238_v29 = vld [vmem:[#allocation2 + $0x78] sm:$0xff] }
  0x87   : > { %1835 = vperm.xlu0 %8534, %v386_v2   ;;  %v9223_v19 = vpop.permute.xlu2 %894  ;;  %v8041_v2 = vld [vmem:[%s12315_s3 + $0x18] sm:$0xf] }
  0x88   : > { %12535 = vst [vmem:[#allocation26_spill] sm:$0xff] %v9223_v19  ;;  %v9227_v56 = vpop.permute.xlu1 %1730  ;;  %8042 = vmatpush.msk.msra.mxu2 %vm735_vm1, %v8041_v2  ;;  %v636_v2 = vld [vmem:[#allocation2 + $0xf0] sm:$0xff] }
  0x89   : > { %12536 = vst [vmem:[#allocation27_spill] sm:$0xff] %v9227_v56  ;;  %v9231_v28 = vpop.permute.xlu0 %859 }
  0x8a   : > { %12537 = vst [vmem:[#allocation28_spill] sm:$0xff] %v9231_v28 }
  0x8b   : > { %7868 = vmatmul.msk.f32.gmra.mxu2 %vm533_vm0, %v635_v30 }
  0x8c   : > { %7902 = vmatmul.msk.f32.gmra.mxu3 %vm533_vm0, %v1169_v46 }
  0x8d   : > { %7854 = vmatmul.msk.f32.gmra.mxu0 %vm533_vm0, %v9238_v29  ;;  %984 = vperm.xlu2 %8536, %v359_v8  }
  0x8e   : > { %7888 = vmatmul.msk.f32.gmra.mxu1 %vm533_vm0, %v9248_v52  ;;  %1845 = vperm.xlu1 %8535, %v388_v38  }
  0x8f   : > { %979 = vperm.xlu0 %8534, %v358_v1   ;;  %v9268_v46 = vpop.permute.xlu2 %1765  ;;  %v390_v1 = vld [vmem:[%s12320_s8 + $0xc8] sm:$0xff] }
  0x90   : > { %12538 = vst [vmem:[#allocation29_spill] sm:$0xff] %v9268_v46  ;;  %v9272_v30 = vpop.permute.xlu1 %1740  ;;  %v1051_v46 = vld [vmem:[#allocation4 + $0x38] sm:$0xff] }
  0x91   : > { %12539 = vst [vmem:[#allocation30_spill] sm:$0xff] %v9272_v30  ;;  %v9276_v8 = vpop.permute.xlu0 %874 }
  0x92   : > { %12540 = vst [vmem:[#allocation31_spill] sm:$0xff] %v9276_v8  ;;  %v756_v38 = vpop.f32.mrf.mxu0 }
  0x93   : > { %7869 = vmatmul.msk.f32.gmra.mxu2 %vm533_vm0, %v636_v2  ;;  %v1012_v27 = vmul.f32 %v9188_v0, %v756_v38  ;;  %v1290_v25 = vpop.f32.mrf.mxu1  ;;  %v389_v2 = vld [vmem:[%s12320_s8 + $0xc0] sm:$0xff] }
  0x94   : > { %7903 = vmatmul.msk.f32.gmra.mxu3 %vm533_vm0, %v1170_v49 }
  0x95   : > { %v1076_v49 = vadd.f32 %v1044_v32, %v1012_v27  ;;  %7975 = vmatmul.msk.f32.vlgmr.msrb.gmra.mxu0 %vm533_vm0, %v8795_v7  ;;  %1855 = vperm.xlu2 %8536, %v390_v1   ;;  %v637_v32 = vld [vmem:[#allocation2 + $0xf8] sm:$0xff] }
  0x96   : > { %8009 = vmatmul.msk.f32.vlgmr.msrb.gmra.mxu1 %vm533_vm0, %v9290_v20  ;;  %989 = vperm.xlu1 %8535, %v360_v63   ;;  %v1171_v7 = vld [vmem:[#allocation2 + $0xf9] sm:$0xff] }
  0x97   : > { %1108 = vst.msk [vmem:[#allocation4] sm:$0xff] %vm573_vm3, %v1076_v49  ;;  %1850 = vperm.xlu0 %8534, %v389_v2   ;;  %v9309_v38 = vpop.permute.xlu2 %909  ;;  %v1045_v63 = vld [vmem:[#allocation4 + $0x8] sm:$0xff]  ;;  %v362_v2 = vld [vmem:[%s12319_s7 + $0xe8] sm:$0xff] }
  0x98   : > { %12541 = vst [vmem:[#allocation32_spill] sm:$0xff] %v9309_v38  ;;  %v9313_v27 = vpop.permute.xlu1 %884 }
  0x99   : > { %12542 = vst [vmem:[#allocation33_spill] sm:$0xff] %v9313_v27  ;;  %v9315_v1 = vpop.permute.xlu0 %1745 }
  0x9a   : > { %12543 = vst [vmem:[#allocation34_spill] sm:$0xff] %v9315_v1  ;;  %v759_v58 = vpop.f32.mrf.mxu0 }
  0x9b   : > { %7870 = vmatmul.msk.f32.gmra.mxu2 %vm533_vm0, %v637_v32  ;;  %v1013_v49 = vmul.f32 %v9231_v28, %v759_v58  ;;  %v1293_v6 = vpop.f32.mrf.mxu1 }
  0x9c   : > { %7904 = vmatmul.msk.f32.gmra.mxu3 %vm533_vm0, %v1171_v7 }
  0x9d   : > { %v1077_v36 = vadd.f32 %v1045_v63, %v1013_v49  ;;  %7976 = vmatmul.msk.f32.gmra.mxu0 %vm533_vm0, %v8834_v39  ;;  %999 = vperm.xlu2 %8536, %v362_v2   ;;  %v1046_v2 = vld [vmem:[#allocation4 + $0x10] sm:$0xff] }
  0x9e   : > { %v1386_v32 = vld [vmem:[#allocation4] sm:$0xff]  ;;  %8010 = vmatmul.msk.f32.gmra.mxu1 %vm533_vm0, %v9327_v60  ;;  %1860 = vperm.xlu1 %8535, %v391_v13   ;;  %v9351_v13 = vld [vmem:[#allocation2 + $0x22] sm:$0xff] }
  0x9f   : > { %v1418_v58 = vadd.f32 %v1386_v32, %v1290_v25  ;;  %1109 = vst.msk [vmem:[#allocation4 + $0x8] sm:$0xff] %vm573_vm3, %v1077_v36  ;;  %994 = vperm.xlu0 %8534, %v361_v50   ;;  %v9340_v7 = vpop.permute.xlu2 %1780  ;;  %v393_v49 = vld [vmem:[%s12320_s8 + $0xe0] sm:$0xff]  ;;  %v392_v50 = vld [vmem:[%s12320_s8 + $0xd8] sm:$0xff] }
  0xa0   : > { %12544 = vst [vmem:[#allocation35_spill] sm:$0xff] %v9340_v7  ;;  %v9342_v22 = vpop.permute.xlu1 %1755 }
  0xa1   : > { %12545 = vst [vmem:[#allocation36_spill] sm:$0xff] %v9342_v22  ;;  %v9345_v63 = vpop.permute.xlu0 %889 }
  0xa2   : > { %1450 = vst.msk [vmem:[#allocation4] sm:$0xff] %vm573_vm3, %v1418_v58  ;;  %v762_v39 = vpop.f32.mrf.mxu0 }
  0xa3   : > { %12546 = vst [vmem:[#allocation37_spill] sm:$0xff] %v9345_v63  ;;  %7907 = vmatmul.msk.f32.vlgmr.msrb.gmra.mxu2 %vm533_vm0, %v1482_v15  ;;  %v1014_v25 = vmul.f32 %v9186_v37, %v762_v39  ;;  %v1296_v36 = vpop.f32.mrf.mxu1 }
  0xa4   : > { %7941 = vmatmul.msk.f32.vlgmr.msrb.gmra.mxu3 %vm533_vm0, %v8793_v5 }
  0xa5   : > { %v1078_v32 = vadd.f32 %v1046_v2, %v1014_v25  ;;  %7977 = vmatmul.msk.f32.gmra.mxu0 %vm533_vm0, %v8865_v55  ;;  %v1483_v2 = vld [vmem:[#allocation2 + $0xa] sm:$0xff]  ;;  %v8109_v25 = vld [vmem:[%s12315_s3 + $0x20] sm:$0xf] }
  0xa6   : > { %v1387_v15 = vld [vmem:[#allocation4 + $0x8] sm:$0xff]  ;;  %v9361_v58 = vpop.f32.mrf.mxu2  ;;  %8011 = vmatmul.msk.f32.gmra.mxu1 %vm533_vm0, %v9351_v13  ;;  %1870 = vperm.xlu1 %8535, %v393_v49  }
  0xa7   : > { %v9363_v5 = vpop.f32.mrf.mxu3  ;;  %v1419_v39 = vadd.f32 %v1387_v15, %v1293_v6  ;;  %1110 = vst.msk [vmem:[#allocation4 + $0x10] sm:$0xff] %vm573_vm3, %v1078_v32  ;;  %1865 = vperm.xlu0 %8534, %v392_v50   ;;  %v9368_v14 = vpop.permute.xlu2 %924  ;;  %8110 = vmatpush.msk.msra.mxu0 %vm735_vm1, %v8109_v25  ;;  %v9383_v50 = vld [vmem:[#allocation2 + $0x2a] sm:$0xff]  ;;  %v364_v32 = vld [vmem:[%s12319_s7 + $0xf8] sm:$0xff] }
  0xa8   : > { %v9370_v11 = vpop.permute.xlu1 %899  ;;  %v363_v15 = vld [vmem:[%s12319_s7 + $0xf0] sm:$0xff] }
  0xa9   : > { %12547 = vst [vmem:[#allocation38_spill] sm:$0xff] %v9370_v11  ;;  %v9373_v55 = vpop.permute.xlu0 %1760 }
  0xaa   : > { %1451 = vst.msk [vmem:[#allocation4 + $0x8] sm:$0xff] %vm573_vm3, %v1419_v39  ;;  %v765_v3 = vpop.f32.mrf.mxu0 }
  0xab   : > { %12548 = vst [vmem:[#allocation39_spill] sm:$0xff] %v9373_v55  ;;  %7908 = vmatmul.msk.f32.gmra.mxu2 %vm533_vm0, %v1483_v2  ;;  %v1015_v6 = vmul.f32 %v9082_v57, %v765_v3  ;;  %v1299_v49 = vpop.f32.mrf.mxu1 }
  0xac   : > { %7942 = vmatmul.msk.f32.gmra.mxu3 %vm533_vm0, %v8826_v35 }
  0xad   : > { %v1079_v39 = vadd.f32 %v1047_v34, %v1015_v6  ;;  %7978 = vmatmul.msk.f32.gmra.mxu0 %vm533_vm0, %v8902_v17  ;;  %v1048_v6 = vld [vmem:[#allocation4 + $0x20] sm:$0xff] }
  0xae   : > { %v1388_v2 = vld [vmem:[#allocation4 + $0x10] sm:$0xff]  ;;  %v807_v25 = vpop.f32.mrf.mxu2  ;;  %8012 = vmatmul.msk.f32.gmra.mxu1 %vm533_vm0, %v9383_v50  ;;  %1009 = vperm.xlu1 %8535, %v364_v32  }
  0xaf   : > { %v1341_v35 = vpop.f32.mrf.mxu3  ;;  %v1420_v3 = vadd.f32 %v1388_v2, %v1296_v36  ;;  %1111 = vst.msk [vmem:[#allocation4 + $0x18] sm:$0xff] %vm573_vm3, %v1079_v39  ;;  %1004 = vperm.xlu0 %8534, %v363_v15   ;;  %v9396_v41 = vpop.permute.xlu2 %1795  ;;  %v9408_v15 = vld [vmem:[#allocation2 + $0x32] sm:$0xff] }
  0xb0   : > { %12549 = vst [vmem:[#allocation40_spill] sm:$0xff] %v9396_v41  ;;  %v9398_v23 = vpop.permute.xlu1 %1770 }
  0xb1   : > { %12550 = vst [vmem:[#allocation41_spill] sm:$0xff] %v9398_v23  ;;  %v9401_v34 = vpop.permute.xlu0 %904  ;;  %v1049_v23 = vld [vmem:[#allocation4 + $0x28] sm:$0xff] }
  0xb2   : > { %1452 = vst.msk [vmem:[#allocation4 + $0x10] sm:$0xff] %vm573_vm3, %v1420_v3  ;;  %v768_v17 = vpop.f32.mrf.mxu0 }
  0xb3   : > { %12551 = vst [vmem:[#allocation42_spill] sm:$0xff] %v9401_v34  ;;  %7909 = vmatmul.msk.f32.gmra.mxu2 %vm533_vm0, %v9290_v20  ;;  %v1016_v36 = vmul.f32 %v9276_v8, %v768_v17  ;;  %v1302_v32 = vpop.f32.mrf.mxu1 }
  0xb4   : > { %7943 = vmatmul.msk.f32.gmra.mxu3 %vm533_vm0, %v8858_v53  ;;  %v1061_v53 = vld [vmem:[#allocation4 + $0x88] sm:$0xff] }
  0xb5   : > { %v1080_v39 = vadd.f32 %v1048_v6, %v1016_v36  ;;  %7979 = vmatmul.msk.f32.gmra.mxu0 %vm533_vm0, %v8933_v51 }
  0xb6   : > { %v1389_v2 = vld [vmem:[#allocation4 + $0x18] sm:$0xff]  ;;  %v9412_v3 = vpop.f32.mrf.mxu2  ;;  %8013 = vmatmul.msk.f32.gmra.mxu1 %vm533_vm0, %v9408_v15 }
  0xb7   : > { %v9414_v16 = vpop.f32.mrf.mxu3  ;;  %v1421_v20 = vadd.f32 %v1389_v2, %v1299_v49  ;;  %1112 = vst.msk [vmem:[#allocation4 + $0x20] sm:$0xff] %vm573_vm3, %v1080_v39  ;;  %v9419_v17 = vpop.permute.xlu2 %939  ;;  %v9432_v2 = vld [vmem:[#allocation2 + $0x3a] sm:$0xff] }
  0xb8   : > { %12552 = vst [vmem:[#allocation43_spill] sm:$0xff] %v9419_v17  ;;  %v1029_v41 = vmul.f32 %v9419_v17, %v807_v25  ;;  %v9422_v6 = vpop.permute.xlu1 %914 }
  0xb9   : > { %12553 = vst [vmem:[#allocation44_spill] sm:$0xff] %v9422_v6  ;;  %v9425_v51 = vpop.permute.xlu0 %1775 }
  0xba   : > { %1453 = vst.msk [vmem:[#allocation4 + $0x18] sm:$0xff] %vm573_vm3, %v1421_v20  ;;  %v1093_v36 = vadd.f32 %v1061_v53, %v1029_v41  ;;  %v771_v7 = vpop.f32.mrf.mxu0 }
  0xbb   : > { %12554 = vst [vmem:[#allocation45_spill] sm:$0xff] %v9425_v51  ;;  %7910 = vmatmul.msk.f32.gmra.mxu2 %vm533_vm0, %v9327_v60  ;;  %v1017_v49 = vmul.f32 %v9144_v26, %v771_v7  ;;  %v1305_v39 = vpop.f32.mrf.mxu1 }
  0xbc   : > { %7944 = vmatmul.msk.f32.gmra.mxu3 %vm533_vm0, %v8895_v9  ;;  %1125 = vst.msk [vmem:[#allocation4 + $0x88] sm:$0xff] %vm573_vm3, %v1093_v36  ;;  %v1050_v36 = vld [vmem:[#allocation4 + $0x30] sm:$0xff] }
  0xbd   : > { %v1081_v25 = vadd.f32 %v1049_v23, %v1017_v49  ;;  %7980 = vmatmul.msk.f32.gmra.mxu0 %vm533_vm0, %v8970_v40 }
  0xbe   : > { %v1390_v41 = vld [vmem:[#allocation4 + $0x20] sm:$0xff]  ;;  %v9437_v20 = vpop.f32.mrf.mxu2  ;;  %8014 = vmatmul.msk.f32.gmra.mxu1 %vm533_vm0, %v9432_v2 }
  0xbf   : > { %v9439_v53 = vpop.f32.mrf.mxu3  ;;  %v1422_v60 = vadd.f32 %v1390_v41, %v1302_v32  ;;  %1113 = vst.msk [vmem:[#allocation4 + $0x28] sm:$0xff] %vm573_vm3, %v1081_v25  ;;  %v9444_v9 = vpop.permute.xlu2 %1810  ;;  %v9456_v25 = vld [vmem:[#allocation2 + $0x42] sm:$0xff] }
  0xc0   : > { %12555 = vst [vmem:[#allocation46_spill] sm:$0xff] %v9444_v9  ;;  %v9446_v7 = vpop.permute.xlu1 %1785 }
  0xc1   : > { %12556 = vst [vmem:[#allocation47_spill] sm:$0xff] %v9446_v7  ;;  %v9449_v23 = vpop.permute.xlu0 %919 }
  0xc2   : > { %1454 = vst.msk [vmem:[#allocation4 + $0x20] sm:$0xff] %vm573_vm3, %v1422_v60  ;;  %v774_v40 = vpop.f32.mrf.mxu0 }
  0xc3   : > { %12557 = vst [vmem:[#allocation48_spill] sm:$0xff] %v9449_v23  ;;  %7911 = vmatmul.msk.f32.gmra.mxu2 %vm533_vm0, %v9351_v13  ;;  %v1018_v32 = vmul.f32 %v9313_v27, %v774_v40  ;;  %v1308_v49 = vpop.f32.mrf.mxu1  ;;  %v1403_v41 = vld [vmem:[#allocation4 + $0x88] sm:$0xff]  ;;  %v1064_v13 = vld [vmem:[#allocation4 + $0xa0] sm:$0xff] }
  0xc4   : > { %7945 = vmatmul.msk.f32.gmra.mxu3 %vm533_vm0, %v8926_v47  ;;  %v1435_v17 = vadd.f32 %v1403_v41, %v1341_v35 }
  0xc5   : > { %v1082_v9 = vadd.f32 %v1050_v36, %v1018_v32  ;;  %7981 = vmatmul.msk.f32.gmra.mxu0 %vm533_vm0, %v9001_v33 }
  0xc6   : > { %v1391_v60 = vld [vmem:[#allocation4 + $0x28] sm:$0xff]  ;;  %v816_v7 = vpop.f32.mrf.mxu2  ;;  %8015 = vmatmul.msk.f32.gmra.mxu1 %vm533_vm0, %v9456_v25  ;;  %1467 = vst.msk [vmem:[#allocation4 + $0x88] sm:$0xff] %vm573_vm3, %v1435_v17 }
  0xc7   : > { %v1350_v51 = vpop.f32.mrf.mxu3  ;;  %v1423_v47 = vadd.f32 %v1391_v60, %v1305_v39  ;;  %1114 = vst.msk [vmem:[#allocation4 + $0x30] sm:$0xff] %vm573_vm3, %v1082_v9  ;;  %v9464_v40 = vpop.permute.xlu2 %954  ;;  %v9477_v9 = vld [vmem:[#allocation2 + $0x4a] sm:$0xff] }
  0xc8   : > { %12558 = vst [vmem:[#allocation49_spill] sm:$0xff] %v9464_v40  ;;  %v1032_v35 = vmul.f32 %v9464_v40, %v816_v7  ;;  %v9467_v36 = vpop.permute.xlu1 %929 }
  0xc9   : > { %12559 = vst [vmem:[#allocation50_spill] sm:$0xff] %v9467_v36  ;;  %v9470_v33 = vpop.permute.xlu0 %1790 }
  0xca   : > { %1455 = vst.msk [vmem:[#allocation4 + $0x28] sm:$0xff] %vm573_vm3, %v1423_v47  ;;  %v1096_v32 = vadd.f32 %v1064_v13, %v1032_v35  ;;  %v777_v41 = vpop.f32.mrf.mxu0  ;;  %v1060_v35 = vld [vmem:[#allocation4 + $0x80] sm:$0xff] }
  0xcb   : > { %12560 = vst [vmem:[#allocation51_spill] sm:$0xff] %v9470_v33  ;;  %7912 = vmatmul.msk.f32.gmra.mxu2 %vm533_vm0, %v9383_v50  ;;  %v1019_v17 = vmul.f32 %v9345_v63, %v777_v41  ;;  %v1311_v39 = vpop.f32.mrf.mxu1  ;;  %v1052_v41 = vld [vmem:[#allocation4 + $0x40] sm:$0xff] }
  0xcc   : > { %7946 = vmatmul.msk.f32.gmra.mxu3 %vm533_vm0, %v8963_v31  ;;  %1128 = vst.msk [vmem:[#allocation4 + $0xa0] sm:$0xff] %vm573_vm3, %v1096_v32 }
  0xcd   : > { %v1083_v7 = vadd.f32 %v1051_v46, %v1019_v17  ;;  %7982 = vmatmul.msk.f32.gmra.mxu0 %vm533_vm0, %v9035_v42 }
  0xce   : > { %v1392_v60 = vld [vmem:[#allocation4 + $0x30] sm:$0xff]  ;;  %v9482_v47 = vpop.f32.mrf.mxu2  ;;  %8016 = vmatmul.msk.f32.gmra.mxu1 %vm533_vm0, %v9477_v9 }
  0xcf   : > { %v9484_v13 = vpop.f32.mrf.mxu3  ;;  %v1424_v31 = vadd.f32 %v1392_v60, %v1308_v49  ;;  %1115 = vst.msk [vmem:[#allocation4 + $0x38] sm:$0xff] %vm573_vm3, %v1083_v7  ;;  %v9496_v17 = vpop.permute.xlu2 %1825  ;;  %v9503_v60 = vld [vmem:[#allocation2 + $0x52] sm:$0xff] }
  0xd0   : > { %v9489_v50 = vpop.permute.xlu1 %1800  ;;  %12563 = vst [vmem:[#allocation54_spill] sm:$0xff] %v9496_v17 }
  0xd1   : > { %12561 = vst [vmem:[#allocation52_spill] sm:$0xff] %v9489_v50  ;;  %v9492_v46 = vpop.permute.xlu0 %934 }
  0xd2   : > { %1456 = vst.msk [vmem:[#allocation4 + $0x30] sm:$0xff] %vm573_vm3, %v1424_v31  ;;  %v1028_v42 = vmul.f32 %v9492_v46, %v9361_v58  ;;  %v780_v32 = vpop.f32.mrf.mxu0 }
  0xd3   : > { %12562 = vst [vmem:[#allocation53_spill] sm:$0xff] %v9492_v46  ;;  %7913 = vmatmul.msk.f32.gmra.mxu2 %vm533_vm0, %v9408_v15  ;;  %v1020_v49 = vmul.f32 %v9223_v19, %v780_v32  ;;  %v1314_v7 = vpop.f32.mrf.mxu1  ;;  %v1406_v31 = vld [vmem:[#allocation4 + $0xa0] sm:$0xff]  ;;  %v1062_v32 = vld [vmem:[#allocation4 + $0x90] sm:$0xff] }
  0xd4   : > { %7947 = vmatmul.msk.f32.gmra.mxu3 %vm533_vm0, %v8994_v4  ;;  %v1092_v40 = vadd.f32 %v1060_v35, %v1028_v42  ;;  %v1438_v50 = vadd.f32 %v1406_v31, %v1350_v51  ;;  %v1053_v42 = vld [vmem:[#allocation4 + $0x48] sm:$0xff] }
  0xd5   : > { %v1084_v33 = vadd.f32 %v1052_v41, %v1020_v49  ;;  %7983 = vmatmul.msk.f32.gmra.mxu0 %vm533_vm0, %v9065_v45 }
  0xd6   : > { %v1393_v58 = vld [vmem:[#allocation4 + $0x38] sm:$0xff]  ;;  %1124 = vst.msk [vmem:[#allocation4 + $0x80] sm:$0xff] %vm573_vm3, %v1092_v40  ;;  %v9508_v17 = vpop.f32.mrf.mxu2  ;;  %8017 = vmatmul.msk.f32.gmra.mxu1 %vm533_vm0, %v9503_v60 }
  0xd7   : > { %v9510_v15 = vpop.f32.mrf.mxu3  ;;  %v1425_v4 = vadd.f32 %v1393_v58, %v1311_v39  ;;  %1116 = vst.msk [vmem:[#allocation4 + $0x40] sm:$0xff] %vm573_vm3, %v1084_v33  ;;  %v9530_v49 = vpop.permute.xlu2 %969 }
  0xd8   : > { %v9515_v35 = vpop.permute.xlu1 %944  ;;  %1470 = vst.msk [vmem:[#allocation4 + $0xa0] sm:$0xff] %vm573_vm3, %v1438_v50  ;;  %v9528_v50 = vld [vmem:[#allocation2 + $0x5a] sm:$0xff] }
  0xd9   : > { %12564 = vst [vmem:[#allocation55_spill] sm:$0xff] %v9515_v35  ;;  %v1030_v45 = vmul.f32 %v9515_v35, %v9412_v3  ;;  %v9521_v51 = vpop.permute.xlu0 %1805 }
  0xda   : > { %1457 = vst.msk [vmem:[#allocation4 + $0x38] sm:$0xff] %vm573_vm3, %v1425_v4  ;;  %v783_v40 = vpop.f32.mrf.mxu0 }
  0xdb   : > { %12565 = vst [vmem:[#allocation56_spill] sm:$0xff] %v9521_v51  ;;  %v1094_v41 = vadd.f32 %v1062_v32, %v1030_v45  ;;  %7914 = vmatmul.msk.f32.gmra.mxu2 %vm533_vm0, %v9432_v2  ;;  %v1021_v33 = vmul.f32 %v9370_v11, %v783_v40  ;;  %v1317_v39 = vpop.f32.mrf.mxu1  ;;  %v1067_v2 = vld [vmem:[#allocation4 + $0xb8] sm:$0xff] }
  0xdc   : > { %7948 = vmatmul.msk.f32.gmra.mxu3 %vm533_vm0, %v9028_v43  ;;  %12566 = vst [vmem:[#allocation57_spill] sm:$0xff] %v9530_v49 }
  0xdd   : > { %1126 = vst.msk [vmem:[#allocation4 + $0x90] sm:$0xff] %vm573_vm3, %v1094_v41  ;;  %v1085_v3 = vadd.f32 %v1053_v42, %v1021_v33  ;;  %7984 = vmatmul.msk.f32.gmra.mxu0 %vm533_vm0, %v9095_v61  ;;  %v1402_v31 = vld [vmem:[#allocation4 + $0x80] sm:$0xff]  ;;  %v1063_v42 = vld [vmem:[#allocation4 + $0x98] sm:$0xff] }
  0xde   : > { %v1394_v58 = vld [vmem:[#allocation4 + $0x40] sm:$0xff]  ;;  %v825_v4 = vpop.f32.mrf.mxu2  ;;  %8018 = vmatmul.msk.f32.gmra.mxu1 %vm533_vm0, %v9528_v50  ;;  %v1434_v43 = vadd.f32 %v1402_v31, %v9363_v5  ;;  %v1054_v5 = vld [vmem:[#allocation4 + $0x50] sm:$0xff] }
  0xdf   : > { %v1359_v32 = vpop.f32.mrf.mxu3  ;;  %v1426_v45 = vadd.f32 %v1394_v58, %v1314_v7  ;;  %1117 = vst.msk [vmem:[#allocation4 + $0x48] sm:$0xff] %vm573_vm3, %v1085_v3  ;;  %v1035_v40 = vmul.f32 %v9530_v49, %v825_v4  ;;  %v9554_v31 = vld [vmem:[#allocation2 + $0x62] sm:$0xff] }
  0xe0   : > { %v9540_v41 = vpop.permute.xlu1 %1815  ;;  %1466 = vst.msk [vmem:[#allocation4 + $0x80] sm:$0xff] %vm573_vm3, %v1434_v43 }
  0xe1   : > { %12567 = vst [vmem:[#allocation58_spill] sm:$0xff] %v9540_v41  ;;  %v1099_v61 = vadd.f32 %v1067_v2, %v1035_v40  ;;  %v9544_v33 = vpop.permute.xlu0 %949 }
  0xe2   : > { %1458 = vst.msk [vmem:[#allocation4 + $0x40] sm:$0xff] %vm573_vm3, %v1426_v45  ;;  %v1031_v35 = vmul.f32 %v9544_v33, %v9437_v20  ;;  %v786_v46 = vpop.f32.mrf.mxu0 }
  0xe3   : > { %1131 = vst.msk [vmem:[#allocation4 + $0xb8] sm:$0xff] %vm573_vm3, %v1099_v61  ;;  %7915 = vmatmul.msk.f32.gmra.mxu2 %vm533_vm0, %v9456_v25  ;;  %v1022_v7 = vmul.f32 %v9401_v34, %v786_v46  ;;  %v1320_v3 = vpop.f32.mrf.mxu1  ;;  %v1065_v46 = vld [vmem:[#allocation4 + $0xa8] sm:$0xff] }
  0xe4   : > { %7949 = vmatmul.msk.f32.gmra.mxu3 %vm533_vm0, %v9058_v44  ;;  %v1095_v58 = vadd.f32 %v1063_v42, %v1031_v35  ;;  %v1404_v4 = vld [vmem:[#allocation4 + $0x90] sm:$0xff]  ;;  %v1055_v42 = vld [vmem:[#allocation4 + $0x58] sm:$0xff] }
  0xe5   : > { %v1086_v2 = vadd.f32 %v1054_v5, %v1022_v7  ;;  %7985 = vmatmul.msk.f32.gmra.mxu0 %vm533_vm0, %v9122_v54  ;;  %v1436_v20 = vadd.f32 %v1404_v4, %v9414_v16  ;;  %v9575_v5 = vpop.permute.xlu2 %1840 }
  0xe6   : > { %v1395_v43 = vld [vmem:[#allocation4 + $0x48] sm:$0xff]  ;;  %1127 = vst.msk [vmem:[#allocation4 + $0x98] sm:$0xff] %vm573_vm3, %v1095_v58  ;;  %v9560_v25 = vpop.f32.mrf.mxu2  ;;  %8019 = vmatmul.msk.f32.gmra.mxu1 %vm533_vm0, %v9554_v31 }
  0xe7   : > { %v9562_v45 = vpop.f32.mrf.mxu3  ;;  %v1427_v44 = vadd.f32 %v1395_v43, %v1317_v39  ;;  %1118 = vst.msk [vmem:[#allocation4 + $0x50] sm:$0xff] %vm573_vm3, %v1086_v2  ;;  %v9582_v2 = vld [vmem:[#allocation2 + $0x6a] sm:$0xff] }
  0xe8   : > { %v9567_v35 = vpop.permute.xlu1 %959  ;;  %1468 = vst.msk [vmem:[#allocation4 + $0x90] sm:$0xff] %vm573_vm3, %v1436_v20 }
  0xe9   : > { %12568 = vst [vmem:[#allocation59_spill] sm:$0xff] %v9567_v35  ;;  %v1033_v16 = vmul.f32 %v9567_v35, %v9482_v47  ;;  %v9573_v54 = vpop.permute.xlu0 %1820 }
  0xea   : > { %1459 = vst.msk [vmem:[#allocation4 + $0x48] sm:$0xff] %vm573_vm3, %v1427_v44  ;;  %v1409_v40 = vld [vmem:[#allocation4 + $0xb8] sm:$0xff]  ;;  %v789_v61 = vpop.f32.mrf.mxu0 }
  0xeb   : > { %12569 = vst [vmem:[#allocation60_spill] sm:$0xff] %v9573_v54  ;;  %v1441_v39 = vadd.f32 %v1409_v40, %v1359_v32  ;;  %v1097_v7 = vadd.f32 %v1065_v46, %v1033_v16  ;;  %7916 = vmatmul.msk.f32.gmra.mxu2 %vm533_vm0, %v9477_v9  ;;  %v1023_v58 = vmul.f32 %v9309_v38, %v789_v61  ;;  %v1323_v4 = vpop.f32.mrf.mxu1 }
  0xec   : > { %12570 = vst [vmem:[#allocation61_spill] sm:$0xff] %v9575_v5  ;;  %7950 = vmatmul.msk.f32.gmra.mxu3 %vm533_vm0, %v9088_v48 }
  0xed   : > { %1473 = vst.msk [vmem:[#allocation4 + $0xb8] sm:$0xff] %vm573_vm3, %v1441_v39  ;;  %v1087_v47 = vadd.f32 %v1055_v42, %v1023_v58  ;;  %7986 = vmatmul.msk.f32.gmra.mxu0 %vm533_vm0, %v9162_v10  ;;  %v1405_v20 = vld [vmem:[#allocation4 + $0x98] sm:$0xff]  ;;  %v1066_v10 = vld [vmem:[#allocation4 + $0xb0] sm:$0xff]  ;;  %v1056_v42 = vld [vmem:[#allocation4 + $0x60] sm:$0xff]  ;;  %v9611_v58 = vpop.permute.xlu2 %984 }
  0xee   : > { %v1396_v32 = vld [vmem:[#allocation4 + $0x50] sm:$0xff]  ;;  %1129 = vst.msk [vmem:[#allocation4 + $0xa8] sm:$0xff] %vm573_vm3, %v1097_v7  ;;  %v9588_v43 = vpop.f32.mrf.mxu2  ;;  %8020 = vmatmul.msk.f32.gmra.mxu1 %vm533_vm0, %v9582_v2  ;;  %v1437_v48 = vadd.f32 %v1405_v20, %v9439_v53  ;;  %v9609_v39 = vld [vmem:[#allocation2 + $0x72] sm:$0xff] }
  0xef   : > { %v9590_v9 = vpop.f32.mrf.mxu3  ;;  %v1428_v44 = vadd.f32 %v1396_v32, %v1320_v3  ;;  %1119 = vst.msk [vmem:[#allocation4 + $0x58] sm:$0xff] %vm573_vm3, %v1087_v47  ;;  %v1070_v32 = vld [vmem:[#allocation4 + $0xd0] sm:$0xff] }
  0xf0   : > { %v9596_v46 = vpop.permute.xlu1 %1830  ;;  %1469 = vst.msk [vmem:[#allocation4 + $0x98] sm:$0xff] %vm573_vm3, %v1437_v48 }
  0xf1   : > { %12571 = vst [vmem:[#allocation62_spill] sm:$0xff] %v9596_v46  ;;  %v9600_v16 = vpop.permute.xlu0 %964 }
  0xf2   : > { %1460 = vst.msk [vmem:[#allocation4 + $0x50] sm:$0xff] %vm573_vm3, %v1428_v44  ;;  %v1034_v40 = vmul.f32 %v9600_v16, %v9508_v17  ;;  %v792_v61 = vpop.f32.mrf.mxu0 }
  0xf3   : > { %12572 = vst [vmem:[#allocation63_spill] sm:$0xff] %v9600_v16  ;;  %7917 = vmatmul.msk.f32.gmra.mxu2 %vm533_vm0, %v9503_v60  ;;  %v1024_v53 = vmul.f32 %v9422_v6, %v792_v61  ;;  %v1326_v3 = vpop.f32.mrf.mxu1 }
  0xf4   : > { %7951 = vmatmul.msk.f32.gmra.mxu3 %vm533_vm0, %v9115_v21  ;;  %v1098_v7 = vadd.f32 %v1066_v10, %v1034_v40  ;;  %12573 = vst [vmem:[#allocation64_spill] sm:$0xff] %v9611_v58  ;;  %v1068_v40 = vld [vmem:[#allocation4 + $0xc0] sm:$0xff] }
  0xf5   : > { %v1088_v47 = vadd.f32 %v1056_v42, %v1024_v53  ;;  %7987 = vmatmul.msk.f32.gmra.mxu0 %vm533_vm0, %v9203_v18  ;;  %v1407_v17 = vld [vmem:[#allocation4 + $0xa8] sm:$0xff] }
  0xf6   : > { %v1397_v20 = vld [vmem:[#allocation4 + $0x58] sm:$0xff]  ;;  %1130 = vst.msk [vmem:[#allocation4 + $0xb0] sm:$0xff] %vm573_vm3, %v1098_v7  ;;  %v834_v60 = vpop.f32.mrf.mxu2  ;;  %8021 = vmatmul.msk.f32.gmra.mxu1 %vm533_vm0, %v9609_v39  ;;  %v1439_v21 = vadd.f32 %v1407_v17, %v9484_v13  ;;  %v1057_v13 = vld [vmem:[#allocation4 + $0x68] sm:$0xff] }
  0xf7   : > { %v1368_v48 = vpop.f32.mrf.mxu3  ;;  %v1429_v44 = vadd.f32 %v1397_v20, %v1323_v4  ;;  %1120 = vst.msk [vmem:[#allocation4 + $0x60] sm:$0xff] %vm573_vm3, %v1088_v47  ;;  %v1038_v10 = vmul.f32 %v9611_v58, %v834_v60  ;;  %v9635_v20 = vld [vmem:[#allocation2 + $0x7a] sm:$0xff] }
  0xf8   : > { %v9621_v61 = vpop.permute.xlu1 %974  ;;  %1471 = vst.msk [vmem:[#allocation4 + $0xa8] sm:$0xff] %vm573_vm3, %v1439_v21 }
  0xf9   : > { %12574 = vst [vmem:[#allocation65_spill] sm:$0xff] %v9621_v61  ;;  %v1102_v18 = vadd.f32 %v1070_v32, %v1038_v10  ;;  %v1036_v42 = vmul.f32 %v9621_v61, %v9560_v25  ;;  %v9627_v53 = vpop.permute.xlu0 %1835 }
  0xfa   : > { %1461 = vst.msk [vmem:[#allocation4 + $0x58] sm:$0xff] %vm573_vm3, %v1429_v44  ;;  %v795_v7 = vpop.f32.mrf.mxu0 }
  0xfb   : > { %12575 = vst [vmem:[#allocation66_spill] sm:$0xff] %v9627_v53  ;;  %v1100_v4 = vadd.f32 %v1068_v40, %v1036_v42  ;;  %7918 = vmatmul.msk.f32.gmra.mxu2 %vm533_vm0, %v9528_v50  ;;  %v1025_v47 = vmul.f32 %v9449_v23, %v795_v7  ;;  %v1329_v17 = vpop.f32.mrf.mxu1 }
  0xfc   : > { %1134 = vst.msk [vmem:[#allocation4 + $0xd0] sm:$0xff] %vm573_vm3, %v1102_v18  ;;  %7952 = vmatmul.msk.f32.gmra.mxu3 %vm533_vm0, %v9153_v59 }
  0xfd   : > { %1132 = vst.msk [vmem:[#allocation4 + $0xc0] sm:$0xff] %vm573_vm3, %v1100_v4  ;;  %v1089_v25 = vadd.f32 %v1057_v13, %v1025_v47  ;;  %7988 = vmatmul.msk.f32.gmra.mxu0 %vm533_vm0, %v9248_v52  ;;  %v1408_v60 = vld [vmem:[#allocation4 + $0xb0] sm:$0xff]  ;;  %v1069_v52 = vld [vmem:[#allocation4 + $0xc8] sm:$0xff]  ;;  %v9654_v4 = vpop.permute.xlu2 %1855 }
  0xfe   : > { %v1398_v32 = vld [vmem:[#allocation4 + $0x60] sm:$0xff]  ;;  %v837_v21 = vpop.f32.mrf.mxu2  ;;  %8022 = vmatmul.msk.f32.gmra.mxu1 %vm533_vm0, %v9635_v20  ;;  %v1440_v59 = vadd.f32 %v1408_v60, %v9510_v15  ;;  %v1058_v13 = vld [vmem:[#allocation4 + $0x70] sm:$0xff]  ;;  %12578 = vst [vmem:[#allocation69_spill] sm:$0xff] %v9654_v4 }
  0xff   : > { %v9640_v44 = vpop.f32.mrf.mxu3  ;;  %v1430_v50 = vadd.f32 %v1398_v32, %v1326_v3  ;;  %1121 = vst.msk [vmem:[#allocation4 + $0x68] sm:$0xff] %vm573_vm3, %v1089_v25  ;;  %v2404_v15 = vld [vmem:[#allocation2 + $0x81] sm:$0xff] }
 0x100   : > { %v9646_v10 = vpop.permute.xlu1 %1845  ;;  %1472 = vst.msk [vmem:[#allocation4 + $0xb0] sm:$0xff] %vm573_vm3, %v1440_v59  ;;  %v9661_v60 = vld [vmem:[#allocation2 + $0x82] sm:$0xff] }
 0x101   : > { %12576 = vst [vmem:[#allocation67_spill] sm:$0xff] %v9646_v10  ;;  %v9650_v40 = vpop.permute.xlu0 %979 }
 0x102   : > { %1462 = vst.msk [vmem:[#allocation4 + $0x60] sm:$0xff] %vm573_vm3, %v1430_v50  ;;  %v1037_v42 = vmul.f32 %v9650_v40, %v9588_v43  ;;  %v798_v7 = vpop.f32.mrf.mxu0 }
 0x103   : > { %12577 = vst [vmem:[#allocation68_spill] sm:$0xff] %v9650_v40  ;;  %v1412_v18 = vld [vmem:[#allocation4 + $0xd0] sm:$0xff]  ;;  %7919 = vmatmul.msk.f32.gmra.mxu2 %vm533_vm0, %v9554_v31  ;;  %v1026_v47 = vmul.f32 %v9368_v14, %v798_v7  ;;  %v1332_v25 = vpop.f32.mrf.mxu1 }
 0x104   : > { %v1444_v3 = vadd.f32 %v1412_v18, %v1368_v48  ;;  %7953 = vmatmul.msk.f32.gmra.mxu3 %vm533_vm0, %v9194_v12  ;;  %v1101_v32 = vadd.f32 %v1069_v52, %v1037_v42  ;;  %v1410_v59 = vld [vmem:[#allocation4 + $0xc0] sm:$0xff]  ;;  %v1071_v52 = vld [vmem:[#allocation4 + $0xd8] sm:$0xff] }
 0x105   : > { %v1090_v43 = vadd.f32 %v1058_v13, %v1026_v47  ;;  %7989 = vmatmul.msk.f32.gmra.mxu0 %vm533_vm0, %v2404_v15  ;;  %v1442_v48 = vadd.f32 %v1410_v59, %v9562_v45  ;;  %v1059_v15 = vld [vmem:[#allocation4 + $0x78] sm:$0xff] }
 0x106   : > { %1476 = vst.msk [vmem:[#allocation4 + $0xd0] sm:$0xff] %vm573_vm3, %v1444_v3  ;;  %v1399_v50 = vld [vmem:[#allocation4 + $0x68] sm:$0xff]  ;;  %v840_v31 = vpop.f32.mrf.mxu2  ;;  %8023 = vmatmul.msk.f32.gmra.mxu1 %vm533_vm0, %v9661_v60  ;;  %v2405_v3 = vld [vmem:[#allocation2 + $0x89] sm:$0xff] }
 0x107   : > { %1133 = vst.msk [vmem:[#allocation4 + $0xc8] sm:$0xff] %vm573_vm3, %v1101_v32  ;;  %v9667_v18 = vpop.f32.mrf.mxu3  ;;  %v1431_v12 = vadd.f32 %v1399_v50, %v1329_v17  ;;  %v9684_v59 = vld [vmem:[#allocation2 + $0x8a] sm:$0xff] }
 0x108   : > { %1122 = vst.msk [vmem:[#allocation4 + $0x70] sm:$0xff] %vm573_vm3, %v1090_v43  ;;  %v9672_v42 = vpop.permute.xlu1 %989  ;;  %v9686_v43 = vpop.permute.xlu2 %999 }
 0x109   : > { %12579 = vst [vmem:[#allocation70_spill] sm:$0xff] %v9672_v42  ;;  %v1039_v45 = vmul.f32 %v9672_v42, %v837_v21  ;;  %v9677_v7 = vpop.permute.xlu0 %1850 }
 0x10a   : > { %1474 = vst.msk [vmem:[#allocation4 + $0xc0] sm:$0xff] %vm573_vm3, %v1442_v48  ;;  %v801_v13 = vpop.f32.mrf.mxu0 }
 0x10b   : > { %1463 = vst.msk [vmem:[#allocation4 + $0x68] sm:$0xff] %vm573_vm3, %v1431_v12  ;;  %v1103_v47 = vadd.f32 %v1071_v52, %v1039_v45  ;;  %7920 = vmatmul.msk.f32.gmra.mxu2 %vm533_vm0, %v9582_v2  ;;  %v1027_v17 = vmul.f32 %v9467_v36, %v801_v13  ;;  %v1335_v32 = vpop.f32.mrf.mxu1  ;;  %v1073_v52 = vld [vmem:[#allocation4 + $0xe8] sm:$0xff] }
 0x10c   : > { %12580 = vst [vmem:[#allocation71_spill] sm:$0xff] %v9677_v7  ;;  %7954 = vmatmul.msk.f32.gmra.mxu3 %vm533_vm0, %v9238_v29 }
 0x10d   : > { %12581 = vst [vmem:[#allocation72_spill] sm:$0xff] %v9686_v43  ;;  %v1091_v21 = vadd.f32 %v1059_v15, %v1027_v17  ;;  %7990 = vmatmul.msk.f32.gmra.mxu0 %vm533_vm0, %v2405_v3  ;;  %v2030_v15 = vld [vmem:[#allocation2 + $0x80] sm:$0xff] }
 0x10e   : > { %1135 = vst.msk [vmem:[#allocation4 + $0xd8] sm:$0xff] %vm573_vm3, %v1103_v47  ;;  %v1411_v48 = vld [vmem:[#allocation4 + $0xc8] sm:$0xff]  ;;  %v843_v12 = vpop.f32.mrf.mxu2  ;;  %8024 = vmatmul.msk.f32.gmra.mxu1 %vm533_vm0, %v9684_v59  ;;  %v1072_v47 = vld [vmem:[#allocation4 + $0xe0] sm:$0xff] }
 0x10f   : > { %v1400_v50 = vld [vmem:[#allocation4 + $0x70] sm:$0xff]  ;;  %v1377_v2 = vpop.f32.mrf.mxu3  ;;  %v1443_v29 = vadd.f32 %v1411_v48, %v9590_v9  ;;  %1123 = vst.msk [vmem:[#allocation4 + $0x78] sm:$0xff] %vm573_vm3, %v1091_v21  ;;  %v1041_v13 = vmul.f32 %v9686_v43, %v843_v12  ;;  %v2406_v9 = vld [vmem:[#allocation2 + $0x91] sm:$0xff] }
 0x110   : > { %v1432_v45 = vadd.f32 %v1400_v50, %v1332_v25  ;;  %v9695_v42 = vpop.permute.xlu1 %1860  ;;  %v9710_v21 = vld [vmem:[#allocation2 + $0x92] sm:$0xff] }
 0x111   : > { %12582 = vst [vmem:[#allocation73_spill] sm:$0xff] %v9695_v42  ;;  %v1105_v3 = vadd.f32 %v1073_v52, %v1041_v13  ;;  %v9699_v17 = vpop.permute.xlu0 %994 }
 0x112   : > { %1475 = vst.msk [vmem:[#allocation4 + $0xc8] sm:$0xff] %vm573_vm3, %v1443_v29  ;;  %v1040_v58 = vmul.f32 %v9699_v17, %v840_v31  ;;  %v9702_v40 = vpop.f32.mrf.mxu0 }
 0x113   : > { %1464 = vst.msk [vmem:[#allocation4 + $0x70] sm:$0xff] %vm573_vm3, %v1432_v45  ;;  %7921 = vmatmul.msk.f32.gmra.mxu2 %vm533_vm0, %v9609_v39  ;;  %v9708_v25 = vpop.f32.mrf.mxu1 }
 0x114   : > { %12583 = vst [vmem:[#allocation74_spill] sm:$0xff] %v9699_v17  ;;  %7955 = vmatmul.msk.f32.gmra.mxu3 %vm533_vm0, %v2030_v15  ;;  %v1104_v48 = vadd.f32 %v1072_v47, %v1040_v58  ;;  %v2031_v58 = vld [vmem:[#allocation2 + $0x88] sm:$0xff] }
 0x115   : > { %1137 = vst.msk [vmem:[#allocation4 + $0xe8] sm:$0xff] %vm573_vm3, %v1105_v3  ;;  %v1413_v50 = vld [vmem:[#allocation4 + $0xd8] sm:$0xff]  ;;  %7991 = vmatmul.msk.f32.gmra.mxu0 %vm533_vm0, %v2406_v9  ;;  %v2407_v3 = vld [vmem:[#allocation2 + $0x99] sm:$0xff] }
 0x116   : > { %v1445_v31 = vadd.f32 %v1413_v50, %v9640_v44  ;;  %v1401_v12 = vld [vmem:[#allocation4 + $0x78] sm:$0xff]  ;;  %1136 = vst.msk [vmem:[#allocation4 + $0xe0] sm:$0xff] %vm573_vm3, %v1104_v48  ;;  %v846_v52 = vpop.f32.mrf.mxu2  ;;  %8025 = vmatmul.msk.f32.gmra.mxu1 %vm533_vm0, %v9710_v21  ;;  %v9732_v9 = vld [vmem:[#allocation2 + $0x9a] sm:$0xff] }
 0x117   : > { %v9715_v29 = vpop.f32.mrf.mxu3  ;;  %v1433_v39 = vadd.f32 %v1401_v12, %v1335_v32  ;;  %v1075_v12 = vld [vmem:[#allocation4 + $0xf8] sm:$0xff] }
 0x118   : > { %1477 = vst.msk [vmem:[#allocation4 + $0xd8] sm:$0xff] %vm573_vm3, %v1445_v31  ;;  %v9720_v45 = vpop.permute.xlu1 %1870  ;;  %v2408_v17 = vld [vmem:[#allocation2 + $0xa1] sm:$0xff] }
 0x119   : > { %12584 = vst [vmem:[#allocation75_spill] sm:$0xff] %v9720_v45  ;;  %v9723_v13 = vpop.permute.xlu0 %1865 }
 0x11a   : > { %1465 = vst.msk [vmem:[#allocation4 + $0x78] sm:$0xff] %vm573_vm3, %v1433_v39  ;;  %v9725_v15 = vpop.f32.mrf.mxu0  ;;  %v2032_v39 = vld [vmem:[#allocation2 + $0x90] sm:$0xff] }
 0x11b   : > { %12585 = vst [vmem:[#allocation76_spill] sm:$0xff] %v9723_v13  ;;  %7922 = vmatmul.msk.f32.gmra.mxu2 %vm533_vm0, %v9635_v20  ;;  %v9730_v32 = vpop.f32.mrf.mxu1  ;;  %v2034_v13 = vld [vmem:[#allocation2 + $0xa0] sm:$0xff] }
 0x11c   : > { %v1415_v44 = vld [vmem:[#allocation4 + $0xe8] sm:$0xff]  ;;  %7956 = vmatmul.msk.f32.gmra.mxu3 %vm533_vm0, %v2031_v58 }
 0x11d   : > { %v1447_v47 = vadd.f32 %v1415_v44, %v1377_v2  ;;  %7992 = vmatmul.msk.f32.gmra.mxu0 %vm533_vm0, %v2407_v3  ;;  %v1414_v48 = vld [vmem:[#allocation4 + $0xe0] sm:$0xff]  ;;  %v1074_v44 = vld [vmem:[#allocation4 + $0xf0] sm:$0xff] }
 0x11e   : > { %v849_v50 = vpop.f32.mrf.mxu2  ;;  %8026 = vmatmul.msk.f32.gmra.mxu1 %vm533_vm0, %v9732_v9  ;;  %v1446_v2 = vadd.f32 %v1414_v48, %v9667_v18  ;;  %v9753_v48 = vld [vmem:[#allocation2 + $0xa2] sm:$0xff] }
 0x11f   : > { %1479 = vst.msk [vmem:[#allocation4 + $0xe8] sm:$0xff] %vm573_vm3, %v1447_v47  ;;  %v1383_v31 = vpop.f32.mrf.mxu3 }
 0x120   : > { %v9739_v20 = vpop.permute.xlu1 %1009  ;;  %1478 = vst.msk [vmem:[#allocation4 + $0xe0] sm:$0xff] %vm573_vm3, %v1446_v2 }
 0x121   : > { %12586 = vst [vmem:[#allocation77_spill] sm:$0xff] %v9739_v20  ;;  %v1043_v58 = vmul.f32 %v9739_v20, %v849_v50  ;;  %v9743_v47 = vpop.permute.xlu0 %1004 }
 0x122   : > { %12587 = vst [vmem:[#allocation78_spill] sm:$0xff] %v9743_v47  ;;  %v1042_v3 = vmul.f32 %v9743_v47, %v846_v52  ;;  %v9746_v43 = vpop.f32.mrf.mxu0  ;;  %v2409_v47 = vld [vmem:[#allocation2 + $0xa9] sm:$0xff] }
 0x123   : > { %v1107_v45 = vadd.f32 %v1075_v12, %v1043_v58  ;;  %7923 = vmatmul.msk.f32.gmra.mxu2 %vm533_vm0, %v9661_v60  ;;  %v9751_v18 = vpop.f32.mrf.mxu1  ;;  %v1920_v12 = vld [vmem:[#allocation4] sm:$0xff] }
 0x124   : > { %7957 = vmatmul.msk.f32.gmra.mxu3 %vm533_vm0, %v2032_v39  ;;  %v1106_v2 = vadd.f32 %v1074_v44, %v1042_v3  ;;  %v2033_v39 = vld [vmem:[#allocation2 + $0x98] sm:$0xff] }
 0x125   : > { %1139 = vst.msk [vmem:[#allocation4 + $0xf8] sm:$0xff] %vm573_vm3, %v1107_v45  ;;  %7993 = vmatmul.msk.f32.gmra.mxu0 %vm533_vm0, %v2408_v17  ;;  %v9769_v45 = vld [vmem:[#allocation2 + $0xaa] sm:$0xff] }
 0x126   : > { %1138 = vst.msk [vmem:[#allocation4 + $0xf0] sm:$0xff] %vm573_vm3, %v1106_v2  ;;  %v1632_v52 = vpop.f32.mrf.mxu2  ;;  %8027 = vmatmul.msk.f32.gmra.mxu1 %vm533_vm0, %v9753_v48 }
 0x127   : > { %v2166_v50 = vpop.f32.mrf.mxu3  ;;  %v1888_v60 = vmul.f32 %v9227_v56, %v1632_v52 }
 0x129   : > { %v1952_v58 = vadd.f32 %v1920_v12, %v1888_v60 }
 0x12a   : > { %v9761_v20 = vpop.f32.mrf.mxu0 }
 0x12b   : > { %1984 = vst.msk [vmem:[#allocation4] sm:$0xff] %vm573_vm3, %v1952_v58  ;;  %7924 = vmatmul.msk.f32.gmra.mxu2 %vm533_vm0, %v9684_v59  ;;  %v9767_v17 = vpop.f32.mrf.mxu1  ;;  %v2262_v59 = vmul.f32 %v2166_v50, %v9188_v0  ;;  %v1921_v58 = vld [vmem:[#allocation4 + $0x8] sm:$0xff] }
 0x12c   : > { %7958 = vmatmul.msk.f32.gmra.mxu3 %vm533_vm0, %v2033_v39  ;;  %v1417_v44 = vld [vmem:[#allocation4 + $0xf8] sm:$0xff]  ;;  %v9787_v50 = vld [vmem:[#allocation2 + $0xb2] sm:$0xff] }
 0x12d   : > { %7994 = vmatmul.msk.f32.gmra.mxu0 %vm533_vm0, %v2409_v47  ;;  %v1416_v3 = vld [vmem:[#allocation4 + $0xf0] sm:$0xff]  ;;  %v1449_v2 = vadd.f32 %v1417_v44, %v1383_v31  ;;  %v2410_v44 = vld [vmem:[#allocation2 + $0xb1] sm:$0xff] }
 0x12e   : > { %v1635_v52 = vpop.f32.mrf.mxu2  ;;  %8028 = vmatmul.msk.f32.gmra.mxu1 %vm533_vm0, %v9769_v45  ;;  %v1448_v12 = vadd.f32 %v1416_v3, %v9715_v29 }
 0x12f   : > { %v2169_v60 = vpop.f32.mrf.mxu3  ;;  %v1889_v39 = vmul.f32 %v9109_v24, %v1635_v52  ;;  %1481 = vst.msk [vmem:[#allocation4 + $0xf8] sm:$0xff] %vm573_vm3, %v1449_v2 }
 0x130   : > { %1480 = vst.msk [vmem:[#allocation4 + $0xf0] sm:$0xff] %vm573_vm3, %v1448_v12  ;;  %v2035_v12 = vld [vmem:[#allocation2 + $0xa8] sm:$0xff] }
 0x131   : > { %v1953_v47 = vadd.f32 %v1921_v58, %v1889_v39  ;;  %v2411_v58 = vld [vmem:[#allocation2 + $0xb9] sm:$0xff] }
 0x132   : > { %v2294_v42 = vld [vmem:[#allocation4] sm:$0xff]  ;;  %v9779_v31 = vpop.f32.mrf.mxu0 }
 0x133   : > { %v2326_v4 = vadd.f32 %v2294_v42, %v2262_v59  ;;  %1985 = vst.msk [vmem:[#allocation4 + $0x8] sm:$0xff] %vm573_vm3, %v1953_v47  ;;  %7925 = vmatmul.msk.f32.gmra.mxu2 %vm533_vm0, %v9710_v21  ;;  %v9785_v29 = vpop.f32.mrf.mxu1  ;;  %v2263_v42 = vmul.f32 %v2169_v60, %v9231_v28  ;;  %v4399_v21 = vld [vmem:[%s12317_s5] sm:$0xff] }
 0x134   : > { %7959 = vmatmul.msk.f32.gmra.mxu3 %vm533_vm0, %v2034_v13  ;;  %v1922_v13 = vld [vmem:[#allocation4 + $0x10] sm:$0xff]  ;;  %4511 = vmatpush.msra.mxu1 %v4399_v21 }
 0x135   : > { %2358 = vst.msk [vmem:[#allocation4] sm:$0xff] %vm573_vm3, %v2326_v4  ;;  %7995 = vmatmul.msk.f32.gmra.mxu0 %vm533_vm0, %v2410_v44  ;;  %v9806_v44 = vld [vmem:[#allocation2 + $0xba] sm:$0xff] }
 0x136   : > { %v1638_v3 = vpop.f32.mrf.mxu2  ;;  %8029 = vmatmul.msk.f32.gmra.mxu1 %vm533_vm0, %v9787_v50 }
 0x137   : > { %v2172_v2 = vpop.f32.mrf.mxu3  ;;  %v1890_v52 = vmul.f32 %v9272_v30, %v1638_v3 }
 0x139   : > { %v1954_v59 = vadd.f32 %v1922_v13, %v1890_v52 }
 0x13a   : > { %v2295_v4 = vld [vmem:[#allocation4 + $0x8] sm:$0xff]  ;;  %v9798_v39 = vpop.f32.mrf.mxu0 }
 0x13b   : > { %v2327_v47 = vadd.f32 %v2295_v4, %v2263_v42  ;;  %1986 = vst.msk [vmem:[#allocation4 + $0x10] sm:$0xff] %vm573_vm3, %v1954_v59  ;;  %7926 = vmatmul.msk.f32.gmra.mxu2 %vm533_vm0, %v9732_v9  ;;  %v9804_v60 = vpop.f32.mrf.mxu1  ;;  %v2264_v9 = vmul.f32 %v2172_v2, %v9186_v37  ;;  %v2036_v59 = vld [vmem:[#allocation2 + $0xb0] sm:$0xff]  ;;  %v2979_v37 = vmul.f32 %v9730_v32, %v9109_v24 }
 0x13c   : > { %7960 = vmatmul.msk.f32.gmra.mxu3 %vm533_vm0, %v2035_v12  ;;  %v2636_v3 = vld [vmem:[#allocation4] sm:$0xff]  ;;  %v1923_v12 = vld [vmem:[#allocation4 + $0x18] sm:$0xff] }
 0x13d   : > { %v2668_v21 = vadd.f32 %v2636_v3, %v9702_v40  ;;  %2359 = vst.msk [vmem:[#allocation4 + $0x8] sm:$0xff] %vm573_vm3, %v2327_v47  ;;  %7996 = vmatmul.msk.f32.gmra.mxu0 %vm533_vm0, %v2411_v58  ;;  %v2412_v47 = vld [vmem:[#allocation2 + $0xc1] sm:$0xff]  ;;  %v2978_v58 = vmul.f32 %v9708_v25, %v9227_v56  ;;  %v2037_v56 = vld [vmem:[#allocation2 + $0xb8] sm:$0xff] }
 0x13e   : > { %v1641_v52 = vpop.f32.mrf.mxu2  ;;  %8030 = vmatmul.msk.f32.gmra.mxu1 %vm533_vm0, %v9806_v44 }
 0x13f   : > { %v2175_v42 = vpop.f32.mrf.mxu3  ;;  %2700 = vst.msk [vmem:[#allocation4] sm:$0xff] %vm573_vm3, %v2668_v21  ;;  %v1891_v13 = vmul.f32 %v9315_v1, %v1641_v52  ;;  %v9826_v21 = vld [vmem:[#allocation2 + $0xc2] sm:$0xff] }
 0x141   : > { %v1955_v4 = vadd.f32 %v1923_v12, %v1891_v13 }
 0x142   : > { %v2296_v28 = vld [vmem:[#allocation4 + $0x10] sm:$0xff]  ;;  %v9816_v40 = vpop.f32.mrf.mxu0 }
 0x143   : > { %v2328_v3 = vadd.f32 %v2296_v28, %v2264_v9  ;;  %1987 = vst.msk [vmem:[#allocation4 + $0x18] sm:$0xff] %vm573_vm3, %v1955_v4  ;;  %7927 = vmatmul.msk.f32.gmra.mxu2 %vm533_vm0, %v9753_v48  ;;  %v9824_v2 = vpop.f32.mrf.mxu1  ;;  %v2265_v48 = vmul.f32 %v2175_v42, %v9082_v57  ;;  %v1924_v4 = vld [vmem:[#allocation4 + $0x20] sm:$0xff] }
 0x144   : > { %7961 = vmatmul.msk.f32.gmra.mxu3 %vm533_vm0, %v2036_v59  ;;  %v2637_v52 = vld [vmem:[#allocation4 + $0x8] sm:$0xff] }
 0x145   : > { %v2669_v13 = vadd.f32 %v2637_v52, %v9725_v15  ;;  %2360 = vst.msk [vmem:[#allocation4 + $0x10] sm:$0xff] %vm573_vm3, %v2328_v3  ;;  %7997 = vmatmul.msk.f32.gmra.mxu0 %vm533_vm0, %v2412_v47  ;;  %v2413_v52 = vld [vmem:[#allocation2 + $0xc9] sm:$0xff] }
 0x146   : > { %v1644_v25 = vpop.f32.mrf.mxu2  ;;  %8031 = vmatmul.msk.f32.gmra.mxu1 %vm533_vm0, %v9826_v21  ;;  %v3010_v9 = vld [vmem:[#allocation4] sm:$0xff] }
 0x147   : > { %v2178_v28 = vpop.f32.mrf.mxu3  ;;  %2701 = vst.msk [vmem:[#allocation4 + $0x8] sm:$0xff] %vm573_vm3, %v2669_v13  ;;  %v1892_v12 = vmul.f32 %v9182_v62, %v1644_v25  ;;  %v3042_v59 = vadd.f32 %v3010_v9, %v2978_v58  ;;  %v9847_v58 = vld [vmem:[#allocation2 + $0xca] sm:$0xff] }
 0x149   : > { %v1956_v15 = vadd.f32 %v1924_v4, %v1892_v12  ;;  %3074 = vst.msk [vmem:[#allocation4] sm:$0xff] %vm573_vm3, %v3042_v59  ;;  %v1925_v59 = vld [vmem:[#allocation4 + $0x28] sm:$0xff]  ;;  %v2038_v4 = vld [vmem:[#allocation2 + $0xc0] sm:$0xff] }
 0x14a   : > { %v2297_v3 = vld [vmem:[#allocation4 + $0x18] sm:$0xff]  ;;  %v9837_v47 = vpop.f32.mrf.mxu0 }
 0x14b   : > { %v2329_v0 = vadd.f32 %v2297_v3, %v2265_v48  ;;  %1988 = vst.msk [vmem:[#allocation4 + $0x20] sm:$0xff] %vm573_vm3, %v1956_v15  ;;  %7928 = vmatmul.msk.f32.gmra.mxu2 %vm533_vm0, %v9769_v45  ;;  %v9845_v42 = vpop.f32.mrf.mxu1 }
 0x14c   : > { %7962 = vmatmul.msk.f32.gmra.mxu3 %vm533_vm0, %v2037_v56  ;;  %v2638_v13 = vld [vmem:[#allocation4 + $0x10] sm:$0xff]  ;;  %v2266_v56 = vmul.f32 %v2178_v28, %v9276_v8 }
 0x14d   : > { %v2670_v25 = vadd.f32 %v2638_v13, %v9746_v43  ;;  %2361 = vst.msk [vmem:[#allocation4 + $0x18] sm:$0xff] %vm573_vm3, %v2329_v0  ;;  %7998 = vmatmul.msk.f32.gmra.mxu0 %vm533_vm0, %v2413_v52  ;;  %v9858_v43 = vld [vmem:[%s8669_s15 + $0x78] sm:$0xff]  }
 0x14e   : > { %v1647_v32 = vpop.f32.mrf.mxu2  ;;  %8032 = vmatmul.msk.f32.gmra.mxu1 %vm533_vm0, %v9847_v58  ;;  %v3011_v45 = vld [vmem:[#allocation4 + $0x8] sm:$0xff]  ;;  %12588 = vst [vmem:[#allocation79_spill] sm:$0xff] %v9858_v43  ;;  %v12428_v15 = vunpack.c.l.bf16 %v9858_v43 }
 0x14f   : > { %v2181_v9 = vpop.f32.mrf.mxu3  ;;  %2702 = vst.msk [vmem:[#allocation4 + $0x10] sm:$0xff] %vm573_vm3, %v2670_v25  ;;  %v1893_v48 = vmul.f32 %v9342_v22, %v1647_v32  ;;  %v3043_v12 = vadd.f32 %v3011_v45, %v2979_v37  ;;  %v2414_v13 = vld [vmem:[#allocation2 + $0xd1] sm:$0xff]  ;;  %v2980_v25 = vmul.f32 %v9751_v18, %v9272_v30  ;;  %v8541_v45 = vld [vmem:[%s12313_s1] ss:$0 sm:$0xff]  ;;  %v12435_v30 = vunpack.c.h.bf16 %v9858_v43 }
 0x150   : > { %v9872_v32 = vld [vmem:[#allocation2 + $0xd2] sm:$0xff] }
 0x151   : > { %v1957_v0 = vadd.f32 %v1925_v59, %v1893_v48  ;;  %3075 = vst.msk [vmem:[#allocation4 + $0x8] sm:$0xff] %vm573_vm3, %v3043_v12  ;;  %v495_v48 = vmul.f32 %v8541_v45, %v12428_v15  ;;  %v2039_v15 = vld [vmem:[#allocation2 + $0xc8] sm:$0xff] }
 0x152   : > { %v2298_v3 = vld [vmem:[#allocation4 + $0x20] sm:$0xff]  ;;  %v9862_v52 = vpop.f32.mrf.mxu0 }
 0x153   : > { %v2330_v28 = vadd.f32 %v2298_v3, %v2266_v56  ;;  %1989 = vst.msk [vmem:[#allocation4 + $0x28] sm:$0xff] %vm573_vm3, %v1957_v0  ;;  %7929 = vmatmul.msk.f32.gmra.mxu2 %vm533_vm0, %v9787_v50  ;;  %v9870_v37 = vpop.f32.mrf.mxu1  ;;  %v8542_v50 = vld [vmem:[%s12314_s2] ss:$0 sm:$0xff]  ;;  %v2267_v3 = vmul.f32 %v2181_v9, %v9144_v26 }
 0x154   : > { %7963 = vmatmul.msk.f32.gmra.mxu3 %vm533_vm0, %v2038_v4  ;;  %v2639_v18 = vld [vmem:[#allocation4 + $0x18] sm:$0xff]  ;;  %v531_v12 = vadd.f32 %v8542_v50, %v495_v48  ;;  %v2415_v9 = vld [vmem:[#allocation2 + $0xd9] sm:$0xff] }
 0x155   : > { %v2671_v56 = vadd.f32 %v2639_v18, %v9761_v20  ;;  %2362 = vst.msk [vmem:[#allocation4 + $0x20] sm:$0xff] %vm573_vm3, %v2330_v28  ;;  %7999 = vmatmul.msk.f32.gmra.mxu0 %vm533_vm0, %v2414_v13  ;;  %v396_v13 = vld [vmem:[%s12320_s8 + $0xf8] sm:$0xff]  ;;  %v1926_v18 = vld [vmem:[#allocation4 + $0x30] sm:$0xff] }
 0x156   : > { %v1650_v59 = vpop.f32.mrf.mxu2  ;;  %8033 = vmatmul.msk.f32.gmra.mxu1 %vm533_vm0, %v9872_v32  ;;  %v3012_v0 = vld [vmem:[#allocation4 + $0x10] sm:$0xff]  ;;  %1885 = vperm.xlu0 %8534, %v396_v13   ;;  %571 = vst.msk [vmem:[#allocation2 + $0x101] sm:$0xff] %vm533_vm0, %v531_v12  ;;  %v496_v12 = vmul.f32 %v8541_v45, %v12435_v30  ;;  %v12589_v45 = vld [vmem:[#allocation29_spill] sm:$0xff]  ;;  %v2984_v30 = vmul.f32 %v9824_v2, %v9373_v55 }
 0x157   : > { %v2184_v4 = vpop.f32.mrf.mxu3  ;;  %2703 = vst.msk [vmem:[#allocation4 + $0x18] sm:$0xff] %vm573_vm3, %v2671_v56  ;;  %v1894_v20 = vmul.f32 %v9373_v55, %v1650_v59  ;;  %v3044_v28 = vadd.f32 %v3012_v0, %v2980_v25  ;;  %v2981_v59 = vmul.f32 %v9767_v17, %v9315_v1  ;;  %v9904_v25 = vld [vmem:[#allocation2 + $0xda] sm:$0xff] }
 0x158   : > { %v532_v17 = vadd.f32 %v8542_v50, %v496_v12  ;;  %v2416_v12 = vld [vmem:[#allocation2 + $0xe1] sm:$0xff] }
 0x159   : > { %v1958_v48 = vadd.f32 %v1926_v18, %v1894_v20  ;;  %3076 = vst.msk [vmem:[#allocation4 + $0x10] sm:$0xff] %vm573_vm3, %v3044_v28 }
 0x15a   : > { %v2299_v56 = vld [vmem:[#allocation4 + $0x28] sm:$0xff]  ;;  %v9896_v8 = vpop.f32.mrf.mxu0  ;;  %572 = vst.msk [vmem:[#allocation2 + $0x109] sm:$0xff] %vm533_vm0, %v532_v17 }
 0x15b   : > { %v2331_v26 = vadd.f32 %v2299_v56, %v2267_v3  ;;  %1990 = vst.msk [vmem:[#allocation4 + $0x30] sm:$0xff] %vm573_vm3, %v1958_v48  ;;  %7930 = vmatmul.msk.f32.gmra.mxu2 %vm533_vm0, %v9806_v44  ;;  %v9910_v13 = vpop.f32.mrf.mxu1  ;;  %v1927_v48 = vld [vmem:[#allocation4 + $0x38] sm:$0xff] }
 0x15c   : > { %7964 = vmatmul.msk.f32.gmra.mxu3 %vm533_vm0, %v2039_v15  ;;  %v2640_v0 = vld [vmem:[#allocation4 + $0x20] sm:$0xff]  ;;  %v2268_v15 = vmul.f32 %v2184_v4, %v9313_v27  ;;  %v9928_v4 = vld [vmem:[#allocation2 + $0xe2] sm:$0xff] }
 0x15d   : > { %v2672_v20 = vadd.f32 %v2640_v0, %v9779_v31  ;;  %2363 = vst.msk [vmem:[#allocation4 + $0x28] sm:$0xff] %vm573_vm3, %v2331_v26  ;;  %8000 = vmatmul.msk.f32.gmra.mxu0 %vm533_vm0, %v2415_v9  ;;  %v2040_v26 = vld [vmem:[#allocation2 + $0xd0] sm:$0xff]  ;;  %v2982_v0 = vmul.f32 %v9785_v29, %v9182_v62 }
 0x15e   : > { %v1653_v3 = vpop.f32.mrf.mxu2  ;;  %8034 = vmatmul.msk.f32.gmra.mxu1 %vm533_vm0, %v9904_v25  ;;  %v3013_v44 = vld [vmem:[#allocation4 + $0x18] sm:$0xff] }
 0x15f   : > { %v2187_v28 = vpop.f32.mrf.mxu3  ;;  %2704 = vst.msk [vmem:[#allocation4 + $0x20] sm:$0xff] %vm573_vm3, %v2672_v20  ;;  %v1895_v18 = vmul.f32 %v12589_v45, %v1653_v3  ;;  %v3045_v31 = vadd.f32 %v3013_v44, %v2981_v59 }
 0x161   : > { %v1959_v56 = vadd.f32 %v1927_v48, %v1895_v18  ;;  %3077 = vst.msk [vmem:[#allocation4 + $0x18] sm:$0xff] %vm573_vm3, %v3045_v31  ;;  %v12590_v18 = vld [vmem:[#allocation41_spill] sm:$0xff] }
 0x162   : > { %v2300_v50 = vld [vmem:[#allocation4 + $0x30] sm:$0xff]  ;;  %v9920_v9 = vpop.f32.mrf.mxu0 }
 0x163   : > { %v2332_v20 = vadd.f32 %v2300_v50, %v2268_v15  ;;  %1991 = vst.msk [vmem:[#allocation4 + $0x38] sm:$0xff] %vm573_vm3, %v1959_v56  ;;  %7931 = vmatmul.msk.f32.gmra.mxu2 %vm533_vm0, %v9826_v21  ;;  %v2269_v21 = vmul.f32 %v2187_v28, %v9345_v63  ;;  %v9937_v15 = vpop.f32.mrf.mxu1  ;;  %v9949_v28 = vld [vmem:[#allocation2 + $0xea] sm:$0xff] }
 0x164   : > { %7965 = vmatmul.msk.f32.gmra.mxu3 %vm533_vm0, %v2040_v26  ;;  %v2641_v59 = vld [vmem:[#allocation4 + $0x28] sm:$0xff] }
 0x165   : > { %v2673_v17 = vadd.f32 %v2641_v59, %v9798_v39  ;;  %2364 = vst.msk [vmem:[#allocation4 + $0x30] sm:$0xff] %vm573_vm3, %v2332_v20  ;;  %8001 = vmatmul.msk.f32.gmra.mxu0 %vm533_vm0, %v2416_v12  ;;  %v1928_v39 = vld [vmem:[#allocation4 + $0x40] sm:$0xff]  ;;  %v2041_v26 = vld [vmem:[#allocation2 + $0xd8] sm:$0xff]  ;;  %v2983_v59 = vmul.f32 %v9804_v60, %v9342_v22 }
 0x166   : > { %v1656_v3 = vpop.f32.mrf.mxu2  ;;  %8035 = vmatmul.msk.f32.gmra.mxu1 %vm533_vm0, %v9928_v4  ;;  %v3014_v29 = vld [vmem:[#allocation4 + $0x20] sm:$0xff] }
 0x167   : > { %v2190_v44 = vpop.f32.mrf.mxu3  ;;  %2705 = vst.msk [vmem:[#allocation4 + $0x28] sm:$0xff] %vm573_vm3, %v2673_v17  ;;  %v1896_v31 = vmul.f32 %v12590_v18, %v1656_v3  ;;  %v3046_v48 = vadd.f32 %v3014_v29, %v2982_v0  ;;  %v2417_v20 = vld [vmem:[#allocation2 + $0xe9] sm:$0xff] }
 0x169   : > { %v1960_v56 = vadd.f32 %v1928_v39, %v1896_v31  ;;  %3078 = vst.msk [vmem:[#allocation4 + $0x20] sm:$0xff] %vm573_vm3, %v3046_v48 }
 0x16a   : > { %v2301_v50 = vld [vmem:[#allocation4 + $0x38] sm:$0xff]  ;;  %v9941_v12 = vpop.f32.mrf.mxu0 }
 0x16b   : > { %v2333_v17 = vadd.f32 %v2301_v50, %v2269_v21  ;;  %1992 = vst.msk [vmem:[#allocation4 + $0x40] sm:$0xff] %vm573_vm3, %v1960_v56  ;;  %7932 = vmatmul.msk.f32.gmra.mxu2 %vm533_vm0, %v9847_v58  ;;  %v2270_v58 = vmul.f32 %v2190_v44, %v9223_v19  ;;  %v12591_v21 = vld [vmem:[#allocation45_spill] sm:$0xff]  ;;  %v2042_v56 = vld [vmem:[#allocation2 + $0xe0] sm:$0xff] }
 0x16c   : > { %7966 = vmatmul.msk.f32.gmra.mxu3 %vm533_vm0, %v2041_v26  ;;  %v2642_v0 = vld [vmem:[#allocation4 + $0x30] sm:$0xff]  ;;  %v1929_v26 = vld [vmem:[#allocation4 + $0x48] sm:$0xff] }
 0x16d   : > { %v2674_v3 = vadd.f32 %v2642_v0, %v9816_v40  ;;  %2365 = vst.msk [vmem:[#allocation4 + $0x38] sm:$0xff] %vm573_vm3, %v2333_v17  ;;  %8002 = vmatmul.msk.f32.gmra.mxu0 %vm533_vm0, %v2417_v20  ;;  %v9959_v40 = vpop.f32.mrf.mxu1  ;;  %v2418_v0 = vld [vmem:[#allocation2 + $0xf1] sm:$0xff] }
 0x16e   : > { %v1659_v29 = vpop.f32.mrf.mxu2  ;;  %8036 = vmatmul.msk.f32.gmra.mxu1 %vm533_vm0, %v9949_v28  ;;  %v3015_v60 = vld [vmem:[#allocation4 + $0x28] sm:$0xff] }
 0x16f   : > { %v2193_v31 = vpop.f32.mrf.mxu3  ;;  %2706 = vst.msk [vmem:[#allocation4 + $0x30] sm:$0xff] %vm573_vm3, %v2674_v3  ;;  %v1897_v48 = vmul.f32 %v12591_v21, %v1659_v29  ;;  %v3047_v39 = vadd.f32 %v3015_v60, %v2983_v59  ;;  %v9970_v44 = vld [vmem:[#allocation2 + $0xf2] sm:$0xff] }
 0x171   : > { %v1961_v50 = vadd.f32 %v1929_v26, %v1897_v48  ;;  %3079 = vst.msk [vmem:[#allocation4 + $0x28] sm:$0xff] %vm573_vm3, %v3047_v39 }
 0x172   : > { %v2302_v20 = vld [vmem:[#allocation4 + $0x40] sm:$0xff]  ;;  %v9962_v17 = vpop.f32.mrf.mxu0 }
 0x173   : > { %v2334_v3 = vadd.f32 %v2302_v20, %v2270_v58  ;;  %1993 = vst.msk [vmem:[#allocation4 + $0x48] sm:$0xff] %vm573_vm3, %v1961_v50  ;;  %7933 = vmatmul.msk.f32.gmra.mxu2 %vm533_vm0, %v9872_v32  ;;  %v2271_v32 = vmul.f32 %v2193_v31, %v9370_v11  ;;  %v12592_v58 = vld [vmem:[#allocation35_spill] sm:$0xff]  ;;  %v2043_v50 = vld [vmem:[#allocation2 + $0xe8] sm:$0xff] }
 0x174   : > { %7967 = vmatmul.msk.f32.gmra.mxu3 %vm533_vm0, %v2042_v56  ;;  %v2643_v59 = vld [vmem:[#allocation4 + $0x38] sm:$0xff]  ;;  %v1930_v56 = vld [vmem:[#allocation4 + $0x50] sm:$0xff] }
 0x175   : > { %v2675_v29 = vadd.f32 %v2643_v59, %v9837_v47  ;;  %2366 = vst.msk [vmem:[#allocation4 + $0x40] sm:$0xff] %vm573_vm3, %v2334_v3  ;;  %8003 = vmatmul.msk.f32.gmra.mxu0 %vm533_vm0, %v2418_v0  ;;  %v2419_v3 = vld [vmem:[#allocation2 + $0xf9] sm:$0xff]  ;;  %v2985_v59 = vmul.f32 %v9845_v42, %v12589_v45  ;;  %v9985_v55 = vpop.f32.mrf.mxu1  ;;  %v394_v31 = vld [vmem:[%s12320_s8 + $0xe8] sm:$0xff] }
 0x176   : > { %v1662_v60 = vpop.f32.mrf.mxu2  ;;  %8037 = vmatmul.msk.f32.gmra.mxu1 %vm533_vm0, %v9970_v44  ;;  %v3016_v2 = vld [vmem:[#allocation4 + $0x30] sm:$0xff]  ;;  %1875 = vperm.xlu2 %8536, %v394_v31   ;;  %v2986_v31 = vmul.f32 %v9870_v37, %v12590_v18 }
 0x177   : > { %v2196_v48 = vpop.f32.mrf.mxu3  ;;  %2707 = vst.msk [vmem:[#allocation4 + $0x38] sm:$0xff] %vm573_vm3, %v2675_v29  ;;  %v1898_v39 = vmul.f32 %v12592_v58, %v1662_v60  ;;  %v3048_v26 = vadd.f32 %v3016_v2, %v2984_v30  ;;  %v9991_v30 = vld [vmem:[#allocation2 + $0xfa] sm:$0xff] }
 0x179   : > { %v1962_v47 = vadd.f32 %v1930_v56, %v1898_v39  ;;  %3080 = vst.msk [vmem:[#allocation4 + $0x30] sm:$0xff] %vm573_vm3, %v3048_v26  ;;  %v12593_v39 = vld [vmem:[#allocation47_spill] sm:$0xff] }
 0x17a   : > { %v2303_v20 = vld [vmem:[#allocation4 + $0x48] sm:$0xff]  ;;  %v9981_v0 = vpop.f32.mrf.mxu0 }
 0x17b   : > { %v2335_v43 = vadd.f32 %v2303_v20, %v2271_v32  ;;  %1994 = vst.msk [vmem:[#allocation4 + $0x50] sm:$0xff] %vm573_vm3, %v1962_v47  ;;  %7934 = vmatmul.msk.f32.gmra.mxu2 %vm533_vm0, %v9904_v25  ;;  %v2272_v32 = vmul.f32 %v2196_v48, %v9401_v34  ;;  %v2044_v47 = vld [vmem:[#allocation2 + $0xf0] sm:$0xff]  ;;  %v2762_v48 = vld [vmem:[#allocation2 + $0x102] sm:$0xff] }
 0x17c   : > { %7968 = vmatmul.msk.f32.gmra.mxu3 %vm533_vm0, %v2043_v50  ;;  %v2644_v29 = vld [vmem:[#allocation4 + $0x40] sm:$0xff]  ;;  %v1931_v50 = vld [vmem:[#allocation4 + $0x58] sm:$0xff] }
 0x17d   : > { %v2676_v42 = vadd.f32 %v2644_v29, %v9862_v52  ;;  %2367 = vst.msk [vmem:[#allocation4 + $0x48] sm:$0xff] %vm573_vm3, %v2335_v43  ;;  %8004 = vmatmul.msk.f32.gmra.mxu0 %vm533_vm0, %v2419_v3  ;;  %v2420_v3 = vld [vmem:[#allocation2 + $0x101] sm:$0xff]  ;;  %v10018_v37 = vpop.f32.mrf.mxu1 }
 0x17e   : > { %v1665_v60 = vpop.f32.mrf.mxu2  ;;  %8038 = vmatmul.msk.f32.gmra.mxu1 %vm533_vm0, %v9991_v30  ;;  %v3017_v25 = vld [vmem:[#allocation4 + $0x38] sm:$0xff] }
 0x17f   : > { %v2199_v2 = vpop.f32.mrf.mxu3  ;;  %2708 = vst.msk [vmem:[#allocation4 + $0x40] sm:$0xff] %vm573_vm3, %v2676_v42  ;;  %v1899_v26 = vmul.f32 %v12593_v39, %v1665_v60  ;;  %v3049_v56 = vadd.f32 %v3017_v25, %v2985_v59  ;;  %v395_v59 = vld [vmem:[%s12320_s8 + $0xf0] sm:$0xff] }
 0x180   : > { %1880 = vperm.xlu2 %8536, %v395_v59  }
 0x181   : > { %v1963_v52 = vadd.f32 %v1931_v50, %v1899_v26  ;;  %3081 = vst.msk [vmem:[#allocation4 + $0x38] sm:$0xff] %vm573_vm3, %v3049_v56  ;;  %v2273_v26 = vmul.f32 %v2199_v2, %v9309_v38  ;;  %v12594_v56 = vld [vmem:[#allocation51_spill] sm:$0xff]  ;;  %v2763_v2 = vld [vmem:[#allocation2 + $0x10a] sm:$0xff] }
 0x182   : > { %v2304_v43 = vld [vmem:[#allocation4 + $0x50] sm:$0xff]  ;;  %v10005_v20 = vpop.f32.mrf.mxu0 }
 0x183   : > { %v2336_v29 = vadd.f32 %v2304_v43, %v2272_v32  ;;  %1995 = vst.msk [vmem:[#allocation4 + $0x58] sm:$0xff] %vm573_vm3, %v1963_v52  ;;  %7935 = vmatmul.msk.f32.gmra.mxu2 %vm533_vm0, %v9928_v4  ;;  %v1932_v52 = vld [vmem:[#allocation4 + $0x60] sm:$0xff] }
 0x184   : > { %7969 = vmatmul.msk.f32.gmra.mxu3 %vm533_vm0, %v2044_v47  ;;  %v2645_v42 = vld [vmem:[#allocation4 + $0x48] sm:$0xff] }
 0x185   : > { %v2677_v60 = vadd.f32 %v2645_v42, %v9896_v8  ;;  %2368 = vst.msk [vmem:[#allocation4 + $0x50] sm:$0xff] %vm573_vm3, %v2336_v29  ;;  %8005 = vmatmul.msk.f32.gmra.mxu0 %vm533_vm0, %v2420_v3  ;;  %v2045_v8 = vld [vmem:[#allocation2 + $0xf8] sm:$0xff]  ;;  %v2421_v3 = vld [vmem:[#allocation2 + $0x109] sm:$0xff] }
 0x186   : > { %v1668_v25 = vpop.f32.mrf.mxu2  ;;  %8039 = vmatmul.msk.f32.gmra.mxu1 %vm533_vm0, %v2762_v48  ;;  %v3018_v4 = vld [vmem:[#allocation4 + $0x40] sm:$0xff]  ;;  %v2987_v48 = vmul.f32 %v9910_v13, %v12591_v21 }
 0x187   : > { %v2202_v32 = vpop.f32.mrf.mxu3  ;;  %2709 = vst.msk [vmem:[#allocation4 + $0x48] sm:$0xff] %vm573_vm3, %v2677_v60  ;;  %v1900_v50 = vmul.f32 %v12594_v56, %v1668_v25  ;;  %v3050_v47 = vadd.f32 %v3018_v4, %v2986_v31 }
 0x189   : > { %v1964_v43 = vadd.f32 %v1932_v52, %v1900_v50  ;;  %3082 = vst.msk [vmem:[#allocation4 + $0x40] sm:$0xff] %vm573_vm3, %v3050_v47  ;;  %v12595_v50 = vld [vmem:[#allocation40_spill] sm:$0xff] }
 0x18a   : > { %v2305_v29 = vld [vmem:[#allocation4 + $0x58] sm:$0xff]  ;;  %v10026_v59 = vpop.f32.mrf.mxu0 }
 0x18b   : > { %v2337_v42 = vadd.f32 %v2305_v29, %v2273_v26  ;;  %1996 = vst.msk [vmem:[#allocation4 + $0x60] sm:$0xff] %vm573_vm3, %v1964_v43  ;;  %7936 = vmatmul.msk.f32.gmra.mxu2 %vm533_vm0, %v9949_v28  ;;  %v10039_v26 = vpop.f32.mrf.mxu1  ;;  %v2274_v28 = vmul.f32 %v2202_v32, %v9422_v6  ;;  %v4367_v32 = vld [vmem:[#allocation3] sm:$0xff] }
 0x18c   : > { %7970 = vmatmul.msk.f32.gmra.mxu3 %vm533_vm0, %v2045_v8  ;;  %v2646_v31 = vld [vmem:[#allocation4 + $0x50] sm:$0xff]  ;;  %v1933_v8 = vld [vmem:[#allocation4 + $0x68] sm:$0xff] }
 0x18d   : > { %v2678_v60 = vadd.f32 %v2646_v31, %v9920_v9  ;;  %2369 = vst.msk [vmem:[#allocation4 + $0x58] sm:$0xff] %vm573_vm3, %v2337_v42  ;;  %8006 = vmatmul.msk.f32.gmra.mxu0 %vm533_vm0, %v2421_v3  ;;  %v2046_v9 = vld [vmem:[#allocation2 + $0x100] sm:$0xff] }
 0x18e   : > { %v1671_v25 = vpop.f32.mrf.mxu2  ;;  %8040 = vmatmul.msk.f32.gmra.mxu1 %vm533_vm0, %v2763_v2  ;;  %v3019_v13 = vld [vmem:[#allocation4 + $0x48] sm:$0xff]  ;;  %v3822_v42 = vld [vmem:[#allocation2 + $0x22] sm:$0xff]  ;;  %v2988_v2 = vmul.f32 %v9937_v15, %v12592_v58 }
 0x18f   : > { %v2205_v4 = vpop.f32.mrf.mxu3  ;;  %2710 = vst.msk [vmem:[#allocation4 + $0x50] sm:$0xff] %vm573_vm3, %v2678_v60  ;;  %v1901_v47 = vmul.f32 %v12595_v50, %v1671_v25  ;;  %v3051_v52 = vadd.f32 %v3019_v13, %v2987_v48 }
 0x191   : > { %v1965_v43 = vadd.f32 %v1933_v8, %v1901_v47  ;;  %3083 = vst.msk [vmem:[#allocation4 + $0x48] sm:$0xff] %vm573_vm3, %v3051_v52  ;;  %v1934_v8 = vld [vmem:[#allocation4 + $0x70] sm:$0xff] }
 0x192   : > { %v2306_v29 = vld [vmem:[#allocation4 + $0x60] sm:$0xff]  ;;  %v10044_v3 = vpop.f32.mrf.mxu0 }
 0x193   : > { %v2338_v31 = vadd.f32 %v2306_v29, %v2274_v28  ;;  %1997 = vst.msk [vmem:[#allocation4 + $0x68] sm:$0xff] %vm573_vm3, %v1965_v43  ;;  %7937 = vmatmul.msk.f32.gmra.mxu2 %vm533_vm0, %v9970_v44  ;;  %v2275_v28 = vmul.f32 %v2205_v4, %v9449_v23  ;;  %v12596_v44 = vld [vmem:[#allocation52_spill] sm:$0xff]  ;;  %v10059_v43 = vpop.f32.mrf.mxu1  ;;  %v4368_v4 = vld [vmem:[#allocation3 + $0x8] sm:$0xff] }
 0x194   : > { %7971 = vmatmul.msk.f32.gmra.mxu3 %vm533_vm0, %v2046_v9  ;;  %v2647_v48 = vld [vmem:[#allocation4 + $0x58] sm:$0xff] }
 0x195   : > { %v2679_v60 = vadd.f32 %v2647_v48, %v9941_v12  ;;  %2370 = vst.msk [vmem:[#allocation4 + $0x60] sm:$0xff] %vm573_vm3, %v2338_v31  ;;  %8111 = vmatmul.msk.f32.vlgmr.msra.gmra.mxu0 %vm533_vm0, %v3822_v42  ;;  %v2047_v9 = vld [vmem:[#allocation2 + $0x108] sm:$0xff] }
 0x196   : > { %v1674_v25 = vpop.f32.mrf.mxu2  ;;  %8143 = vmatmul.msk.f32.vlgmr.msra.gmra.mxu1 %vm573_vm3, %v4367_v32  ;;  %v3020_v15 = vld [vmem:[#allocation4 + $0x50] sm:$0xff]  ;;  %v3823_v31 = vld [vmem:[#allocation2 + $0x2a] sm:$0xff]  ;;  %v2989_v32 = vmul.f32 %v9959_v40, %v12593_v39 }
 0x197   : > { %v2208_v13 = vpop.f32.mrf.mxu3  ;;  %2711 = vst.msk [vmem:[#allocation4 + $0x58] sm:$0xff] %vm573_vm3, %v2679_v60  ;;  %v1902_v47 = vmul.f32 %v12596_v44, %v1674_v25  ;;  %v3052_v52 = vadd.f32 %v3020_v15, %v2988_v2 }
 0x199   : > { %v1966_v12 = vadd.f32 %v1934_v8, %v1902_v47  ;;  %3084 = vst.msk [vmem:[#allocation4 + $0x50] sm:$0xff] %vm573_vm3, %v3052_v52  ;;  %v1935_v52 = vld [vmem:[#allocation4 + $0x78] sm:$0xff]  ;;  %v3106_v8 = vld [vmem:[#allocation2 + $0x20] sm:$0xff] }
 0x19a   : > { %v2307_v29 = vld [vmem:[#allocation4 + $0x68] sm:$0xff]  ;;  %v10062_v42 = vpop.f32.mrf.mxu0 }
 0x19b   : > { %v2339_v48 = vadd.f32 %v2307_v29, %v2275_v28  ;;  %1998 = vst.msk [vmem:[#allocation4 + $0x70] sm:$0xff] %vm573_vm3, %v1966_v12  ;;  %7938 = vmatmul.msk.f32.gmra.mxu2 %vm533_vm0, %v9991_v30  ;;  %v2276_v28 = vmul.f32 %v2208_v13, %v9368_v14 }
 0x19c   : > { %7972 = vmatmul.msk.f32.gmra.mxu3 %vm533_vm0, %v2047_v9  ;;  %v2648_v2 = vld [vmem:[#allocation4 + $0x60] sm:$0xff]  ;;  %v3480_v9 = vld [vmem:[#allocation2 + $0x21] sm:$0xff] }
 0x19d   : > { %v2680_v60 = vadd.f32 %v2648_v2, %v9962_v17  ;;  %2371 = vst.msk [vmem:[#allocation4 + $0x68] sm:$0xff] %vm573_vm3, %v2339_v48  ;;  %8112 = vmatmul.msk.f32.gmra.mxu0 %vm533_vm0, %v3823_v31  ;;  %v3824_v31 = vld [vmem:[#allocation2 + $0x32] sm:$0xff]  ;;  %v2990_v48 = vmul.f32 %v9985_v55, %v12594_v56 }
 0x19e   : > { %v1677_v25 = vpop.f32.mrf.mxu2  ;;  %8144 = vmatmul.msk.f32.gmra.mxu1 %vm573_vm3, %v4368_v4  ;;  %v3021_v40 = vld [vmem:[#allocation4 + $0x58] sm:$0xff]  ;;  %v10082_v4 = vpop.f32.mrf.mxu1 }
 0x19f   : > { %v2211_v15 = vpop.f32.mrf.mxu3  ;;  %2712 = vst.msk [vmem:[#allocation4 + $0x60] sm:$0xff] %vm573_vm3, %v2680_v60  ;;  %v1903_v30 = vmul.f32 %v9521_v51, %v1677_v25  ;;  %v3053_v47 = vadd.f32 %v3021_v40, %v2989_v32 }
 0x1a0   : > { %v2277_v55 = vmul.f32 %v2211_v15, %v9467_v36 }
 0x1a1   : > { %v1967_v17 = vadd.f32 %v1935_v52, %v1903_v30  ;;  %3085 = vst.msk [vmem:[#allocation4 + $0x58] sm:$0xff] %vm573_vm3, %v3053_v47  ;;  %v1936_v52 = vld [vmem:[#allocation4 + $0x80] sm:$0xff] }
 0x1a2   : > { %v2308_v12 = vld [vmem:[#allocation4 + $0x70] sm:$0xff]  ;;  %v10078_v29 = vpop.f32.mrf.mxu0 }
 0x1a3   : > { %v2340_v2 = vadd.f32 %v2308_v12, %v2276_v28  ;;  %1999 = vst.msk [vmem:[#allocation4 + $0x78] sm:$0xff] %vm573_vm3, %v1967_v17  ;;  %8043 = vmatmul.msk.f32.vlgmr.msra.gmra.mxu2 %vm533_vm0, %v3106_v8  ;;  %v12597_v28 = vld [vmem:[#allocation46_spill] sm:$0xff]  ;;  %v3107_v8 = vld [vmem:[#allocation2 + $0x28] sm:$0xff] }
 0x1a4   : > { %8077 = vmatmul.msk.f32.vlgmr.msra.gmra.mxu3 %vm533_vm0, %v3480_v9  ;;  %v2649_v13 = vld [vmem:[#allocation4 + $0x68] sm:$0xff]  ;;  %v3481_v9 = vld [vmem:[#allocation2 + $0x29] sm:$0xff] }
 0x1a5   : > { %v2681_v32 = vadd.f32 %v2649_v13, %v9981_v0  ;;  %2372 = vst.msk [vmem:[#allocation4 + $0x70] sm:$0xff] %vm573_vm3, %v2340_v2  ;;  %8113 = vmatmul.msk.f32.gmra.mxu0 %vm533_vm0, %v3824_v31  ;;  %v3825_v31 = vld [vmem:[#allocation2 + $0x3a] sm:$0xff]  ;;  %v2991_v2 = vmul.f32 %v10018_v37, %v12595_v50  ;;  %v12598_v37 = vld [vmem:[#allocation53_spill] sm:$0xff] }
 0x1a6   : > { %v1680_v60 = vpop.f32.mrf.mxu2  ;;  %v3022_v40 = vld [vmem:[#allocation4 + $0x60] sm:$0xff] }
 0x1a7   : > { %v2214_v25 = vpop.f32.mrf.mxu3  ;;  %2713 = vst.msk [vmem:[#allocation4 + $0x68] sm:$0xff] %vm573_vm3, %v2681_v32  ;;  %v1904_v30 = vmul.f32 %v12597_v28, %v1680_v60  ;;  %v3054_v47 = vadd.f32 %v3022_v40, %v2990_v48  ;;  %v10102_v32 = vpop.f32.mrf.mxu1 }
 0x1a9   : > { %v1968_v17 = vadd.f32 %v1936_v52, %v1904_v30  ;;  %3086 = vst.msk [vmem:[#allocation4 + $0x60] sm:$0xff] %vm573_vm3, %v3054_v47 }
 0x1aa   : > { %v2309_v0 = vld [vmem:[#allocation4 + $0x78] sm:$0xff]  ;;  %v10094_v12 = vpop.f32.mrf.mxu0 }
 0x1ab   : > { %v2341_v13 = vadd.f32 %v2309_v0, %v2277_v55  ;;  %2000 = vst.msk [vmem:[#allocation4 + $0x80] sm:$0xff] %vm573_vm3, %v1968_v17  ;;  %8044 = vmatmul.msk.f32.gmra.mxu2 %vm533_vm0, %v3107_v8  ;;  %v2278_v55 = vmul.f32 %v2214_v25, %v12598_v37  ;;  %v1937_v8 = vld [vmem:[#allocation4 + $0x88] sm:$0xff] }
 0x1ac   : > { %8078 = vmatmul.msk.f32.gmra.mxu3 %vm533_vm0, %v3481_v9  ;;  %v2650_v15 = vld [vmem:[#allocation4 + $0x70] sm:$0xff]  ;;  %v3108_v9 = vld [vmem:[#allocation2 + $0x30] sm:$0xff] }
 0x1ad   : > { %v2682_v48 = vadd.f32 %v2650_v15, %v10005_v20  ;;  %2373 = vst.msk [vmem:[#allocation4 + $0x78] sm:$0xff] %vm573_vm3, %v2341_v13  ;;  %8114 = vmatmul.msk.f32.gmra.mxu0 %vm533_vm0, %v3825_v31  ;;  %v3482_v17 = vld [vmem:[#allocation2 + $0x31] sm:$0xff]  ;;  %v3826_v31 = vld [vmem:[#allocation2 + $0x42] sm:$0xff]  ;;  %v2992_v15 = vmul.f32 %v10039_v26, %v12596_v44 }
 0x1ae   : > { %v1683_v60 = vpop.f32.mrf.mxu2  ;;  %v3023_v30 = vld [vmem:[#allocation4 + $0x68] sm:$0xff] }
 0x1af   : > { %v2217_v40 = vpop.f32.mrf.mxu3  ;;  %2714 = vst.msk [vmem:[#allocation4 + $0x70] sm:$0xff] %vm573_vm3, %v2682_v48  ;;  %v1905_v47 = vmul.f32 %v9540_v41, %v1683_v60  ;;  %v3055_v52 = vadd.f32 %v3023_v30, %v2991_v2  ;;  %v10121_v26 = vpop.f32.mrf.mxu1 }
 0x1b1   : > { %v1969_v20 = vadd.f32 %v1937_v8, %v1905_v47  ;;  %3087 = vst.msk [vmem:[#allocation4 + $0x68] sm:$0xff] %vm573_vm3, %v3055_v52 }
 0x1b2   : > { %v2310_v0 = vld [vmem:[#allocation4 + $0x80] sm:$0xff]  ;;  %v10110_v13 = vpop.f32.mrf.mxu0 }
 0x1b3   : > { %v2342_v50 = vadd.f32 %v2310_v0, %v2278_v55  ;;  %2001 = vst.msk [vmem:[#allocation4 + $0x88] sm:$0xff] %vm573_vm3, %v1969_v20  ;;  %8045 = vmatmul.msk.f32.gmra.mxu2 %vm533_vm0, %v3108_v9  ;;  %v12599_v55 = vld [vmem:[#allocation43_spill] sm:$0xff] }
 0x1b4   : > { %8079 = vmatmul.msk.f32.gmra.mxu3 %vm533_vm0, %v3482_v17  ;;  %v2651_v25 = vld [vmem:[#allocation4 + $0x78] sm:$0xff]  ;;  %v2279_v47 = vmul.f32 %v2217_v40, %v12599_v55  ;;  %v1938_v9 = vld [vmem:[#allocation4 + $0x90] sm:$0xff]  ;;  %v3109_v17 = vld [vmem:[#allocation2 + $0x38] sm:$0xff] }
 0x1b5   : > { %v2683_v2 = vadd.f32 %v2651_v25, %v10026_v59  ;;  %2374 = vst.msk [vmem:[#allocation4 + $0x80] sm:$0xff] %vm573_vm3, %v2342_v50  ;;  %8115 = vmatmul.msk.f32.gmra.mxu0 %vm533_vm0, %v3826_v31  ;;  %v3483_v20 = vld [vmem:[#allocation2 + $0x39] sm:$0xff]  ;;  %v3827_v31 = vld [vmem:[#allocation2 + $0x4a] sm:$0xff]  ;;  %v2993_v25 = vmul.f32 %v10059_v43, %v9521_v51 }
 0x1b6   : > { %v1686_v48 = vpop.f32.mrf.mxu2  ;;  %v3024_v30 = vld [vmem:[#allocation4 + $0x70] sm:$0xff] }
 0x1b7   : > { %v2220_v60 = vpop.f32.mrf.mxu3  ;;  %2715 = vst.msk [vmem:[#allocation4 + $0x78] sm:$0xff] %vm573_vm3, %v2683_v2  ;;  %v1906_v52 = vmul.f32 %v9573_v54, %v1686_v48  ;;  %v3056_v8 = vadd.f32 %v3024_v30, %v2992_v15  ;;  %v12600_v43 = vld [vmem:[#allocation55_spill] sm:$0xff]  ;;  %v10139_v51 = vpop.f32.mrf.mxu1 }
 0x1b9   : > { %v1970_v59 = vadd.f32 %v1938_v9, %v1906_v52  ;;  %3088 = vst.msk [vmem:[#allocation4 + $0x70] sm:$0xff] %vm573_vm3, %v3056_v8  ;;  %v12601_v8 = vld [vmem:[#allocation54_spill] sm:$0xff] }
 0x1ba   : > { %v2311_v50 = vld [vmem:[#allocation4 + $0x88] sm:$0xff]  ;;  %v10126_v0 = vpop.f32.mrf.mxu0 }
 0x1bb   : > { %v2343_v2 = vadd.f32 %v2311_v50, %v2279_v47  ;;  %2002 = vst.msk [vmem:[#allocation4 + $0x90] sm:$0xff] %vm573_vm3, %v1970_v59  ;;  %8046 = vmatmul.msk.f32.gmra.mxu2 %vm533_vm0, %v3109_v17  ;;  %v2280_v47 = vmul.f32 %v2220_v60, %v12600_v43  ;;  %v1939_v17 = vld [vmem:[#allocation4 + $0x98] sm:$0xff]  ;;  %v3110_v50 = vld [vmem:[#allocation2 + $0x40] sm:$0xff] }
 0x1bc   : > { %8080 = vmatmul.msk.f32.gmra.mxu3 %vm533_vm0, %v3483_v20  ;;  %v2652_v40 = vld [vmem:[#allocation4 + $0x80] sm:$0xff]  ;;  %v3484_v20 = vld [vmem:[#allocation2 + $0x41] sm:$0xff] }
 0x1bd   : > { %v2684_v15 = vadd.f32 %v2652_v40, %v10044_v3  ;;  %2375 = vst.msk [vmem:[#allocation4 + $0x88] sm:$0xff] %vm573_vm3, %v2343_v2  ;;  %8116 = vmatmul.msk.f32.gmra.mxu0 %vm533_vm0, %v3827_v31  ;;  %v3828_v40 = vld [vmem:[#allocation2 + $0x52] sm:$0xff] }
 0x1be   : > { %v1689_v48 = vpop.f32.mrf.mxu2  ;;  %v3025_v52 = vld [vmem:[#allocation4 + $0x78] sm:$0xff] }
 0x1bf   : > { %v2223_v30 = vpop.f32.mrf.mxu3  ;;  %2716 = vst.msk [vmem:[#allocation4 + $0x80] sm:$0xff] %vm573_vm3, %v2684_v15  ;;  %v1907_v9 = vmul.f32 %v12601_v8, %v1689_v48  ;;  %v3057_v59 = vadd.f32 %v3025_v52, %v2993_v25  ;;  %v2994_v15 = vmul.f32 %v10082_v4, %v12597_v28 }
 0x1c0   : > { %v2281_v4 = vmul.f32 %v2223_v30, %v9544_v33 }
 0x1c1   : > { %v1971_v3 = vadd.f32 %v1939_v17, %v1907_v9  ;;  %3089 = vst.msk [vmem:[#allocation4 + $0x78] sm:$0xff] %vm573_vm3, %v3057_v59  ;;  %v1940_v17 = vld [vmem:[#allocation4 + $0xa0] sm:$0xff] }
 0x1c2   : > { %v2312_v2 = vld [vmem:[#allocation4 + $0x90] sm:$0xff]  ;;  %v10142_v31 = vpop.f32.mrf.mxu0 }
 0x1c3   : > { %v2344_v55 = vadd.f32 %v2312_v2, %v2280_v47  ;;  %2003 = vst.msk [vmem:[#allocation4 + $0x98] sm:$0xff] %vm573_vm3, %v1971_v3  ;;  %8047 = vmatmul.msk.f32.gmra.mxu2 %vm533_vm0, %v3110_v50  ;;  %v3111_v50 = vld [vmem:[#allocation2 + $0x48] sm:$0xff]  ;;  %v3829_v2 = vld [vmem:[#allocation2 + $0x5a] sm:$0xff] }
 0x1c4   : > { %8081 = vmatmul.msk.f32.gmra.mxu3 %vm533_vm0, %v3484_v20  ;;  %v2653_v60 = vld [vmem:[#allocation4 + $0x88] sm:$0xff]  ;;  %v3485_v20 = vld [vmem:[#allocation2 + $0x49] sm:$0xff] }
 0x1c5   : > { %v2685_v25 = vadd.f32 %v2653_v60, %v10062_v42  ;;  %2376 = vst.msk [vmem:[#allocation4 + $0x90] sm:$0xff] %vm573_vm3, %v2344_v55  ;;  %8117 = vmatmul.msk.f32.gmra.mxu0 %vm533_vm0, %v3828_v40  ;;  %v2995_v40 = vmul.f32 %v10102_v32, %v9540_v41  ;;  %v10160_v60 = vpop.f32.mrf.mxu1  ;;  %v12602_v32 = vld [vmem:[#allocation49_spill] sm:$0xff] }
 0x1c6   : > { %v1692_v48 = vpop.f32.mrf.mxu2  ;;  %v3026_v9 = vld [vmem:[#allocation4 + $0x80] sm:$0xff] }
 0x1c7   : > { %v2226_v52 = vpop.f32.mrf.mxu3  ;;  %2717 = vst.msk [vmem:[#allocation4 + $0x88] sm:$0xff] %vm573_vm3, %v2685_v25  ;;  %v1908_v47 = vmul.f32 %v9596_v46, %v1692_v48  ;;  %v3058_v59 = vadd.f32 %v3026_v9, %v2994_v15 }
 0x1c9   : > { %v1972_v3 = vadd.f32 %v1940_v17, %v1908_v47  ;;  %3090 = vst.msk [vmem:[#allocation4 + $0x80] sm:$0xff] %vm573_vm3, %v3058_v59 }
 0x1ca   : > { %v2313_v42 = vld [vmem:[#allocation4 + $0x98] sm:$0xff]  ;;  %v10156_v55 = vpop.f32.mrf.mxu0 }
 0x1cb   : > { %v2345_v25 = vadd.f32 %v2313_v42, %v2281_v4  ;;  %2004 = vst.msk [vmem:[#allocation4 + $0xa0] sm:$0xff] %vm573_vm3, %v1972_v3  ;;  %8048 = vmatmul.msk.f32.gmra.mxu2 %vm533_vm0, %v3111_v50  ;;  %v2282_v4 = vmul.f32 %v2226_v52, %v12602_v32  ;;  %v1941_v50 = vld [vmem:[#allocation4 + $0xa8] sm:$0xff]  ;;  %v3112_v3 = vld [vmem:[#allocation2 + $0x50] sm:$0xff] }
 0x1cc   : > { %8082 = vmatmul.msk.f32.gmra.mxu3 %vm533_vm0, %v3485_v20  ;;  %v2654_v30 = vld [vmem:[#allocation4 + $0x90] sm:$0xff]  ;;  %v3486_v20 = vld [vmem:[#allocation2 + $0x51] sm:$0xff] }
 0x1cd   : > { %v2686_v15 = vadd.f32 %v2654_v30, %v10078_v29  ;;  %2377 = vst.msk [vmem:[#allocation4 + $0x98] sm:$0xff] %vm573_vm3, %v2345_v25  ;;  %8118 = vmatmul.msk.f32.gmra.mxu0 %vm533_vm0, %v3829_v2  ;;  %v3830_v2 = vld [vmem:[#allocation2 + $0x62] sm:$0xff]  ;;  %v2996_v30 = vmul.f32 %v10121_v26, %v9573_v54 }
 0x1ce   : > { %v1695_v48 = vpop.f32.mrf.mxu2  ;;  %v3027_v47 = vld [vmem:[#allocation4 + $0x88] sm:$0xff] }
 0x1cf   : > { %v2229_v9 = vpop.f32.mrf.mxu3  ;;  %2718 = vst.msk [vmem:[#allocation4 + $0x90] sm:$0xff] %vm573_vm3, %v2686_v15  ;;  %v1909_v59 = vmul.f32 %v9627_v53, %v1695_v48  ;;  %v3059_v17 = vadd.f32 %v3027_v47, %v2995_v40  ;;  %v10179_v40 = vpop.f32.mrf.mxu1 }
 0x1d0   : > { %v2283_v26 = vmul.f32 %v2229_v9, %v9567_v35 }
 0x1d1   : > { %v1973_v42 = vadd.f32 %v1941_v50, %v1909_v59  ;;  %3091 = vst.msk [vmem:[#allocation4 + $0x88] sm:$0xff] %vm573_vm3, %v3059_v17  ;;  %v1942_v50 = vld [vmem:[#allocation4 + $0xb0] sm:$0xff] }
 0x1d2   : > { %v2314_v29 = vld [vmem:[#allocation4 + $0xa0] sm:$0xff]  ;;  %v10172_v25 = vpop.f32.mrf.mxu0 }
 0x1d3   : > { %v2346_v41 = vadd.f32 %v2314_v29, %v2282_v4  ;;  %2005 = vst.msk [vmem:[#allocation4 + $0xa8] sm:$0xff] %vm573_vm3, %v1973_v42  ;;  %8049 = vmatmul.msk.f32.gmra.mxu2 %vm533_vm0, %v3112_v3  ;;  %v3113_v3 = vld [vmem:[#allocation2 + $0x58] sm:$0xff]  ;;  %v3831_v29 = vld [vmem:[#allocation2 + $0x6a] sm:$0xff] }
 0x1d4   : > { %8083 = vmatmul.msk.f32.gmra.mxu3 %vm533_vm0, %v3486_v20  ;;  %v2655_v52 = vld [vmem:[#allocation4 + $0x98] sm:$0xff]  ;;  %v3487_v20 = vld [vmem:[#allocation2 + $0x59] sm:$0xff] }
 0x1d5   : > { %v2687_v15 = vadd.f32 %v2655_v52, %v10094_v12  ;;  %2378 = vst.msk [vmem:[#allocation4 + $0xa0] sm:$0xff] %vm573_vm3, %v2346_v41  ;;  %8119 = vmatmul.msk.f32.gmra.mxu0 %vm533_vm0, %v3830_v2  ;;  %v2997_v2 = vmul.f32 %v10139_v51, %v12601_v8 }
 0x1d6   : > { %v1698_v48 = vpop.f32.mrf.mxu2  ;;  %v3028_v59 = vld [vmem:[#allocation4 + $0x90] sm:$0xff] }
 0x1d7   : > { %v2232_v47 = vpop.f32.mrf.mxu3  ;;  %2719 = vst.msk [vmem:[#allocation4 + $0x98] sm:$0xff] %vm573_vm3, %v2687_v15  ;;  %v1910_v4 = vmul.f32 %v9575_v5, %v1698_v48  ;;  %v3060_v17 = vadd.f32 %v3028_v59, %v2996_v30 }
 0x1d8   : > { %v2284_v51 = vmul.f32 %v2232_v47, %v9600_v16 }
 0x1d9   : > { %v1974_v42 = vadd.f32 %v1942_v50, %v1910_v4  ;;  %3092 = vst.msk [vmem:[#allocation4 + $0x90] sm:$0xff] %vm573_vm3, %v3060_v17  ;;  %v2948_v4 = vpop.f32.mrf.mxu1  ;;  %v1943_v50 = vld [vmem:[#allocation4 + $0xb8] sm:$0xff] }
 0x1da   : > { %v2315_v12 = vld [vmem:[#allocation4 + $0xa8] sm:$0xff]  ;;  %v10188_v41 = vpop.f32.mrf.mxu0 }
 0x1db   : > { %v2347_v52 = vadd.f32 %v2315_v12, %v2283_v26  ;;  %2006 = vst.msk [vmem:[#allocation4 + $0xb0] sm:$0xff] %vm573_vm3, %v1974_v42  ;;  %8050 = vmatmul.msk.f32.gmra.mxu2 %vm533_vm0, %v3113_v3  ;;  %v3114_v3 = vld [vmem:[#allocation2 + $0x60] sm:$0xff] }
 0x1dc   : > { %8084 = vmatmul.msk.f32.gmra.mxu3 %vm533_vm0, %v3487_v20  ;;  %v2656_v9 = vld [vmem:[#allocation4 + $0xa0] sm:$0xff]  ;;  %v3488_v20 = vld [vmem:[#allocation2 + $0x61] sm:$0xff] }
 0x1dd   : > { %v2688_v30 = vadd.f32 %v2656_v9, %v10110_v13  ;;  %2379 = vst.msk [vmem:[#allocation4 + $0xa8] sm:$0xff] %vm573_vm3, %v2347_v52  ;;  %8120 = vmatmul.msk.f32.gmra.mxu0 %vm533_vm0, %v3831_v29  ;;  %v3832_v29 = vld [vmem:[#allocation2 + $0x72] sm:$0xff]  ;;  %v2998_v52 = vmul.f32 %v10160_v60, %v9596_v46 }
 0x1de   : > { %v1701_v15 = vpop.f32.mrf.mxu2  ;;  %v3029_v59 = vld [vmem:[#allocation4 + $0x98] sm:$0xff] }
 0x1df   : > { %v2235_v48 = vpop.f32.mrf.mxu3  ;;  %2720 = vst.msk [vmem:[#allocation4 + $0xa0] sm:$0xff] %vm573_vm3, %v2688_v30  ;;  %v1911_v26 = vmul.f32 %v9646_v10, %v1701_v15  ;;  %v3061_v17 = vadd.f32 %v3029_v59, %v2997_v2 }
 0x1e0   : > { %v2285_v60 = vmul.f32 %v2235_v48, %v9530_v49 }
 0x1e1   : > { %v1975_v42 = vadd.f32 %v1943_v50, %v1911_v26  ;;  %3093 = vst.msk [vmem:[#allocation4 + $0x98] sm:$0xff] %vm573_vm3, %v3061_v17  ;;  %v1944_v17 = vld [vmem:[#allocation4 + $0xc0] sm:$0xff]  ;;  %v3115_v50 = vld [vmem:[#allocation2 + $0x68] sm:$0xff] }
 0x1e2   : > { %v2316_v13 = vld [vmem:[#allocation4 + $0xb0] sm:$0xff]  ;;  %v10202_v12 = vpop.f32.mrf.mxu0 }
 0x1e3   : > { %v2348_v9 = vadd.f32 %v2316_v13, %v2284_v51  ;;  %2007 = vst.msk [vmem:[#allocation4 + $0xb8] sm:$0xff] %vm573_vm3, %v1975_v42  ;;  %8051 = vmatmul.msk.f32.gmra.mxu2 %vm533_vm0, %v3114_v3  ;;  %v3489_v3 = vld [vmem:[#allocation2 + $0x69] sm:$0xff] }
 0x1e4   : > { %8085 = vmatmul.msk.f32.gmra.mxu3 %vm533_vm0, %v3488_v20  ;;  %v2657_v47 = vld [vmem:[#allocation4 + $0xa8] sm:$0xff]  ;;  %v2951_v20 = vpop.f32.mrf.mxu1 }
 0x1e5   : > { %v2689_v2 = vadd.f32 %v2657_v47, %v10126_v0  ;;  %2380 = vst.msk [vmem:[#allocation4 + $0xb0] sm:$0xff] %vm573_vm3, %v2348_v9  ;;  %8121 = vmatmul.msk.f32.gmra.mxu0 %vm533_vm0, %v3832_v29  ;;  %v3833_v29 = vld [vmem:[#allocation2 + $0x7a] sm:$0xff] }
 0x1e6   : > { %v1704_v30 = vpop.f32.mrf.mxu2  ;;  %v3030_v59 = vld [vmem:[#allocation4 + $0xa0] sm:$0xff] }
 0x1e7   : > { %v2238_v15 = vpop.f32.mrf.mxu3  ;;  %2721 = vst.msk [vmem:[#allocation4 + $0xa8] sm:$0xff] %vm573_vm3, %v2689_v2  ;;  %v1912_v51 = vmul.f32 %v9677_v7, %v1704_v30  ;;  %v3062_v26 = vadd.f32 %v3030_v59, %v2998_v52  ;;  %v2999_v52 = vmul.f32 %v10179_v40, %v9627_v53 }
 0x1e9   : > { %v1976_v42 = vadd.f32 %v1944_v17, %v1912_v51  ;;  %3094 = vst.msk [vmem:[#allocation4 + $0xa0] sm:$0xff] %vm573_vm3, %v3062_v26  ;;  %v12603_v51 = vld [vmem:[#allocation69_spill] sm:$0xff] }
 0x1ea   : > { %v2317_v0 = vld [vmem:[#allocation4 + $0xb8] sm:$0xff]  ;;  %v10216_v13 = vpop.f32.mrf.mxu0 }
 0x1eb   : > { %v2349_v9 = vadd.f32 %v2317_v0, %v2285_v60  ;;  %2008 = vst.msk [vmem:[#allocation4 + $0xc0] sm:$0xff] %vm573_vm3, %v1976_v42  ;;  %8052 = vmatmul.msk.f32.gmra.mxu2 %vm533_vm0, %v3115_v50  ;;  %v2286_v60 = vmul.f32 %v2238_v15, %v9621_v61  ;;  %v1945_v50 = vld [vmem:[#allocation4 + $0xc8] sm:$0xff] }
 0x1ec   : > { %8086 = vmatmul.msk.f32.gmra.mxu3 %vm533_vm0, %v3489_v3  ;;  %v2658_v48 = vld [vmem:[#allocation4 + $0xb0] sm:$0xff]  ;;  %v3116_v3 = vld [vmem:[#allocation2 + $0x70] sm:$0xff] }
 0x1ed   : > { %v2690_v47 = vadd.f32 %v2658_v48, %v10142_v31  ;;  %2381 = vst.msk [vmem:[#allocation4 + $0xb8] sm:$0xff] %vm573_vm3, %v2349_v9  ;;  %8122 = vmatmul.msk.f32.gmra.mxu0 %vm533_vm0, %v3833_v29  ;;  %v3490_v42 = vld [vmem:[#allocation2 + $0x71] sm:$0xff]  ;;  %v3834_v29 = vld [vmem:[#allocation2 + $0x82] sm:$0xff]  ;;  %v3000_v9 = vmul.f32 %v2948_v4, %v9575_v5  ;;  %v2954_v48 = vpop.f32.mrf.mxu1 }
 0x1ee   : > { %v1707_v2 = vpop.f32.mrf.mxu2  ;;  %v3031_v59 = vld [vmem:[#allocation4 + $0xa8] sm:$0xff]  ;;  %v12604_v4 = vld [vmem:[#allocation73_spill] sm:$0xff] }
 0x1ef   : > { %v2241_v30 = vpop.f32.mrf.mxu3  ;;  %2722 = vst.msk [vmem:[#allocation4 + $0xb0] sm:$0xff] %vm573_vm3, %v2690_v47  ;;  %v1913_v26 = vmul.f32 %v12603_v51, %v1707_v2  ;;  %v3063_v17 = vadd.f32 %v3031_v59, %v2999_v52 }
 0x1f1   : > { %v1977_v40 = vadd.f32 %v1945_v50, %v1913_v26  ;;  %3095 = vst.msk [vmem:[#allocation4 + $0xa8] sm:$0xff] %vm573_vm3, %v3063_v17  ;;  %v1946_v17 = vld [vmem:[#allocation4 + $0xd0] sm:$0xff]  ;;  %v3117_v50 = vld [vmem:[#allocation2 + $0x78] sm:$0xff] }
 0x1f2   : > { %v2318_v31 = vld [vmem:[#allocation4 + $0xc0] sm:$0xff]  ;;  %v10230_v0 = vpop.f32.mrf.mxu0 }
 0x1f3   : > { %v2350_v53 = vadd.f32 %v2318_v31, %v2286_v60  ;;  %2009 = vst.msk [vmem:[#allocation4 + $0xc8] sm:$0xff] %vm573_vm3, %v1977_v40  ;;  %8053 = vmatmul.msk.f32.gmra.mxu2 %vm533_vm0, %v3116_v3  ;;  %v3491_v3 = vld [vmem:[#allocation2 + $0x79] sm:$0xff]  ;;  %v12605_v40 = vld [vmem:[#allocation68_spill] sm:$0xff] }
 0x1f4   : > { %8087 = vmatmul.msk.f32.gmra.mxu3 %vm533_vm0, %v3490_v42  ;;  %v2659_v15 = vld [vmem:[#allocation4 + $0xb8] sm:$0xff]  ;;  %v2287_v42 = vmul.f32 %v2241_v30, %v12605_v40 }
 0x1f5   : > { %v2691_v52 = vadd.f32 %v2659_v15, %v10156_v55  ;;  %2382 = vst.msk [vmem:[#allocation4 + $0xc0] sm:$0xff] %vm573_vm3, %v2350_v53  ;;  %8123 = vmatmul.msk.f32.gmra.mxu0 %vm533_vm0, %v3834_v29  ;;  %v3835_v29 = vld [vmem:[#allocation2 + $0x8a] sm:$0xff] }
 0x1f6   : > { %v1710_v47 = vpop.f32.mrf.mxu2  ;;  %v3032_v59 = vld [vmem:[#allocation4 + $0xb0] sm:$0xff]  ;;  %v12607_v40 = vld [vmem:[#allocation64_spill] sm:$0xff] }
 0x1f7   : > { %v2244_v2 = vpop.f32.mrf.mxu3  ;;  %2723 = vst.msk [vmem:[#allocation4 + $0xb8] sm:$0xff] %vm573_vm3, %v2691_v52  ;;  %v1914_v60 = vmul.f32 %v12604_v4, %v1710_v47  ;;  %v3064_v26 = vadd.f32 %v3032_v59, %v3000_v9  ;;  %v3001_v52 = vmul.f32 %v2951_v20, %v9646_v10  ;;  %v2957_v47 = vpop.f32.mrf.mxu1 }
 0x1f8   : > { %v2288_v20 = vmul.f32 %v2244_v2, %v12607_v40  ;;  %v12609_v40 = vld [vmem:[#allocation70_spill] sm:$0xff] }
 0x1f9   : > { %v1978_v31 = vadd.f32 %v1946_v17, %v1914_v60  ;;  %3096 = vst.msk [vmem:[#allocation4 + $0xb0] sm:$0xff] %vm573_vm3, %v3064_v26  ;;  %v12606_v17 = vld [vmem:[#allocation76_spill] sm:$0xff] }
 0x1fa   : > { %v2319_v55 = vld [vmem:[#allocation4 + $0xc8] sm:$0xff]  ;;  %v10243_v53 = vpop.f32.mrf.mxu0 }
 0x1fb   : > { %v2351_v15 = vadd.f32 %v2319_v55, %v2287_v42  ;;  %2010 = vst.msk [vmem:[#allocation4 + $0xd0] sm:$0xff] %vm573_vm3, %v1978_v31  ;;  %8054 = vmatmul.msk.f32.gmra.mxu2 %vm533_vm0, %v3117_v50  ;;  %v1947_v31 = vld [vmem:[#allocation4 + $0xd8] sm:$0xff] }
 0x1fc   : > { %8088 = vmatmul.msk.f32.gmra.mxu3 %vm533_vm0, %v3491_v3  ;;  %v2660_v9 = vld [vmem:[#allocation4 + $0xc0] sm:$0xff]  ;;  %v3118_v3 = vld [vmem:[#allocation2 + $0x80] sm:$0xff] }
 0x1fd   : > { %v2692_v30 = vadd.f32 %v2660_v9, %v10172_v25  ;;  %2383 = vst.msk [vmem:[#allocation4 + $0xc8] sm:$0xff] %vm573_vm3, %v2351_v15  ;;  %8124 = vmatmul.msk.f32.gmra.mxu0 %vm533_vm0, %v3835_v29  ;;  %v3492_v55 = vld [vmem:[#allocation2 + $0x81] sm:$0xff]  ;;  %v3836_v29 = vld [vmem:[#allocation2 + $0x92] sm:$0xff] }
 0x1fe   : > { %v1713_v59 = vpop.f32.mrf.mxu2  ;;  %v3033_v26 = vld [vmem:[#allocation4 + $0xb8] sm:$0xff] }
 0x1ff   : > { %v2247_v60 = vpop.f32.mrf.mxu3  ;;  %2724 = vst.msk [vmem:[#allocation4 + $0xc0] sm:$0xff] %vm573_vm3, %v2692_v30  ;;  %v1915_v42 = vmul.f32 %v12606_v17, %v1713_v59  ;;  %v3065_v50 = vadd.f32 %v3033_v26, %v3001_v52  ;;  %v3002_v30 = vmul.f32 %v2954_v48, %v9677_v7 }
 0x200   : > { %v2289_v48 = vmul.f32 %v2247_v60, %v12609_v40 }
 0x201   : > { %v1979_v10 = vadd.f32 %v1947_v31, %v1915_v42  ;;  %3097 = vst.msk [vmem:[#allocation4 + $0xb8] sm:$0xff] %vm573_vm3, %v3065_v50  ;;  %v2960_v50 = vpop.f32.mrf.mxu1 }
 0x202   : > { %v2320_v25 = vld [vmem:[#allocation4 + $0xd0] sm:$0xff]  ;;  %v10256_v15 = vpop.f32.mrf.mxu0 }
 0x203   : > { %v2352_v9 = vadd.f32 %v2320_v25, %v2288_v20  ;;  %2011 = vst.msk [vmem:[#allocation4 + $0xd8] sm:$0xff] %vm573_vm3, %v1979_v10  ;;  %8055 = vmatmul.msk.f32.gmra.mxu2 %vm533_vm0, %v3118_v3  ;;  %v12608_v10 = vld [vmem:[#allocation75_spill] sm:$0xff]  ;;  %v1948_v20 = vld [vmem:[#allocation4 + $0xe0] sm:$0xff] }
 0x204   : > { %8089 = vmatmul.msk.f32.gmra.mxu3 %vm533_vm0, %v3492_v55  ;;  %v2661_v52 = vld [vmem:[#allocation4 + $0xc8] sm:$0xff]  ;;  %v3119_v55 = vld [vmem:[#allocation2 + $0x88] sm:$0xff] }
 0x205   : > { %v2693_v59 = vadd.f32 %v2661_v52, %v10188_v41  ;;  %2384 = vst.msk [vmem:[#allocation4 + $0xd0] sm:$0xff] %vm573_vm3, %v2352_v9  ;;  %8125 = vmatmul.msk.f32.gmra.mxu0 %vm533_vm0, %v3836_v29  ;;  %v3493_v25 = vld [vmem:[#allocation2 + $0x89] sm:$0xff]  ;;  %v3837_v29 = vld [vmem:[#allocation2 + $0x9a] sm:$0xff]  ;;  %v10271_v52 = vpop.permute.xlu2 %1875 }
 0x206   : > { %v1716_v2 = vpop.f32.mrf.mxu2  ;;  %v3034_v42 = vld [vmem:[#allocation4 + $0xc0] sm:$0xff]  ;;  %12610 = vst [vmem:[#allocation55_spill] sm:$0xff] %v10271_v52 }
 0x207   : > { %v2250_v26 = vpop.f32.mrf.mxu3  ;;  %2725 = vst.msk [vmem:[#allocation4 + $0xc8] sm:$0xff] %vm573_vm3, %v2693_v59  ;;  %v1916_v31 = vmul.f32 %v12608_v10, %v1716_v2  ;;  %v3066_v3 = vadd.f32 %v3034_v42, %v3002_v30  ;;  %v3003_v59 = vmul.f32 %v2957_v47, %v12603_v51 }
 0x209   : > { %v1980_v7 = vadd.f32 %v1948_v20, %v1916_v31  ;;  %3098 = vst.msk [vmem:[#allocation4 + $0xc0] sm:$0xff] %vm573_vm3, %v3066_v3  ;;  %v1949_v20 = vld [vmem:[#allocation4 + $0xe8] sm:$0xff] }
 0x20a   : > { %v2321_v41 = vld [vmem:[#allocation4 + $0xd8] sm:$0xff]  ;;  %v10269_v9 = vpop.f32.mrf.mxu0 }
 0x20b   : > { %v2353_v5 = vadd.f32 %v2321_v41, %v2289_v48  ;;  %2012 = vst.msk [vmem:[#allocation4 + $0xe0] sm:$0xff] %vm573_vm3, %v1980_v7  ;;  %8056 = vmatmul.msk.f32.gmra.mxu2 %vm533_vm0, %v3119_v55  ;;  %v3120_v55 = vld [vmem:[#allocation2 + $0x90] sm:$0xff]  ;;  %v2963_v48 = vpop.f32.mrf.mxu1  ;;  %v12611_v41 = vld [vmem:[#allocation74_spill] sm:$0xff] }
 0x20c   : > { %8090 = vmatmul.msk.f32.gmra.mxu3 %vm533_vm0, %v3493_v25  ;;  %v2662_v30 = vld [vmem:[#allocation4 + $0xd0] sm:$0xff]  ;;  %v3494_v25 = vld [vmem:[#allocation2 + $0x91] sm:$0xff]  ;;  %v2290_v47 = vmul.f32 %v2250_v26, %v12611_v41 }
 0x20d   : > { %v2694_v60 = vadd.f32 %v2662_v30, %v10202_v12  ;;  %2385 = vst.msk [vmem:[#allocation4 + $0xd8] sm:$0xff] %vm573_vm3, %v2353_v5  ;;  %8126 = vmatmul.msk.f32.gmra.mxu0 %vm533_vm0, %v3837_v29  ;;  %v3838_v29 = vld [vmem:[#allocation2 + $0xa2] sm:$0xff] }
 0x20e   : > { %v1719_v2 = vpop.f32.mrf.mxu2  ;;  %v3035_v31 = vld [vmem:[#allocation4 + $0xc8] sm:$0xff] }
 0x20f   : > { %v2253_v42 = vpop.f32.mrf.mxu3  ;;  %2726 = vst.msk [vmem:[#allocation4 + $0xd0] sm:$0xff] %vm573_vm3, %v2694_v60  ;;  %v1917_v7 = vmul.f32 %v10271_v52, %v1719_v2  ;;  %v3067_v3 = vadd.f32 %v3035_v31, %v3003_v59  ;;  %v3004_v60 = vmul.f32 %v2960_v50, %v12604_v4  ;;  %v10290_v2 = vpop.permute.xlu2 %1880 }
 0x210   : > { %12612 = vst [vmem:[#allocation80_spill] sm:$0xff] %v10290_v2 }
 0x211   : > { %v1981_v51 = vadd.f32 %v1949_v20, %v1917_v7  ;;  %3099 = vst.msk [vmem:[#allocation4 + $0xc8] sm:$0xff] %vm573_vm3, %v3067_v3  ;;  %v8175_v20 = vld [vmem:[%s12317_s5 + $0x8] sm:$0xff] }
 0x212   : > { %v2322_v5 = vld [vmem:[#allocation4 + $0xe0] sm:$0xff]  ;;  %v10284_v12 = vpop.f32.mrf.mxu0  ;;  %4882 = vmatpush.msrb.mxu2 %v8175_v20 }
 0x213   : > { %v2354_v30 = vadd.f32 %v2322_v5, %v2290_v47  ;;  %2013 = vst.msk [vmem:[#allocation4 + $0xe8] sm:$0xff] %vm573_vm3, %v1981_v51  ;;  %8057 = vmatmul.msk.f32.gmra.mxu2 %vm533_vm0, %v3120_v55  ;;  %v1950_v55 = vld [vmem:[#allocation4 + $0xf0] sm:$0xff]  ;;  %v2966_v4 = vpop.f32.mrf.mxu1 }
 0x214   : > { %8091 = vmatmul.msk.f32.gmra.mxu3 %vm533_vm0, %v3494_v25  ;;  %v2663_v59 = vld [vmem:[#allocation4 + $0xd8] sm:$0xff]  ;;  %v3121_v25 = vld [vmem:[#allocation2 + $0x98] sm:$0xff] }
 0x215   : > { %v2695_v26 = vadd.f32 %v2663_v59, %v10216_v13  ;;  %2386 = vst.msk [vmem:[#allocation4 + $0xe0] sm:$0xff] %vm573_vm3, %v2354_v30  ;;  %8127 = vmatmul.msk.f32.gmra.mxu0 %vm533_vm0, %v3838_v29  ;;  %v3495_v47 = vld [vmem:[#allocation2 + $0x99] sm:$0xff]  ;;  %v12613_v13 = vld [vmem:[#allocation72_spill] sm:$0xff] }
 0x216   : > { %v1722_v31 = vpop.f32.mrf.mxu2  ;;  %v3036_v3 = vld [vmem:[#allocation4 + $0xd0] sm:$0xff]  ;;  %v2291_v5 = vmul.f32 %v2253_v42, %v12613_v13  ;;  %v3005_v42 = vmul.f32 %v2963_v48, %v12606_v17 }
 0x217   : > { %v2256_v7 = vpop.f32.mrf.mxu3  ;;  %2727 = vst.msk [vmem:[#allocation4 + $0xd8] sm:$0xff] %vm573_vm3, %v2695_v26  ;;  %v1918_v51 = vmul.f32 %v10290_v2, %v1722_v31  ;;  %v3068_v50 = vadd.f32 %v3036_v3, %v3004_v60  ;;  %v3839_v26 = vld [vmem:[#allocation2 + $0xaa] sm:$0xff]  ;;  %v10307_v3 = vpop.permute.xlu0 %1885  ;;  %v3122_v48 = vld [vmem:[#allocation2 + $0xa0] sm:$0xff] }
 0x218   : > { %12614 = vst [vmem:[#allocation81_spill] sm:$0xff] %v10307_v3 }
 0x219   : > { %v1982_v30 = vadd.f32 %v1950_v55, %v1918_v51  ;;  %3100 = vst.msk [vmem:[#allocation4 + $0xd0] sm:$0xff] %vm573_vm3, %v3068_v50 }
 0x21a   : > { %v2323_v29 = vld [vmem:[#allocation4 + $0xe8] sm:$0xff]  ;;  %v10302_v59 = vpop.f32.mrf.mxu0 }
 0x21b   : > { %v2355_v31 = vadd.f32 %v2323_v29, %v2291_v5  ;;  %2014 = vst.msk [vmem:[#allocation4 + $0xf0] sm:$0xff] %vm573_vm3, %v1982_v30  ;;  %8058 = vmatmul.msk.f32.gmra.mxu2 %vm533_vm0, %v3121_v25  ;;  %v1951_v30 = vld [vmem:[#allocation4 + $0xf8] sm:$0xff] }
 0x21c   : > { %8092 = vmatmul.msk.f32.gmra.mxu3 %vm533_vm0, %v3495_v47  ;;  %v2664_v60 = vld [vmem:[#allocation4 + $0xe0] sm:$0xff]  ;;  %v3496_v29 = vld [vmem:[#allocation2 + $0xa1] sm:$0xff] }
 0x21d   : > { %v2696_v51 = vadd.f32 %v2664_v60, %v10230_v0  ;;  %2387 = vst.msk [vmem:[#allocation4 + $0xe8] sm:$0xff] %vm573_vm3, %v2355_v31  ;;  %8128 = vmatmul.msk.f32.gmra.mxu0 %vm533_vm0, %v3839_v26  ;;  %v8208_v47 = vld [vmem:[%s12317_s5 + $0x10] sm:$0xff]  ;;  %v12615_v0 = vld [vmem:[#allocation78_spill] sm:$0xff] }
 0x21e   : > { %v1725_v20 = vpop.f32.mrf.mxu2  ;;  %v3037_v55 = vld [vmem:[#allocation4 + $0xd8] sm:$0xff]  ;;  %5221 = vmatpush.msrb.mxu3 %v8208_v47  ;;  %v2292_v31 = vmul.f32 %v2256_v7, %v12615_v0  ;;  %v12617_v0 = vld [vmem:[#allocation77_spill] sm:$0xff] }
 0x21f   : > { %v2259_v50 = vpop.f32.mrf.mxu3  ;;  %2728 = vst.msk [vmem:[#allocation4 + $0xe0] sm:$0xff] %vm573_vm3, %v2696_v51  ;;  %v1919_v25 = vmul.f32 %v10307_v3, %v1725_v20  ;;  %v3069_v5 = vadd.f32 %v3037_v55, %v3005_v42  ;;  %v3840_v51 = vld [vmem:[#allocation2 + $0xb2] sm:$0xff]  ;;  %v3006_v20 = vmul.f32 %v2966_v4, %v12608_v10  ;;  %v2969_v55 = vpop.f32.mrf.mxu1 }
 0x220   : > { %v2293_v4 = vmul.f32 %v2259_v50, %v12617_v0  ;;  %v3007_v50 = vmul.f32 %v2969_v55, %v10271_v52  ;;  %v3842_v52 = vld [vmem:[#allocation2 + $0xc2] sm:$0xff] }
 0x221   : > { %v1983_v60 = vadd.f32 %v1951_v30, %v1919_v25  ;;  %3101 = vst.msk [vmem:[#allocation4 + $0xd8] sm:$0xff] %vm573_vm3, %v3069_v5  ;;  %v12616_v30 = vld [vmem:[#allocation25_spill] sm:$0xff] }
 0x222   : > { %v2324_v26 = vld [vmem:[#allocation4 + $0xf0] sm:$0xff]  ;;  %v10320_v17 = vpop.f32.mrf.mxu0 }
 0x223   : > { %v2356_v13 = vadd.f32 %v2324_v26, %v2292_v31  ;;  %2015 = vst.msk [vmem:[#allocation4 + $0xf8] sm:$0xff] %vm573_vm3, %v1983_v60  ;;  %8059 = vmatmul.msk.f32.gmra.mxu2 %vm533_vm0, %v3122_v48  ;;  %v3384_v60 = vld [vmem:[#allocation4] sm:$0xff] }
 0x224   : > { %8093 = vmatmul.msk.f32.gmra.mxu3 %vm533_vm0, %v3496_v29  ;;  %v2665_v42 = vld [vmem:[#allocation4 + $0xe8] sm:$0xff]  ;;  %v3123_v29 = vld [vmem:[#allocation2 + $0xa8] sm:$0xff] }
 0x225   : > { %v2697_v7 = vadd.f32 %v2665_v42, %v10243_v53  ;;  %2388 = vst.msk [vmem:[#allocation4 + $0xf0] sm:$0xff] %vm573_vm3, %v2356_v13  ;;  %8129 = vmatmul.msk.f32.gmra.mxu0 %vm533_vm0, %v3840_v51  ;;  %v3497_v26 = vld [vmem:[#allocation2 + $0xa9] sm:$0xff]  ;;  %v3841_v51 = vld [vmem:[#allocation2 + $0xba] sm:$0xff] }
 0x226   : > { %v3256_v25 = vpop.f32.mrf.mxu2  ;;  %v3038_v5 = vld [vmem:[#allocation4 + $0xe0] sm:$0xff] }
 0x227   : > { %v3630_v47 = vpop.f32.mrf.mxu3  ;;  %2729 = vst.msk [vmem:[#allocation4 + $0xe8] sm:$0xff] %vm573_vm3, %v2697_v7  ;;  %v3352_v31 = vmul.f32 %v3256_v25, %v12616_v30  ;;  %v3070_v48 = vadd.f32 %v3038_v5, %v3006_v20  ;;  %v12618_v7 = vmov 0.0  }
 0x228   : > { %4299 = vst.msk [vmem:[#allocation3 + $0x10] sm:$0x1] %vm4298_vm4, %v12618_v7 }
 0x229   : > { %v3416_v10 = vadd.f32 %v3384_v60, %v3352_v31  ;;  %3102 = vst.msk [vmem:[#allocation4 + $0xe0] sm:$0xff] %vm573_vm3, %v3070_v48  ;;  %v12619_v48 = vld [vmem:[#allocation28_spill] sm:$0xff] }
 0x22a   : > { %v2325_v53 = vld [vmem:[#allocation4 + $0xf8] sm:$0xff]  ;;  %v10333_v13 = vpop.f32.mrf.mxu0  ;;  %4302 = vst.msk [vmem:[#allocation3 + $0x121] sm:$0x1] %vm4298_vm4, %v12618_v7 }
 0x22b   : > { %v2357_v42 = vadd.f32 %v2325_v53, %v2293_v4  ;;  %3448 = vst.msk [vmem:[#allocation4] sm:$0xff] %vm573_vm3, %v3416_v10  ;;  %8060 = vmatmul.msk.f32.gmra.mxu2 %vm533_vm0, %v3123_v29  ;;  %v8241_v29 = vld [vmem:[%s12317_s5 + $0x18] sm:$0xff]  ;;  %v3124_v4 = vld [vmem:[#allocation2 + $0xb0] sm:$0xff] }
 0x22c   : > { %8094 = vmatmul.msk.f32.gmra.mxu3 %vm533_vm0, %v3497_v26  ;;  %v2666_v20 = vld [vmem:[#allocation4 + $0xf0] sm:$0xff]  ;;  %v2972_v26 = vpop.f32.mrf.mxu1  ;;  %v3498_v53 = vld [vmem:[#allocation2 + $0xb1] sm:$0xff]  ;;  %5592 = vmatpush.msrb.mxu0 %v8241_v29 }
 0x22d   : > { %v2698_v25 = vadd.f32 %v2666_v20, %v10256_v15  ;;  %2389 = vst.msk [vmem:[#allocation4 + $0xf8] sm:$0xff] %vm573_vm3, %v2357_v42  ;;  %8130 = vmatmul.msk.f32.gmra.mxu0 %vm533_vm0, %v3841_v51  ;;  %v3385_v15 = vld [vmem:[#allocation4 + $0x8] sm:$0xff] }
 0x22e   : > { %v3259_v5 = vpop.f32.mrf.mxu2  ;;  %v3039_v10 = vld [vmem:[#allocation4 + $0xe8] sm:$0xff] }
 0x22f   : > { %v3633_v31 = vpop.f32.mrf.mxu3  ;;  %2730 = vst.msk [vmem:[#allocation4 + $0xf0] sm:$0xff] %vm573_vm3, %v2698_v25  ;;  %v3353_v60 = vmul.f32 %v3259_v5, %v12619_v48  ;;  %v3071_v55 = vadd.f32 %v3039_v10, %v3007_v50  ;;  %v3008_v5 = vmul.f32 %v2972_v26, %v10290_v2  ;;  %v3125_v26 = vld [vmem:[#allocation2 + $0xb8] sm:$0xff]  ;;  %v3843_v2 = vld [vmem:[#allocation2 + $0xca] sm:$0xff] }
 0x231   : > { %v3417_v51 = vadd.f32 %v3385_v15, %v3353_v60  ;;  %3103 = vst.msk [vmem:[#allocation4 + $0xe8] sm:$0xff] %vm573_vm3, %v3071_v55 }
 0x232   : > { %v3726_v42 = vld [vmem:[#allocation4] sm:$0xff]  ;;  %v10350_v20 = vpop.f32.mrf.mxu0 }
 0x233   : > { %v3758_v25 = vadd.f32 %v3726_v42, %v3630_v47  ;;  %3449 = vst.msk [vmem:[#allocation4 + $0x8] sm:$0xff] %vm573_vm3, %v3417_v51  ;;  %8061 = vmatmul.msk.f32.gmra.mxu2 %vm533_vm0, %v3124_v4  ;;  %v12620_v47 = vld [vmem:[#allocation24_spill] sm:$0xff]  ;;  %v8274_v4 = vld [vmem:[%s12317_s5 + $0x20] sm:$0xff] }
 0x234   : > { %8095 = vmatmul.msk.f32.gmra.mxu3 %vm533_vm0, %v3498_v53  ;;  %v2667_v50 = vld [vmem:[#allocation4 + $0xf8] sm:$0xff]  ;;  %v3386_v51 = vld [vmem:[#allocation4 + $0x10] sm:$0xff]  ;;  %5963 = vmatpush.msrb.mxu1 %v8274_v4 }
 0x235   : > { %v2699_v10 = vadd.f32 %v2667_v50, %v10269_v9  ;;  %3790 = vst.msk [vmem:[#allocation4] sm:$0xff] %vm573_vm3, %v3758_v25  ;;  %8131 = vmatmul.msk.f32.gmra.mxu0 %vm533_vm0, %v3842_v52  ;;  %v3499_v42 = vld [vmem:[#allocation2 + $0xb9] sm:$0xff]  ;;  %v2975_v52 = vpop.f32.mrf.mxu1 }
 0x236   : > { %v3262_v60 = vpop.f32.mrf.mxu2  ;;  %v3040_v55 = vld [vmem:[#allocation4 + $0xf0] sm:$0xff] }
 0x237   : > { %v3636_v29 = vpop.f32.mrf.mxu3  ;;  %2731 = vst.msk [vmem:[#allocation4 + $0xf8] sm:$0xff] %vm573_vm3, %v2699_v10  ;;  %v3354_v15 = vmul.f32 %v3262_v60, %v12620_v47  ;;  %v3072_v53 = vadd.f32 %v3040_v55, %v3008_v5  ;;  %v12621_v10 = vld [vmem:[#allocation27_spill] sm:$0xff]  ;;  %v3009_v55 = vmul.f32 %v2975_v52, %v10307_v3  ;;  %v12623_v3 = vld [vmem:[#allocation30_spill] sm:$0xff] }
 0x238   : > { %v4068_v60 = vmul.f32 %v10284_v12, %v12621_v10 }
 0x239   : > { %v3418_v9 = vadd.f32 %v3386_v51, %v3354_v15  ;;  %3104 = vst.msk [vmem:[#allocation4 + $0xf0] sm:$0xff] %vm573_vm3, %v3072_v53 }
 0x23a   : > { %v3727_v25 = vld [vmem:[#allocation4 + $0x8] sm:$0xff]  ;;  %v10365_v50 = vpop.f32.mrf.mxu0 }
 0x23b   : > { %v3759_v0 = vadd.f32 %v3727_v25, %v3633_v31  ;;  %3450 = vst.msk [vmem:[#allocation4 + $0x10] sm:$0xff] %vm573_vm3, %v3418_v9  ;;  %8062 = vmatmul.msk.f32.gmra.mxu2 %vm533_vm0, %v3125_v26  ;;  %v3387_v9 = vld [vmem:[#allocation4 + $0x18] sm:$0xff]  ;;  %v3126_v26 = vld [vmem:[#allocation2 + $0xc0] sm:$0xff] }
 0x23c   : > { %8096 = vmatmul.msk.f32.gmra.mxu3 %vm533_vm0, %v3499_v42  ;;  %v4100_v5 = vld [vmem:[#allocation4] sm:$0xff]  ;;  %v3500_v25 = vld [vmem:[#allocation2 + $0xc1] sm:$0xff] }
 0x23d   : > { %v4132_v15 = vadd.f32 %v4100_v5, %v4068_v60  ;;  %3791 = vst.msk [vmem:[#allocation4 + $0x8] sm:$0xff] %vm573_vm3, %v3759_v0  ;;  %8132 = vmatmul.msk.f32.gmra.mxu0 %vm533_vm0, %v3843_v2  ;;  %v3844_v0 = vld [vmem:[#allocation2 + $0xd2] sm:$0xff]  ;;  %v4069_v2 = vmul.f32 %v10302_v59, %v9109_v24  ;;  %v3845_v24 = vld [vmem:[#allocation2 + $0xda] sm:$0xff] }
 0x23e   : > { %v3265_v4 = vpop.f32.mrf.mxu2  ;;  %v3041_v51 = vld [vmem:[#allocation4 + $0xf8] sm:$0xff] }
 0x23f   : > { %v3639_v53 = vpop.f32.mrf.mxu3  ;;  %4164 = vst.msk [vmem:[#allocation4] sm:$0xff] %vm573_vm3, %v4132_v15  ;;  %v3355_v12 = vmul.f32 %v3265_v4, %v9082_v57  ;;  %v3073_v31 = vadd.f32 %v3041_v51, %v3009_v55  ;;  %v10388_v55 = vld [vmem:[%s12316_s4] ss:$0 sm:$0xff] }
 0x241   : > { %v3419_v42 = vadd.f32 %v3387_v9, %v3355_v12  ;;  %3105 = vst.msk [vmem:[#allocation4 + $0xf8] sm:$0xff] %vm573_vm3, %v3073_v31  ;;  %v12622_v12 = vld [vmem:[#allocation31_spill] sm:$0xff] }
 0x242   : > { %v3728_v52 = vld [vmem:[#allocation4 + $0x10] sm:$0xff]  ;;  %v10378_v60 = vpop.f32.mrf.mxu0 }
 0x243   : > { %v3760_v5 = vadd.f32 %v3728_v52, %v3636_v29  ;;  %3451 = vst.msk [vmem:[#allocation4 + $0x18] sm:$0xff] %vm573_vm3, %v3419_v42  ;;  %8063 = vmatmul.msk.f32.gmra.mxu2 %vm533_vm0, %v3126_v26  ;;  %v3388_v26 = vld [vmem:[#allocation4 + $0x20] sm:$0xff]  ;;  %v4513_v52 = vpop.f32.mrf.mxu1 }
 0x244   : > { %8097 = vmatmul.msk.f32.gmra.mxu3 %vm533_vm0, %v3500_v25  ;;  %v4101_v15 = vld [vmem:[#allocation4 + $0x8] sm:$0xff]  ;;  %v3127_v25 = vld [vmem:[#allocation2 + $0xc8] sm:$0xff] }
 0x245   : > { %v4133_v4 = vadd.f32 %v4101_v15, %v4069_v2  ;;  %3792 = vst.msk [vmem:[#allocation4 + $0x10] sm:$0xff] %vm573_vm3, %v3760_v5  ;;  %8133 = vmatmul.msk.f32.gmra.mxu0 %vm533_vm0, %v3844_v0  ;;  %v3501_v42 = vld [vmem:[#allocation2 + $0xc9] sm:$0xff] }
 0x246   : > { %v3268_v51 = vpop.f32.mrf.mxu2  ;;  %v4196_v29 = vld [vmem:[#allocation4] sm:$0xff] }
 0x247   : > { %v3642_v59 = vpop.f32.mrf.mxu3  ;;  %4165 = vst.msk [vmem:[#allocation4 + $0x8] sm:$0xff] %vm573_vm3, %v4133_v4  ;;  %v3356_v31 = vmul.f32 %v3268_v51, %v12622_v12  ;;  %v4232_v9 = vadd.f32 %v10388_v55, %v4196_v29  ;;  %v4070_v4 = vmul.f32 %v10320_v17, %v12623_v3  ;;  %v3128_v3 = vld [vmem:[#allocation2 + $0xd0] sm:$0xff] }
 0x248   : > { %4335 = vst.msk [vmem:[#allocation4] sm:$0xff] %vm573_vm3, %v12618_v7 }
 0x249   : > { %v3420_v2 = vadd.f32 %v3388_v26, %v3356_v31  ;;  %v4264_v5 = vmax.f32 %v4232_v9, 0.0  ;;  %v4609_v31 = vmul.f32 %v4513_v52, %v12616_v30  ;;  %v3846_v30 = vld [vmem:[#allocation2 + $0xe2] sm:$0xff] }
 0x24a   : > { %v3729_v15 = vld [vmem:[#allocation4 + $0x18] sm:$0xff]  ;;  %v10397_v0 = vpop.f32.mrf.mxu0 }
 0x24b   : > { %v3761_v10 = vadd.f32 %v3729_v15, %v3639_v53  ;;  %3452 = vst.msk [vmem:[#allocation4 + $0x20] sm:$0xff] %vm573_vm3, %v3420_v2  ;;  %8064 = vmatmul.msk.f32.gmra.mxu2 %vm533_vm0, %v3127_v25  ;;  %v12624_v53 = vld [vmem:[#allocation22_spill] sm:$0xff] }
 0x24c   : > { %8098 = vmatmul.msk.f32.gmra.mxu3 %vm533_vm0, %v3501_v42  ;;  %v4102_v51 = vld [vmem:[#allocation4 + $0x10] sm:$0xff]  ;;  %4303 = vst.msk [vmem:[#allocation3 + $0x11] sm:$0xff] %vm573_vm3, %v4264_v5  ;;  %v3389_v15 = vld [vmem:[#allocation4 + $0x28] sm:$0xff] }
 0x24d   : > { %v4134_v29 = vadd.f32 %v4102_v51, %v4070_v4  ;;  %3793 = vst.msk [vmem:[#allocation4 + $0x18] sm:$0xff] %vm573_vm3, %v3761_v10  ;;  %8134 = vmatmul.msk.f32.gmra.mxu0 %vm533_vm0, %v3845_v24  ;;  %v3502_v5 = vld [vmem:[#allocation2 + $0xd1] sm:$0xff] }
 0x24e   : > { %v3271_v9 = vpop.f32.mrf.mxu2  ;;  %v4197_v17 = vld [vmem:[#allocation4 + $0x8] sm:$0xff] }
 0x24f   : > { %v3645_v26 = vpop.f32.mrf.mxu3  ;;  %4166 = vst.msk [vmem:[#allocation4 + $0x10] sm:$0xff] %vm573_vm3, %v4134_v29  ;;  %v3357_v2 = vmul.f32 %v3271_v9, %v12624_v53  ;;  %v4233_v25 = vadd.f32 %v10388_v55, %v4197_v17  ;;  %v4641_v42 = vld [vmem:[#allocation4] sm:$0xff]  ;;  %v4516_v29 = vpop.f32.mrf.mxu1  ;;  %v4071_v9 = vmul.f32 %v10333_v13, %v9315_v1 }
 0x250   : > { %4336 = vst.msk [vmem:[#allocation4 + $0x8] sm:$0xff] %vm573_vm3, %v12618_v7  ;;  %v4673_v10 = vadd.f32 %v4641_v42, %v4609_v31  ;;  %v4610_v13 = vmul.f32 %v4516_v29, %v12619_v48  ;;  %v3847_v1 = vld [vmem:[#allocation2 + $0xea] sm:$0xff] }
 0x251   : > { %v3421_v24 = vadd.f32 %v3389_v15, %v3357_v2  ;;  %v4265_v4 = vmax.f32 %v4233_v25, 0.0 }
 0x252   : > { %v3730_v52 = vld [vmem:[#allocation4 + $0x20] sm:$0xff]  ;;  %v10413_v51 = vpop.f32.mrf.mxu0  ;;  %4705 = vst.msk [vmem:[#allocation4] sm:$0xff] %vm573_vm3, %v4673_v10 }
 0x253   : > { %v3762_v17 = vadd.f32 %v3730_v52, %v3642_v59  ;;  %3453 = vst.msk [vmem:[#allocation4 + $0x28] sm:$0xff] %vm573_vm3, %v3421_v24  ;;  %8065 = vmatmul.msk.f32.gmra.mxu2 %vm533_vm0, %v3128_v3  ;;  %v10421_v31 = vld [vmem:[#allocation3 + $0x10] sm:$0xff]  ;;  %v3390_v24 = vld [vmem:[#allocation4 + $0x30] sm:$0xff] }
 0x254   : > { %8099 = vmatmul.msk.f32.gmra.mxu3 %vm533_vm0, %v3502_v5  ;;  %v4103_v2 = vld [vmem:[#allocation4 + $0x18] sm:$0xff]  ;;  %8145 = vmatmul.msk.f32.gmra.mxu1 %vm573_vm3, %v10421_v31  ;;  %4304 = vst.msk [vmem:[#allocation3 + $0x19] sm:$0xff] %vm573_vm3, %v4265_v4  ;;  %v3129_v52 = vld [vmem:[#allocation2 + $0xd8] sm:$0xff] }
 0x255   : > { %v4135_v25 = vadd.f32 %v4103_v2, %v4071_v9  ;;  %3794 = vst.msk [vmem:[#allocation4 + $0x20] sm:$0xff] %vm573_vm3, %v3762_v17  ;;  %8135 = vmatmul.msk.f32.gmra.mxu0 %vm533_vm0, %v3846_v30  ;;  %v3503_v4 = vld [vmem:[#allocation2 + $0xd9] sm:$0xff] }
 0x256   : > { %v3274_v59 = vpop.f32.mrf.mxu2  ;;  %v4198_v3 = vld [vmem:[#allocation4 + $0x10] sm:$0xff] }
 0x257   : > { %v3648_v42 = vpop.f32.mrf.mxu3  ;;  %4167 = vst.msk [vmem:[#allocation4 + $0x18] sm:$0xff] %vm573_vm3, %v4135_v25  ;;  %v3358_v15 = vmul.f32 %v3274_v59, %v9313_v27  ;;  %v4234_v5 = vadd.f32 %v10388_v55, %v4198_v3  ;;  %v4642_v10 = vld [vmem:[#allocation4 + $0x8] sm:$0xff]  ;;  %v4072_v25 = vmul.f32 %v10350_v20, %v9182_v62 }
 0x258   : > { %4337 = vst.msk [vmem:[#allocation4 + $0x10] sm:$0xff] %vm573_vm3, %v12618_v7  ;;  %v4674_v9 = vadd.f32 %v4642_v10, %v4610_v13 }
 0x259   : > { %v3422_v30 = vadd.f32 %v3390_v24, %v3358_v15  ;;  %v4266_v17 = vmax.f32 %v4234_v5, 0.0 }
 0x25a   : > { %v3731_v29 = vld [vmem:[#allocation4 + $0x28] sm:$0xff]  ;;  %v10434_v2 = vpop.f32.mrf.mxu0  ;;  %4706 = vst.msk [vmem:[#allocation4 + $0x8] sm:$0xff] %vm573_vm3, %v4674_v9  ;;  %v3504_v9 = vld [vmem:[#allocation2 + $0xe1] sm:$0xff] }
 0x25b   : > { %v3763_v59 = vadd.f32 %v3731_v29, %v3645_v26  ;;  %3454 = vst.msk [vmem:[#allocation4 + $0x30] sm:$0xff] %vm573_vm3, %v3422_v30  ;;  %8066 = vmatmul.msk.f32.gmra.mxu2 %vm533_vm0, %v3129_v52  ;;  %v10442_v3 = vld [vmem:[#allocation3 + $0x18] sm:$0xff]  ;;  %v3391_v52 = vld [vmem:[#allocation4 + $0x38] sm:$0xff] }
 0x25c   : > { %8100 = vmatmul.msk.f32.gmra.mxu3 %vm533_vm0, %v3503_v4  ;;  %v4104_v13 = vld [vmem:[#allocation4 + $0x20] sm:$0xff]  ;;  %8146 = vmatmul.msk.f32.gmra.mxu1 %vm573_vm3, %v10442_v3  ;;  %4305 = vst.msk [vmem:[#allocation3 + $0x21] sm:$0xff] %vm573_vm3, %v4266_v17  ;;  %v3130_v4 = vld [vmem:[#allocation2 + $0xe0] sm:$0xff] }
 0x25d   : > { %v4136_v15 = vadd.f32 %v4104_v13, %v4072_v25  ;;  %3795 = vst.msk [vmem:[#allocation4 + $0x28] sm:$0xff] %vm573_vm3, %v3763_v59  ;;  %8136 = vmatmul.msk.f32.gmra.mxu0 %vm533_vm0, %v3847_v1  ;;  %v3848_v1 = vld [vmem:[#allocation2 + $0xf2] sm:$0xff]  ;;  %v4073_v59 = vmul.f32 %v10365_v50, %v9342_v22 }
 0x25e   : > { %v3277_v20 = vpop.f32.mrf.mxu2  ;;  %v4199_v5 = vld [vmem:[#allocation4 + $0x18] sm:$0xff] }
 0x25f   : > { %v3651_v26 = vpop.f32.mrf.mxu3  ;;  %4168 = vst.msk [vmem:[#allocation4 + $0x20] sm:$0xff] %vm573_vm3, %v4136_v15  ;;  %v3359_v10 = vmul.f32 %v3277_v20, %v9345_v63  ;;  %v4235_v24 = vadd.f32 %v10388_v55, %v4199_v5 }
 0x260   : > { %4338 = vst.msk [vmem:[#allocation4 + $0x18] sm:$0xff] %vm573_vm3, %v12618_v7 }
 0x261   : > { %v3423_v30 = vadd.f32 %v3391_v52, %v3359_v10  ;;  %v4267_v17 = vmax.f32 %v4235_v24, 0.0 }
 0x262   : > { %v3732_v29 = vld [vmem:[#allocation4 + $0x30] sm:$0xff]  ;;  %v10454_v25 = vpop.f32.mrf.mxu0 }
 0x263   : > { %v3764_v13 = vadd.f32 %v3732_v29, %v3648_v42  ;;  %3455 = vst.msk [vmem:[#allocation4 + $0x38] sm:$0xff] %vm573_vm3, %v3423_v30  ;;  %8067 = vmatmul.msk.f32.gmra.mxu2 %vm533_vm0, %v3130_v4  ;;  %v10461_v15 = vld [vmem:[#allocation3 + $0x20] sm:$0xff]  ;;  %v3392_v4 = vld [vmem:[#allocation4 + $0x40] sm:$0xff] }
 0x264   : > { %8101 = vmatmul.msk.f32.gmra.mxu3 %vm533_vm0, %v3504_v9  ;;  %v4105_v20 = vld [vmem:[#allocation4 + $0x28] sm:$0xff]  ;;  %8147 = vmatmul.msk.f32.gmra.mxu1 %vm573_vm3, %v10461_v15  ;;  %4306 = vst.msk [vmem:[#allocation3 + $0x29] sm:$0xff] %vm573_vm3, %v4267_v17  ;;  %v3131_v9 = vld [vmem:[#allocation2 + $0xe8] sm:$0xff] }
 0x265   : > { %v4137_v5 = vadd.f32 %v4105_v20, %v4073_v59  ;;  %3796 = vst.msk [vmem:[#allocation4 + $0x30] sm:$0xff] %vm573_vm3, %v3764_v13  ;;  %8137 = vmatmul.msk.f32.gmra.mxu0 %vm533_vm0, %v3848_v1  ;;  %v3505_v30 = vld [vmem:[#allocation2 + $0xe9] sm:$0xff]  ;;  %v3849_v1 = vld [vmem:[#allocation2 + $0xfa] sm:$0xff] }
 0x266   : > { %v3280_v50 = vpop.f32.mrf.mxu2  ;;  %v4200_v10 = vld [vmem:[#allocation4 + $0x20] sm:$0xff]  ;;  %v12625_v20 = vld [vmem:[#allocation39_spill] sm:$0xff] }
 0x267   : > { %v3654_v42 = vpop.f32.mrf.mxu3  ;;  %4169 = vst.msk [vmem:[#allocation4 + $0x28] sm:$0xff] %vm573_vm3, %v4137_v5  ;;  %v3360_v24 = vmul.f32 %v3280_v50, %v9223_v19  ;;  %v4236_v52 = vadd.f32 %v10388_v55, %v4200_v10  ;;  %v4074_v22 = vmul.f32 %v10378_v60, %v12625_v20  ;;  %v4075_v20 = vmul.f32 %v10397_v0, %v12589_v45 }
 0x268   : > { %4339 = vst.msk [vmem:[#allocation4 + $0x20] sm:$0xff] %vm573_vm3, %v12618_v7  ;;  %v4076_v45 = vmul.f32 %v10413_v51, %v12590_v18  ;;  %v4077_v18 = vmul.f32 %v10434_v2, %v12591_v21  ;;  %v4078_v21 = vmul.f32 %v10454_v25, %v12592_v58 }
 0x269   : > { %v3424_v17 = vadd.f32 %v3392_v4, %v3360_v24  ;;  %v4268_v29 = vmax.f32 %v4236_v52, 0.0 }
 0x26a   : > { %v3733_v59 = vld [vmem:[#allocation4 + $0x38] sm:$0xff]  ;;  %v10473_v13 = vpop.f32.mrf.mxu0 }
 0x26b   : > { %v3765_v5 = vadd.f32 %v3733_v59, %v3651_v26  ;;  %3456 = vst.msk [vmem:[#allocation4 + $0x40] sm:$0xff] %vm573_vm3, %v3424_v17  ;;  %8068 = vmatmul.msk.f32.gmra.mxu2 %vm533_vm0, %v3131_v9  ;;  %v10480_v50 = vld [vmem:[#allocation3 + $0x28] sm:$0xff] }
 0x26c   : > { %8102 = vmatmul.msk.f32.gmra.mxu3 %vm533_vm0, %v3505_v30  ;;  %v4106_v10 = vld [vmem:[#allocation4 + $0x30] sm:$0xff]  ;;  %8148 = vmatmul.msk.f32.gmra.mxu1 %vm573_vm3, %v10480_v50  ;;  %4307 = vst.msk [vmem:[#allocation3 + $0x31] sm:$0xff] %vm573_vm3, %v4268_v29  ;;  %v3393_v30 = vld [vmem:[#allocation4 + $0x48] sm:$0xff]  ;;  %v3132_v17 = vld [vmem:[#allocation2 + $0xf0] sm:$0xff] }
 0x26d   : > { %v4138_v24 = vadd.f32 %v4106_v10, %v4074_v22  ;;  %3797 = vst.msk [vmem:[#allocation4 + $0x38] sm:$0xff] %vm573_vm3, %v3765_v5  ;;  %8138 = vmatmul.msk.f32.gmra.mxu0 %vm533_vm0, %v3849_v1  ;;  %v3506_v59 = vld [vmem:[#allocation2 + $0xf1] sm:$0xff]  ;;  %v3850_v1 = vld [vmem:[#allocation2 + $0x102] sm:$0xff] }
 0x26e   : > { %v3283_v60 = vpop.f32.mrf.mxu2  ;;  %v4201_v52 = vld [vmem:[#allocation4 + $0x28] sm:$0xff] }
 0x26f   : > { %v3657_v26 = vpop.f32.mrf.mxu3  ;;  %4170 = vst.msk [vmem:[#allocation4 + $0x30] sm:$0xff] %vm573_vm3, %v4138_v24  ;;  %v3361_v4 = vmul.f32 %v3283_v60, %v9370_v11  ;;  %v4237_v9 = vadd.f32 %v10388_v55, %v4201_v52 }
 0x270   : > { %4340 = vst.msk [vmem:[#allocation4 + $0x28] sm:$0xff] %vm573_vm3, %v12618_v7 }
 0x271   : > { %v3425_v22 = vadd.f32 %v3393_v30, %v3361_v4  ;;  %v4269_v29 = vmax.f32 %v4237_v9, 0.0 }
 0x272   : > { %v3734_v5 = vld [vmem:[#allocation4 + $0x40] sm:$0xff]  ;;  %v10492_v10 = vpop.f32.mrf.mxu0 }
 0x273   : > { %v3766_v24 = vadd.f32 %v3734_v5, %v3654_v42  ;;  %3457 = vst.msk [vmem:[#allocation4 + $0x48] sm:$0xff] %vm573_vm3, %v3425_v22  ;;  %8069 = vmatmul.msk.f32.gmra.mxu2 %vm533_vm0, %v3132_v17  ;;  %v10499_v60 = vld [vmem:[#allocation3 + $0x30] sm:$0xff] }
 0x274   : > { %8103 = vmatmul.msk.f32.gmra.mxu3 %vm533_vm0, %v3506_v59  ;;  %v4107_v52 = vld [vmem:[#allocation4 + $0x38] sm:$0xff]  ;;  %8149 = vmatmul.msk.f32.gmra.mxu1 %vm573_vm3, %v10499_v60  ;;  %4308 = vst.msk [vmem:[#allocation3 + $0x39] sm:$0xff] %vm573_vm3, %v4269_v29  ;;  %v3394_v59 = vld [vmem:[#allocation4 + $0x50] sm:$0xff]  ;;  %v3133_v22 = vld [vmem:[#allocation2 + $0xf8] sm:$0xff] }
 0x275   : > { %v4139_v4 = vadd.f32 %v4107_v52, %v4075_v20  ;;  %3798 = vst.msk [vmem:[#allocation4 + $0x40] sm:$0xff] %vm573_vm3, %v3766_v24  ;;  %8139 = vmatmul.msk.f32.gmra.mxu0 %vm533_vm0, %v3850_v1  ;;  %v3507_v5 = vld [vmem:[#allocation2 + $0xf9] sm:$0xff]  ;;  %v3851_v1 = vld [vmem:[#allocation2 + $0x10a] sm:$0xff] }
 0x276   : > { %v3286_v0 = vpop.f32.mrf.mxu2  ;;  %v4202_v9 = vld [vmem:[#allocation4 + $0x30] sm:$0xff] }
 0x277   : > { %v3660_v42 = vpop.f32.mrf.mxu3  ;;  %4171 = vst.msk [vmem:[#allocation4 + $0x38] sm:$0xff] %vm573_vm3, %v4139_v4  ;;  %v3362_v30 = vmul.f32 %v3286_v0, %v9401_v34  ;;  %v4238_v17 = vadd.f32 %v10388_v55, %v4202_v9 }
 0x278   : > { %4341 = vst.msk [vmem:[#allocation4 + $0x30] sm:$0xff] %vm573_vm3, %v12618_v7 }
 0x279   : > { %v3426_v20 = vadd.f32 %v3394_v59, %v3362_v30  ;;  %v4270_v29 = vmax.f32 %v4238_v17, 0.0 }
 0x27a   : > { %v3735_v24 = vld [vmem:[#allocation4 + $0x48] sm:$0xff]  ;;  %v10511_v52 = vpop.f32.mrf.mxu0 }
 0x27b   : > { %v3767_v4 = vadd.f32 %v3735_v24, %v3657_v26  ;;  %3458 = vst.msk [vmem:[#allocation4 + $0x50] sm:$0xff] %vm573_vm3, %v3426_v20  ;;  %8070 = vmatmul.msk.f32.gmra.mxu2 %vm533_vm0, %v3133_v22  ;;  %v10518_v0 = vld [vmem:[#allocation3 + $0x38] sm:$0xff] }
 0x27c   : > { %8104 = vmatmul.msk.f32.gmra.mxu3 %vm533_vm0, %v3507_v5  ;;  %v4108_v9 = vld [vmem:[#allocation4 + $0x40] sm:$0xff]  ;;  %8150 = vmatmul.msk.f32.gmra.mxu1 %vm573_vm3, %v10518_v0  ;;  %4309 = vst.msk [vmem:[#allocation3 + $0x41] sm:$0xff] %vm573_vm3, %v4270_v29  ;;  %v3395_v5 = vld [vmem:[#allocation4 + $0x58] sm:$0xff]  ;;  %v3134_v20 = vld [vmem:[#allocation2 + $0x100] sm:$0xff] }
 0x27d   : > { %v4140_v30 = vadd.f32 %v4108_v9, %v4076_v45  ;;  %3799 = vst.msk [vmem:[#allocation4 + $0x48] sm:$0xff] %vm573_vm3, %v3767_v4  ;;  %8140 = vmatmul.msk.f32.gmra.mxu0 %vm533_vm0, %v3851_v1  ;;  %v3508_v24 = vld [vmem:[#allocation2 + $0x101] sm:$0xff]  ;;  %v3852_v1 = vld [vmem:[#allocation2 + $0x112] sm:$0xff] }
 0x27e   : > { %v3289_v51 = vpop.f32.mrf.mxu2  ;;  %v4203_v17 = vld [vmem:[#allocation4 + $0x38] sm:$0xff] }
 0x27f   : > { %v3663_v26 = vpop.f32.mrf.mxu3  ;;  %4172 = vst.msk [vmem:[#allocation4 + $0x40] sm:$0xff] %vm573_vm3, %v4140_v30  ;;  %v3363_v59 = vmul.f32 %v3289_v51, %v9309_v38  ;;  %v4239_v22 = vadd.f32 %v10388_v55, %v4203_v17 }
 0x280   : > { %4342 = vst.msk [vmem:[#allocation4 + $0x38] sm:$0xff] %vm573_vm3, %v12618_v7 }
 0x281   : > { %v3427_v45 = vadd.f32 %v3395_v5, %v3363_v59  ;;  %v4271_v29 = vmax.f32 %v4239_v22, 0.0 }
 0x282   : > { %v3736_v4 = vld [vmem:[#allocation4 + $0x50] sm:$0xff]  ;;  %v10530_v9 = vpop.f32.mrf.mxu0 }
 0x283   : > { %v3768_v30 = vadd.f32 %v3736_v4, %v3660_v42  ;;  %3459 = vst.msk [vmem:[#allocation4 + $0x58] sm:$0xff] %vm573_vm3, %v3427_v45  ;;  %8071 = vmatmul.msk.f32.gmra.mxu2 %vm533_vm0, %v3134_v20  ;;  %v10537_v51 = vld [vmem:[#allocation3 + $0x40] sm:$0xff] }
 0x284   : > { %8105 = vmatmul.msk.f32.gmra.mxu3 %vm533_vm0, %v3508_v24  ;;  %v4109_v17 = vld [vmem:[#allocation4 + $0x48] sm:$0xff]  ;;  %8151 = vmatmul.msk.f32.gmra.mxu1 %vm573_vm3, %v10537_v51  ;;  %4310 = vst.msk [vmem:[#allocation3 + $0x49] sm:$0xff] %vm573_vm3, %v4271_v29  ;;  %v3396_v24 = vld [vmem:[#allocation4 + $0x60] sm:$0xff]  ;;  %v3135_v45 = vld [vmem:[#allocation2 + $0x108] sm:$0xff] }
 0x285   : > { %v4141_v59 = vadd.f32 %v4109_v17, %v4077_v18  ;;  %3800 = vst.msk [vmem:[#allocation4 + $0x50] sm:$0xff] %vm573_vm3, %v3768_v30  ;;  %8141 = vmatmul.msk.f32.gmra.mxu0 %vm533_vm0, %v3852_v1  ;;  %v3509_v4 = vld [vmem:[#allocation2 + $0x109] sm:$0xff]  ;;  %v3853_v1 = vld [vmem:[#allocation2 + $0x11a] sm:$0xff] }
 0x286   : > { %v3292_v2 = vpop.f32.mrf.mxu2  ;;  %v4204_v22 = vld [vmem:[#allocation4 + $0x40] sm:$0xff] }
 0x287   : > { %v3666_v42 = vpop.f32.mrf.mxu3  ;;  %4173 = vst.msk [vmem:[#allocation4 + $0x48] sm:$0xff] %vm573_vm3, %v4141_v59  ;;  %v3364_v5 = vmul.f32 %v3292_v2, %v9422_v6  ;;  %v4240_v20 = vadd.f32 %v10388_v55, %v4204_v22 }
 0x288   : > { %4343 = vst.msk [vmem:[#allocation4 + $0x40] sm:$0xff] %vm573_vm3, %v12618_v7 }
 0x289   : > { %v3428_v18 = vadd.f32 %v3396_v24, %v3364_v5  ;;  %v4272_v29 = vmax.f32 %v4240_v20, 0.0 }
 0x28a   : > { %v3737_v30 = vld [vmem:[#allocation4 + $0x58] sm:$0xff]  ;;  %v10549_v17 = vpop.f32.mrf.mxu0 }
 0x28b   : > { %v3769_v59 = vadd.f32 %v3737_v30, %v3663_v26  ;;  %3460 = vst.msk [vmem:[#allocation4 + $0x60] sm:$0xff] %vm573_vm3, %v3428_v18  ;;  %8072 = vmatmul.msk.f32.gmra.mxu2 %vm533_vm0, %v3135_v45  ;;  %v10556_v2 = vld [vmem:[#allocation3 + $0x48] sm:$0xff] }
 0x28c   : > { %8106 = vmatmul.msk.f32.gmra.mxu3 %vm533_vm0, %v3509_v4  ;;  %v4110_v22 = vld [vmem:[#allocation4 + $0x50] sm:$0xff]  ;;  %8152 = vmatmul.msk.f32.gmra.mxu1 %vm573_vm3, %v10556_v2  ;;  %4311 = vst.msk [vmem:[#allocation3 + $0x51] sm:$0xff] %vm573_vm3, %v4272_v29  ;;  %v3397_v4 = vld [vmem:[#allocation4 + $0x68] sm:$0xff]  ;;  %v3136_v18 = vld [vmem:[#allocation2 + $0x110] sm:$0xff] }
 0x28d   : > { %v4142_v5 = vadd.f32 %v4110_v22, %v4078_v21  ;;  %3801 = vst.msk [vmem:[#allocation4 + $0x58] sm:$0xff] %vm573_vm3, %v3769_v59  ;;  %8142 = vmatmul.msk.f32.gmra.mxu0 %vm533_vm0, %v3853_v1  ;;  %v3510_v30 = vld [vmem:[#allocation2 + $0x111] sm:$0xff]  ;;  %v4079_v1 = vmul.f32 %v10473_v13, %v12593_v39 }
 0x28e   : > { %v3295_v25 = vpop.f32.mrf.mxu2  ;;  %v4205_v20 = vld [vmem:[#allocation4 + $0x48] sm:$0xff] }
 0x28f   : > { %v3669_v26 = vpop.f32.mrf.mxu3  ;;  %4174 = vst.msk [vmem:[#allocation4 + $0x50] sm:$0xff] %vm573_vm3, %v4142_v5  ;;  %v3365_v24 = vmul.f32 %v3295_v25, %v9449_v23  ;;  %v4241_v45 = vadd.f32 %v10388_v55, %v4205_v20 }
 0x290   : > { %4344 = vst.msk [vmem:[#allocation4 + $0x48] sm:$0xff] %vm573_vm3, %v12618_v7 }
 0x291   : > { %v3429_v21 = vadd.f32 %v3397_v4, %v3365_v24  ;;  %v4273_v29 = vmax.f32 %v4241_v45, 0.0 }
 0x292   : > { %v3738_v59 = vld [vmem:[#allocation4 + $0x60] sm:$0xff]  ;;  %v10568_v22 = vpop.f32.mrf.mxu0 }
 0x293   : > { %v3770_v58 = vadd.f32 %v3738_v59, %v3666_v42  ;;  %3461 = vst.msk [vmem:[#allocation4 + $0x68] sm:$0xff] %vm573_vm3, %v3429_v21  ;;  %8073 = vmatmul.msk.f32.gmra.mxu2 %vm533_vm0, %v3136_v18  ;;  %v10575_v5 = vld [vmem:[#allocation3 + $0x50] sm:$0xff]  ;;  %v3398_v18 = vld [vmem:[#allocation4 + $0x70] sm:$0xff] }
 0x294   : > { %8107 = vmatmul.msk.f32.gmra.mxu3 %vm533_vm0, %v3510_v30  ;;  %v4111_v25 = vld [vmem:[#allocation4 + $0x58] sm:$0xff]  ;;  %8153 = vmatmul.msk.f32.gmra.mxu1 %vm573_vm3, %v10575_v5  ;;  %4312 = vst.msk [vmem:[#allocation3 + $0x59] sm:$0xff] %vm573_vm3, %v4273_v29  ;;  %v3137_v30 = vld [vmem:[#allocation2 + $0x118] sm:$0xff] }
 0x295   : > { %v4143_v20 = vadd.f32 %v4111_v25, %v4079_v1  ;;  %3802 = vst.msk [vmem:[#allocation4 + $0x60] sm:$0xff] %vm573_vm3, %v3770_v58  ;;  %8242 = vmatmul.msk.f32.vlgmr.msrb.gmra.mxu0 %vm573_vm3, %v10421_v31  ;;  %v3511_v21 = vld [vmem:[#allocation2 + $0x119] sm:$0xff]  ;;  %v4080_v31 = vmul.f32 %v10492_v10, %v12594_v56 }
 0x296   : > { %v3298_v13 = vpop.f32.mrf.mxu2  ;;  %v4206_v24 = vld [vmem:[#allocation4 + $0x50] sm:$0xff] }
 0x297   : > { %v3672_v42 = vpop.f32.mrf.mxu3  ;;  %4175 = vst.msk [vmem:[#allocation4 + $0x58] sm:$0xff] %vm573_vm3, %v4143_v20  ;;  %v3366_v45 = vmul.f32 %v3298_v13, %v9368_v14  ;;  %v4242_v4 = vadd.f32 %v10388_v55, %v4206_v24 }
 0x298   : > { %4345 = vst.msk [vmem:[#allocation4 + $0x50] sm:$0xff] %vm573_vm3, %v12618_v7 }
 0x299   : > { %v3430_v29 = vadd.f32 %v3398_v18, %v3366_v45  ;;  %v4274_v58 = vmax.f32 %v4242_v4, 0.0 }
 0x29a   : > { %v3739_v59 = vld [vmem:[#allocation4 + $0x68] sm:$0xff]  ;;  %v10588_v1 = vpop.f32.mrf.mxu0 }
 0x29b   : > { %v3771_v25 = vadd.f32 %v3739_v59, %v3669_v26  ;;  %3462 = vst.msk [vmem:[#allocation4 + $0x70] sm:$0xff] %vm573_vm3, %v3430_v29  ;;  %8074 = vmatmul.msk.f32.gmra.mxu2 %vm533_vm0, %v3137_v30  ;;  %v10595_v20 = vld [vmem:[#allocation3 + $0x58] sm:$0xff]  ;;  %v3399_v30 = vld [vmem:[#allocation4 + $0x78] sm:$0xff] }
 0x29c   : > { %8108 = vmatmul.msk.f32.gmra.mxu3 %vm533_vm0, %v3511_v21  ;;  %v4112_v13 = vld [vmem:[#allocation4 + $0x60] sm:$0xff]  ;;  %8154 = vmatmul.msk.f32.gmra.mxu1 %vm573_vm3, %v10595_v20  ;;  %4313 = vst.msk [vmem:[#allocation3 + $0x61] sm:$0xff] %vm573_vm3, %v4274_v58 }
 0x29d   : > { %v4144_v24 = vadd.f32 %v4112_v13, %v4080_v31  ;;  %3803 = vst.msk [vmem:[#allocation4 + $0x68] sm:$0xff] %vm573_vm3, %v3771_v25  ;;  %8243 = vmatmul.msk.f32.gmra.mxu0 %vm573_vm3, %v10442_v3  ;;  %v4737_v21 = vld [vmem:[#allocation3 + $0x1] sm:$0xff] }
 0x29e   : > { %v3301_v10 = vpop.f32.mrf.mxu2  ;;  %v4207_v45 = vld [vmem:[#allocation4 + $0x58] sm:$0xff] }
 0x29f   : > { %v3675_v26 = vpop.f32.mrf.mxu3  ;;  %4176 = vst.msk [vmem:[#allocation4 + $0x60] sm:$0xff] %vm573_vm3, %v4144_v24  ;;  %v3367_v4 = vmul.f32 %v3301_v10, %v9467_v36  ;;  %v4243_v18 = vadd.f32 %v10388_v55, %v4207_v45  ;;  %v5076_v29 = vld [vmem:[#allocation3 + $0x2] sm:$0xff] }
 0x2a0   : > { %4346 = vst.msk [vmem:[#allocation4 + $0x58] sm:$0xff] %vm573_vm3, %v12618_v7  ;;  %v12626_v3 = vld [vmem:[#allocation40_spill] sm:$0xff] }
 0x2a1   : > { %v3431_v58 = vadd.f32 %v3399_v30, %v3367_v4  ;;  %v4275_v59 = vmax.f32 %v4243_v18, 0.0  ;;  %v4081_v13 = vmul.f32 %v10511_v52, %v12626_v3 }
 0x2a2   : > { %v3740_v31 = vld [vmem:[#allocation4 + $0x70] sm:$0xff]  ;;  %v10608_v25 = vpop.f32.mrf.mxu0 }
 0x2a3   : > { %v3772_v56 = vadd.f32 %v3740_v31, %v3672_v42  ;;  %3463 = vst.msk [vmem:[#allocation4 + $0x78] sm:$0xff] %vm573_vm3, %v3431_v58  ;;  %v10613_v24 = vld [vmem:[#allocation3 + $0x60] sm:$0xff]  ;;  %8176 = vmatmul.msk.f32.vlgmr.msrb.gmra.mxu2 %vm573_vm3, %v4737_v21  ;;  %v3400_v21 = vld [vmem:[#allocation4 + $0x80] sm:$0xff] }
 0x2a4   : > { %8209 = vmatmul.msk.f32.vlgmr.msrb.gmra.mxu3 %vm573_vm3, %v5076_v29  ;;  %v4113_v10 = vld [vmem:[#allocation4 + $0x68] sm:$0xff]  ;;  %8155 = vmatmul.msk.f32.gmra.mxu1 %vm573_vm3, %v10613_v24  ;;  %4314 = vst.msk [vmem:[#allocation3 + $0x69] sm:$0xff] %vm573_vm3, %v4275_v59 }
 0x2a5   : > { %v4145_v45 = vadd.f32 %v4113_v10, %v4081_v13  ;;  %3804 = vst.msk [vmem:[#allocation4 + $0x70] sm:$0xff] %vm573_vm3, %v3772_v56  ;;  %8244 = vmatmul.msk.f32.gmra.mxu0 %vm573_vm3, %v10461_v15  ;;  %v4738_v29 = vld [vmem:[#allocation3 + $0x9] sm:$0xff]  ;;  %v4082_v15 = vmul.f32 %v10530_v9, %v12596_v44 }
 0x2a6   : > { %v3304_v52 = vpop.f32.mrf.mxu2  ;;  %v4208_v4 = vld [vmem:[#allocation4 + $0x60] sm:$0xff] }
 0x2a7   : > { %v3678_v42 = vpop.f32.mrf.mxu3  ;;  %4177 = vst.msk [vmem:[#allocation4 + $0x68] sm:$0xff] %vm573_vm3, %v4145_v45  ;;  %v3368_v18 = vmul.f32 %v3304_v52, %v12598_v37  ;;  %v4244_v30 = vadd.f32 %v10388_v55, %v4208_v4  ;;  %v5077_v31 = vld [vmem:[#allocation3 + $0xa] sm:$0xff] }
 0x2a8   : > { %4347 = vst.msk [vmem:[#allocation4 + $0x60] sm:$0xff] %vm573_vm3, %v12618_v7 }
 0x2a9   : > { %v3432_v58 = vadd.f32 %v3400_v21, %v3368_v18  ;;  %v4276_v59 = vmax.f32 %v4244_v30, 0.0  ;;  %v12627_v30 = vld [vmem:[#allocation43_spill] sm:$0xff] }
 0x2aa   : > { %v3741_v56 = vld [vmem:[#allocation4 + $0x78] sm:$0xff]  ;;  %v10628_v13 = vpop.f32.mrf.mxu0 }
 0x2ab   : > { %v3773_v10 = vadd.f32 %v3741_v56, %v3675_v26  ;;  %3464 = vst.msk [vmem:[#allocation4 + $0x80] sm:$0xff] %vm573_vm3, %v3432_v58  ;;  %v10633_v45 = vld [vmem:[#allocation3 + $0x68] sm:$0xff]  ;;  %8177 = vmatmul.msk.f32.gmra.mxu2 %vm573_vm3, %v4738_v29  ;;  %v3401_v58 = vld [vmem:[#allocation4 + $0x88] sm:$0xff] }
 0x2ac   : > { %8210 = vmatmul.msk.f32.gmra.mxu3 %vm573_vm3, %v5077_v31  ;;  %v4114_v52 = vld [vmem:[#allocation4 + $0x70] sm:$0xff]  ;;  %8156 = vmatmul.msk.f32.gmra.mxu1 %vm573_vm3, %v10633_v45  ;;  %4315 = vst.msk [vmem:[#allocation3 + $0x71] sm:$0xff] %vm573_vm3, %v4276_v59 }
 0x2ad   : > { %v4146_v4 = vadd.f32 %v4114_v52, %v4082_v15  ;;  %3805 = vst.msk [vmem:[#allocation4 + $0x78] sm:$0xff] %vm573_vm3, %v3773_v10  ;;  %8245 = vmatmul.msk.f32.gmra.mxu0 %vm573_vm3, %v10480_v50  ;;  %v4739_v15 = vld [vmem:[#allocation3 + $0x11] sm:$0xff]  ;;  %v12628_v50 = vld [vmem:[#allocation56_spill] sm:$0xff] }
 0x2ae   : > { %v3307_v9 = vpop.f32.mrf.mxu2  ;;  %v4209_v18 = vld [vmem:[#allocation4 + $0x68] sm:$0xff]  ;;  %v4083_v44 = vmul.f32 %v10549_v17, %v12628_v50 }
 0x2af   : > { %v3681_v26 = vpop.f32.mrf.mxu3  ;;  %4178 = vst.msk [vmem:[#allocation4 + $0x70] sm:$0xff] %vm573_vm3, %v4146_v4  ;;  %v3369_v21 = vmul.f32 %v3307_v9, %v12627_v30  ;;  %v4245_v29 = vadd.f32 %v10388_v55, %v4209_v18  ;;  %v5078_v10 = vld [vmem:[#allocation3 + $0x12] sm:$0xff] }
 0x2b0   : > { %4348 = vst.msk [vmem:[#allocation4 + $0x68] sm:$0xff] %vm573_vm3, %v12618_v7 }
 0x2b1   : > { %v3433_v59 = vadd.f32 %v3401_v58, %v3369_v21  ;;  %v4277_v56 = vmax.f32 %v4245_v29, 0.0 }
 0x2b2   : > { %v3742_v31 = vld [vmem:[#allocation4 + $0x80] sm:$0xff]  ;;  %v10648_v52 = vpop.f32.mrf.mxu0 }
 0x2b3   : > { %v3774_v3 = vadd.f32 %v3742_v31, %v3678_v42  ;;  %3465 = vst.msk [vmem:[#allocation4 + $0x88] sm:$0xff] %vm573_vm3, %v3433_v59  ;;  %v10653_v4 = vld [vmem:[#allocation3 + $0x70] sm:$0xff]  ;;  %8178 = vmatmul.msk.f32.gmra.mxu2 %vm573_vm3, %v4739_v15  ;;  %v3402_v59 = vld [vmem:[#allocation4 + $0x90] sm:$0xff] }
 0x2b4   : > { %8211 = vmatmul.msk.f32.gmra.mxu3 %vm573_vm3, %v5078_v10  ;;  %v4115_v9 = vld [vmem:[#allocation4 + $0x78] sm:$0xff]  ;;  %8157 = vmatmul.msk.f32.gmra.mxu1 %vm573_vm3, %v10653_v4  ;;  %4316 = vst.msk [vmem:[#allocation3 + $0x79] sm:$0xff] %vm573_vm3, %v4277_v56 }
 0x2b5   : > { %v4147_v18 = vadd.f32 %v4115_v9, %v4083_v44  ;;  %3806 = vst.msk [vmem:[#allocation4 + $0x80] sm:$0xff] %vm573_vm3, %v3774_v3  ;;  %8246 = vmatmul.msk.f32.gmra.mxu0 %vm573_vm3, %v10499_v60  ;;  %v4740_v3 = vld [vmem:[#allocation3 + $0x19] sm:$0xff]  ;;  %v4084_v60 = vmul.f32 %v10568_v22, %v12597_v28 }
 0x2b6   : > { %v3310_v17 = vpop.f32.mrf.mxu2  ;;  %v4210_v21 = vld [vmem:[#allocation4 + $0x70] sm:$0xff] }
 0x2b7   : > { %v3684_v42 = vpop.f32.mrf.mxu3  ;;  %4179 = vst.msk [vmem:[#allocation4 + $0x78] sm:$0xff] %vm573_vm3, %v4147_v18  ;;  %v3370_v29 = vmul.f32 %v3310_v17, %v12600_v43  ;;  %v4246_v58 = vadd.f32 %v10388_v55, %v4210_v21  ;;  %v5079_v15 = vld [vmem:[#allocation3 + $0x1a] sm:$0xff] }
 0x2b8   : > { %4349 = vst.msk [vmem:[#allocation4 + $0x70] sm:$0xff] %vm573_vm3, %v12618_v7 }
 0x2b9   : > { %v3434_v56 = vadd.f32 %v3402_v59, %v3370_v29  ;;  %v4278_v44 = vmax.f32 %v4246_v58, 0.0 }
 0x2ba   : > { %v3743_v31 = vld [vmem:[#allocation4 + $0x88] sm:$0xff]  ;;  %v10668_v10 = vpop.f32.mrf.mxu0 }
 0x2bb   : > { %v3775_v9 = vadd.f32 %v3743_v31, %v3681_v26  ;;  %3466 = vst.msk [vmem:[#allocation4 + $0x90] sm:$0xff] %vm573_vm3, %v3434_v56  ;;  %v10673_v18 = vld [vmem:[#allocation3 + $0x78] sm:$0xff]  ;;  %8179 = vmatmul.msk.f32.gmra.mxu2 %vm573_vm3, %v4740_v3  ;;  %v3403_v56 = vld [vmem:[#allocation4 + $0x98] sm:$0xff] }
 0x2bc   : > { %8212 = vmatmul.msk.f32.gmra.mxu3 %vm573_vm3, %v5079_v15  ;;  %v4116_v17 = vld [vmem:[#allocation4 + $0x80] sm:$0xff]  ;;  %8158 = vmatmul.msk.f32.gmra.mxu1 %vm573_vm3, %v10673_v18  ;;  %4317 = vst.msk [vmem:[#allocation3 + $0x81] sm:$0xff] %vm573_vm3, %v4278_v44 }
 0x2bd   : > { %v4148_v21 = vadd.f32 %v4116_v17, %v4084_v60  ;;  %3807 = vst.msk [vmem:[#allocation4 + $0x88] sm:$0xff] %vm573_vm3, %v3775_v9  ;;  %8247 = vmatmul.msk.f32.gmra.mxu0 %vm573_vm3, %v10518_v0  ;;  %v4741_v15 = vld [vmem:[#allocation3 + $0x21] sm:$0xff]  ;;  %v12629_v0 = vld [vmem:[#allocation58_spill] sm:$0xff] }
 0x2be   : > { %v3313_v22 = vpop.f32.mrf.mxu2  ;;  %v4211_v29 = vld [vmem:[#allocation4 + $0x78] sm:$0xff]  ;;  %v4085_v17 = vmul.f32 %v10588_v1, %v12629_v0 }
 0x2bf   : > { %v3687_v26 = vpop.f32.mrf.mxu3  ;;  %4180 = vst.msk [vmem:[#allocation4 + $0x80] sm:$0xff] %vm573_vm3, %v4148_v21  ;;  %v3371_v58 = vmul.f32 %v3313_v22, %v9544_v33  ;;  %v4247_v59 = vadd.f32 %v10388_v55, %v4211_v29  ;;  %v5080_v60 = vld [vmem:[#allocation3 + $0x22] sm:$0xff] }
 0x2c0   : > { %4350 = vst.msk [vmem:[#allocation4 + $0x78] sm:$0xff] %vm573_vm3, %v12618_v7 }
 0x2c1   : > { %v3435_v44 = vadd.f32 %v3403_v56, %v3371_v58  ;;  %v4279_v31 = vmax.f32 %v4247_v59, 0.0 }
 0x2c2   : > { %v3744_v3 = vld [vmem:[#allocation4 + $0x90] sm:$0xff]  ;;  %v10688_v9 = vpop.f32.mrf.mxu0 }
 0x2c3   : > { %v3776_v28 = vadd.f32 %v3744_v3, %v3684_v42  ;;  %3467 = vst.msk [vmem:[#allocation4 + $0x98] sm:$0xff] %vm573_vm3, %v3435_v44  ;;  %v10693_v21 = vld [vmem:[#allocation3 + $0x80] sm:$0xff]  ;;  %8180 = vmatmul.msk.f32.gmra.mxu2 %vm573_vm3, %v4741_v15  ;;  %v3404_v44 = vld [vmem:[#allocation4 + $0xa0] sm:$0xff] }
 0x2c4   : > { %8213 = vmatmul.msk.f32.gmra.mxu3 %vm573_vm3, %v5080_v60  ;;  %v4117_v22 = vld [vmem:[#allocation4 + $0x88] sm:$0xff]  ;;  %8159 = vmatmul.msk.f32.gmra.mxu1 %vm573_vm3, %v10693_v21  ;;  %4318 = vst.msk [vmem:[#allocation3 + $0x89] sm:$0xff] %vm573_vm3, %v4279_v31 }
 0x2c5   : > { %v4149_v29 = vadd.f32 %v4117_v22, %v4085_v17  ;;  %3808 = vst.msk [vmem:[#allocation4 + $0x90] sm:$0xff] %vm573_vm3, %v3776_v28  ;;  %8248 = vmatmul.msk.f32.gmra.mxu0 %vm573_vm3, %v10537_v51  ;;  %v4742_v28 = vld [vmem:[#allocation3 + $0x29] sm:$0xff]  ;;  %v4086_v51 = vmul.f32 %v10608_v25, %v9573_v54 }
 0x2c6   : > { %v3316_v1 = vpop.f32.mrf.mxu2  ;;  %v4212_v58 = vld [vmem:[#allocation4 + $0x80] sm:$0xff] }
 0x2c7   : > { %v3690_v42 = vpop.f32.mrf.mxu3  ;;  %4181 = vst.msk [vmem:[#allocation4 + $0x88] sm:$0xff] %vm573_vm3, %v4149_v29  ;;  %v3372_v59 = vmul.f32 %v3316_v1, %v12602_v32  ;;  %v4248_v56 = vadd.f32 %v10388_v55, %v4212_v58  ;;  %v5081_v60 = vld [vmem:[#allocation3 + $0x2a] sm:$0xff] }
 0x2c8   : > { %4351 = vst.msk [vmem:[#allocation4 + $0x80] sm:$0xff] %vm573_vm3, %v12618_v7 }
 0x2c9   : > { %v3436_v31 = vadd.f32 %v3404_v44, %v3372_v59  ;;  %v4280_v3 = vmax.f32 %v4248_v56, 0.0 }
 0x2ca   : > { %v3745_v15 = vld [vmem:[#allocation4 + $0x98] sm:$0xff]  ;;  %v10708_v17 = vpop.f32.mrf.mxu0 }
 0x2cb   : > { %v3777_v22 = vadd.f32 %v3745_v15, %v3687_v26  ;;  %3468 = vst.msk [vmem:[#allocation4 + $0xa0] sm:$0xff] %vm573_vm3, %v3436_v31  ;;  %v10713_v29 = vld [vmem:[#allocation3 + $0x88] sm:$0xff]  ;;  %8181 = vmatmul.msk.f32.gmra.mxu2 %vm573_vm3, %v4742_v28  ;;  %v3405_v31 = vld [vmem:[#allocation4 + $0xa8] sm:$0xff]  ;;  %v4643_v28 = vld [vmem:[#allocation4 + $0x10] sm:$0xff] }
 0x2cc   : > { %8214 = vmatmul.msk.f32.gmra.mxu3 %vm573_vm3, %v5081_v60  ;;  %v4118_v1 = vld [vmem:[#allocation4 + $0x90] sm:$0xff]  ;;  %8160 = vmatmul.msk.f32.gmra.mxu1 %vm573_vm3, %v10713_v29  ;;  %4319 = vst.msk [vmem:[#allocation3 + $0x91] sm:$0xff] %vm573_vm3, %v4280_v3 }
 0x2cd   : > { %v4150_v58 = vadd.f32 %v4118_v1, %v4086_v51  ;;  %3809 = vst.msk [vmem:[#allocation4 + $0x98] sm:$0xff] %vm573_vm3, %v3777_v22  ;;  %8249 = vmatmul.msk.f32.gmra.mxu0 %vm573_vm3, %v10556_v2  ;;  %v4743_v22 = vld [vmem:[#allocation3 + $0x31] sm:$0xff] }
 0x2ce   : > { %v3319_v25 = vpop.f32.mrf.mxu2  ;;  %v4213_v59 = vld [vmem:[#allocation4 + $0x88] sm:$0xff] }
 0x2cf   : > { %v3693_v26 = vpop.f32.mrf.mxu3  ;;  %4182 = vst.msk [vmem:[#allocation4 + $0x90] sm:$0xff] %vm573_vm3, %v4150_v58  ;;  %v3373_v56 = vmul.f32 %v3319_v25, %v9567_v35  ;;  %v4249_v44 = vadd.f32 %v10388_v55, %v4213_v59  ;;  %v5082_v1 = vld [vmem:[#allocation3 + $0x32] sm:$0xff]  ;;  %v4087_v58 = vmul.f32 %v10628_v13, %v12601_v8 }
 0x2d0   : > { %4352 = vst.msk [vmem:[#allocation4 + $0x88] sm:$0xff] %vm573_vm3, %v12618_v7 }
 0x2d1   : > { %v3437_v3 = vadd.f32 %v3405_v31, %v3373_v56  ;;  %v4519_v15 = vpop.f32.mrf.mxu1  ;;  %v4281_v60 = vmax.f32 %v4249_v44, 0.0 }
 0x2d2   : > { %v3746_v51 = vld [vmem:[#allocation4 + $0xa0] sm:$0xff]  ;;  %v4611_v2 = vmul.f32 %v4519_v15, %v12620_v47  ;;  %v10729_v54 = vpop.f32.mrf.mxu0 }
 0x2d3   : > { %v3778_v25 = vadd.f32 %v3746_v51, %v3690_v42  ;;  %3469 = vst.msk [vmem:[#allocation4 + $0xa8] sm:$0xff] %vm573_vm3, %v3437_v3  ;;  %v10734_v59 = vld [vmem:[#allocation3 + $0x90] sm:$0xff]  ;;  %8182 = vmatmul.msk.f32.gmra.mxu2 %vm573_vm3, %v4743_v22  ;;  %v3406_v51 = vld [vmem:[#allocation4 + $0xb0] sm:$0xff]  ;;  %v4644_v22 = vld [vmem:[#allocation4 + $0x18] sm:$0xff] }
 0x2d4   : > { %8215 = vmatmul.msk.f32.gmra.mxu3 %vm573_vm3, %v5082_v1  ;;  %v4119_v56 = vld [vmem:[#allocation4 + $0x98] sm:$0xff]  ;;  %v4675_v44 = vadd.f32 %v4643_v28, %v4611_v2  ;;  %8161 = vmatmul.msk.f32.gmra.mxu1 %vm573_vm3, %v10734_v59  ;;  %4320 = vst.msk [vmem:[#allocation3 + $0x99] sm:$0xff] %vm573_vm3, %v4281_v60 }
 0x2d5   : > { %v4151_v31 = vadd.f32 %v4119_v56, %v4087_v58  ;;  %3810 = vst.msk [vmem:[#allocation4 + $0xa0] sm:$0xff] %vm573_vm3, %v3778_v25  ;;  %8250 = vmatmul.msk.f32.gmra.mxu0 %vm573_vm3, %v10575_v5  ;;  %v4744_v25 = vld [vmem:[#allocation3 + $0x39] sm:$0xff] }
 0x2d6   : > { %4707 = vst.msk [vmem:[#allocation4 + $0x10] sm:$0xff] %vm573_vm3, %v4675_v44  ;;  %v3322_v13 = vpop.f32.mrf.mxu2  ;;  %v4214_v3 = vld [vmem:[#allocation4 + $0x90] sm:$0xff] }
 0x2d7   : > { %v3696_v42 = vpop.f32.mrf.mxu3  ;;  %4183 = vst.msk [vmem:[#allocation4 + $0x98] sm:$0xff] %vm573_vm3, %v4151_v31  ;;  %v3374_v15 = vmul.f32 %v3322_v13, %v9600_v16  ;;  %v4250_v28 = vadd.f32 %v10388_v55, %v4214_v3  ;;  %v5083_v56 = vld [vmem:[#allocation3 + $0x3a] sm:$0xff]  ;;  %v4088_v31 = vmul.f32 %v10648_v52, %v9596_v46 }
 0x2d8   : > { %4353 = vst.msk [vmem:[#allocation4 + $0x90] sm:$0xff] %vm573_vm3, %v12618_v7 }
 0x2d9   : > { %v3438_v60 = vadd.f32 %v3406_v51, %v3374_v15  ;;  %v4522_v2 = vpop.f32.mrf.mxu1  ;;  %v4282_v1 = vmax.f32 %v4250_v28, 0.0 }
 0x2da   : > { %v3747_v5 = vld [vmem:[#allocation4 + $0xa8] sm:$0xff]  ;;  %v4612_v58 = vmul.f32 %v4522_v2, %v9082_v57  ;;  %v10751_v44 = vpop.f32.mrf.mxu0  ;;  %v10772_v2 = vld [vmem:[%s12316_s4] ss:$0 sm:$0xff] }
 0x2db   : > { %v3779_v13 = vadd.f32 %v3747_v5, %v3693_v26  ;;  %3470 = vst.msk [vmem:[#allocation4 + $0xb0] sm:$0xff] %vm573_vm3, %v3438_v60  ;;  %v10756_v55 = vld [vmem:[#allocation3 + $0x98] sm:$0xff]  ;;  %8183 = vmatmul.msk.f32.gmra.mxu2 %vm573_vm3, %v4744_v25 }
 0x2dc   : > { %8216 = vmatmul.msk.f32.gmra.mxu3 %vm573_vm3, %v5083_v56  ;;  %v4120_v3 = vld [vmem:[#allocation4 + $0xa0] sm:$0xff]  ;;  %v4676_v15 = vadd.f32 %v4644_v22, %v4612_v58  ;;  %8162 = vmatmul.msk.f32.gmra.mxu1 %vm573_vm3, %v10756_v55  ;;  %4321 = vst.msk [vmem:[#allocation3 + $0xa1] sm:$0xff] %vm573_vm3, %v4282_v1  ;;  %v3407_v1 = vld [vmem:[#allocation4 + $0xb8] sm:$0xff] }
 0x2dd   : > { %v4152_v28 = vadd.f32 %v4120_v3, %v4088_v31  ;;  %3811 = vst.msk [vmem:[#allocation4 + $0xa8] sm:$0xff] %vm573_vm3, %v3779_v13  ;;  %8251 = vmatmul.msk.f32.gmra.mxu0 %vm573_vm3, %v10595_v20  ;;  %v4645_v58 = vld [vmem:[#allocation4 + $0x20] sm:$0xff] }
 0x2de   : > { %4708 = vst.msk [vmem:[#allocation4 + $0x18] sm:$0xff] %vm573_vm3, %v4676_v15  ;;  %v3325_v52 = vpop.f32.mrf.mxu2  ;;  %v4215_v51 = vld [vmem:[#allocation4 + $0x98] sm:$0xff] }
 0x2df   : > { %v3699_v26 = vpop.f32.mrf.mxu3  ;;  %4184 = vst.msk [vmem:[#allocation4 + $0xa0] sm:$0xff] %vm573_vm3, %v4152_v28  ;;  %v3375_v60 = vmul.f32 %v3325_v52, %v9530_v49  ;;  %v4251_v22 = vadd.f32 %v10772_v2, %v4215_v51  ;;  %v4745_v13 = vld [vmem:[#allocation3 + $0x41] sm:$0xff]  ;;  %v12630_v28 = vld [vmem:[#allocation66_spill] sm:$0xff] }
 0x2e0   : > { %4354 = vst.msk [vmem:[#allocation4 + $0x98] sm:$0xff] %vm573_vm3, %v12618_v7  ;;  %v5084_v3 = vld [vmem:[#allocation3 + $0x42] sm:$0xff]  ;;  %v4089_v52 = vmul.f32 %v10668_v10, %v12630_v28 }
 0x2e1   : > { %v3439_v20 = vadd.f32 %v3407_v1, %v3375_v60  ;;  %v4525_v5 = vpop.f32.mrf.mxu1  ;;  %v4283_v25 = vmax.f32 %v4251_v22, 0.0 }
 0x2e2   : > { %v3748_v56 = vld [vmem:[#allocation4 + $0xb0] sm:$0xff]  ;;  %v4613_v31 = vmul.f32 %v4525_v5, %v12622_v12  ;;  %v10778_v15 = vpop.f32.mrf.mxu0 }
 0x2e3   : > { %v3780_v46 = vadd.f32 %v3748_v56, %v3696_v42  ;;  %3471 = vst.msk [vmem:[#allocation4 + $0xb8] sm:$0xff] %vm573_vm3, %v3439_v20  ;;  %v10783_v51 = vld [vmem:[#allocation3 + $0xa0] sm:$0xff]  ;;  %8184 = vmatmul.msk.f32.gmra.mxu2 %vm573_vm3, %v4745_v13  ;;  %v3408_v56 = vld [vmem:[#allocation4 + $0xc0] sm:$0xff] }
 0x2e4   : > { %8217 = vmatmul.msk.f32.gmra.mxu3 %vm573_vm3, %v5084_v3  ;;  %v4121_v60 = vld [vmem:[#allocation4 + $0xa8] sm:$0xff]  ;;  %v4677_v22 = vadd.f32 %v4645_v58, %v4613_v31  ;;  %8163 = vmatmul.msk.f32.gmra.mxu1 %vm573_vm3, %v10783_v51  ;;  %4322 = vst.msk [vmem:[#allocation3 + $0xa9] sm:$0xff] %vm573_vm3, %v4283_v25 }
 0x2e5   : > { %v4153_v1 = vadd.f32 %v4121_v60, %v4089_v52  ;;  %3812 = vst.msk [vmem:[#allocation4 + $0xb0] sm:$0xff] %vm573_vm3, %v3780_v46  ;;  %8252 = vmatmul.msk.f32.gmra.mxu0 %vm573_vm3, %v10613_v24  ;;  %v4646_v31 = vld [vmem:[#allocation4 + $0x28] sm:$0xff] }
 0x2e6   : > { %4709 = vst.msk [vmem:[#allocation4 + $0x20] sm:$0xff] %vm573_vm3, %v4677_v22  ;;  %v3328_v10 = vpop.f32.mrf.mxu2  ;;  %v4216_v20 = vld [vmem:[#allocation4 + $0xa0] sm:$0xff] }
 0x2e7   : > { %v3702_v42 = vpop.f32.mrf.mxu3  ;;  %4185 = vst.msk [vmem:[#allocation4 + $0xa8] sm:$0xff] %vm573_vm3, %v4153_v1  ;;  %v3376_v5 = vmul.f32 %v3328_v10, %v9621_v61  ;;  %v4252_v58 = vadd.f32 %v10772_v2, %v4216_v20  ;;  %v4746_v52 = vld [vmem:[#allocation3 + $0x49] sm:$0xff] }
 0x2e8   : > { %4355 = vst.msk [vmem:[#allocation4 + $0xa0] sm:$0xff] %vm573_vm3, %v12618_v7  ;;  %v5085_v60 = vld [vmem:[#allocation3 + $0x4a] sm:$0xff] }
 0x2e9   : > { %v3440_v25 = vadd.f32 %v3408_v56, %v3376_v5  ;;  %v4528_v46 = vpop.f32.mrf.mxu1  ;;  %v4284_v13 = vmax.f32 %v4252_v58, 0.0  ;;  %v12631_v1 = vld [vmem:[#allocation61_spill] sm:$0xff] }
 0x2ea   : > { %v3749_v24 = vld [vmem:[#allocation4 + $0xb8] sm:$0xff]  ;;  %v4614_v3 = vmul.f32 %v4528_v46, %v12624_v53  ;;  %v10800_v22 = vpop.f32.mrf.mxu0  ;;  %v4090_v10 = vmul.f32 %v10688_v9, %v12631_v1 }
 0x2eb   : > { %v3781_v28 = vadd.f32 %v3749_v24, %v3699_v26  ;;  %3472 = vst.msk [vmem:[#allocation4 + $0xc0] sm:$0xff] %vm573_vm3, %v3440_v25  ;;  %v10805_v20 = vld [vmem:[#allocation3 + $0xa8] sm:$0xff]  ;;  %8185 = vmatmul.msk.f32.gmra.mxu2 %vm573_vm3, %v4746_v52  ;;  %v12632_v46 = vld [vmem:[#allocation68_spill] sm:$0xff]  ;;  %v4647_v52 = vld [vmem:[#allocation4 + $0x30] sm:$0xff] }
 0x2ec   : > { %8218 = vmatmul.msk.f32.gmra.mxu3 %vm573_vm3, %v5085_v60  ;;  %v4122_v5 = vld [vmem:[#allocation4 + $0xb0] sm:$0xff]  ;;  %v4678_v58 = vadd.f32 %v4646_v31, %v4614_v3  ;;  %8164 = vmatmul.msk.f32.gmra.mxu1 %vm573_vm3, %v10805_v20  ;;  %4323 = vst.msk [vmem:[#allocation3 + $0xb1] sm:$0xff] %vm573_vm3, %v4284_v13  ;;  %v3409_v3 = vld [vmem:[#allocation4 + $0xc8] sm:$0xff] }
 0x2ed   : > { %v4154_v56 = vadd.f32 %v4122_v5, %v4090_v10  ;;  %3813 = vst.msk [vmem:[#allocation4 + $0xb8] sm:$0xff] %vm573_vm3, %v3781_v28  ;;  %8253 = vmatmul.msk.f32.gmra.mxu0 %vm573_vm3, %v10633_v45  ;;  %v4747_v5 = vld [vmem:[#allocation3 + $0x51] sm:$0xff] }
 0x2ee   : > { %4710 = vst.msk [vmem:[#allocation4 + $0x28] sm:$0xff] %vm573_vm3, %v4678_v58  ;;  %v3331_v9 = vpop.f32.mrf.mxu2  ;;  %v4217_v25 = vld [vmem:[#allocation4 + $0xa8] sm:$0xff] }
 0x2ef   : > { %v3705_v26 = vpop.f32.mrf.mxu3  ;;  %4186 = vst.msk [vmem:[#allocation4 + $0xb0] sm:$0xff] %vm573_vm3, %v4154_v56  ;;  %v3377_v31 = vmul.f32 %v3331_v9, %v12632_v46  ;;  %v4253_v24 = vadd.f32 %v10772_v2, %v4217_v25  ;;  %v5086_v58 = vld [vmem:[#allocation3 + $0x52] sm:$0xff] }
 0x2f0   : > { %4356 = vst.msk [vmem:[#allocation4 + $0xa8] sm:$0xff] %vm573_vm3, %v12618_v7  ;;  %v12633_v56 = vld [vmem:[#allocation67_spill] sm:$0xff] }
 0x2f1   : > { %v3441_v13 = vadd.f32 %v3409_v3, %v3377_v31  ;;  %v4531_v28 = vpop.f32.mrf.mxu1  ;;  %v4285_v60 = vmax.f32 %v4253_v24, 0.0  ;;  %v4091_v9 = vmul.f32 %v10708_v17, %v12633_v56 }
 0x2f2   : > { %v3750_v45 = vld [vmem:[#allocation4 + $0xc0] sm:$0xff]  ;;  %v4615_v10 = vmul.f32 %v4531_v28, %v9313_v27  ;;  %v10822_v1 = vpop.f32.mrf.mxu0  ;;  %v12634_v28 = vld [vmem:[#allocation64_spill] sm:$0xff] }
 0x2f3   : > { %v3782_v8 = vadd.f32 %v3750_v45, %v3702_v42  ;;  %3473 = vst.msk [vmem:[#allocation4 + $0xc8] sm:$0xff] %vm573_vm3, %v3441_v13  ;;  %v10827_v25 = vld [vmem:[#allocation3 + $0xb0] sm:$0xff]  ;;  %8186 = vmatmul.msk.f32.gmra.mxu2 %vm573_vm3, %v4747_v5  ;;  %v4648_v5 = vld [vmem:[#allocation4 + $0x38] sm:$0xff] }
 0x2f4   : > { %8219 = vmatmul.msk.f32.gmra.mxu3 %vm573_vm3, %v5086_v58  ;;  %v4123_v31 = vld [vmem:[#allocation4 + $0xb8] sm:$0xff]  ;;  %v4679_v24 = vadd.f32 %v4647_v52, %v4615_v10  ;;  %8165 = vmatmul.msk.f32.gmra.mxu1 %vm573_vm3, %v10827_v25  ;;  %4324 = vst.msk [vmem:[#allocation3 + $0xb9] sm:$0xff] %vm573_vm3, %v4285_v60  ;;  %v3410_v10 = vld [vmem:[#allocation4 + $0xd0] sm:$0xff] }
 0x2f5   : > { %v4155_v3 = vadd.f32 %v4123_v31, %v4091_v9  ;;  %3814 = vst.msk [vmem:[#allocation4 + $0xc0] sm:$0xff] %vm573_vm3, %v3782_v8  ;;  %8254 = vmatmul.msk.f32.gmra.mxu0 %vm573_vm3, %v10653_v4  ;;  %v4748_v31 = vld [vmem:[#allocation3 + $0x59] sm:$0xff] }
 0x2f6   : > { %4711 = vst.msk [vmem:[#allocation4 + $0x30] sm:$0xff] %vm573_vm3, %v4679_v24  ;;  %v3334_v17 = vpop.f32.mrf.mxu2  ;;  %v4218_v13 = vld [vmem:[#allocation4 + $0xb0] sm:$0xff] }
 0x2f7   : > { %v3708_v42 = vpop.f32.mrf.mxu3  ;;  %4187 = vst.msk [vmem:[#allocation4 + $0xb8] sm:$0xff] %vm573_vm3, %v4155_v3  ;;  %v3378_v52 = vmul.f32 %v3334_v17, %v12634_v28  ;;  %v4254_v45 = vadd.f32 %v10772_v2, %v4218_v13  ;;  %v5087_v24 = vld [vmem:[#allocation3 + $0x5a] sm:$0xff] }
 0x2f8   : > { %4357 = vst.msk [vmem:[#allocation4 + $0xb0] sm:$0xff] %vm573_vm3, %v12618_v7  ;;  %v12635_v3 = vld [vmem:[#allocation71_spill] sm:$0xff] }
 0x2f9   : > { %v3442_v60 = vadd.f32 %v3410_v10, %v3378_v52  ;;  %v4534_v8 = vpop.f32.mrf.mxu1  ;;  %v4286_v58 = vmax.f32 %v4254_v45, 0.0  ;;  %v4092_v17 = vmul.f32 %v10729_v54, %v12635_v3 }
 0x2fa   : > { %v3751_v4 = vld [vmem:[#allocation4 + $0xc8] sm:$0xff]  ;;  %v4616_v9 = vmul.f32 %v4534_v8, %v9345_v63  ;;  %v10844_v56 = vpop.f32.mrf.mxu0 }
 0x2fb   : > { %v3783_v0 = vadd.f32 %v3751_v4, %v3705_v26  ;;  %3474 = vst.msk [vmem:[#allocation4 + $0xd0] sm:$0xff] %vm573_vm3, %v3442_v60  ;;  %v10849_v13 = vld [vmem:[#allocation3 + $0xb8] sm:$0xff]  ;;  %8187 = vmatmul.msk.f32.gmra.mxu2 %vm573_vm3, %v4748_v31  ;;  %v3411_v4 = vld [vmem:[#allocation4 + $0xd8] sm:$0xff] }
 0x2fc   : > { %8220 = vmatmul.msk.f32.gmra.mxu3 %vm573_vm3, %v5087_v24  ;;  %v4124_v52 = vld [vmem:[#allocation4 + $0xc0] sm:$0xff]  ;;  %v4680_v45 = vadd.f32 %v4648_v5, %v4616_v9  ;;  %8166 = vmatmul.msk.f32.gmra.mxu1 %vm573_vm3, %v10849_v13  ;;  %4325 = vst.msk [vmem:[#allocation3 + $0xc1] sm:$0xff] %vm573_vm3, %v4286_v58 }
 0x2fd   : > { %v4156_v10 = vadd.f32 %v4124_v52, %v4092_v17  ;;  %3815 = vst.msk [vmem:[#allocation4 + $0xc8] sm:$0xff] %vm573_vm3, %v3783_v0  ;;  %8255 = vmatmul.msk.f32.gmra.mxu0 %vm573_vm3, %v10673_v18  ;;  %v4649_v9 = vld [vmem:[#allocation4 + $0x40] sm:$0xff] }
 0x2fe   : > { %4712 = vst.msk [vmem:[#allocation4 + $0x38] sm:$0xff] %vm573_vm3, %v4680_v45  ;;  %v3337_v54 = vpop.f32.mrf.mxu2  ;;  %v4219_v60 = vld [vmem:[#allocation4 + $0xb8] sm:$0xff] }
 0x2ff   : > { %v3711_v26 = vpop.f32.mrf.mxu3  ;;  %4188 = vst.msk [vmem:[#allocation4 + $0xc0] sm:$0xff] %vm573_vm3, %v4156_v10  ;;  %v3379_v8 = vmul.f32 %v3337_v54, %v12609_v40  ;;  %v4255_v5 = vadd.f32 %v10772_v2, %v4219_v60  ;;  %v4749_v17 = vld [vmem:[#allocation3 + $0x61] sm:$0xff] }
 0x300   : > { %4358 = vst.msk [vmem:[#allocation4 + $0xb8] sm:$0xff] %vm573_vm3, %v12618_v7  ;;  %v5088_v52 = vld [vmem:[#allocation3 + $0x62] sm:$0xff] }
 0x301   : > { %v3443_v58 = vadd.f32 %v3411_v4, %v3379_v8  ;;  %v4537_v0 = vpop.f32.mrf.mxu1  ;;  %v4287_v31 = vmax.f32 %v4255_v5, 0.0  ;;  %v12636_v10 = vld [vmem:[#allocation69_spill] sm:$0xff] }
 0x302   : > { %v3752_v18 = vld [vmem:[#allocation4 + $0xd0] sm:$0xff]  ;;  %v4617_v24 = vmul.f32 %v4537_v0, %v9223_v19  ;;  %v10866_v45 = vpop.f32.mrf.mxu0  ;;  %v4093_v54 = vmul.f32 %v10751_v44, %v12636_v10 }
 0x303   : > { %v3784_v3 = vadd.f32 %v3752_v18, %v3708_v42  ;;  %3475 = vst.msk [vmem:[#allocation4 + $0xd8] sm:$0xff] %vm573_vm3, %v3443_v58  ;;  %v10871_v60 = vld [vmem:[#allocation3 + $0xc0] sm:$0xff]  ;;  %8188 = vmatmul.msk.f32.gmra.mxu2 %vm573_vm3, %v4749_v17  ;;  %v3412_v18 = vld [vmem:[#allocation4 + $0xe0] sm:$0xff] }
 0x304   : > { %8221 = vmatmul.msk.f32.gmra.mxu3 %vm573_vm3, %v5088_v52  ;;  %v4125_v8 = vld [vmem:[#allocation4 + $0xc8] sm:$0xff]  ;;  %v4681_v5 = vadd.f32 %v4649_v9, %v4617_v24  ;;  %8167 = vmatmul.msk.f32.gmra.mxu1 %vm573_vm3, %v10871_v60  ;;  %4326 = vst.msk [vmem:[#allocation3 + $0xc9] sm:$0xff] %vm573_vm3, %v4287_v31 }
 0x305   : > { %v4157_v4 = vadd.f32 %v4125_v8, %v4093_v54  ;;  %3816 = vst.msk [vmem:[#allocation4 + $0xd0] sm:$0xff] %vm573_vm3, %v3784_v3  ;;  %8256 = vmatmul.msk.f32.gmra.mxu0 %vm573_vm3, %v10693_v21  ;;  %v4650_v24 = vld [vmem:[#allocation4 + $0x48] sm:$0xff] }
 0x306   : > { %4713 = vst.msk [vmem:[#allocation4 + $0x40] sm:$0xff] %vm573_vm3, %v4681_v5  ;;  %v3340_v44 = vpop.f32.mrf.mxu2  ;;  %v4220_v58 = vld [vmem:[#allocation4 + $0xc0] sm:$0xff] }
 0x307   : > { %v3714_v42 = vpop.f32.mrf.mxu3  ;;  %4189 = vst.msk [vmem:[#allocation4 + $0xc8] sm:$0xff] %vm573_vm3, %v4157_v4  ;;  %v3380_v0 = vmul.f32 %v3340_v44, %v12611_v41  ;;  %v4256_v9 = vadd.f32 %v10772_v2, %v4220_v58  ;;  %v4750_v54 = vld [vmem:[#allocation3 + $0x69] sm:$0xff] }
 0x308   : > { %4359 = vst.msk [vmem:[#allocation4 + $0xc0] sm:$0xff] %vm573_vm3, %v12618_v7  ;;  %v5089_v8 = vld [vmem:[#allocation3 + $0x6a] sm:$0xff] }
 0x309   : > { %v3444_v31 = vadd.f32 %v3412_v18, %v3380_v0  ;;  %v4540_v3 = vpop.f32.mrf.mxu1  ;;  %v4288_v17 = vmax.f32 %v4256_v9, 0.0  ;;  %v12637_v4 = vld [vmem:[#allocation73_spill] sm:$0xff] }
 0x30a   : > { %v3753_v21 = vld [vmem:[#allocation4 + $0xd8] sm:$0xff]  ;;  %v4618_v52 = vmul.f32 %v4540_v3, %v9370_v11  ;;  %v10888_v5 = vpop.f32.mrf.mxu0  ;;  %v4094_v44 = vmul.f32 %v10778_v15, %v12637_v4 }
 0x30b   : > { %v3785_v10 = vadd.f32 %v3753_v21, %v3711_v26  ;;  %3476 = vst.msk [vmem:[#allocation4 + $0xe0] sm:$0xff] %vm573_vm3, %v3444_v31  ;;  %v10893_v58 = vld [vmem:[#allocation3 + $0xc8] sm:$0xff]  ;;  %8189 = vmatmul.msk.f32.gmra.mxu2 %vm573_vm3, %v4750_v54  ;;  %v12638_v3 = vld [vmem:[#allocation72_spill] sm:$0xff]  ;;  %v4651_v54 = vld [vmem:[#allocation4 + $0x50] sm:$0xff] }
 0x30c   : > { %8222 = vmatmul.msk.f32.gmra.mxu3 %vm573_vm3, %v5089_v8  ;;  %v4126_v0 = vld [vmem:[#allocation4 + $0xd0] sm:$0xff]  ;;  %v4682_v9 = vadd.f32 %v4650_v24, %v4618_v52  ;;  %8168 = vmatmul.msk.f32.gmra.mxu1 %vm573_vm3, %v10893_v58  ;;  %4327 = vst.msk [vmem:[#allocation3 + $0xd1] sm:$0xff] %vm573_vm3, %v4288_v17  ;;  %v3413_v52 = vld [vmem:[#allocation4 + $0xe8] sm:$0xff] }
 0x30d   : > { %v4158_v18 = vadd.f32 %v4126_v0, %v4094_v44  ;;  %3817 = vst.msk [vmem:[#allocation4 + $0xd8] sm:$0xff] %vm573_vm3, %v3785_v10  ;;  %8257 = vmatmul.msk.f32.gmra.mxu0 %vm573_vm3, %v10713_v29  ;;  %v4751_v0 = vld [vmem:[#allocation3 + $0x71] sm:$0xff] }
 0x30e   : > { %4714 = vst.msk [vmem:[#allocation4 + $0x48] sm:$0xff] %vm573_vm3, %v4682_v9  ;;  %v3343_v15 = vpop.f32.mrf.mxu2  ;;  %v4221_v31 = vld [vmem:[#allocation4 + $0xc8] sm:$0xff] }
 0x30f   : > { %v3717_v26 = vpop.f32.mrf.mxu3  ;;  %4190 = vst.msk [vmem:[#allocation4 + $0xd0] sm:$0xff] %vm573_vm3, %v4158_v18  ;;  %v3381_v24 = vmul.f32 %v3343_v15, %v12638_v3  ;;  %v4257_v21 = vadd.f32 %v10772_v2, %v4221_v31  ;;  %v5090_v9 = vld [vmem:[#allocation3 + $0x72] sm:$0xff]  ;;  %v12639_v18 = vld [vmem:[#allocation76_spill] sm:$0xff] }
 0x310   : > { %4360 = vst.msk [vmem:[#allocation4 + $0xc8] sm:$0xff] %vm573_vm3, %v12618_v7  ;;  %v4095_v15 = vmul.f32 %v10800_v22, %v12639_v18  ;;  %v12641_v18 = vld [vmem:[#allocation75_spill] sm:$0xff] }
 0x311   : > { %v3445_v17 = vadd.f32 %v3413_v52, %v3381_v24  ;;  %v4543_v10 = vpop.f32.mrf.mxu1  ;;  %v4289_v8 = vmax.f32 %v4257_v21, 0.0 }
 0x312   : > { %v3754_v29 = vld [vmem:[#allocation4 + $0xe0] sm:$0xff]  ;;  %v4619_v44 = vmul.f32 %v4543_v10, %v9401_v34  ;;  %v10910_v4 = vpop.f32.mrf.mxu0  ;;  %v12640_v10 = vld [vmem:[#allocation78_spill] sm:$0xff] }
 0x313   : > { %v3786_v3 = vadd.f32 %v3754_v29, %v3714_v42  ;;  %3477 = vst.msk [vmem:[#allocation4 + $0xe8] sm:$0xff] %vm573_vm3, %v3445_v17  ;;  %v10915_v31 = vld [vmem:[#allocation3 + $0xd0] sm:$0xff]  ;;  %8190 = vmatmul.msk.f32.gmra.mxu2 %vm573_vm3, %v4751_v0  ;;  %v8307_v29 = vld [vmem:[%s12317_s5 + $0x28] sm:$0xff] }
 0x314   : > { %8223 = vmatmul.msk.f32.gmra.mxu3 %vm573_vm3, %v5090_v9  ;;  %v4127_v24 = vld [vmem:[#allocation4 + $0xd8] sm:$0xff]  ;;  %v4683_v21 = vadd.f32 %v4651_v54, %v4619_v44  ;;  %8169 = vmatmul.msk.f32.gmra.mxu1 %vm573_vm3, %v10915_v31  ;;  %4328 = vst.msk [vmem:[#allocation3 + $0xd9] sm:$0xff] %vm573_vm3, %v4289_v8 }
 0x315   : > { %v4159_v52 = vadd.f32 %v4127_v24, %v4095_v15  ;;  %3818 = vst.msk [vmem:[#allocation4 + $0xe0] sm:$0xff] %vm573_vm3, %v3786_v3  ;;  %8258 = vmatmul.msk.f32.gmra.mxu0 %vm573_vm3, %v10734_v59  ;;  %v8340_v3 = vld [vmem:[%s12317_s5 + $0x30] sm:$0xff]  ;;  %v3414_v59 = vld [vmem:[#allocation4 + $0xf0] sm:$0xff]  ;;  %6302 = vmatpush.msra.mxu2 %v8307_v29  ;;  %v4652_v9 = vld [vmem:[#allocation4 + $0x58] sm:$0xff] }
 0x316   : > { %4715 = vst.msk [vmem:[#allocation4 + $0x50] sm:$0xff] %vm573_vm3, %v4683_v21  ;;  %v3346_v22 = vpop.f32.mrf.mxu2  ;;  %v4222_v17 = vld [vmem:[#allocation4 + $0xd0] sm:$0xff]  ;;  %6673 = vmatpush.msra.mxu3 %v8340_v3 }
 0x317   : > { %v3720_v42 = vpop.f32.mrf.mxu3  ;;  %4191 = vst.msk [vmem:[#allocation4 + $0xd8] sm:$0xff] %vm573_vm3, %v4159_v52  ;;  %v3382_v54 = vmul.f32 %v3346_v22, %v12640_v10  ;;  %v4258_v8 = vadd.f32 %v10772_v2, %v4222_v17  ;;  %v10938_v52 = vld [vmem:[#allocation3 + $0x79] sm:$0xff]  ;;  %v4096_v10 = vmul.f32 %v10822_v1, %v12641_v18 }
 0x318   : > { %4361 = vst.msk [vmem:[#allocation4 + $0xd0] sm:$0xff] %vm573_vm3, %v12618_v7  ;;  %v5091_v22 = vld [vmem:[#allocation3 + $0x7a] sm:$0xff] }
 0x319   : > { %v3446_v44 = vadd.f32 %v3414_v59, %v3382_v54  ;;  %v4546_v0 = vpop.f32.mrf.mxu1  ;;  %v4290_v15 = vmax.f32 %v4258_v8, 0.0 }
 0x31a   : > { %v3755_v24 = vld [vmem:[#allocation4 + $0xe8] sm:$0xff]  ;;  %v4620_v21 = vmul.f32 %v4546_v0, %v9309_v38  ;;  %v10940_v17 = vpop.f32.mrf.mxu0 }
 0x31b   : > { %v3787_v29 = vadd.f32 %v3755_v24, %v3717_v26  ;;  %3478 = vst.msk [vmem:[#allocation4 + $0xf0] sm:$0xff] %vm573_vm3, %v3446_v44  ;;  %v10945_v50 = vld [vmem:[#allocation3 + $0xd8] sm:$0xff]  ;;  %8191 = vmatmul.msk.f32.gmra.mxu2 %vm573_vm3, %v10938_v52  ;;  %v12642_v44 = vld [vmem:[#allocation77_spill] sm:$0xff]  ;;  %v3415_v24 = vld [vmem:[#allocation4 + $0xf8] sm:$0xff] }
 0x31c   : > { %8224 = vmatmul.msk.f32.gmra.mxu3 %vm573_vm3, %v5091_v22  ;;  %v4128_v54 = vld [vmem:[#allocation4 + $0xe0] sm:$0xff]  ;;  %v4684_v8 = vadd.f32 %v4652_v9, %v4620_v21  ;;  %8170 = vmatmul.msk.f32.gmra.mxu1 %vm573_vm3, %v10945_v50  ;;  %4329 = vst.msk [vmem:[#allocation3 + $0xe1] sm:$0xff] %vm573_vm3, %v4290_v15 }
 0x31d   : > { %v4160_v3 = vadd.f32 %v4128_v54, %v4096_v10  ;;  %3819 = vst.msk [vmem:[#allocation4 + $0xe8] sm:$0xff] %vm573_vm3, %v3787_v29  ;;  %8259 = vmatmul.msk.f32.gmra.mxu0 %vm573_vm3, %v10756_v55  ;;  %v4653_v21 = vld [vmem:[#allocation4 + $0x60] sm:$0xff] }
 0x31e   : > { %4716 = vst.msk [vmem:[#allocation4 + $0x58] sm:$0xff] %vm573_vm3, %v4684_v8  ;;  %v3349_v1 = vpop.f32.mrf.mxu2  ;;  %v4223_v59 = vld [vmem:[#allocation4 + $0xd8] sm:$0xff] }
 0x31f   : > { %v3723_v26 = vpop.f32.mrf.mxu3  ;;  %4192 = vst.msk [vmem:[#allocation4 + $0xe0] sm:$0xff] %vm573_vm3, %v4160_v3  ;;  %v3383_v0 = vmul.f32 %v3349_v1, %v12642_v44  ;;  %v4259_v9 = vadd.f32 %v10772_v2, %v4223_v59  ;;  %v10963_v54 = vld [vmem:[#allocation3 + $0x81] sm:$0xff]  ;;  %v12644_v3 = vld [vmem:[#allocation55_spill] sm:$0xff] }
 0x320   : > { %4362 = vst.msk [vmem:[#allocation4 + $0xd8] sm:$0xff] %vm573_vm3, %v12618_v7  ;;  %v5092_v8 = vld [vmem:[#allocation3 + $0x82] sm:$0xff]  ;;  %v4097_v1 = vmul.f32 %v10844_v56, %v12644_v3 }
 0x321   : > { %v3447_v10 = vadd.f32 %v3415_v24, %v3383_v0  ;;  %v4549_v15 = vpop.f32.mrf.mxu1  ;;  %v4291_v22 = vmax.f32 %v4259_v9, 0.0  ;;  %12643 = vst [vmem:[#allocation28_spill] sm:$0xff] %v10963_v54  ;;  %v8373_v0 = vld [vmem:[%s12317_s5 + $0x38] sm:$0xff] }
 0x322   : > { %v3756_v55 = vld [vmem:[#allocation4 + $0xf0] sm:$0xff]  ;;  %v4621_v29 = vmul.f32 %v4549_v15, %v9422_v6  ;;  %v10965_v18 = vpop.f32.mrf.mxu0  ;;  %7044 = vmatpush.msra.mxu0 %v8373_v0  ;;  %v10991_v0 = vld [vmem:[#allocation3 + $0x89] sm:$0xff] }
 0x323   : > { %v3788_v59 = vadd.f32 %v3756_v55, %v3720_v42  ;;  %3479 = vst.msk [vmem:[#allocation4 + $0xf8] sm:$0xff] %vm573_vm3, %v3447_v10  ;;  %v10970_v44 = vld [vmem:[#allocation3 + $0xe0] sm:$0xff]  ;;  %8192 = vmatmul.msk.f32.gmra.mxu2 %vm573_vm3, %v10963_v54  ;;  %v4980_v10 = vld [vmem:[#allocation4] sm:$0xff] }
 0x324   : > { %8225 = vmatmul.msk.f32.gmra.mxu3 %vm573_vm3, %v5092_v8  ;;  %v4129_v9 = vld [vmem:[#allocation4 + $0xe8] sm:$0xff]  ;;  %v4685_v24 = vadd.f32 %v4653_v21, %v4621_v29  ;;  %8171 = vmatmul.msk.f32.gmra.mxu1 %vm573_vm3, %v10970_v44  ;;  %4330 = vst.msk [vmem:[#allocation3 + $0xe9] sm:$0xff] %vm573_vm3, %v4291_v22  ;;  %v11046_v54 = vld [vmem:[#allocation3 + $0x99] sm:$0xff] }
 0x325   : > { %v4161_v56 = vadd.f32 %v4129_v9, %v4097_v1  ;;  %3820 = vst.msk [vmem:[#allocation4 + $0xf0] sm:$0xff] %vm573_vm3, %v3788_v59  ;;  %8260 = vmatmul.msk.f32.gmra.mxu0 %vm573_vm3, %v10783_v51  ;;  %v4654_v8 = vld [vmem:[#allocation4 + $0x68] sm:$0xff] }
 0x326   : > { %4717 = vst.msk [vmem:[#allocation4 + $0x60] sm:$0xff] %vm573_vm3, %v4685_v24  ;;  %v4884_v42 = vpop.f32.mrf.mxu2  ;;  %v4224_v55 = vld [vmem:[#allocation4 + $0xe0] sm:$0xff] }
 0x327   : > { %v5223_v15 = vpop.f32.mrf.mxu3  ;;  %4193 = vst.msk [vmem:[#allocation4 + $0xe8] sm:$0xff] %vm573_vm3, %v4161_v56  ;;  %v5012_v21 = vadd.f32 %v4980_v10, %v4884_v42  ;;  %v4260_v29 = vadd.f32 %v10772_v2, %v4224_v55  ;;  %v5093_v9 = vld [vmem:[#allocation3 + $0x8a] sm:$0xff]  ;;  %v12646_v56 = vld [vmem:[#allocation80_spill] sm:$0xff] }
 0x328   : > { %4363 = vst.msk [vmem:[#allocation4 + $0xe0] sm:$0xff] %vm573_vm3, %v12618_v7  ;;  %v4098_v42 = vmul.f32 %v10866_v45, %v12646_v56  ;;  %v12647_v56 = vld [vmem:[#allocation27_spill] sm:$0xff] }
 0x329   : > { %5044 = vst.msk [vmem:[#allocation4] sm:$0xff] %vm573_vm3, %v5012_v21  ;;  %v4552_v22 = vpop.f32.mrf.mxu1  ;;  %v4292_v1 = vmax.f32 %v4260_v29, 0.0  ;;  %v8406_v21 = vld [vmem:[%s12317_s5 + $0x40] sm:$0xff] }
 0x32a   : > { %v3757_v51 = vld [vmem:[#allocation4 + $0xf8] sm:$0xff]  ;;  %v4622_v59 = vmul.f32 %v4552_v22, %v9449_v23  ;;  %12645 = vst [vmem:[#allocation24_spill] sm:$0xff] %v10991_v0  ;;  %v10993_v24 = vpop.f32.mrf.mxu0  ;;  %7383 = vmatpush.msra.mxu1 %v8406_v21  ;;  %v4655_v21 = vld [vmem:[#allocation4 + $0x70] sm:$0xff] }
 0x32b   : > { %v3789_v10 = vadd.f32 %v3757_v51, %v3723_v26  ;;  %v10997_v55 = vld [vmem:[#allocation3 + $0xe8] sm:$0xff]  ;;  %8193 = vmatmul.msk.f32.gmra.mxu2 %vm573_vm3, %v10991_v0  ;;  %4331 = vst.msk [vmem:[#allocation3 + $0xf1] sm:$0xff] %vm573_vm3, %v4292_v1  ;;  %v4981_v1 = vld [vmem:[#allocation4 + $0x8] sm:$0xff] }
 0x32c   : > { %8226 = vmatmul.msk.f32.gmra.mxu3 %vm573_vm3, %v5093_v9  ;;  %v4130_v29 = vld [vmem:[#allocation4 + $0xf0] sm:$0xff]  ;;  %v4686_v22 = vadd.f32 %v4654_v8, %v4622_v59  ;;  %8172 = vmatmul.msk.f32.gmra.mxu1 %vm573_vm3, %v10997_v55  ;;  %v5319_v8 = vmul.f32 %v5223_v15, %v12647_v56 }
 0x32d   : > { %v4162_v45 = vadd.f32 %v4130_v29, %v4098_v42  ;;  %3821 = vst.msk [vmem:[#allocation4 + $0xf8] sm:$0xff] %vm573_vm3, %v3789_v10  ;;  %8261 = vmatmul.msk.f32.gmra.mxu0 %vm573_vm3, %v10805_v20  ;;  %v5094_v15 = vld [vmem:[#allocation3 + $0x92] sm:$0xff] }
 0x32e   : > { %4718 = vst.msk [vmem:[#allocation4 + $0x68] sm:$0xff] %vm573_vm3, %v4686_v22  ;;  %v4887_v26 = vpop.f32.mrf.mxu2  ;;  %v4225_v9 = vld [vmem:[#allocation4 + $0xe8] sm:$0xff] }
 0x32f   : > { %v5226_v51 = vpop.f32.mrf.mxu3  ;;  %4194 = vst.msk [vmem:[#allocation4 + $0xf0] sm:$0xff] %vm573_vm3, %v4162_v45  ;;  %v5013_v59 = vadd.f32 %v4981_v1, %v4887_v26  ;;  %v4261_v3 = vadd.f32 %v10772_v2, %v4225_v9  ;;  %v11021_v45 = vld [vmem:[#allocation3 + $0x91] sm:$0xff]  ;;  %v12649_v1 = vld [vmem:[#allocation81_spill] sm:$0xff] }
 0x330   : > { %v5351_v42 = vld [vmem:[#allocation4] sm:$0xff]  ;;  %4364 = vst.msk [vmem:[#allocation4 + $0xe8] sm:$0xff] %vm573_vm3, %v12618_v7  ;;  %v4099_v9 = vmul.f32 %v10888_v5, %v12649_v1 }
 0x331   : > { %v5383_v10 = vadd.f32 %v5351_v42, %v5319_v8  ;;  %5045 = vst.msk [vmem:[#allocation4 + $0x8] sm:$0xff] %vm573_vm3, %v5013_v59  ;;  %v4555_v20 = vpop.f32.mrf.mxu1  ;;  %v4293_v29 = vmax.f32 %v4261_v3, 0.0  ;;  %v4982_v42 = vld [vmem:[#allocation4 + $0x10] sm:$0xff] }
 0x332   : > { %v4623_v22 = vmul.f32 %v4555_v20, %v9368_v14  ;;  %v11019_v0 = vld [vmem:[#allocation3 + $0xf0] sm:$0xff]  ;;  %12648 = vst [vmem:[#allocation82_spill] sm:$0xff] %v11021_v45  ;;  %v11023_v26 = vpop.f32.mrf.mxu0 }
 0x333   : > { %5415 = vst.msk [vmem:[#allocation4] sm:$0xff] %vm573_vm3, %v5383_v10  ;;  %8194 = vmatmul.msk.f32.gmra.mxu2 %vm573_vm3, %v11021_v45 }
 0x334   : > { %8227 = vmatmul.msk.f32.gmra.mxu3 %vm573_vm3, %v5094_v15  ;;  %v4131_v3 = vld [vmem:[#allocation4 + $0xf8] sm:$0xff]  ;;  %v4687_v8 = vadd.f32 %v4655_v21, %v4623_v22  ;;  %8173 = vmatmul.msk.f32.gmra.mxu1 %vm573_vm3, %v11019_v0  ;;  %4332 = vst.msk [vmem:[#allocation3 + $0xf9] sm:$0xff] %vm573_vm3, %v4293_v29  ;;  %v12650_v15 = vld [vmem:[#allocation21_spill] sm:$0xff] }
 0x335   : > { %v4163_v59 = vadd.f32 %v4131_v3, %v4099_v9  ;;  %8262 = vmatmul.msk.f32.gmra.mxu0 %vm573_vm3, %v10827_v25  ;;  %v5320_v56 = vmul.f32 %v5226_v51, %v12650_v15  ;;  %v12651_v29 = vld [vmem:[#allocation25_spill] sm:$0xff]  ;;  %v5095_v51 = vld [vmem:[#allocation3 + $0x9a] sm:$0xff] }
 0x336   : > { %4719 = vst.msk [vmem:[#allocation4 + $0x70] sm:$0xff] %vm573_vm3, %v4687_v8  ;;  %v4890_v5 = vpop.f32.mrf.mxu2  ;;  %v4226_v20 = vld [vmem:[#allocation4 + $0xf0] sm:$0xff]  ;;  %v5690_v25 = vmul.f32 %v10910_v4, %v12651_v29  ;;  %v4656_v8 = vld [vmem:[#allocation4 + $0x78] sm:$0xff] }
 0x337   : > { %v5229_v10 = vpop.f32.mrf.mxu3  ;;  %4195 = vst.msk [vmem:[#allocation4 + $0xf8] sm:$0xff] %vm573_vm3, %v4163_v59  ;;  %v5014_v21 = vadd.f32 %v4982_v42, %v4890_v5  ;;  %v4262_v22 = vadd.f32 %v10772_v2, %v4226_v20  ;;  %v11071_v15 = vld [vmem:[#allocation3 + $0xa1] sm:$0xff] }
 0x338   : > { %v5352_v1 = vld [vmem:[#allocation4 + $0x8] sm:$0xff]  ;;  %4365 = vst.msk [vmem:[#allocation4 + $0xf0] sm:$0xff] %vm573_vm3, %v12618_v7 }
 0x339   : > { %v5384_v9 = vadd.f32 %v5352_v1, %v5320_v56  ;;  %5046 = vst.msk [vmem:[#allocation4 + $0x10] sm:$0xff] %vm573_vm3, %v5014_v21  ;;  %v4558_v3 = vpop.f32.mrf.mxu1  ;;  %v4294_v45 = vmax.f32 %v4262_v22, 0.0  ;;  %v4983_v21 = vld [vmem:[#allocation4 + $0x18] sm:$0xff] }
 0x33a   : > { %v4624_v59 = vmul.f32 %v4558_v3, %v9467_v36  ;;  %v11048_v5 = vpop.f32.mrf.mxu0  ;;  %v5722_v42 = vld [vmem:[#allocation4] sm:$0xff]  ;;  %v12652_v3 = vld [vmem:[#allocation30_spill] sm:$0xff] }
 0x33b   : > { %5416 = vst.msk [vmem:[#allocation4 + $0x8] sm:$0xff] %vm573_vm3, %v5384_v9  ;;  %v11051_v20 = vld [vmem:[#allocation3 + $0xf8] sm:$0xff]  ;;  %8195 = vmatmul.msk.f32.gmra.mxu2 %vm573_vm3, %v11046_v54  ;;  %v5754_v4 = vadd.f32 %v5722_v42, %v5690_v25 }
 0x33c   : > { %8228 = vmatmul.msk.f32.gmra.mxu3 %vm573_vm3, %v5095_v51  ;;  %v4688_v56 = vadd.f32 %v4656_v8, %v4624_v59  ;;  %8174 = vmatmul.msk.f32.gmra.mxu1 %vm573_vm3, %v11051_v20  ;;  %4333 = vst.msk [vmem:[#allocation3 + $0x101] sm:$0xff] %vm573_vm3, %v4294_v45  ;;  %v5321_v51 = vmul.f32 %v5229_v10, %v12652_v3  ;;  %v5096_v10 = vld [vmem:[#allocation3 + $0xa2] sm:$0xff] }
 0x33d   : > { %8263 = vmatmul.msk.f32.gmra.mxu0 %vm573_vm3, %v10849_v13  ;;  %5786 = vst.msk [vmem:[#allocation4] sm:$0xff] %vm573_vm3, %v5754_v4  ;;  %v5691_v13 = vmul.f32 %v10940_v17, %v12619_v48  ;;  %v4657_v4 = vld [vmem:[#allocation4 + $0x80] sm:$0xff] }
 0x33e   : > { %4720 = vst.msk [vmem:[#allocation4 + $0x78] sm:$0xff] %vm573_vm3, %v4688_v56  ;;  %v4893_v1 = vpop.f32.mrf.mxu2  ;;  %v4227_v9 = vld [vmem:[#allocation4 + $0xf8] sm:$0xff] }
 0x33f   : > { %v5232_v22 = vpop.f32.mrf.mxu3  ;;  %v5015_v25 = vadd.f32 %v4983_v21, %v4893_v1  ;;  %v4263_v8 = vadd.f32 %v10772_v2, %v4227_v9  ;;  %4366 = vst.msk [vmem:[#allocation4 + $0xf8] sm:$0xff] %vm573_vm3, %v12618_v7  ;;  %v5818_v7 = vld [vmem:[#allocation3 + $0x11] sm:$0xff] }
 0x340   : > { %v5353_v45 = vld [vmem:[#allocation4 + $0x10] sm:$0xff] }
 0x341   : > { %v5385_v59 = vadd.f32 %v5353_v45, %v5321_v51  ;;  %5047 = vst.msk [vmem:[#allocation4 + $0x18] sm:$0xff] %vm573_vm3, %v5015_v25  ;;  %v4561_v42 = vpop.f32.mrf.mxu1  ;;  %v4295_v56 = vmax.f32 %v4263_v8, 0.0  ;;  %v4984_v51 = vld [vmem:[#allocation4 + $0x20] sm:$0xff]  ;;  %v12653_v8 = vld [vmem:[#allocation34_spill] sm:$0xff] }
 0x342   : > { %v4625_v29 = vmul.f32 %v4561_v42, %v12598_v37  ;;  %v11073_v1 = vpop.f32.mrf.mxu0  ;;  %v5723_v2 = vld [vmem:[#allocation4 + $0x8] sm:$0xff]  ;;  %v5322_v45 = vmul.f32 %v5232_v22, %v12653_v8 }
 0x343   : > { %5417 = vst.msk [vmem:[#allocation4 + $0x10] sm:$0xff] %vm573_vm3, %v5385_v59  ;;  %8196 = vmatmul.msk.f32.gmra.mxu2 %vm573_vm3, %v11071_v15  ;;  %v5755_v17 = vadd.f32 %v5723_v2, %v5691_v13  ;;  %v5097_v2 = vld [vmem:[#allocation3 + $0xaa] sm:$0xff] }
 0x344   : > { %8229 = vmatmul.msk.f32.gmra.mxu3 %vm573_vm3, %v5096_v10  ;;  %v4689_v21 = vadd.f32 %v4657_v4, %v4625_v29  ;;  %8275 = vmatmul.msk.f32.vlgmr.msrb.gmra.mxu1 %vm573_vm3, %v5818_v7  ;;  %4334 = vst.msk [vmem:[#allocation3 + $0x109] sm:$0xff] %vm573_vm3, %v4295_v56  ;;  %v5692_v29 = vmul.f32 %v10965_v18, %v12620_v47  ;;  %v4658_v56 = vld [vmem:[#allocation4 + $0x88] sm:$0xff]  ;;  %v5819_v18 = vld [vmem:[#allocation3 + $0x19] sm:$0xff] }
 0x345   : > { %8264 = vmatmul.msk.f32.gmra.mxu0 %vm573_vm3, %v10871_v60  ;;  %5787 = vst.msk [vmem:[#allocation4 + $0x8] sm:$0xff] %vm573_vm3, %v5755_v17  ;;  %v11090_v10 = vld [vmem:[#allocation3 + $0xa9] sm:$0xff] }
 0x346   : > { %4721 = vst.msk [vmem:[#allocation4 + $0x80] sm:$0xff] %vm573_vm3, %v4689_v21  ;;  %v4896_v9 = vpop.f32.mrf.mxu2 }
 0x347   : > { %v5235_v25 = vpop.f32.mrf.mxu3  ;;  %v5016_v59 = vadd.f32 %v4984_v51, %v4896_v9  ;;  %v4985_v51 = vld [vmem:[#allocation4 + $0x28] sm:$0xff] }
 0x348   : > { %v5354_v42 = vld [vmem:[#allocation4 + $0x18] sm:$0xff] }
 0x349   : > { %v5386_v13 = vadd.f32 %v5354_v42, %v5322_v45  ;;  %5048 = vst.msk [vmem:[#allocation4 + $0x20] sm:$0xff] %vm573_vm3, %v5016_v59  ;;  %v4564_v4 = vpop.f32.mrf.mxu1  ;;  %v5323_v59 = vmul.f32 %v5235_v25, %v9182_v62 }
 0x34a   : > { %v4626_v60 = vmul.f32 %v4564_v4, %v12627_v30  ;;  %v11092_v7 = vpop.f32.mrf.mxu0  ;;  %v5724_v17 = vld [vmem:[#allocation4 + $0x10] sm:$0xff] }
 0x34b   : > { %5418 = vst.msk [vmem:[#allocation4 + $0x18] sm:$0xff] %vm573_vm3, %v5386_v13  ;;  %8197 = vmatmul.msk.f32.gmra.mxu2 %vm573_vm3, %v11090_v10  ;;  %v5756_v22 = vadd.f32 %v5724_v17, %v5692_v29  ;;  %v5693_v29 = vmul.f32 %v10993_v24, %v9082_v57  ;;  %v5098_v17 = vld [vmem:[#allocation3 + $0xb2] sm:$0xff]  ;;  %v11116_v24 = vld [vmem:[#allocation3 + $0x21] sm:$0xff] }
 0x34c   : > { %8230 = vmatmul.msk.f32.gmra.mxu3 %vm573_vm3, %v5097_v2  ;;  %v4690_v21 = vadd.f32 %v4658_v56, %v4626_v60  ;;  %8276 = vmatmul.msk.f32.gmra.mxu1 %vm573_vm3, %v5819_v18  ;;  %v4659_v60 = vld [vmem:[#allocation4 + $0x90] sm:$0xff] }
 0x34d   : > { %8265 = vmatmul.msk.f32.gmra.mxu0 %vm573_vm3, %v10893_v58  ;;  %5788 = vst.msk [vmem:[#allocation4 + $0x10] sm:$0xff] %vm573_vm3, %v5756_v22  ;;  %v11108_v2 = vld [vmem:[#allocation3 + $0xb1] sm:$0xff] }
 0x34e   : > { %4722 = vst.msk [vmem:[#allocation4 + $0x88] sm:$0xff] %vm573_vm3, %v4690_v21  ;;  %v4899_v9 = vpop.f32.mrf.mxu2 }
 0x34f   : > { %v5238_v45 = vpop.f32.mrf.mxu3  ;;  %v5017_v42 = vadd.f32 %v4985_v51, %v4899_v9  ;;  %v4986_v51 = vld [vmem:[#allocation4 + $0x30] sm:$0xff] }
 0x350   : > { %v5355_v13 = vld [vmem:[#allocation4 + $0x20] sm:$0xff] }
 0x351   : > { %v5387_v4 = vadd.f32 %v5355_v13, %v5323_v59  ;;  %5049 = vst.msk [vmem:[#allocation4 + $0x28] sm:$0xff] %vm573_vm3, %v5017_v42  ;;  %v4567_v56 = vpop.f32.mrf.mxu1  ;;  %v12654_v42 = vld [vmem:[#allocation36_spill] sm:$0xff] }
 0x352   : > { %v4627_v58 = vmul.f32 %v4567_v56, %v12600_v43  ;;  %v11110_v18 = vpop.f32.mrf.mxu0  ;;  %v5725_v22 = vld [vmem:[#allocation4 + $0x18] sm:$0xff]  ;;  %v5324_v13 = vmul.f32 %v5238_v45, %v12654_v42 }
 0x353   : > { %5419 = vst.msk [vmem:[#allocation4 + $0x20] sm:$0xff] %vm573_vm3, %v5387_v4  ;;  %8198 = vmatmul.msk.f32.gmra.mxu2 %vm573_vm3, %v11108_v2  ;;  %v5757_v25 = vadd.f32 %v5725_v22, %v5693_v29  ;;  %v5694_v29 = vmul.f32 %v11023_v26, %v12622_v12  ;;  %v11129_v22 = vld [vmem:[#allocation3 + $0xb9] sm:$0xff]  ;;  %v11137_v26 = vld [vmem:[#allocation3 + $0x29] sm:$0xff] }
 0x354   : > { %8231 = vmatmul.msk.f32.gmra.mxu3 %vm573_vm3, %v5098_v17  ;;  %v4691_v21 = vadd.f32 %v4659_v60, %v4627_v58  ;;  %8277 = vmatmul.msk.f32.gmra.mxu1 %vm573_vm3, %v11116_v24  ;;  %v4660_v17 = vld [vmem:[#allocation4 + $0x98] sm:$0xff] }
 0x355   : > { %8266 = vmatmul.msk.f32.gmra.mxu0 %vm573_vm3, %v10915_v31  ;;  %5789 = vst.msk [vmem:[#allocation4 + $0x18] sm:$0xff] %vm573_vm3, %v5757_v25  ;;  %v5099_v25 = vld [vmem:[#allocation3 + $0xba] sm:$0xff] }
 0x356   : > { %4723 = vst.msk [vmem:[#allocation4 + $0x90] sm:$0xff] %vm573_vm3, %v4691_v21  ;;  %v4902_v9 = vpop.f32.mrf.mxu2 }
 0x357   : > { %v5241_v59 = vpop.f32.mrf.mxu3  ;;  %v5018_v4 = vadd.f32 %v4986_v51, %v4902_v9 }
 0x358   : > { %v5356_v56 = vld [vmem:[#allocation4 + $0x28] sm:$0xff] }
 0x359   : > { %v5388_v60 = vadd.f32 %v5356_v56, %v5324_v13  ;;  %5050 = vst.msk [vmem:[#allocation4 + $0x30] sm:$0xff] %vm573_vm3, %v5018_v4  ;;  %v4570_v58 = vpop.f32.mrf.mxu1  ;;  %v4987_v13 = vld [vmem:[#allocation4 + $0x38] sm:$0xff]  ;;  %v12655_v56 = vld [vmem:[#allocation39_spill] sm:$0xff] }
 0x35a   : > { %v4628_v31 = vmul.f32 %v4570_v58, %v9544_v33  ;;  %v11131_v21 = vpop.f32.mrf.mxu0  ;;  %v5726_v57 = vld [vmem:[#allocation4 + $0x20] sm:$0xff] }
 0x35b   : > { %5420 = vst.msk [vmem:[#allocation4 + $0x28] sm:$0xff] %vm573_vm3, %v5388_v60  ;;  %8199 = vmatmul.msk.f32.gmra.mxu2 %vm573_vm3, %v11129_v22  ;;  %v5758_v45 = vadd.f32 %v5726_v57, %v5694_v29  ;;  %v5325_v60 = vmul.f32 %v5241_v59, %v12655_v56  ;;  %v5695_v57 = vmul.f32 %v11048_v5, %v12624_v53  ;;  %v11158_v5 = vld [vmem:[#allocation3 + $0x31] sm:$0xff] }
 0x35c   : > { %8232 = vmatmul.msk.f32.gmra.mxu3 %vm573_vm3, %v5099_v25  ;;  %v4692_v9 = vadd.f32 %v4660_v17, %v4628_v31  ;;  %8278 = vmatmul.msk.f32.gmra.mxu1 %vm573_vm3, %v11137_v26  ;;  %v4661_v31 = vld [vmem:[#allocation4 + $0xa0] sm:$0xff] }
 0x35d   : > { %8267 = vmatmul.msk.f32.gmra.mxu0 %vm573_vm3, %v10945_v50  ;;  %5790 = vst.msk [vmem:[#allocation4 + $0x20] sm:$0xff] %vm573_vm3, %v5758_v45  ;;  %v11150_v45 = vld [vmem:[#allocation3 + $0xc1] sm:$0xff] }
 0x35e   : > { %4724 = vst.msk [vmem:[#allocation4 + $0x98] sm:$0xff] %vm573_vm3, %v4692_v9  ;;  %v4905_v51 = vpop.f32.mrf.mxu2  ;;  %v5100_v9 = vld [vmem:[#allocation3 + $0xc2] sm:$0xff] }
 0x35f   : > { %v5244_v4 = vpop.f32.mrf.mxu3  ;;  %v5019_v58 = vadd.f32 %v4987_v13, %v4905_v51 }
 0x360   : > { %v5357_v25 = vld [vmem:[#allocation4 + $0x30] sm:$0xff] }
 0x361   : > { %v5389_v29 = vadd.f32 %v5357_v25, %v5325_v60  ;;  %5051 = vst.msk [vmem:[#allocation4 + $0x38] sm:$0xff] %vm573_vm3, %v5019_v58  ;;  %v4573_v17 = vpop.f32.mrf.mxu1  ;;  %v4988_v60 = vld [vmem:[#allocation4 + $0x40] sm:$0xff] }
 0x362   : > { %v4629_v50 = vmul.f32 %v4573_v17, %v12602_v32  ;;  %v11152_v12 = vpop.f32.mrf.mxu0  ;;  %v5727_v42 = vld [vmem:[#allocation4 + $0x28] sm:$0xff]  ;;  %v12656_v25 = vld [vmem:[#allocation29_spill] sm:$0xff] }
 0x363   : > { %5421 = vst.msk [vmem:[#allocation4 + $0x30] sm:$0xff] %vm573_vm3, %v5389_v29  ;;  %8200 = vmatmul.msk.f32.gmra.mxu2 %vm573_vm3, %v11150_v45  ;;  %v5759_v59 = vadd.f32 %v5727_v42, %v5695_v57  ;;  %v5326_v29 = vmul.f32 %v5244_v4, %v12656_v25  ;;  %v5696_v42 = vmul.f32 %v11073_v1, %v9313_v27  ;;  %v11179_v1 = vld [vmem:[#allocation3 + $0x39] sm:$0xff] }
 0x364   : > { %8233 = vmatmul.msk.f32.gmra.mxu3 %vm573_vm3, %v5100_v9  ;;  %v4693_v51 = vadd.f32 %v4661_v31, %v4629_v50  ;;  %8279 = vmatmul.msk.f32.gmra.mxu1 %vm573_vm3, %v11158_v5  ;;  %v4662_v50 = vld [vmem:[#allocation4 + $0xa8] sm:$0xff] }
 0x365   : > { %8268 = vmatmul.msk.f32.gmra.mxu0 %vm573_vm3, %v10970_v44  ;;  %5791 = vst.msk [vmem:[#allocation4 + $0x28] sm:$0xff] %vm573_vm3, %v5759_v59  ;;  %v11171_v59 = vld [vmem:[#allocation3 + $0xc9] sm:$0xff] }
 0x366   : > { %4725 = vst.msk [vmem:[#allocation4 + $0xa0] sm:$0xff] %vm573_vm3, %v4693_v51  ;;  %v4908_v13 = vpop.f32.mrf.mxu2  ;;  %v5101_v51 = vld [vmem:[#allocation3 + $0xca] sm:$0xff] }
 0x367   : > { %v5247_v58 = vpop.f32.mrf.mxu3  ;;  %v5020_v17 = vadd.f32 %v4988_v60, %v4908_v13 }
 0x368   : > { %v5358_v9 = vld [vmem:[#allocation4 + $0x38] sm:$0xff] }
 0x369   : > { %v5390_v57 = vadd.f32 %v5358_v9, %v5326_v29  ;;  %5052 = vst.msk [vmem:[#allocation4 + $0x40] sm:$0xff] %vm573_vm3, %v5020_v17  ;;  %v4576_v31 = vpop.f32.mrf.mxu1  ;;  %v4989_v29 = vld [vmem:[#allocation4 + $0x48] sm:$0xff]  ;;  %v12657_v9 = vld [vmem:[#allocation41_spill] sm:$0xff] }
 0x36a   : > { %v4630_v44 = vmul.f32 %v4576_v31, %v9567_v35  ;;  %v11173_v53 = vpop.f32.mrf.mxu0  ;;  %v5728_v56 = vld [vmem:[#allocation4 + $0x30] sm:$0xff] }
 0x36b   : > { %5422 = vst.msk [vmem:[#allocation4 + $0x38] sm:$0xff] %vm573_vm3, %v5390_v57  ;;  %8201 = vmatmul.msk.f32.gmra.mxu2 %vm573_vm3, %v11171_v59  ;;  %v5760_v4 = vadd.f32 %v5728_v56, %v5696_v42  ;;  %v5327_v57 = vmul.f32 %v5247_v58, %v12657_v9  ;;  %v5697_v56 = vmul.f32 %v11092_v7, %v9345_v63  ;;  %v11200_v7 = vld [vmem:[#allocation3 + $0x41] sm:$0xff] }
 0x36c   : > { %8234 = vmatmul.msk.f32.gmra.mxu3 %vm573_vm3, %v5101_v51  ;;  %v4694_v13 = vadd.f32 %v4662_v50, %v4630_v44  ;;  %8280 = vmatmul.msk.f32.gmra.mxu1 %vm573_vm3, %v11179_v1  ;;  %v4663_v44 = vld [vmem:[#allocation4 + $0xb0] sm:$0xff] }
 0x36d   : > { %8269 = vmatmul.msk.f32.gmra.mxu0 %vm573_vm3, %v10997_v55  ;;  %5792 = vst.msk [vmem:[#allocation4 + $0x30] sm:$0xff] %vm573_vm3, %v5760_v4  ;;  %v11192_v4 = vld [vmem:[#allocation3 + $0xd1] sm:$0xff] }
 0x36e   : > { %4726 = vst.msk [vmem:[#allocation4 + $0xa8] sm:$0xff] %vm573_vm3, %v4694_v13  ;;  %v4911_v60 = vpop.f32.mrf.mxu2  ;;  %v5102_v13 = vld [vmem:[#allocation3 + $0xd2] sm:$0xff] }
 0x36f   : > { %v5250_v17 = vpop.f32.mrf.mxu3  ;;  %v5021_v31 = vadd.f32 %v4989_v29, %v4911_v60 }
 0x370   : > { %v5359_v51 = vld [vmem:[#allocation4 + $0x40] sm:$0xff] }
 0x371   : > { %v5391_v42 = vadd.f32 %v5359_v51, %v5327_v57  ;;  %5053 = vst.msk [vmem:[#allocation4 + $0x48] sm:$0xff] %vm573_vm3, %v5021_v31  ;;  %v4579_v50 = vpop.f32.mrf.mxu1  ;;  %v4990_v57 = vld [vmem:[#allocation4 + $0x50] sm:$0xff]  ;;  %v12658_v51 = vld [vmem:[#allocation45_spill] sm:$0xff] }
 0x372   : > { %v4631_v55 = vmul.f32 %v4579_v50, %v9600_v16  ;;  %v11194_v27 = vpop.f32.mrf.mxu0  ;;  %v5729_v25 = vld [vmem:[#allocation4 + $0x38] sm:$0xff] }
 0x373   : > { %5423 = vst.msk [vmem:[#allocation4 + $0x40] sm:$0xff] %vm573_vm3, %v5391_v42  ;;  %8202 = vmatmul.msk.f32.gmra.mxu2 %vm573_vm3, %v11192_v4  ;;  %v5761_v58 = vadd.f32 %v5729_v25, %v5697_v56  ;;  %v5328_v42 = vmul.f32 %v5250_v17, %v12658_v51  ;;  %v5698_v25 = vmul.f32 %v11110_v18, %v9223_v19  ;;  %v11221_v18 = vld [vmem:[#allocation3 + $0x49] sm:$0xff] }
 0x374   : > { %8235 = vmatmul.msk.f32.gmra.mxu3 %vm573_vm3, %v5102_v13  ;;  %v4695_v60 = vadd.f32 %v4663_v44, %v4631_v55  ;;  %8281 = vmatmul.msk.f32.gmra.mxu1 %vm573_vm3, %v11200_v7  ;;  %v4664_v55 = vld [vmem:[#allocation4 + $0xb8] sm:$0xff] }
 0x375   : > { %8270 = vmatmul.msk.f32.gmra.mxu0 %vm573_vm3, %v11019_v0  ;;  %5793 = vst.msk [vmem:[#allocation4 + $0x38] sm:$0xff] %vm573_vm3, %v5761_v58  ;;  %v11213_v58 = vld [vmem:[#allocation3 + $0xd9] sm:$0xff] }
 0x376   : > { %4727 = vst.msk [vmem:[#allocation4 + $0xb0] sm:$0xff] %vm573_vm3, %v4695_v60  ;;  %v4914_v29 = vpop.f32.mrf.mxu2  ;;  %v5103_v60 = vld [vmem:[#allocation3 + $0xda] sm:$0xff] }
 0x377   : > { %v5253_v31 = vpop.f32.mrf.mxu3  ;;  %v5022_v50 = vadd.f32 %v4990_v57, %v4914_v29 }
 0x378   : > { %v5360_v13 = vld [vmem:[#allocation4 + $0x48] sm:$0xff] }
 0x379   : > { %v5392_v56 = vadd.f32 %v5360_v13, %v5328_v42  ;;  %5054 = vst.msk [vmem:[#allocation4 + $0x50] sm:$0xff] %vm573_vm3, %v5022_v50  ;;  %v4582_v44 = vpop.f32.mrf.mxu1  ;;  %v4991_v42 = vld [vmem:[#allocation4 + $0x58] sm:$0xff]  ;;  %v12659_v13 = vld [vmem:[#allocation35_spill] sm:$0xff] }
 0x37a   : > { %v4632_v0 = vmul.f32 %v4582_v44, %v9530_v49  ;;  %v11215_v63 = vpop.f32.mrf.mxu0  ;;  %v5730_v9 = vld [vmem:[#allocation4 + $0x40] sm:$0xff] }
 0x37b   : > { %5424 = vst.msk [vmem:[#allocation4 + $0x48] sm:$0xff] %vm573_vm3, %v5392_v56  ;;  %8203 = vmatmul.msk.f32.gmra.mxu2 %vm573_vm3, %v11213_v58  ;;  %v5762_v17 = vadd.f32 %v5730_v9, %v5698_v25  ;;  %v5329_v56 = vmul.f32 %v5253_v31, %v12659_v13  ;;  %v5699_v9 = vmul.f32 %v11131_v21, %v9370_v11  ;;  %v11242_v21 = vld [vmem:[#allocation3 + $0x51] sm:$0xff] }
 0x37c   : > { %8236 = vmatmul.msk.f32.gmra.mxu3 %vm573_vm3, %v5103_v60  ;;  %v4696_v29 = vadd.f32 %v4664_v55, %v4632_v0  ;;  %8282 = vmatmul.msk.f32.gmra.mxu1 %vm573_vm3, %v11221_v18  ;;  %v4665_v0 = vld [vmem:[#allocation4 + $0xc0] sm:$0xff] }
 0x37d   : > { %8271 = vmatmul.msk.f32.gmra.mxu0 %vm573_vm3, %v11051_v20  ;;  %5794 = vst.msk [vmem:[#allocation4 + $0x40] sm:$0xff] %vm573_vm3, %v5762_v17  ;;  %v11234_v17 = vld [vmem:[#allocation3 + $0xe1] sm:$0xff] }
 0x37e   : > { %4728 = vst.msk [vmem:[#allocation4 + $0xb8] sm:$0xff] %vm573_vm3, %v4696_v29  ;;  %v4917_v57 = vpop.f32.mrf.mxu2  ;;  %v5104_v29 = vld [vmem:[#allocation3 + $0xe2] sm:$0xff] }
 0x37f   : > { %v5256_v50 = vpop.f32.mrf.mxu3  ;;  %v5023_v44 = vadd.f32 %v4991_v42, %v4917_v57  ;;  %v5477_v42 = vld [vmem:[#allocation3 + $0x100] sm:$0xff] }
 0x380   : > { %v5361_v60 = vld [vmem:[#allocation4 + $0x50] sm:$0xff] }
 0x381   : > { %v5393_v25 = vadd.f32 %v5361_v60, %v5329_v56  ;;  %5055 = vst.msk [vmem:[#allocation4 + $0x58] sm:$0xff] %vm573_vm3, %v5023_v44  ;;  %v4585_v55 = vpop.f32.mrf.mxu1  ;;  %v4992_v44 = vld [vmem:[#allocation4 + $0x60] sm:$0xff] }
 0x382   : > { %v4633_v20 = vmul.f32 %v4585_v55, %v9621_v61  ;;  %v11236_v19 = vpop.f32.mrf.mxu0  ;;  %v5731_v51 = vld [vmem:[#allocation4 + $0x48] sm:$0xff] }
 0x383   : > { %5425 = vst.msk [vmem:[#allocation4 + $0x50] sm:$0xff] %vm573_vm3, %v5393_v25  ;;  %8204 = vmatmul.msk.f32.gmra.mxu2 %vm573_vm3, %v11234_v17  ;;  %v5763_v31 = vadd.f32 %v5731_v51, %v5699_v9  ;;  %v5330_v25 = vmul.f32 %v5256_v50, %v12593_v39  ;;  %v5700_v51 = vmul.f32 %v11152_v12, %v9401_v34  ;;  %v11262_v12 = vld [vmem:[#allocation3 + $0x59] sm:$0xff] }
 0x384   : > { %8237 = vmatmul.msk.f32.gmra.mxu3 %vm573_vm3, %v5104_v29  ;;  %v4697_v57 = vadd.f32 %v4665_v0, %v4633_v20  ;;  %8283 = vmatmul.msk.f32.gmra.mxu1 %vm573_vm3, %v11242_v21  ;;  %v4666_v20 = vld [vmem:[#allocation4 + $0xc8] sm:$0xff] }
 0x385   : > { %8272 = vmatmul.msk.f32.gmra.mxu0 %vm573_vm3, %v5477_v42  ;;  %5795 = vst.msk [vmem:[#allocation4 + $0x48] sm:$0xff] %vm573_vm3, %v5763_v31  ;;  %v11254_v31 = vld [vmem:[#allocation3 + $0xe9] sm:$0xff] }
 0x386   : > { %4729 = vst.msk [vmem:[#allocation4 + $0xc0] sm:$0xff] %vm573_vm3, %v4697_v57  ;;  %v4920_v56 = vpop.f32.mrf.mxu2  ;;  %v5105_v57 = vld [vmem:[#allocation3 + $0xea] sm:$0xff] }
 0x387   : > { %v5259_v60 = vpop.f32.mrf.mxu3  ;;  %v5024_v55 = vadd.f32 %v4992_v44, %v4920_v56  ;;  %v5478_v44 = vld [vmem:[#allocation3 + $0x108] sm:$0xff] }
 0x388   : > { %v5362_v29 = vld [vmem:[#allocation4 + $0x58] sm:$0xff] }
 0x389   : > { %v5394_v9 = vadd.f32 %v5362_v29, %v5330_v25  ;;  %5056 = vst.msk [vmem:[#allocation4 + $0x60] sm:$0xff] %vm573_vm3, %v5024_v55  ;;  %v4588_v0 = vpop.f32.mrf.mxu1  ;;  %v4993_v55 = vld [vmem:[#allocation4 + $0x68] sm:$0xff] }
 0x38a   : > { %v4634_v42 = vmul.f32 %v4588_v0, %v12632_v46  ;;  %v11256_v11 = vpop.f32.mrf.mxu0  ;;  %v5732_v13 = vld [vmem:[#allocation4 + $0x50] sm:$0xff] }
 0x38b   : > { %5426 = vst.msk [vmem:[#allocation4 + $0x58] sm:$0xff] %vm573_vm3, %v5394_v9  ;;  %8205 = vmatmul.msk.f32.gmra.mxu2 %vm573_vm3, %v11254_v31  ;;  %v5764_v50 = vadd.f32 %v5732_v13, %v5700_v51  ;;  %v12660_v9 = vld [vmem:[#allocation51_spill] sm:$0xff]  ;;  %v5701_v13 = vmul.f32 %v11173_v53, %v9309_v38 }
 0x38c   : > { %8238 = vmatmul.msk.f32.gmra.mxu3 %vm573_vm3, %v5105_v57  ;;  %v4698_v56 = vadd.f32 %v4666_v20, %v4634_v42  ;;  %8284 = vmatmul.msk.f32.gmra.mxu1 %vm573_vm3, %v11262_v12  ;;  %v5331_v0 = vmul.f32 %v5259_v60, %v12660_v9  ;;  %v4667_v42 = vld [vmem:[#allocation4 + $0xd0] sm:$0xff] }
 0x38d   : > { %8273 = vmatmul.msk.f32.gmra.mxu0 %vm573_vm3, %v5478_v44  ;;  %5796 = vst.msk [vmem:[#allocation4 + $0x50] sm:$0xff] %vm573_vm3, %v5764_v50  ;;  %v11274_v50 = vld [vmem:[#allocation3 + $0xf1] sm:$0xff] }
 0x38e   : > { %4730 = vst.msk [vmem:[#allocation4 + $0xc8] sm:$0xff] %vm573_vm3, %v4698_v56  ;;  %v4923_v25 = vpop.f32.mrf.mxu2  ;;  %v5106_v56 = vld [vmem:[#allocation3 + $0xf2] sm:$0xff] }
 0x38f   : > { %v5262_v29 = vpop.f32.mrf.mxu3  ;;  %v5025_v57 = vadd.f32 %v4993_v55, %v4923_v25  ;;  %v4994_v55 = vld [vmem:[#allocation4 + $0x70] sm:$0xff] }
 0x390   : > { %v5363_v34 = vld [vmem:[#allocation4 + $0x60] sm:$0xff] }
 0x391   : > { %v5395_v51 = vadd.f32 %v5363_v34, %v5331_v0  ;;  %5057 = vst.msk [vmem:[#allocation4 + $0x68] sm:$0xff] %vm573_vm3, %v5025_v57  ;;  %v4591_v20 = vpop.f32.mrf.mxu1  ;;  %v11282_v34 = vld [vmem:[#allocation3 + $0x61] sm:$0xff] }
 0x392   : > { %v4635_v44 = vmul.f32 %v4591_v20, %v12634_v28  ;;  %v11276_v39 = vpop.f32.mrf.mxu0  ;;  %v5733_v62 = vld [vmem:[#allocation4 + $0x58] sm:$0xff] }
 0x393   : > { %5427 = vst.msk [vmem:[#allocation4 + $0x60] sm:$0xff] %vm573_vm3, %v5395_v51  ;;  %8206 = vmatmul.msk.f32.gmra.mxu2 %vm573_vm3, %v11274_v50  ;;  %v5765_v53 = vadd.f32 %v5733_v62, %v5701_v13  ;;  %v12661_v57 = vld [vmem:[#allocation40_spill] sm:$0xff]  ;;  %v5702_v62 = vmul.f32 %v11194_v27, %v9422_v6 }
 0x394   : > { %8239 = vmatmul.msk.f32.gmra.mxu3 %vm573_vm3, %v5106_v56  ;;  %v4699_v60 = vadd.f32 %v4667_v42, %v4635_v44  ;;  %8285 = vmatmul.msk.f32.gmra.mxu1 %vm573_vm3, %v11282_v34  ;;  %v5332_v51 = vmul.f32 %v5262_v29, %v12661_v57  ;;  %v4668_v44 = vld [vmem:[#allocation4 + $0xd8] sm:$0xff] }
 0x395   : > { %8374 = vmatmul.msk.f32.vlgmr.msra.gmra.mxu0 %vm573_vm3, %v11116_v24  ;;  %5797 = vst.msk [vmem:[#allocation4 + $0x58] sm:$0xff] %vm573_vm3, %v5765_v53  ;;  %v11295_v53 = vld [vmem:[#allocation3 + $0xf9] sm:$0xff] }
 0x396   : > { %4731 = vst.msk [vmem:[#allocation4 + $0xd0] sm:$0xff] %vm573_vm3, %v4699_v60  ;;  %v4926_v25 = vpop.f32.mrf.mxu2  ;;  %v5107_v60 = vld [vmem:[#allocation3 + $0xfa] sm:$0xff] }
 0x397   : > { %v5265_v0 = vpop.f32.mrf.mxu3  ;;  %v5026_v20 = vadd.f32 %v4994_v55, %v4926_v25  ;;  %v8544_v25 = vld [vmem:[#allocation3 + $0x69] sm:$0xff] }
 0x398   : > { %v5364_v56 = vld [vmem:[#allocation4 + $0x68] sm:$0xff] }
 0x399   : > { %v5396_v13 = vadd.f32 %v5364_v56, %v5332_v51  ;;  %5058 = vst.msk [vmem:[#allocation4 + $0x70] sm:$0xff] %vm573_vm3, %v5026_v20  ;;  %v4594_v42 = vpop.f32.mrf.mxu1  ;;  %v4995_v51 = vld [vmem:[#allocation4 + $0x78] sm:$0xff] }
 0x39a   : > { %v4636_v24 = vmul.f32 %v4594_v42, %v12609_v40  ;;  %v11297_v38 = vpop.f32.mrf.mxu0  ;;  %v5734_v9 = vld [vmem:[#allocation4 + $0x60] sm:$0xff]  ;;  %v12662_v56 = vld [vmem:[#allocation52_spill] sm:$0xff] }
 0x39b   : > { %5428 = vst.msk [vmem:[#allocation4 + $0x68] sm:$0xff] %vm573_vm3, %v5396_v13  ;;  %8207 = vmatmul.msk.f32.gmra.mxu2 %vm573_vm3, %v11295_v53  ;;  %v5766_v27 = vadd.f32 %v5734_v9, %v5702_v62  ;;  %v5333_v13 = vmul.f32 %v5265_v0, %v12662_v56  ;;  %v5703_v9 = vmul.f32 %v11215_v63, %v9449_v23 }
 0x39c   : > { %8240 = vmatmul.msk.f32.gmra.mxu3 %vm573_vm3, %v5107_v60  ;;  %v4700_v29 = vadd.f32 %v4668_v44, %v4636_v24  ;;  %8286 = vmatmul.msk.f32.gmra.mxu1 %vm573_vm3, %v8544_v25  ;;  %v4669_v24 = vld [vmem:[#allocation4 + $0xe0] sm:$0xff]  ;;  %v6157_v60 = vld [vmem:[#allocation3 + $0x12] sm:$0xff] }
 0x39d   : > { %8375 = vmatmul.msk.f32.gmra.mxu0 %vm573_vm3, %v11137_v26  ;;  %5798 = vst.msk [vmem:[#allocation4 + $0x60] sm:$0xff] %vm573_vm3, %v5766_v27  ;;  %v6528_v27 = vld [vmem:[#allocation3 + $0x20] sm:$0xff] }
 0x39e   : > { %4732 = vst.msk [vmem:[#allocation4 + $0xd8] sm:$0xff] %vm573_vm3, %v4700_v29  ;;  %v4929_v55 = vpop.f32.mrf.mxu2 }
 0x39f   : > { %v5268_v20 = vpop.f32.mrf.mxu3  ;;  %v5027_v42 = vadd.f32 %v4995_v51, %v4929_v55  ;;  %v4996_v51 = vld [vmem:[#allocation4 + $0x80] sm:$0xff] }
 0x3a0   : > { %v5365_v6 = vld [vmem:[#allocation4 + $0x70] sm:$0xff] }
 0x3a1   : > { %v5397_v62 = vadd.f32 %v5365_v6, %v5333_v13  ;;  %5059 = vst.msk [vmem:[#allocation4 + $0x78] sm:$0xff] %vm573_vm3, %v5027_v42  ;;  %v4597_v44 = vpop.f32.mrf.mxu1  ;;  %v8545_v6 = vld [vmem:[#allocation3 + $0x71] sm:$0xff]  ;;  %v12663_v42 = vld [vmem:[#allocation56_spill] sm:$0xff] }
 0x3a2   : > { %v4637_v26 = vmul.f32 %v4597_v44, %v12611_v41  ;;  %v11313_v29 = vpop.f32.mrf.mxu0  ;;  %v5735_v25 = vld [vmem:[#allocation4 + $0x68] sm:$0xff] }
 0x3a3   : > { %5429 = vst.msk [vmem:[#allocation4 + $0x70] sm:$0xff] %vm573_vm3, %v5397_v62  ;;  %8308 = vmatmul.msk.f32.vlgmr.msra.gmra.mxu2 %vm573_vm3, %v6157_v60  ;;  %v5767_v0 = vadd.f32 %v5735_v25, %v5703_v9  ;;  %v5334_v62 = vmul.f32 %v5268_v20, %v12663_v42  ;;  %v5704_v9 = vmul.f32 %v11236_v19, %v9368_v14 }
 0x3a4   : > { %8341 = vmatmul.msk.f32.vlgmr.msra.gmra.mxu3 %vm573_vm3, %v6528_v27  ;;  %v4701_v63 = vadd.f32 %v4669_v24, %v4637_v26  ;;  %8287 = vmatmul.msk.f32.gmra.mxu1 %vm573_vm3, %v8545_v6  ;;  %v4670_v27 = vld [vmem:[#allocation4 + $0xe8] sm:$0xff]  ;;  %v6529_v6 = vld [vmem:[#allocation3 + $0x28] sm:$0xff] }
 0x3a5   : > { %8376 = vmatmul.msk.f32.gmra.mxu0 %vm573_vm3, %v11158_v5  ;;  %5799 = vst.msk [vmem:[#allocation4 + $0x68] sm:$0xff] %vm573_vm3, %v5767_v0  ;;  %v12664_v5 = vld [vmem:[#allocation72_spill] sm:$0xff] }
 0x3a6   : > { %4733 = vst.msk [vmem:[#allocation4 + $0xe0] sm:$0xff] %vm573_vm3, %v4701_v63  ;;  %v4932_v55 = vpop.f32.mrf.mxu2  ;;  %v6158_v0 = vld [vmem:[#allocation3 + $0x1a] sm:$0xff] }
 0x3a7   : > { %v5271_v13 = vpop.f32.mrf.mxu3  ;;  %v5028_v44 = vadd.f32 %v4996_v51, %v4932_v55  ;;  %v4997_v51 = vld [vmem:[#allocation4 + $0x88] sm:$0xff] }
 0x3a8   : > { %v5366_v60 = vld [vmem:[#allocation4 + $0x78] sm:$0xff] }
 0x3a9   : > { %v5398_v24 = vadd.f32 %v5366_v60, %v5334_v62  ;;  %5060 = vst.msk [vmem:[#allocation4 + $0x80] sm:$0xff] %vm573_vm3, %v5028_v44  ;;  %v4600_v26 = vpop.f32.mrf.mxu1  ;;  %v12665_v44 = vld [vmem:[#allocation46_spill] sm:$0xff] }
 0x3aa   : > { %v4638_v25 = vmul.f32 %v4600_v26, %v12664_v5  ;;  %v11328_v63 = vpop.f32.mrf.mxu0  ;;  %v5736_v23 = vld [vmem:[#allocation4 + $0x70] sm:$0xff]  ;;  %v5335_v60 = vmul.f32 %v5271_v13, %v12665_v44 }
 0x3ab   : > { %5430 = vst.msk [vmem:[#allocation4 + $0x78] sm:$0xff] %vm573_vm3, %v5398_v24  ;;  %8309 = vmatmul.msk.f32.gmra.mxu2 %vm573_vm3, %v6158_v0  ;;  %v5768_v20 = vadd.f32 %v5736_v23, %v5704_v9  ;;  %v5705_v23 = vmul.f32 %v11256_v11, %v9467_v36  ;;  %v11344_v0 = vld [vmem:[#allocation3 + $0x22] sm:$0xff] }
 0x3ac   : > { %8342 = vmatmul.msk.f32.gmra.mxu3 %vm573_vm3, %v6529_v6  ;;  %v4702_v19 = vadd.f32 %v4670_v27, %v4638_v25  ;;  %8288 = vmatmul.msk.f32.gmra.mxu1 %vm573_vm3, %v10938_v52  ;;  %v4671_v27 = vld [vmem:[#allocation4 + $0xf0] sm:$0xff]  ;;  %v6530_v6 = vld [vmem:[#allocation3 + $0x30] sm:$0xff] }
 0x3ad   : > { %8377 = vmatmul.msk.f32.gmra.mxu0 %vm573_vm3, %v11179_v1  ;;  %5800 = vst.msk [vmem:[#allocation4 + $0x70] sm:$0xff] %vm573_vm3, %v5768_v20  ;;  %v12666_v1 = vld [vmem:[#allocation78_spill] sm:$0xff] }
 0x3ae   : > { %4734 = vst.msk [vmem:[#allocation4 + $0xe8] sm:$0xff] %vm573_vm3, %v4702_v19  ;;  %v4935_v55 = vpop.f32.mrf.mxu2 }
 0x3af   : > { %v5274_v62 = vpop.f32.mrf.mxu3  ;;  %v5029_v24 = vadd.f32 %v4997_v51, %v4935_v55  ;;  %v12667_v55 = vld [vmem:[#allocation28_spill] sm:$0xff] }
 0x3b0   : > { %v5367_v26 = vld [vmem:[#allocation4 + $0x80] sm:$0xff] }
 0x3b1   : > { %v5399_v9 = vadd.f32 %v5367_v26, %v5335_v60  ;;  %5061 = vst.msk [vmem:[#allocation4 + $0x88] sm:$0xff] %vm573_vm3, %v5029_v24  ;;  %v4603_v52 = vpop.f32.mrf.mxu1  ;;  %v4998_v60 = vld [vmem:[#allocation4 + $0x90] sm:$0xff]  ;;  %v12668_v26 = vld [vmem:[#allocation58_spill] sm:$0xff] }
 0x3b2   : > { %v4639_v25 = vmul.f32 %v4603_v52, %v12666_v1  ;;  %v11346_v20 = vpop.f32.mrf.mxu0  ;;  %v5737_v19 = vld [vmem:[#allocation4 + $0x78] sm:$0xff] }
 0x3b3   : > { %5431 = vst.msk [vmem:[#allocation4 + $0x80] sm:$0xff] %vm573_vm3, %v5399_v9  ;;  %8310 = vmatmul.msk.f32.gmra.mxu2 %vm573_vm3, %v11344_v0  ;;  %v5769_v11 = vadd.f32 %v5737_v19, %v5705_v23  ;;  %v5336_v9 = vmul.f32 %v5274_v62, %v12668_v26  ;;  %v5706_v23 = vmul.f32 %v11276_v39, %v12598_v37  ;;  %v12670_v62 = vld [vmem:[#allocation24_spill] sm:$0xff] }
 0x3b4   : > { %8343 = vmatmul.msk.f32.gmra.mxu3 %vm573_vm3, %v6530_v6  ;;  %v4703_v13 = vadd.f32 %v4671_v27, %v4639_v25  ;;  %8289 = vmatmul.msk.f32.gmra.mxu1 %vm573_vm3, %v12667_v55  ;;  %v4672_v6 = vld [vmem:[#allocation4 + $0xf8] sm:$0xff] }
 0x3b5   : > { %8378 = vmatmul.msk.f32.gmra.mxu0 %vm573_vm3, %v11200_v7  ;;  %5801 = vst.msk [vmem:[#allocation4 + $0x78] sm:$0xff] %vm573_vm3, %v5769_v11  ;;  %v12669_v7 = vld [vmem:[#allocation77_spill] sm:$0xff] }
 0x3b6   : > { %4735 = vst.msk [vmem:[#allocation4 + $0xf0] sm:$0xff] %vm573_vm3, %v4703_v13  ;;  %v4938_v51 = vpop.f32.mrf.mxu2  ;;  %v11363_v11 = vld [vmem:[#allocation3 + $0x2a] sm:$0xff]  ;;  %v6531_v13 = vld [vmem:[#allocation3 + $0x38] sm:$0xff] }
 0x3b7   : > { %v5277_v24 = vpop.f32.mrf.mxu3  ;;  %v5030_v52 = vadd.f32 %v4998_v60, %v4938_v51  ;;  %v4999_v60 = vld [vmem:[#allocation4 + $0x98] sm:$0xff] }
 0x3b8   : > { %v5368_v36 = vld [vmem:[#allocation4 + $0x88] sm:$0xff] }
 0x3b9   : > { %v5400_v27 = vadd.f32 %v5368_v36, %v5336_v9  ;;  %5062 = vst.msk [vmem:[#allocation4 + $0x90] sm:$0xff] %vm573_vm3, %v5030_v52  ;;  %v4606_v25 = vpop.f32.mrf.mxu1  ;;  %v12671_v52 = vld [vmem:[#allocation60_spill] sm:$0xff] }
 0x3ba   : > { %v4640_v19 = vmul.f32 %v4606_v25, %v12669_v7  ;;  %v11365_v55 = vpop.f32.mrf.mxu0  ;;  %v5738_v44 = vld [vmem:[#allocation4 + $0x80] sm:$0xff] }
 0x3bb   : > { %5432 = vst.msk [vmem:[#allocation4 + $0x88] sm:$0xff] %vm573_vm3, %v5400_v27  ;;  %8311 = vmatmul.msk.f32.gmra.mxu2 %vm573_vm3, %v11363_v11  ;;  %v5770_v36 = vadd.f32 %v5738_v44, %v5706_v23  ;;  %v5337_v27 = vmul.f32 %v5277_v24, %v12671_v52  ;;  %v5707_v44 = vmul.f32 %v11297_v38, %v12627_v30 }
 0x3bc   : > { %8344 = vmatmul.msk.f32.gmra.mxu3 %vm573_vm3, %v6531_v13  ;;  %v4704_v39 = vadd.f32 %v4672_v6, %v4640_v19  ;;  %8290 = vmatmul.msk.f32.gmra.mxu1 %vm573_vm3, %v12670_v62  ;;  %v6061_v19 = vld [vmem:[#allocation4] sm:$0xff]  ;;  %v11381_v13 = vld [vmem:[#allocation3 + $0x32] sm:$0xff] }
 0x3bd   : > { %8379 = vmatmul.msk.f32.gmra.mxu0 %vm573_vm3, %v11221_v18  ;;  %5802 = vst.msk [vmem:[#allocation4 + $0x80] sm:$0xff] %vm573_vm3, %v5770_v36  ;;  %v6532_v36 = vld [vmem:[#allocation3 + $0x40] sm:$0xff] }
 0x3be   : > { %4736 = vst.msk [vmem:[#allocation4 + $0xf8] sm:$0xff] %vm573_vm3, %v4704_v39  ;;  %v4941_v51 = vpop.f32.mrf.mxu2 }
 0x3bf   : > { %v5280_v9 = vpop.f32.mrf.mxu3  ;;  %v5031_v25 = vadd.f32 %v4999_v60, %v4941_v51  ;;  %v5000_v51 = vld [vmem:[#allocation4 + $0xa0] sm:$0xff] }
 0x3c0   : > { %v5369_v37 = vld [vmem:[#allocation4 + $0x90] sm:$0xff] }
 0x3c1   : > { %v5401_v23 = vadd.f32 %v5369_v37, %v5337_v27  ;;  %5063 = vst.msk [vmem:[#allocation4 + $0x98] sm:$0xff] %vm573_vm3, %v5031_v25  ;;  %v5965_v6 = vpop.f32.mrf.mxu1  ;;  %v12672_v37 = vld [vmem:[#allocation82_spill] sm:$0xff] }
 0x3c2   : > { %v6093_v18 = vadd.f32 %v6061_v19, %v5965_v6  ;;  %v11383_v39 = vpop.f32.mrf.mxu0  ;;  %v5739_v62 = vld [vmem:[#allocation4 + $0x88] sm:$0xff] }
 0x3c3   : > { %5433 = vst.msk [vmem:[#allocation4 + $0x90] sm:$0xff] %vm573_vm3, %v5401_v23  ;;  %8312 = vmatmul.msk.f32.gmra.mxu2 %vm573_vm3, %v11381_v13  ;;  %v5771_v38 = vadd.f32 %v5739_v62, %v5707_v44  ;;  %v12673_v27 = vld [vmem:[#allocation54_spill] sm:$0xff]  ;;  %v5708_v44 = vmul.f32 %v11313_v29, %v12600_v43 }
 0x3c4   : > { %8345 = vmatmul.msk.f32.gmra.mxu3 %vm573_vm3, %v6532_v36  ;;  %6125 = vst.msk [vmem:[#allocation4] sm:$0xff] %vm573_vm3, %v6093_v18  ;;  %8291 = vmatmul.msk.f32.gmra.mxu1 %vm573_vm3, %v12672_v37  ;;  %v5338_v25 = vmul.f32 %v5280_v9, %v12673_v27  ;;  %v6062_v36 = vld [vmem:[#allocation4 + $0x8] sm:$0xff]  ;;  %v11399_v37 = vld [vmem:[#allocation3 + $0x3a] sm:$0xff] }
 0x3c5   : > { %8380 = vmatmul.msk.f32.gmra.mxu0 %vm573_vm3, %v11242_v21  ;;  %5803 = vst.msk [vmem:[#allocation4 + $0x88] sm:$0xff] %vm573_vm3, %v5771_v38  ;;  %v6533_v21 = vld [vmem:[#allocation3 + $0x48] sm:$0xff] }
 0x3c6   : > { %v4944_v24 = vpop.f32.mrf.mxu2 }
 0x3c7   : > { %v5283_v60 = vpop.f32.mrf.mxu3  ;;  %v5032_v23 = vadd.f32 %v5000_v51, %v4944_v24  ;;  %v5001_v24 = vld [vmem:[#allocation4 + $0xa8] sm:$0xff] }
 0x3c8   : > { %v5370_v6 = vld [vmem:[#allocation4 + $0x98] sm:$0xff] }
 0x3c9   : > { %v5402_v19 = vadd.f32 %v5370_v6, %v5338_v25  ;;  %5064 = vst.msk [vmem:[#allocation4 + $0xa0] sm:$0xff] %vm573_vm3, %v5032_v23  ;;  %v5968_v18 = vpop.f32.mrf.mxu1  ;;  %v12674_v25 = vld [vmem:[#allocation62_spill] sm:$0xff] }
 0x3ca   : > { %v6094_v62 = vadd.f32 %v6062_v36, %v5968_v18  ;;  %v11401_v38 = vpop.f32.mrf.mxu0  ;;  %v5740_v30 = vld [vmem:[#allocation4 + $0x90] sm:$0xff]  ;;  %v5339_v23 = vmul.f32 %v5283_v60, %v12674_v25 }
 0x3cb   : > { %5434 = vst.msk [vmem:[#allocation4 + $0x98] sm:$0xff] %vm573_vm3, %v5402_v19  ;;  %8313 = vmatmul.msk.f32.gmra.mxu2 %vm573_vm3, %v11399_v37  ;;  %v5772_v29 = vadd.f32 %v5740_v30, %v5708_v44  ;;  %v5709_v30 = vmul.f32 %v11328_v63, %v9544_v33 }
 0x3cc   : > { %8346 = vmatmul.msk.f32.gmra.mxu3 %vm573_vm3, %v6533_v21  ;;  %6126 = vst.msk [vmem:[#allocation4 + $0x8] sm:$0xff] %vm573_vm3, %v6094_v62  ;;  %8292 = vmatmul.msk.f32.gmra.mxu1 %vm573_vm3, %v11046_v54  ;;  %v6063_v54 = vld [vmem:[#allocation4 + $0x10] sm:$0xff]  ;;  %v11417_v62 = vld [vmem:[#allocation3 + $0x42] sm:$0xff] }
 0x3cd   : > { %8381 = vmatmul.msk.f32.gmra.mxu0 %vm573_vm3, %v11262_v12  ;;  %5804 = vst.msk [vmem:[#allocation4 + $0x90] sm:$0xff] %vm573_vm3, %v5772_v29  ;;  %v6534_v12 = vld [vmem:[#allocation3 + $0x50] sm:$0xff] }
 0x3ce   : > { %v4947_v9 = vpop.f32.mrf.mxu2 }
 0x3cf   : > { %v5286_v51 = vpop.f32.mrf.mxu3  ;;  %v5033_v6 = vadd.f32 %v5001_v24, %v4947_v9  ;;  %v5002_v9 = vld [vmem:[#allocation4 + $0xb0] sm:$0xff] }
 0x3d0   : > { %v5371_v19 = vld [vmem:[#allocation4 + $0xa0] sm:$0xff] }
 0x3d1   : > { %v5403_v44 = vadd.f32 %v5371_v19, %v5339_v23  ;;  %5065 = vst.msk [vmem:[#allocation4 + $0xa8] sm:$0xff] %vm573_vm3, %v5033_v6  ;;  %v5971_v18 = vpop.f32.mrf.mxu1  ;;  %v12675_v23 = vld [vmem:[#allocation66_spill] sm:$0xff] }
 0x3d2   : > { %v6095_v36 = vadd.f32 %v6063_v54, %v5971_v18  ;;  %v11419_v21 = vpop.f32.mrf.mxu0  ;;  %v5741_v29 = vld [vmem:[#allocation4 + $0x98] sm:$0xff]  ;;  %v5340_v6 = vmul.f32 %v5286_v51, %v12675_v23  ;;  %v6908_v51 = vld [vmem:[#allocation3 + $0x69] sm:$0xff] }
 0x3d3   : > { %5435 = vst.msk [vmem:[#allocation4 + $0xa0] sm:$0xff] %vm573_vm3, %v5403_v44  ;;  %8314 = vmatmul.msk.f32.gmra.mxu2 %vm573_vm3, %v11417_v62  ;;  %v5773_v63 = vadd.f32 %v5741_v29, %v5709_v30  ;;  %v5710_v30 = vmul.f32 %v11346_v20, %v12602_v32 }
 0x3d4   : > { %8347 = vmatmul.msk.f32.gmra.mxu3 %vm573_vm3, %v6534_v12  ;;  %6127 = vst.msk [vmem:[#allocation4 + $0x10] sm:$0xff] %vm573_vm3, %v6095_v36  ;;  %8293 = vmatmul.msk.f32.gmra.mxu1 %vm573_vm3, %v11071_v15  ;;  %v6064_v15 = vld [vmem:[#allocation4 + $0x18] sm:$0xff]  ;;  %v11435_v12 = vld [vmem:[#allocation3 + $0x4a] sm:$0xff] }
 0x3d5   : > { %8382 = vmatmul.msk.f32.gmra.mxu0 %vm573_vm3, %v11282_v34  ;;  %5805 = vst.msk [vmem:[#allocation4 + $0x98] sm:$0xff] %vm573_vm3, %v5773_v63  ;;  %v6535_v34 = vld [vmem:[#allocation3 + $0x58] sm:$0xff] }
 0x3d6   : > { %v4950_v60 = vpop.f32.mrf.mxu2 }
 0x3d7   : > { %v5289_v24 = vpop.f32.mrf.mxu3  ;;  %v5034_v19 = vadd.f32 %v5002_v9, %v4950_v60  ;;  %v5003_v9 = vld [vmem:[#allocation4 + $0xb8] sm:$0xff] }
 0x3d8   : > { %v5372_v44 = vld [vmem:[#allocation4 + $0xa8] sm:$0xff] }
 0x3d9   : > { %v5404_v18 = vadd.f32 %v5372_v44, %v5340_v6  ;;  %5066 = vst.msk [vmem:[#allocation4 + $0xb0] sm:$0xff] %vm573_vm3, %v5034_v19  ;;  %v5974_v54 = vpop.f32.mrf.mxu1  ;;  %v12676_v19 = vld [vmem:[#allocation61_spill] sm:$0xff] }
 0x3da   : > { %v6096_v36 = vadd.f32 %v6064_v15, %v5974_v54  ;;  %v11437_v29 = vpop.f32.mrf.mxu0  ;;  %v5742_v63 = vld [vmem:[#allocation4 + $0xa0] sm:$0xff]  ;;  %v5341_v44 = vmul.f32 %v5289_v24, %v12676_v19  ;;  %v6909_v24 = vld [vmem:[#allocation3 + $0x71] sm:$0xff] }
 0x3db   : > { %5436 = vst.msk [vmem:[#allocation4 + $0xa8] sm:$0xff] %vm573_vm3, %v5404_v18  ;;  %8315 = vmatmul.msk.f32.gmra.mxu2 %vm573_vm3, %v11435_v12  ;;  %v5774_v20 = vadd.f32 %v5742_v63, %v5710_v30  ;;  %v5711_v30 = vmul.f32 %v11365_v55, %v9567_v35  ;;  %v11452_v63 = vld [vmem:[#allocation3 + $0x52] sm:$0xff] }
 0x3dc   : > { %8348 = vmatmul.msk.f32.gmra.mxu3 %vm573_vm3, %v6535_v34  ;;  %6128 = vst.msk [vmem:[#allocation4 + $0x18] sm:$0xff] %vm573_vm3, %v6096_v36  ;;  %8294 = vmatmul.msk.f32.gmra.mxu1 %vm573_vm3, %v11090_v10  ;;  %v6065_v10 = vld [vmem:[#allocation4 + $0x20] sm:$0xff] }
 0x3dd   : > { %8383 = vmatmul.msk.f32.gmra.mxu0 %vm573_vm3, %v6908_v51  ;;  %5806 = vst.msk [vmem:[#allocation4 + $0xa0] sm:$0xff] %vm573_vm3, %v5774_v20  ;;  %v6536_v51 = vld [vmem:[#allocation3 + $0x60] sm:$0xff] }
 0x3de   : > { %v4953_v60 = vpop.f32.mrf.mxu2 }
 0x3df   : > { %v5292_v6 = vpop.f32.mrf.mxu3  ;;  %v5035_v18 = vadd.f32 %v5003_v9, %v4953_v60  ;;  %v5004_v9 = vld [vmem:[#allocation4 + $0xc0] sm:$0xff] }
 0x3e0   : > { %v5373_v54 = vld [vmem:[#allocation4 + $0xb0] sm:$0xff] }
 0x3e1   : > { %v5405_v15 = vadd.f32 %v5373_v54, %v5341_v44  ;;  %5067 = vst.msk [vmem:[#allocation4 + $0xb8] sm:$0xff] %vm573_vm3, %v5035_v18  ;;  %v5977_v36 = vpop.f32.mrf.mxu1  ;;  %v12677_v18 = vld [vmem:[#allocation67_spill] sm:$0xff] }
 0x3e2   : > { %v6097_v34 = vadd.f32 %v6065_v10, %v5977_v36  ;;  %v11454_v20 = vpop.f32.mrf.mxu0  ;;  %v5743_v32 = vld [vmem:[#allocation4 + $0xa8] sm:$0xff]  ;;  %v5342_v54 = vmul.f32 %v5292_v6, %v12677_v18  ;;  %v6910_v6 = vld [vmem:[#allocation3 + $0x79] sm:$0xff] }
 0x3e3   : > { %5437 = vst.msk [vmem:[#allocation4 + $0xb0] sm:$0xff] %vm573_vm3, %v5405_v15  ;;  %8316 = vmatmul.msk.f32.gmra.mxu2 %vm573_vm3, %v11452_v63  ;;  %v5775_v55 = vadd.f32 %v5743_v32, %v5711_v30  ;;  %v5712_v32 = vmul.f32 %v11383_v39, %v9600_v16 }
 0x3e4   : > { %8349 = vmatmul.msk.f32.gmra.mxu3 %vm573_vm3, %v6536_v51  ;;  %6129 = vst.msk [vmem:[#allocation4 + $0x20] sm:$0xff] %vm573_vm3, %v6097_v34  ;;  %8295 = vmatmul.msk.f32.gmra.mxu1 %vm573_vm3, %v11108_v2  ;;  %v6066_v2 = vld [vmem:[#allocation4 + $0x28] sm:$0xff]  ;;  %v11469_v51 = vld [vmem:[#allocation3 + $0x5a] sm:$0xff] }
 0x3e5   : > { %8384 = vmatmul.msk.f32.gmra.mxu0 %vm573_vm3, %v6909_v24  ;;  %5807 = vst.msk [vmem:[#allocation4 + $0xa8] sm:$0xff] %vm573_vm3, %v5775_v55  ;;  %v6537_v24 = vld [vmem:[#allocation3 + $0x68] sm:$0xff] }
 0x3e6   : > { %v4956_v60 = vpop.f32.mrf.mxu2 }
 0x3e7   : > { %v5295_v44 = vpop.f32.mrf.mxu3  ;;  %v5036_v15 = vadd.f32 %v5004_v9, %v4956_v60  ;;  %v5005_v9 = vld [vmem:[#allocation4 + $0xc8] sm:$0xff] }
 0x3e8   : > { %v5374_v36 = vld [vmem:[#allocation4 + $0xb8] sm:$0xff] }
 0x3e9   : > { %v5406_v30 = vadd.f32 %v5374_v36, %v5342_v54  ;;  %5068 = vst.msk [vmem:[#allocation4 + $0xc0] sm:$0xff] %vm573_vm3, %v5036_v15  ;;  %v5980_v10 = vpop.f32.mrf.mxu1  ;;  %v12678_v15 = vld [vmem:[#allocation71_spill] sm:$0xff] }
 0x3ea   : > { %v6098_v34 = vadd.f32 %v6066_v2, %v5980_v10  ;;  %v11471_v55 = vpop.f32.mrf.mxu0  ;;  %v5744_v35 = vld [vmem:[#allocation4 + $0xb0] sm:$0xff]  ;;  %v5343_v36 = vmul.f32 %v5295_v44, %v12678_v15  ;;  %v6911_v44 = vld [vmem:[#allocation3 + $0x81] sm:$0xff] }
 0x3eb   : > { %5438 = vst.msk [vmem:[#allocation4 + $0xb8] sm:$0xff] %vm573_vm3, %v5406_v30  ;;  %8317 = vmatmul.msk.f32.gmra.mxu2 %vm573_vm3, %v11469_v51  ;;  %v5776_v39 = vadd.f32 %v5744_v35, %v5712_v32  ;;  %v5713_v35 = vmul.f32 %v11401_v38, %v9530_v49 }
 0x3ec   : > { %8350 = vmatmul.msk.f32.gmra.mxu3 %vm573_vm3, %v6537_v24  ;;  %6130 = vst.msk [vmem:[#allocation4 + $0x28] sm:$0xff] %vm573_vm3, %v6098_v34  ;;  %8296 = vmatmul.msk.f32.gmra.mxu1 %vm573_vm3, %v11129_v22  ;;  %v6067_v22 = vld [vmem:[#allocation4 + $0x30] sm:$0xff]  ;;  %v11486_v24 = vld [vmem:[#allocation3 + $0x62] sm:$0xff] }
 0x3ed   : > { %8385 = vmatmul.msk.f32.gmra.mxu0 %vm573_vm3, %v6910_v6  ;;  %5808 = vst.msk [vmem:[#allocation4 + $0xb0] sm:$0xff] %vm573_vm3, %v5776_v39  ;;  %v6538_v6 = vld [vmem:[#allocation3 + $0x70] sm:$0xff] }
 0x3ee   : > { %v4959_v60 = vpop.f32.mrf.mxu2 }
 0x3ef   : > { %v5298_v54 = vpop.f32.mrf.mxu3  ;;  %v5037_v30 = vadd.f32 %v5005_v9, %v4959_v60  ;;  %v5006_v9 = vld [vmem:[#allocation4 + $0xd0] sm:$0xff] }
 0x3f0   : > { %v5375_v10 = vld [vmem:[#allocation4 + $0xc0] sm:$0xff] }
 0x3f1   : > { %v5407_v32 = vadd.f32 %v5375_v10, %v5343_v36  ;;  %5069 = vst.msk [vmem:[#allocation4 + $0xc8] sm:$0xff] %vm573_vm3, %v5037_v30  ;;  %v5983_v2 = vpop.f32.mrf.mxu1  ;;  %v12679_v30 = vld [vmem:[#allocation69_spill] sm:$0xff] }
 0x3f2   : > { %v6099_v34 = vadd.f32 %v6067_v22, %v5983_v2  ;;  %v11488_v39 = vpop.f32.mrf.mxu0  ;;  %v5745_v16 = vld [vmem:[#allocation4 + $0xb8] sm:$0xff]  ;;  %v5344_v10 = vmul.f32 %v5298_v54, %v12679_v30  ;;  %v6912_v54 = vld [vmem:[#allocation3 + $0x89] sm:$0xff] }
 0x3f3   : > { %5439 = vst.msk [vmem:[#allocation4 + $0xc0] sm:$0xff] %vm573_vm3, %v5407_v32  ;;  %8318 = vmatmul.msk.f32.gmra.mxu2 %vm573_vm3, %v11486_v24  ;;  %v5777_v38 = vadd.f32 %v5745_v16, %v5713_v35  ;;  %v5714_v16 = vmul.f32 %v11419_v21, %v9621_v61  ;;  %v11711_v30 = vld [vmem:[#allocation3 + $0xca] sm:$0xff] }
 0x3f4   : > { %8351 = vmatmul.msk.f32.gmra.mxu3 %vm573_vm3, %v6538_v6  ;;  %6131 = vst.msk [vmem:[#allocation4 + $0x30] sm:$0xff] %vm573_vm3, %v6099_v34  ;;  %8297 = vmatmul.msk.f32.gmra.mxu1 %vm573_vm3, %v11150_v45  ;;  %v6068_v45 = vld [vmem:[#allocation4 + $0x38] sm:$0xff]  ;;  %v11503_v6 = vld [vmem:[#allocation3 + $0x6a] sm:$0xff] }
 0x3f5   : > { %8386 = vmatmul.msk.f32.gmra.mxu0 %vm573_vm3, %v6911_v44  ;;  %5809 = vst.msk [vmem:[#allocation4 + $0xb8] sm:$0xff] %vm573_vm3, %v5777_v38  ;;  %v6539_v44 = vld [vmem:[#allocation3 + $0x78] sm:$0xff] }
 0x3f6   : > { %v4962_v60 = vpop.f32.mrf.mxu2 }
 0x3f7   : > { %v5301_v36 = vpop.f32.mrf.mxu3  ;;  %v5038_v32 = vadd.f32 %v5006_v9, %v4962_v60  ;;  %v5007_v9 = vld [vmem:[#allocation4 + $0xd8] sm:$0xff] }
 0x3f8   : > { %v5376_v2 = vld [vmem:[#allocation4 + $0xc8] sm:$0xff] }
 0x3f9   : > { %v5408_v35 = vadd.f32 %v5376_v2, %v5344_v10  ;;  %5070 = vst.msk [vmem:[#allocation4 + $0xd0] sm:$0xff] %vm573_vm3, %v5038_v32  ;;  %v5986_v22 = vpop.f32.mrf.mxu1  ;;  %v12680_v32 = vld [vmem:[#allocation73_spill] sm:$0xff] }
 0x3fa   : > { %v6100_v34 = vadd.f32 %v6068_v45, %v5986_v22  ;;  %v11505_v38 = vpop.f32.mrf.mxu0  ;;  %v5746_v49 = vld [vmem:[#allocation4 + $0xc0] sm:$0xff]  ;;  %v5345_v2 = vmul.f32 %v5301_v36, %v12680_v32  ;;  %v6913_v36 = vld [vmem:[#allocation3 + $0x91] sm:$0xff] }
 0x3fb   : > { %5440 = vst.msk [vmem:[#allocation4 + $0xc8] sm:$0xff] %vm573_vm3, %v5408_v35  ;;  %8319 = vmatmul.msk.f32.gmra.mxu2 %vm573_vm3, %v11503_v6  ;;  %v5778_v21 = vadd.f32 %v5746_v49, %v5714_v16  ;;  %v5715_v49 = vmul.f32 %v11437_v29, %v12632_v46  ;;  %v11694_v32 = vld [vmem:[#allocation3 + $0xc2] sm:$0xff] }
 0x3fc   : > { %8352 = vmatmul.msk.f32.gmra.mxu3 %vm573_vm3, %v6539_v44  ;;  %6132 = vst.msk [vmem:[#allocation4 + $0x38] sm:$0xff] %vm573_vm3, %v6100_v34  ;;  %8298 = vmatmul.msk.f32.gmra.mxu1 %vm573_vm3, %v11171_v59  ;;  %v6069_v59 = vld [vmem:[#allocation4 + $0x40] sm:$0xff]  ;;  %v11520_v44 = vld [vmem:[#allocation3 + $0x72] sm:$0xff] }
 0x3fd   : > { %8387 = vmatmul.msk.f32.gmra.mxu0 %vm573_vm3, %v6912_v54  ;;  %5810 = vst.msk [vmem:[#allocation4 + $0xc0] sm:$0xff] %vm573_vm3, %v5778_v21  ;;  %v6540_v54 = vld [vmem:[#allocation3 + $0x80] sm:$0xff] }
 0x3fe   : > { %v4965_v60 = vpop.f32.mrf.mxu2 }
 0x3ff   : > { %v5304_v10 = vpop.f32.mrf.mxu3  ;;  %v5039_v35 = vadd.f32 %v5007_v9, %v4965_v60  ;;  %v5008_v9 = vld [vmem:[#allocation4 + $0xe0] sm:$0xff] }
 0x400   : > { %v5377_v22 = vld [vmem:[#allocation4 + $0xd0] sm:$0xff] }
 0x401   : > { %v5409_v16 = vadd.f32 %v5377_v22, %v5345_v2  ;;  %5071 = vst.msk [vmem:[#allocation4 + $0xd8] sm:$0xff] %vm573_vm3, %v5039_v35  ;;  %v5989_v45 = vpop.f32.mrf.mxu1  ;;  %v12681_v35 = vld [vmem:[#allocation76_spill] sm:$0xff] }
 0x402   : > { %v6101_v34 = vadd.f32 %v6069_v59, %v5989_v45  ;;  %v11522_v21 = vpop.f32.mrf.mxu0  ;;  %v5747_v61 = vld [vmem:[#allocation4 + $0xc8] sm:$0xff]  ;;  %v5346_v22 = vmul.f32 %v5304_v10, %v12681_v35  ;;  %v6914_v10 = vld [vmem:[#allocation3 + $0x99] sm:$0xff] }
 0x403   : > { %5441 = vst.msk [vmem:[#allocation4 + $0xd0] sm:$0xff] %vm573_vm3, %v5409_v16  ;;  %8320 = vmatmul.msk.f32.gmra.mxu2 %vm573_vm3, %v11520_v44  ;;  %v5779_v29 = vadd.f32 %v5747_v61, %v5715_v49  ;;  %v5716_v61 = vmul.f32 %v11454_v20, %v12634_v28 }
 0x404   : > { %8353 = vmatmul.msk.f32.gmra.mxu3 %vm573_vm3, %v6540_v54  ;;  %6133 = vst.msk [vmem:[#allocation4 + $0x40] sm:$0xff] %vm573_vm3, %v6101_v34  ;;  %8299 = vmatmul.msk.f32.gmra.mxu1 %vm573_vm3, %v11192_v4  ;;  %v6070_v4 = vld [vmem:[#allocation4 + $0x48] sm:$0xff]  ;;  %v11537_v54 = vld [vmem:[#allocation3 + $0x7a] sm:$0xff] }
 0x405   : > { %8388 = vmatmul.msk.f32.gmra.mxu0 %vm573_vm3, %v6913_v36  ;;  %5811 = vst.msk [vmem:[#allocation4 + $0xc8] sm:$0xff] %vm573_vm3, %v5779_v29  ;;  %v6541_v36 = vld [vmem:[#allocation3 + $0x88] sm:$0xff] }
 0x406   : > { %v4968_v60 = vpop.f32.mrf.mxu2 }
 0x407   : > { %v5307_v2 = vpop.f32.mrf.mxu3  ;;  %v5040_v16 = vadd.f32 %v5008_v9, %v4968_v60  ;;  %v5009_v9 = vld [vmem:[#allocation4 + $0xe8] sm:$0xff] }
 0x408   : > { %v5378_v45 = vld [vmem:[#allocation4 + $0xd8] sm:$0xff] }
 0x409   : > { %v5410_v49 = vadd.f32 %v5378_v45, %v5346_v22  ;;  %5072 = vst.msk [vmem:[#allocation4 + $0xe0] sm:$0xff] %vm573_vm3, %v5040_v16  ;;  %v5992_v59 = vpop.f32.mrf.mxu1  ;;  %v12682_v16 = vld [vmem:[#allocation75_spill] sm:$0xff] }
 0x40a   : > { %v6102_v34 = vadd.f32 %v6070_v4, %v5992_v59  ;;  %v11539_v29 = vpop.f32.mrf.mxu0  ;;  %v5748_v46 = vld [vmem:[#allocation4 + $0xd0] sm:$0xff]  ;;  %v5347_v45 = vmul.f32 %v5307_v2, %v12682_v16  ;;  %v6915_v2 = vld [vmem:[#allocation3 + $0xa1] sm:$0xff] }
 0x40b   : > { %5442 = vst.msk [vmem:[#allocation4 + $0xd8] sm:$0xff] %vm573_vm3, %v5410_v49  ;;  %8321 = vmatmul.msk.f32.gmra.mxu2 %vm573_vm3, %v11537_v54  ;;  %v5780_v20 = vadd.f32 %v5748_v46, %v5716_v61  ;;  %v5717_v46 = vmul.f32 %v11471_v55, %v12609_v40 }
 0x40c   : > { %8354 = vmatmul.msk.f32.gmra.mxu3 %vm573_vm3, %v6541_v36  ;;  %6134 = vst.msk [vmem:[#allocation4 + $0x48] sm:$0xff] %vm573_vm3, %v6102_v34  ;;  %8300 = vmatmul.msk.f32.gmra.mxu1 %vm573_vm3, %v11213_v58  ;;  %v6071_v58 = vld [vmem:[#allocation4 + $0x50] sm:$0xff]  ;;  %v11554_v36 = vld [vmem:[#allocation3 + $0x82] sm:$0xff] }
 0x40d   : > { %8389 = vmatmul.msk.f32.gmra.mxu0 %vm573_vm3, %v6914_v10  ;;  %5812 = vst.msk [vmem:[#allocation4 + $0xd0] sm:$0xff] %vm573_vm3, %v5780_v20  ;;  %v6542_v10 = vld [vmem:[#allocation3 + $0x90] sm:$0xff] }
 0x40e   : > { %v4971_v60 = vpop.f32.mrf.mxu2 }
 0x40f   : > { %v5310_v22 = vpop.f32.mrf.mxu3  ;;  %v5041_v49 = vadd.f32 %v5009_v9, %v4971_v60  ;;  %v5010_v9 = vld [vmem:[#allocation4 + $0xf0] sm:$0xff] }
 0x410   : > { %v5379_v59 = vld [vmem:[#allocation4 + $0xe0] sm:$0xff] }
 0x411   : > { %v5411_v61 = vadd.f32 %v5379_v59, %v5347_v45  ;;  %5073 = vst.msk [vmem:[#allocation4 + $0xe8] sm:$0xff] %vm573_vm3, %v5041_v49  ;;  %v5995_v4 = vpop.f32.mrf.mxu1  ;;  %v12683_v49 = vld [vmem:[#allocation55_spill] sm:$0xff] }
 0x412   : > { %v6103_v34 = vadd.f32 %v6071_v58, %v5995_v4  ;;  %v11556_v20 = vpop.f32.mrf.mxu0  ;;  %v5749_v28 = vld [vmem:[#allocation4 + $0xd8] sm:$0xff]  ;;  %v5348_v59 = vmul.f32 %v5310_v22, %v12683_v49  ;;  %v6916_v22 = vld [vmem:[#allocation3 + $0xa9] sm:$0xff] }
 0x413   : > { %5443 = vst.msk [vmem:[#allocation4 + $0xe0] sm:$0xff] %vm573_vm3, %v5411_v61  ;;  %8322 = vmatmul.msk.f32.gmra.mxu2 %vm573_vm3, %v11554_v36  ;;  %v5781_v55 = vadd.f32 %v5749_v28, %v5717_v46  ;;  %v5718_v28 = vmul.f32 %v11488_v39, %v12611_v41 }
 0x414   : > { %8355 = vmatmul.msk.f32.gmra.mxu3 %vm573_vm3, %v6542_v10  ;;  %6135 = vst.msk [vmem:[#allocation4 + $0x50] sm:$0xff] %vm573_vm3, %v6103_v34  ;;  %8301 = vmatmul.msk.f32.gmra.mxu1 %vm573_vm3, %v11234_v17  ;;  %v6072_v17 = vld [vmem:[#allocation4 + $0x58] sm:$0xff]  ;;  %v11571_v10 = vld [vmem:[#allocation3 + $0x8a] sm:$0xff] }
 0x415   : > { %8390 = vmatmul.msk.f32.gmra.mxu0 %vm573_vm3, %v6915_v2  ;;  %5813 = vst.msk [vmem:[#allocation4 + $0xd8] sm:$0xff] %vm573_vm3, %v5781_v55  ;;  %v6543_v2 = vld [vmem:[#allocation3 + $0x98] sm:$0xff] }
 0x416   : > { %v4974_v60 = vpop.f32.mrf.mxu2 }
 0x417   : > { %v5313_v45 = vpop.f32.mrf.mxu3  ;;  %v5042_v61 = vadd.f32 %v5010_v9, %v4974_v60  ;;  %v5011_v9 = vld [vmem:[#allocation4 + $0xf8] sm:$0xff] }
 0x418   : > { %v5380_v4 = vld [vmem:[#allocation4 + $0xe8] sm:$0xff] }
 0x419   : > { %v5412_v46 = vadd.f32 %v5380_v4, %v5348_v59  ;;  %5074 = vst.msk [vmem:[#allocation4 + $0xf0] sm:$0xff] %vm573_vm3, %v5042_v61  ;;  %v5998_v58 = vpop.f32.mrf.mxu1  ;;  %v12684_v61 = vld [vmem:[#allocation80_spill] sm:$0xff] }
 0x41a   : > { %v6104_v34 = vadd.f32 %v6072_v17, %v5998_v58  ;;  %v11573_v55 = vpop.f32.mrf.mxu0  ;;  %v5750_v40 = vld [vmem:[#allocation4 + $0xe0] sm:$0xff]  ;;  %v5349_v4 = vmul.f32 %v5313_v45, %v12684_v61  ;;  %v6917_v45 = vld [vmem:[#allocation3 + $0xb1] sm:$0xff]  ;;  %v11605_v61 = vld [vmem:[#allocation3 + $0x9a] sm:$0xff] }
 0x41b   : > { %5444 = vst.msk [vmem:[#allocation4 + $0xe8] sm:$0xff] %vm573_vm3, %v5412_v46  ;;  %8323 = vmatmul.msk.f32.gmra.mxu2 %vm573_vm3, %v11571_v10  ;;  %v5782_v39 = vadd.f32 %v5750_v40, %v5718_v28  ;;  %v5719_v40 = vmul.f32 %v11505_v38, %v12664_v5 }
 0x41c   : > { %8356 = vmatmul.msk.f32.gmra.mxu3 %vm573_vm3, %v6543_v2  ;;  %6136 = vst.msk [vmem:[#allocation4 + $0x58] sm:$0xff] %vm573_vm3, %v6104_v34  ;;  %8302 = vmatmul.msk.f32.gmra.mxu1 %vm573_vm3, %v11254_v31  ;;  %v6073_v31 = vld [vmem:[#allocation4 + $0x60] sm:$0xff]  ;;  %v11588_v2 = vld [vmem:[#allocation3 + $0x92] sm:$0xff] }
 0x41d   : > { %8391 = vmatmul.msk.f32.gmra.mxu0 %vm573_vm3, %v6916_v22  ;;  %5814 = vst.msk [vmem:[#allocation4 + $0xe0] sm:$0xff] %vm573_vm3, %v5782_v39  ;;  %v6544_v22 = vld [vmem:[#allocation3 + $0xa0] sm:$0xff] }
 0x41e   : > { %v4977_v60 = vpop.f32.mrf.mxu2 }
 0x41f   : > { %v5316_v59 = vpop.f32.mrf.mxu3  ;;  %v5043_v46 = vadd.f32 %v5011_v9, %v4977_v60 }
 0x420   : > { %v5381_v58 = vld [vmem:[#allocation4 + $0xf0] sm:$0xff] }
 0x421   : > { %v5413_v28 = vadd.f32 %v5381_v58, %v5349_v4  ;;  %5075 = vst.msk [vmem:[#allocation4 + $0xf8] sm:$0xff] %vm573_vm3, %v5043_v46  ;;  %v6001_v17 = vpop.f32.mrf.mxu1  ;;  %v12685_v4 = vld [vmem:[#allocation81_spill] sm:$0xff]  ;;  %v12686_v58 = vld [vmem:[#allocation27_spill] sm:$0xff] }
 0x422   : > { %v6105_v34 = vadd.f32 %v6073_v31, %v6001_v17  ;;  %v11590_v39 = vpop.f32.mrf.mxu0  ;;  %v5751_v41 = vld [vmem:[#allocation4 + $0xe8] sm:$0xff]  ;;  %v5350_v46 = vmul.f32 %v5316_v59, %v12685_v4  ;;  %v6432_v31 = vld [vmem:[#allocation4] sm:$0xff] }
 0x423   : > { %5445 = vst.msk [vmem:[#allocation4 + $0xf0] sm:$0xff] %vm573_vm3, %v5413_v28  ;;  %8324 = vmatmul.msk.f32.gmra.mxu2 %vm573_vm3, %v11588_v2  ;;  %v5783_v38 = vadd.f32 %v5751_v41, %v5719_v40  ;;  %v5720_v41 = vmul.f32 %v11522_v21, %v12666_v1  ;;  %v6918_v21 = vld [vmem:[#allocation3 + $0xb9] sm:$0xff] }
 0x424   : > { %8357 = vmatmul.msk.f32.gmra.mxu3 %vm573_vm3, %v6544_v22  ;;  %6137 = vst.msk [vmem:[#allocation4 + $0x60] sm:$0xff] %vm573_vm3, %v6105_v34  ;;  %8303 = vmatmul.msk.f32.gmra.mxu1 %vm573_vm3, %v11274_v50  ;;  %v6074_v50 = vld [vmem:[#allocation4 + $0x68] sm:$0xff] }
 0x425   : > { %8392 = vmatmul.msk.f32.gmra.mxu0 %vm573_vm3, %v6917_v45  ;;  %5815 = vst.msk [vmem:[#allocation4 + $0xe8] sm:$0xff] %vm573_vm3, %v5783_v38  ;;  %v6545_v45 = vld [vmem:[#allocation3 + $0xa8] sm:$0xff] }
 0x426   : > { %v6304_v60 = vpop.f32.mrf.mxu2 }
 0x427   : > { %v6675_v9 = vpop.f32.mrf.mxu3  ;;  %v6400_v28 = vmul.f32 %v6304_v60, %v12686_v58 }
 0x428   : > { %v5382_v17 = vld [vmem:[#allocation4 + $0xf8] sm:$0xff] }
 0x429   : > { %v5414_v40 = vadd.f32 %v5382_v17, %v5350_v46  ;;  %v6464_v34 = vadd.f32 %v6432_v31, %v6400_v28  ;;  %v6004_v22 = vpop.f32.mrf.mxu1  ;;  %v12687_v28 = vld [vmem:[#allocation21_spill] sm:$0xff]  ;;  %v6433_v31 = vld [vmem:[#allocation4 + $0x8] sm:$0xff] }
 0x42a   : > { %v6106_v5 = vadd.f32 %v6074_v50, %v6004_v22  ;;  %v11607_v38 = vpop.f32.mrf.mxu0  ;;  %v5752_v49 = vld [vmem:[#allocation4 + $0xf0] sm:$0xff]  ;;  %v12688_v22 = vld [vmem:[#allocation25_spill] sm:$0xff] }
 0x42b   : > { %5446 = vst.msk [vmem:[#allocation4 + $0xf8] sm:$0xff] %vm573_vm3, %v5414_v40  ;;  %8325 = vmatmul.msk.f32.gmra.mxu2 %vm573_vm3, %v11605_v61  ;;  %v5784_v59 = vadd.f32 %v5752_v49, %v5720_v41  ;;  %v5721_v49 = vmul.f32 %v11539_v29, %v12669_v7 }
 0x42c   : > { %8358 = vmatmul.msk.f32.gmra.mxu3 %vm573_vm3, %v6545_v45  ;;  %6496 = vst.msk [vmem:[#allocation4] sm:$0xff] %vm573_vm3, %v6464_v34  ;;  %8304 = vmatmul.msk.f32.gmra.mxu1 %vm573_vm3, %v11295_v53  ;;  %v6075_v34 = vld [vmem:[#allocation4 + $0x70] sm:$0xff]  ;;  %v6771_v53 = vmul.f32 %v6675_v9, %v12688_v22  ;;  %v11623_v45 = vld [vmem:[#allocation3 + $0xa2] sm:$0xff] }
 0x42d   : > { %6138 = vst.msk [vmem:[#allocation4 + $0x68] sm:$0xff] %vm573_vm3, %v6106_v5  ;;  %8393 = vmatmul.msk.f32.gmra.mxu0 %vm573_vm3, %v6918_v21  ;;  %v6546_v5 = vld [vmem:[#allocation3 + $0xb0] sm:$0xff]  ;;  %v6919_v9 = vld [vmem:[#allocation3 + $0xc1] sm:$0xff] }
 0x42e   : > { %v6307_v60 = vpop.f32.mrf.mxu2  ;;  %5816 = vst.msk [vmem:[#allocation4 + $0xf0] sm:$0xff] %vm573_vm3, %v5784_v59  ;;  %v11628_v59 = vld [vmem:[#allocation3 + $0x101] sm:$0xff] }
 0x42f   : > { %v6678_v46 = vpop.f32.mrf.mxu3  ;;  %v6401_v17 = vmul.f32 %v6307_v60, %v12687_v28 }
 0x431   : > { %v6465_v41 = vadd.f32 %v6433_v31, %v6401_v17  ;;  %v6007_v40 = vpop.f32.mrf.mxu1 }
 0x432   : > { %v6107_v50 = vadd.f32 %v6075_v34, %v6007_v40  ;;  %v11625_v21 = vpop.f32.mrf.mxu0  ;;  %v5753_v1 = vld [vmem:[#allocation4 + $0xf8] sm:$0xff]  ;;  %v6434_v40 = vld [vmem:[#allocation4 + $0x10] sm:$0xff] }
 0x433   : > { %v6803_v4 = vld [vmem:[#allocation4] sm:$0xff]  ;;  %6497 = vst.msk [vmem:[#allocation4 + $0x8] sm:$0xff] %vm573_vm3, %v6465_v41  ;;  %8326 = vmatmul.msk.f32.gmra.mxu2 %vm573_vm3, %v11623_v45  ;;  %v5785_v29 = vadd.f32 %v5753_v1, %v5721_v49  ;;  %v6772_v1 = vmul.f32 %v6678_v46, %v12619_v48  ;;  %v6076_v34 = vld [vmem:[#allocation4 + $0x78] sm:$0xff] }
 0x434   : > { %8359 = vmatmul.msk.f32.gmra.mxu3 %vm573_vm3, %v6546_v5  ;;  %v6835_v60 = vadd.f32 %v6803_v4, %v6771_v53  ;;  %6139 = vst.msk [vmem:[#allocation4 + $0x70] sm:$0xff] %vm573_vm3, %v6107_v50  ;;  %8305 = vmatmul.msk.f32.gmra.mxu1 %vm573_vm3, %v11628_v59  ;;  %v11641_v50 = vld [vmem:[#allocation3 + $0xaa] sm:$0xff]  ;;  %v6547_v5 = vld [vmem:[#allocation3 + $0xb8] sm:$0xff] }
 0x435   : > { %8394 = vmatmul.msk.f32.gmra.mxu0 %vm573_vm3, %v6919_v9  ;;  %5817 = vst.msk [vmem:[#allocation4 + $0xf8] sm:$0xff] %vm573_vm3, %v5785_v29  ;;  %v6920_v48 = vld [vmem:[#allocation3 + $0xc9] sm:$0xff] }
 0x436   : > { %6867 = vst.msk [vmem:[#allocation4] sm:$0xff] %vm573_vm3, %v6835_v60  ;;  %v6310_v17 = vpop.f32.mrf.mxu2  ;;  %v11646_v60 = vld [vmem:[#allocation3 + $0x109] sm:$0xff] }
 0x437   : > { %v6681_v31 = vpop.f32.mrf.mxu3  ;;  %v6402_v41 = vmul.f32 %v6310_v17, %v12652_v3 }
 0x439   : > { %v6466_v4 = vadd.f32 %v6434_v40, %v6402_v41  ;;  %v6010_v49 = vpop.f32.mrf.mxu1 }
 0x43a   : > { %v6804_v22 = vld [vmem:[#allocation4 + $0x8] sm:$0xff]  ;;  %v6108_v53 = vadd.f32 %v6076_v34, %v6010_v49  ;;  %v11643_v9 = vpop.f32.mrf.mxu0  ;;  %v6773_v49 = vmul.f32 %v6681_v31, %v12620_v47 }
 0x43b   : > { %v6836_v29 = vadd.f32 %v6804_v22, %v6772_v1  ;;  %6498 = vst.msk [vmem:[#allocation4 + $0x10] sm:$0xff] %vm573_vm3, %v6466_v4  ;;  %8327 = vmatmul.msk.f32.gmra.mxu2 %vm573_vm3, %v11641_v50  ;;  %v6435_v4 = vld [vmem:[#allocation4 + $0x18] sm:$0xff]  ;;  %v6921_v47 = vld [vmem:[#allocation3 + $0xd1] sm:$0xff] }
 0x43c   : > { %8360 = vmatmul.msk.f32.gmra.mxu3 %vm573_vm3, %v6547_v5  ;;  %6140 = vst.msk [vmem:[#allocation4 + $0x78] sm:$0xff] %vm573_vm3, %v6108_v53  ;;  %8306 = vmatmul.msk.f32.gmra.mxu1 %vm573_vm3, %v11646_v60  ;;  %v6077_v53 = vld [vmem:[#allocation4 + $0x80] sm:$0xff] }
 0x43d   : > { %6868 = vst.msk [vmem:[#allocation4 + $0x8] sm:$0xff] %vm573_vm3, %v6836_v29  ;;  %8395 = vmatmul.msk.f32.gmra.mxu0 %vm573_vm3, %v6920_v48  ;;  %v7142_v46 = vld [vmem:[#allocation4] sm:$0xff]  ;;  %v11660_v29 = vld [vmem:[#allocation3 + $0xb2] sm:$0xff]  ;;  %v6548_v48 = vld [vmem:[#allocation3 + $0xc0] sm:$0xff] }
 0x43e   : > { %v6313_v17 = vpop.f32.mrf.mxu2  ;;  %v7174_v40 = vadd.f32 %v7142_v46, %v11556_v20 }
 0x43f   : > { %v6684_v41 = vpop.f32.mrf.mxu3  ;;  %v6403_v1 = vmul.f32 %v6313_v17, %v12653_v8 }
 0x440   : > { %7206 = vst.msk [vmem:[#allocation4] sm:$0xff] %vm573_vm3, %v7174_v40  ;;  %v12689_v40 = vld [vmem:[#allocation23_spill] sm:$0xff] }
 0x441   : > { %v6467_v34 = vadd.f32 %v6435_v4, %v6403_v1  ;;  %v6013_v22 = vpop.f32.mrf.mxu1  ;;  %v6436_v4 = vld [vmem:[#allocation4 + $0x20] sm:$0xff] }
 0x442   : > { %v6805_v5 = vld [vmem:[#allocation4 + $0x10] sm:$0xff]  ;;  %v6109_v7 = vadd.f32 %v6077_v53, %v6013_v22  ;;  %v11662_v16 = vpop.f32.mrf.mxu0 }
 0x443   : > { %v6837_v35 = vadd.f32 %v6805_v5, %v6773_v49  ;;  %6499 = vst.msk [vmem:[#allocation4 + $0x18] sm:$0xff] %vm573_vm3, %v6467_v34  ;;  %8328 = vmatmul.msk.f32.gmra.mxu2 %vm573_vm3, %v11660_v29  ;;  %v12690_v49 = vld [vmem:[#allocation20_spill] sm:$0xff] }
 0x444   : > { %8361 = vmatmul.msk.f32.gmra.mxu3 %vm573_vm3, %v6548_v48  ;;  %6141 = vst.msk [vmem:[#allocation4 + $0x80] sm:$0xff] %vm573_vm3, %v6109_v7  ;;  %8407 = vmatmul.msk.f32.vlgmr.msra.gmra.mxu1 %vm573_vm3, %v11344_v0  ;;  %v7143_v20 = vld [vmem:[#allocation4 + $0x8] sm:$0xff]  ;;  %v6774_v7 = vmul.f32 %v6684_v41, %v12690_v49  ;;  %v11677_v48 = vld [vmem:[#allocation3 + $0xba] sm:$0xff] }
 0x445   : > { %6869 = vst.msk [vmem:[#allocation4 + $0x10] sm:$0xff] %vm573_vm3, %v6837_v35  ;;  %8396 = vmatmul.msk.f32.gmra.mxu0 %vm573_vm3, %v6921_v47  ;;  %v7175_v31 = vadd.f32 %v7143_v20, %v11573_v55  ;;  %v6078_v0 = vld [vmem:[#allocation4 + $0x88] sm:$0xff]  ;;  %v6549_v35 = vld [vmem:[#allocation3 + $0xc8] sm:$0xff]  ;;  %v6922_v41 = vld [vmem:[#allocation3 + $0xd9] sm:$0xff] }
 0x446   : > { %v6316_v46 = vpop.f32.mrf.mxu2 }
 0x447   : > { %v6687_v17 = vpop.f32.mrf.mxu3  ;;  %v6404_v1 = vmul.f32 %v6316_v46, %v12689_v40  ;;  %7207 = vst.msk [vmem:[#allocation4 + $0x8] sm:$0xff] %vm573_vm3, %v7175_v31 }
 0x449   : > { %v6468_v34 = vadd.f32 %v6436_v4, %v6404_v1  ;;  %v6016_v22 = vpop.f32.mrf.mxu1  ;;  %v12691_v4 = vld [vmem:[#allocation36_spill] sm:$0xff] }
 0x44a   : > { %v6806_v53 = vld [vmem:[#allocation4 + $0x18] sm:$0xff]  ;;  %v6110_v5 = vadd.f32 %v6078_v0, %v6016_v22  ;;  %v11679_v47 = vpop.f32.mrf.mxu0 }
 0x44b   : > { %v6838_v55 = vadd.f32 %v6806_v53, %v6774_v7  ;;  %6500 = vst.msk [vmem:[#allocation4 + $0x20] sm:$0xff] %vm573_vm3, %v6468_v34  ;;  %8329 = vmatmul.msk.f32.gmra.mxu2 %vm573_vm3, %v11677_v48  ;;  %v6437_v7 = vld [vmem:[#allocation4 + $0x28] sm:$0xff]  ;;  %v12692_v34 = vld [vmem:[#allocation31_spill] sm:$0xff] }
 0x44c   : > { %8362 = vmatmul.msk.f32.gmra.mxu3 %vm573_vm3, %v6549_v35  ;;  %6142 = vst.msk [vmem:[#allocation4 + $0x88] sm:$0xff] %vm573_vm3, %v6110_v5  ;;  %8408 = vmatmul.msk.f32.gmra.mxu1 %vm573_vm3, %v11363_v11  ;;  %v7144_v20 = vld [vmem:[#allocation4 + $0x10] sm:$0xff]  ;;  %v6775_v22 = vmul.f32 %v6687_v17, %v12692_v34  ;;  %v6923_v17 = vld [vmem:[#allocation3 + $0xe1] sm:$0xff] }
 0x44d   : > { %6870 = vst.msk [vmem:[#allocation4 + $0x18] sm:$0xff] %vm573_vm3, %v6838_v55  ;;  %8397 = vmatmul.msk.f32.gmra.mxu0 %vm573_vm3, %v6922_v41  ;;  %v7176_v31 = vadd.f32 %v7144_v20, %v11590_v39  ;;  %v6079_v11 = vld [vmem:[#allocation4 + $0x90] sm:$0xff]  ;;  %v6550_v55 = vld [vmem:[#allocation3 + $0xd0] sm:$0xff] }
 0x44e   : > { %v6319_v46 = vpop.f32.mrf.mxu2 }
 0x44f   : > { %v6690_v1 = vpop.f32.mrf.mxu3  ;;  %v6405_v49 = vmul.f32 %v6319_v46, %v12691_v4  ;;  %7208 = vst.msk [vmem:[#allocation4 + $0x10] sm:$0xff] %vm573_vm3, %v7176_v31 }
 0x451   : > { %v6469_v0 = vadd.f32 %v6437_v7, %v6405_v49  ;;  %v6019_v53 = vpop.f32.mrf.mxu1  ;;  %v12693_v7 = vld [vmem:[#allocation39_spill] sm:$0xff] }
 0x452   : > { %v6807_v5 = vld [vmem:[#allocation4 + $0x20] sm:$0xff]  ;;  %v6111_v35 = vadd.f32 %v6079_v11, %v6019_v53  ;;  %v11696_v41 = vpop.f32.mrf.mxu0 }
 0x453   : > { %v6839_v39 = vadd.f32 %v6807_v5, %v6775_v22  ;;  %6501 = vst.msk [vmem:[#allocation4 + $0x28] sm:$0xff] %vm573_vm3, %v6469_v0  ;;  %8330 = vmatmul.msk.f32.gmra.mxu2 %vm573_vm3, %v11694_v32  ;;  %v6438_v22 = vld [vmem:[#allocation4 + $0x30] sm:$0xff]  ;;  %v12694_v0 = vld [vmem:[#allocation22_spill] sm:$0xff] }
 0x454   : > { %8363 = vmatmul.msk.f32.gmra.mxu3 %vm573_vm3, %v6550_v55  ;;  %6143 = vst.msk [vmem:[#allocation4 + $0x90] sm:$0xff] %vm573_vm3, %v6111_v35  ;;  %8409 = vmatmul.msk.f32.gmra.mxu1 %vm573_vm3, %v11381_v13  ;;  %v7145_v20 = vld [vmem:[#allocation4 + $0x18] sm:$0xff]  ;;  %v6776_v53 = vmul.f32 %v6690_v1, %v12694_v0  ;;  %v6924_v1 = vld [vmem:[#allocation3 + $0xe9] sm:$0xff] }
 0x455   : > { %6871 = vst.msk [vmem:[#allocation4 + $0x20] sm:$0xff] %vm573_vm3, %v6839_v39  ;;  %8398 = vmatmul.msk.f32.gmra.mxu0 %vm573_vm3, %v6923_v17  ;;  %v7177_v31 = vadd.f32 %v7145_v20, %v11607_v38  ;;  %v6080_v13 = vld [vmem:[#allocation4 + $0x98] sm:$0xff]  ;;  %v6551_v39 = vld [vmem:[#allocation3 + $0xd8] sm:$0xff] }
 0x456   : > { %v6322_v46 = vpop.f32.mrf.mxu2 }
 0x457   : > { %v6693_v49 = vpop.f32.mrf.mxu3  ;;  %v6406_v34 = vmul.f32 %v6322_v46, %v12693_v7  ;;  %7209 = vst.msk [vmem:[#allocation4 + $0x18] sm:$0xff] %vm573_vm3, %v7177_v31  ;;  %v11728_v7 = vld [vmem:[#allocation3 + $0xd2] sm:$0xff] }
 0x459   : > { %v6470_v11 = vadd.f32 %v6438_v22, %v6406_v34  ;;  %v6022_v5 = vpop.f32.mrf.mxu1  ;;  %v12695_v22 = vld [vmem:[#allocation29_spill] sm:$0xff] }
 0x45a   : > { %v6808_v35 = vld [vmem:[#allocation4 + $0x28] sm:$0xff]  ;;  %v6112_v55 = vadd.f32 %v6080_v13, %v6022_v5  ;;  %v11713_v17 = vpop.f32.mrf.mxu0 }
 0x45b   : > { %v6840_v38 = vadd.f32 %v6808_v35, %v6776_v53  ;;  %6502 = vst.msk [vmem:[#allocation4 + $0x30] sm:$0xff] %vm573_vm3, %v6470_v11  ;;  %8331 = vmatmul.msk.f32.gmra.mxu2 %vm573_vm3, %v11711_v30  ;;  %v6439_v53 = vld [vmem:[#allocation4 + $0x38] sm:$0xff]  ;;  %v12696_v11 = vld [vmem:[#allocation33_spill] sm:$0xff] }
 0x45c   : > { %8364 = vmatmul.msk.f32.gmra.mxu3 %vm573_vm3, %v6551_v39  ;;  %6144 = vst.msk [vmem:[#allocation4 + $0x98] sm:$0xff] %vm573_vm3, %v6112_v55  ;;  %8410 = vmatmul.msk.f32.gmra.mxu1 %vm573_vm3, %v11399_v37  ;;  %v7146_v20 = vld [vmem:[#allocation4 + $0x20] sm:$0xff]  ;;  %v6777_v5 = vmul.f32 %v6693_v49, %v12696_v11  ;;  %v6925_v49 = vld [vmem:[#allocation3 + $0xf1] sm:$0xff] }
 0x45d   : > { %6872 = vst.msk [vmem:[#allocation4 + $0x28] sm:$0xff] %vm573_vm3, %v6840_v38  ;;  %8399 = vmatmul.msk.f32.gmra.mxu0 %vm573_vm3, %v6924_v1  ;;  %v7178_v31 = vadd.f32 %v7146_v20, %v11625_v21  ;;  %v6081_v37 = vld [vmem:[#allocation4 + $0xa0] sm:$0xff]  ;;  %v6552_v38 = vld [vmem:[#allocation3 + $0xe0] sm:$0xff] }
 0x45e   : > { %v6325_v46 = vpop.f32.mrf.mxu2 }
 0x45f   : > { %v6696_v34 = vpop.f32.mrf.mxu3  ;;  %v6407_v0 = vmul.f32 %v6325_v46, %v12695_v22  ;;  %7210 = vst.msk [vmem:[#allocation4 + $0x20] sm:$0xff] %vm573_vm3, %v7178_v31  ;;  %v11745_v22 = vld [vmem:[#allocation3 + $0xda] sm:$0xff] }
 0x461   : > { %v6471_v13 = vadd.f32 %v6439_v53, %v6407_v0  ;;  %v6025_v35 = vpop.f32.mrf.mxu1  ;;  %v12697_v53 = vld [vmem:[#allocation41_spill] sm:$0xff] }
 0x462   : > { %v6809_v55 = vld [vmem:[#allocation4 + $0x30] sm:$0xff]  ;;  %v6113_v39 = vadd.f32 %v6081_v37, %v6025_v35  ;;  %v11734_v21 = vpop.f32.mrf.mxu0 }
 0x463   : > { %v6841_v1 = vadd.f32 %v6809_v55, %v6777_v5  ;;  %6503 = vst.msk [vmem:[#allocation4 + $0x38] sm:$0xff] %vm573_vm3, %v6471_v13  ;;  %8332 = vmatmul.msk.f32.gmra.mxu2 %vm573_vm3, %v11728_v7  ;;  %v6440_v5 = vld [vmem:[#allocation4 + $0x40] sm:$0xff] }
 0x464   : > { %8365 = vmatmul.msk.f32.gmra.mxu3 %vm573_vm3, %v6552_v38  ;;  %6145 = vst.msk [vmem:[#allocation4 + $0xa0] sm:$0xff] %vm573_vm3, %v6113_v39  ;;  %8411 = vmatmul.msk.f32.gmra.mxu1 %vm573_vm3, %v11417_v62  ;;  %v7147_v20 = vld [vmem:[#allocation4 + $0x28] sm:$0xff]  ;;  %v12698_v13 = vld [vmem:[#allocation37_spill] sm:$0xff] }
 0x465   : > { %6873 = vst.msk [vmem:[#allocation4 + $0x30] sm:$0xff] %vm573_vm3, %v6841_v1  ;;  %8400 = vmatmul.msk.f32.gmra.mxu0 %vm573_vm3, %v6925_v49  ;;  %v7179_v31 = vadd.f32 %v7147_v20, %v11643_v9  ;;  %v6778_v35 = vmul.f32 %v6696_v34, %v12698_v13  ;;  %v6082_v62 = vld [vmem:[#allocation4 + $0xa8] sm:$0xff]  ;;  %v6553_v1 = vld [vmem:[#allocation3 + $0xe8] sm:$0xff]  ;;  %v6926_v9 = vld [vmem:[#allocation3 + $0xf9] sm:$0xff] }
 0x466   : > { %v6328_v46 = vpop.f32.mrf.mxu2 }
 0x467   : > { %v6699_v0 = vpop.f32.mrf.mxu3  ;;  %v6408_v11 = vmul.f32 %v6328_v46, %v12697_v53  ;;  %7211 = vst.msk [vmem:[#allocation4 + $0x28] sm:$0xff] %vm573_vm3, %v7179_v31  ;;  %v6554_v53 = vld [vmem:[#allocation3 + $0xf0] sm:$0xff] }
 0x469   : > { %v6472_v37 = vadd.f32 %v6440_v5, %v6408_v11  ;;  %v6028_v55 = vpop.f32.mrf.mxu1  ;;  %v12699_v5 = vld [vmem:[#allocation45_spill] sm:$0xff] }
 0x46a   : > { %v6810_v39 = vld [vmem:[#allocation4 + $0x38] sm:$0xff]  ;;  %v6114_v38 = vadd.f32 %v6082_v62, %v6028_v55  ;;  %v11755_v20 = vpop.f32.mrf.mxu0 }
 0x46b   : > { %v6842_v49 = vadd.f32 %v6810_v39, %v6778_v35  ;;  %6504 = vst.msk [vmem:[#allocation4 + $0x40] sm:$0xff] %vm573_vm3, %v6472_v37  ;;  %8333 = vmatmul.msk.f32.gmra.mxu2 %vm573_vm3, %v11745_v22  ;;  %v6441_v35 = vld [vmem:[#allocation4 + $0x48] sm:$0xff]  ;;  %v6083_v39 = vld [vmem:[#allocation4 + $0xb0] sm:$0xff] }
 0x46c   : > { %8366 = vmatmul.msk.f32.gmra.mxu3 %vm573_vm3, %v6553_v1  ;;  %6146 = vst.msk [vmem:[#allocation4 + $0xa8] sm:$0xff] %vm573_vm3, %v6114_v38  ;;  %8412 = vmatmul.msk.f32.gmra.mxu1 %vm573_vm3, %v11435_v12  ;;  %v7148_v34 = vld [vmem:[#allocation4 + $0x30] sm:$0xff]  ;;  %v12700_v37 = vld [vmem:[#allocation26_spill] sm:$0xff] }
 0x46d   : > { %6874 = vst.msk [vmem:[#allocation4 + $0x38] sm:$0xff] %vm573_vm3, %v6842_v49  ;;  %8401 = vmatmul.msk.f32.gmra.mxu0 %vm573_vm3, %v6926_v9  ;;  %v7180_v31 = vadd.f32 %v7148_v34, %v11662_v16  ;;  %v6779_v55 = vmul.f32 %v6699_v0, %v12700_v37  ;;  %v11762_v49 = vld [vmem:[#allocation3 + $0xe2] sm:$0xff]  ;;  %v12702_v37 = vld [vmem:[#allocation38_spill] sm:$0xff] }
 0x46e   : > { %v6331_v46 = vpop.f32.mrf.mxu2 }
 0x46f   : > { %v6702_v11 = vpop.f32.mrf.mxu3  ;;  %v6409_v13 = vmul.f32 %v6331_v46, %v12699_v5  ;;  %7212 = vst.msk [vmem:[#allocation4 + $0x30] sm:$0xff] %vm573_vm3, %v7180_v31 }
 0x471   : > { %v6473_v12 = vadd.f32 %v6441_v35, %v6409_v13  ;;  %v6031_v62 = vpop.f32.mrf.mxu1  ;;  %v12701_v13 = vld [vmem:[#allocation35_spill] sm:$0xff] }
 0x472   : > { %v6811_v38 = vld [vmem:[#allocation4 + $0x40] sm:$0xff]  ;;  %v6115_v1 = vadd.f32 %v6083_v39, %v6031_v62  ;;  %v11775_v46 = vpop.f32.mrf.mxu0  ;;  %v6084_v62 = vld [vmem:[#allocation4 + $0xb8] sm:$0xff] }
 0x473   : > { %v6843_v9 = vadd.f32 %v6811_v38, %v6779_v55  ;;  %6505 = vst.msk [vmem:[#allocation4 + $0x48] sm:$0xff] %vm573_vm3, %v6473_v12  ;;  %8334 = vmatmul.msk.f32.gmra.mxu2 %vm573_vm3, %v11762_v49  ;;  %v6780_v55 = vmul.f32 %v6702_v11, %v12702_v37  ;;  %v12704_v37 = vld [vmem:[#allocation42_spill] sm:$0xff] }
 0x474   : > { %8367 = vmatmul.msk.f32.gmra.mxu3 %vm573_vm3, %v6554_v53  ;;  %6147 = vst.msk [vmem:[#allocation4 + $0xb0] sm:$0xff] %vm573_vm3, %v6115_v1  ;;  %8413 = vmatmul.msk.f32.gmra.mxu1 %vm573_vm3, %v11452_v63  ;;  %v7149_v16 = vld [vmem:[#allocation4 + $0x38] sm:$0xff]  ;;  %v6442_v53 = vld [vmem:[#allocation4 + $0x50] sm:$0xff]  ;;  %v11780_v1 = vld [vmem:[#allocation3 + $0xea] sm:$0xff] }
 0x475   : > { %6875 = vst.msk [vmem:[#allocation4 + $0x40] sm:$0xff] %vm573_vm3, %v6843_v9  ;;  %8402 = vmatmul.msk.f32.gmra.mxu0 %vm573_vm3, %v11628_v59  ;;  %v7181_v0 = vadd.f32 %v7149_v16, %v11679_v47  ;;  %v6555_v59 = vld [vmem:[#allocation3 + $0xf8] sm:$0xff] }
 0x476   : > { %v6334_v34 = vpop.f32.mrf.mxu2 }
 0x477   : > { %v6705_v31 = vpop.f32.mrf.mxu3  ;;  %v6410_v35 = vmul.f32 %v6334_v34, %v12701_v13  ;;  %7213 = vst.msk [vmem:[#allocation4 + $0x38] sm:$0xff] %vm573_vm3, %v7181_v0  ;;  %v12703_v34 = vld [vmem:[#allocation47_spill] sm:$0xff] }
 0x479   : > { %v6474_v63 = vadd.f32 %v6442_v53, %v6410_v35  ;;  %v6034_v12 = vpop.f32.mrf.mxu1  ;;  %v6443_v53 = vld [vmem:[#allocation4 + $0x58] sm:$0xff] }
 0x47a   : > { %v6812_v39 = vld [vmem:[#allocation4 + $0x48] sm:$0xff]  ;;  %v6116_v38 = vadd.f32 %v6084_v62, %v6034_v12  ;;  %v6085_v62 = vld [vmem:[#allocation4 + $0xc0] sm:$0xff] }
 0x47b   : > { %v6844_v47 = vadd.f32 %v6812_v39, %v6780_v55  ;;  %6506 = vst.msk [vmem:[#allocation4 + $0x50] sm:$0xff] %vm573_vm3, %v6474_v63  ;;  %8335 = vmatmul.msk.f32.gmra.mxu2 %vm573_vm3, %v11780_v1  ;;  %v6781_v55 = vmul.f32 %v6705_v31, %v12704_v37  ;;  %v11796_v63 = vpop.f32.mrf.mxu0  ;;  %v12706_v37 = vld [vmem:[#allocation32_spill] sm:$0xff] }
 0x47c   : > { %8368 = vmatmul.msk.f32.gmra.mxu3 %vm573_vm3, %v6555_v59  ;;  %6148 = vst.msk [vmem:[#allocation4 + $0xb8] sm:$0xff] %vm573_vm3, %v6116_v38  ;;  %8414 = vmatmul.msk.f32.gmra.mxu1 %vm573_vm3, %v11469_v51  ;;  %v7150_v11 = vld [vmem:[#allocation4 + $0x40] sm:$0xff]  ;;  %v11798_v59 = vld [vmem:[#allocation3 + $0xf2] sm:$0xff] }
 0x47d   : > { %6876 = vst.msk [vmem:[#allocation4 + $0x48] sm:$0xff] %vm573_vm3, %v6844_v47  ;;  %8403 = vmatmul.msk.f32.gmra.mxu0 %vm573_vm3, %v11646_v60  ;;  %v7182_v9 = vadd.f32 %v7150_v11, %v11696_v41  ;;  %v6556_v60 = vld [vmem:[#allocation3 + $0x100] sm:$0xff] }
 0x47e   : > { %v6337_v16 = vpop.f32.mrf.mxu2 }
 0x47f   : > { %v6708_v0 = vpop.f32.mrf.mxu3  ;;  %v6411_v35 = vmul.f32 %v6337_v16, %v12703_v34  ;;  %7214 = vst.msk [vmem:[#allocation4 + $0x40] sm:$0xff] %vm573_vm3, %v7182_v9  ;;  %v12705_v16 = vld [vmem:[#allocation51_spill] sm:$0xff] }
 0x481   : > { %v6475_v51 = vadd.f32 %v6443_v53, %v6411_v35  ;;  %v6037_v12 = vpop.f32.mrf.mxu1  ;;  %v6444_v53 = vld [vmem:[#allocation4 + $0x60] sm:$0xff] }
 0x482   : > { %v6813_v39 = vld [vmem:[#allocation4 + $0x50] sm:$0xff]  ;;  %v6117_v38 = vadd.f32 %v6085_v62, %v6037_v12  ;;  %v6086_v62 = vld [vmem:[#allocation4 + $0xc8] sm:$0xff] }
 0x483   : > { %v6845_v41 = vadd.f32 %v6813_v39, %v6781_v55  ;;  %6507 = vst.msk [vmem:[#allocation4 + $0x58] sm:$0xff] %vm573_vm3, %v6475_v51  ;;  %8336 = vmatmul.msk.f32.gmra.mxu2 %vm573_vm3, %v11798_v59  ;;  %v6782_v55 = vmul.f32 %v6708_v0, %v12706_v37  ;;  %v11814_v34 = vpop.f32.mrf.mxu0 }
 0x484   : > { %8369 = vmatmul.msk.f32.gmra.mxu3 %vm573_vm3, %v6556_v60  ;;  %6149 = vst.msk [vmem:[#allocation4 + $0xc0] sm:$0xff] %vm573_vm3, %v6117_v38  ;;  %8415 = vmatmul.msk.f32.gmra.mxu1 %vm573_vm3, %v11486_v24  ;;  %v7151_v31 = vld [vmem:[#allocation4 + $0x48] sm:$0xff]  ;;  %v11812_v24 = vld [vmem:[#allocation3 + $0xfa] sm:$0xff]  ;;  %v6557_v60 = vld [vmem:[#allocation3 + $0x108] sm:$0xff] }
 0x485   : > { %6877 = vst.msk [vmem:[#allocation4 + $0x50] sm:$0xff] %vm573_vm3, %v6845_v41  ;;  %v7183_v47 = vadd.f32 %v7151_v31, %v11713_v17 }
 0x486   : > { %v6340_v11 = vpop.f32.mrf.mxu2 }
 0x487   : > { %v6711_v9 = vpop.f32.mrf.mxu3  ;;  %v6412_v35 = vmul.f32 %v6340_v11, %v12705_v16  ;;  %7215 = vst.msk [vmem:[#allocation4 + $0x48] sm:$0xff] %vm573_vm3, %v7183_v47 }
 0x489   : > { %v6476_v51 = vadd.f32 %v6444_v53, %v6412_v35  ;;  %v6040_v12 = vpop.f32.mrf.mxu1  ;;  %v6445_v35 = vld [vmem:[#allocation4 + $0x68] sm:$0xff]  ;;  %v12707_v53 = vld [vmem:[#allocation44_spill] sm:$0xff] }
 0x48a   : > { %v6814_v39 = vld [vmem:[#allocation4 + $0x58] sm:$0xff]  ;;  %v6118_v38 = vadd.f32 %v6086_v62, %v6040_v12  ;;  %v6783_v37 = vmul.f32 %v6711_v9, %v12707_v53  ;;  %v6087_v12 = vld [vmem:[#allocation4 + $0xd0] sm:$0xff] }
 0x48b   : > { %v6846_v41 = vadd.f32 %v6814_v39, %v6782_v55  ;;  %6508 = vst.msk [vmem:[#allocation4 + $0x60] sm:$0xff] %vm573_vm3, %v6476_v51  ;;  %8337 = vmatmul.msk.f32.gmra.mxu2 %vm573_vm3, %v11812_v24  ;;  %v11828_v62 = vld [vmem:[#allocation3 + $0x102] sm:$0xff]  ;;  %v11839_v9 = vpop.f32.mrf.mxu0  ;;  %v6559_v53 = vld [vmem:[#allocation3 + $0x118] sm:$0xff] }
 0x48c   : > { %8370 = vmatmul.msk.f32.gmra.mxu3 %vm573_vm3, %v6557_v60  ;;  %6150 = vst.msk [vmem:[#allocation4 + $0xc8] sm:$0xff] %vm573_vm3, %v6118_v38  ;;  %8416 = vmatmul.msk.f32.gmra.mxu1 %vm573_vm3, %v11503_v6  ;;  %v7152_v17 = vld [vmem:[#allocation4 + $0x50] sm:$0xff]  ;;  %v6558_v38 = vld [vmem:[#allocation3 + $0x110] sm:$0xff] }
 0x48d   : > { %6878 = vst.msk [vmem:[#allocation4 + $0x58] sm:$0xff] %vm573_vm3, %v6846_v41  ;;  %v7184_v0 = vadd.f32 %v7152_v17, %v11734_v21  ;;  %v6929_v60 = vld [vmem:[#allocation3 + $0x111] sm:$0xff] }
 0x48e   : > { %v6343_v31 = vpop.f32.mrf.mxu2  ;;  %8404 = vmatmul.msk.f32.gmra.mxu0 %vm573_vm3, %v6929_v60  ;;  %v6930_v60 = vld [vmem:[#allocation3 + $0x119] sm:$0xff] }
 0x48f   : > { %v6714_v47 = vpop.f32.mrf.mxu3  ;;  %v6413_v11 = vmul.f32 %v6343_v31, %v12661_v57  ;;  %7216 = vst.msk [vmem:[#allocation4 + $0x50] sm:$0xff] %vm573_vm3, %v7184_v0 }
 0x491   : > { %v6477_v55 = vadd.f32 %v6445_v35, %v6413_v11  ;;  %v6043_v51 = vpop.f32.mrf.mxu1  ;;  %v6446_v35 = vld [vmem:[#allocation4 + $0x70] sm:$0xff] }
 0x492   : > { %v6815_v6 = vld [vmem:[#allocation4 + $0x60] sm:$0xff]  ;;  %v6119_v39 = vadd.f32 %v6087_v12, %v6043_v51  ;;  %v6088_v12 = vld [vmem:[#allocation4 + $0xd8] sm:$0xff] }
 0x493   : > { %v6847_v41 = vadd.f32 %v6815_v6, %v6783_v37  ;;  %6509 = vst.msk [vmem:[#allocation4 + $0x68] sm:$0xff] %vm573_vm3, %v6477_v55  ;;  %8338 = vmatmul.msk.f32.gmra.mxu2 %vm573_vm3, %v11828_v62  ;;  %v12708_v37 = vld [vmem:[#allocation48_spill] sm:$0xff] }
 0x494   : > { %8371 = vmatmul.msk.f32.gmra.mxu3 %vm573_vm3, %v6558_v38  ;;  %6151 = vst.msk [vmem:[#allocation4 + $0xd0] sm:$0xff] %vm573_vm3, %v6119_v39  ;;  %8417 = vmatmul.msk.f32.gmra.mxu1 %vm573_vm3, %v11520_v44  ;;  %v7153_v21 = vld [vmem:[#allocation4 + $0x58] sm:$0xff]  ;;  %v6784_v55 = vmul.f32 %v6714_v47, %v12708_v37  ;;  %v11845_v38 = vld [vmem:[#allocation3 + $0x10a] sm:$0xff] }
 0x495   : > { %6879 = vst.msk [vmem:[#allocation4 + $0x60] sm:$0xff] %vm573_vm3, %v6847_v41  ;;  %v7185_v17 = vadd.f32 %v7153_v21, %v11755_v20 }
 0x496   : > { %v6346_v0 = vpop.f32.mrf.mxu2  ;;  %8405 = vmatmul.msk.f32.gmra.mxu0 %vm573_vm3, %v6930_v60 }
 0x497   : > { %v6717_v31 = vpop.f32.mrf.mxu3  ;;  %v6414_v11 = vmul.f32 %v6346_v0, %v12662_v56  ;;  %7217 = vst.msk [vmem:[#allocation4 + $0x58] sm:$0xff] %vm573_vm3, %v7185_v17  ;;  %v11857_v0 = vpop.f32.mrf.mxu0 }
 0x499   : > { %v6478_v44 = vadd.f32 %v6446_v35, %v6414_v11  ;;  %v6046_v51 = vpop.f32.mrf.mxu1  ;;  %v6447_v35 = vld [vmem:[#allocation4 + $0x78] sm:$0xff] }
 0x49a   : > { %v6816_v6 = vld [vmem:[#allocation4 + $0x68] sm:$0xff]  ;;  %v6120_v39 = vadd.f32 %v6088_v12, %v6046_v51 }
 0x49b   : > { %v6848_v41 = vadd.f32 %v6816_v6, %v6784_v55  ;;  %6510 = vst.msk [vmem:[#allocation4 + $0x70] sm:$0xff] %vm573_vm3, %v6478_v44  ;;  %8339 = vmatmul.msk.f32.gmra.mxu2 %vm573_vm3, %v11845_v38  ;;  %v6089_v55 = vld [vmem:[#allocation4 + $0xe0] sm:$0xff] }
 0x49c   : > { %8372 = vmatmul.msk.f32.gmra.mxu3 %vm573_vm3, %v6559_v53  ;;  %6152 = vst.msk [vmem:[#allocation4 + $0xd8] sm:$0xff] %vm573_vm3, %v6120_v39  ;;  %8418 = vmatmul.msk.f32.gmra.mxu1 %vm573_vm3, %v11537_v54  ;;  %v7154_v20 = vld [vmem:[#allocation4 + $0x60] sm:$0xff]  ;;  %v6785_v53 = vmul.f32 %v6717_v31, %v9368_v14  ;;  %v12709_v31 = vld [vmem:[#allocation46_spill] sm:$0xff] }
 0x49d   : > { %6880 = vst.msk [vmem:[#allocation4 + $0x68] sm:$0xff] %vm573_vm3, %v6848_v41  ;;  %v7186_v47 = vadd.f32 %v7154_v20, %v11775_v46  ;;  %v6448_v41 = vld [vmem:[#allocation4 + $0x80] sm:$0xff] }
 0x49e   : > { %v6349_v21 = vpop.f32.mrf.mxu2 }
 0x49f   : > { %v6720_v17 = vpop.f32.mrf.mxu3  ;;  %v6415_v11 = vmul.f32 %v6349_v21, %v12663_v42  ;;  %7218 = vst.msk [vmem:[#allocation4 + $0x60] sm:$0xff] %vm573_vm3, %v7186_v47  ;;  %v11870_v20 = vpop.f32.mrf.mxu0  ;;  %v12710_v47 = vld [vmem:[#allocation50_spill] sm:$0xff] }
 0x4a0   : > { %v6786_v21 = vmul.f32 %v6720_v17, %v12710_v47 }
 0x4a1   : > { %v6479_v37 = vadd.f32 %v6447_v35, %v6415_v11  ;;  %v6049_v54 = vpop.f32.mrf.mxu1 }
 0x4a2   : > { %v6817_v44 = vld [vmem:[#allocation4 + $0x70] sm:$0xff]  ;;  %v6121_v51 = vadd.f32 %v6089_v55, %v6049_v54 }
 0x4a3   : > { %v6849_v12 = vadd.f32 %v6817_v44, %v6785_v53  ;;  %6511 = vst.msk [vmem:[#allocation4 + $0x78] sm:$0xff] %vm573_vm3, %v6479_v37  ;;  %v6090_v53 = vld [vmem:[#allocation4 + $0xe8] sm:$0xff] }
 0x4a4   : > { %6153 = vst.msk [vmem:[#allocation4 + $0xe0] sm:$0xff] %vm573_vm3, %v6121_v51  ;;  %8419 = vmatmul.msk.f32.gmra.mxu1 %vm573_vm3, %v11554_v36  ;;  %v7155_v46 = vld [vmem:[#allocation4 + $0x68] sm:$0xff] }
 0x4a5   : > { %6881 = vst.msk [vmem:[#allocation4 + $0x70] sm:$0xff] %vm573_vm3, %v6849_v12  ;;  %v7187_v6 = vadd.f32 %v7155_v46, %v11796_v63  ;;  %v6449_v12 = vld [vmem:[#allocation4 + $0x88] sm:$0xff]  ;;  %v12711_v46 = vld [vmem:[#allocation53_spill] sm:$0xff] }
 0x4a6   : > { %v6352_v39 = vpop.f32.mrf.mxu2 }
 0x4a7   : > { %v6723_v14 = vpop.f32.mrf.mxu3  ;;  %v6416_v60 = vmul.f32 %v6352_v39, %v12709_v31  ;;  %7219 = vst.msk [vmem:[#allocation4 + $0x68] sm:$0xff] %vm573_vm3, %v7187_v6 }
 0x4a8   : > { %v6787_v6 = vmul.f32 %v6723_v14, %v12711_v46 }
 0x4a9   : > { %v6480_v11 = vadd.f32 %v6448_v41, %v6416_v60  ;;  %v6052_v35 = vpop.f32.mrf.mxu1  ;;  %v6091_v41 = vld [vmem:[#allocation4 + $0xf0] sm:$0xff] }
 0x4aa   : > { %v6818_v36 = vld [vmem:[#allocation4 + $0x78] sm:$0xff]  ;;  %v6122_v37 = vadd.f32 %v6090_v53, %v6052_v35 }
 0x4ab   : > { %v6850_v54 = vadd.f32 %v6818_v36, %v6786_v21  ;;  %6512 = vst.msk [vmem:[#allocation4 + $0x80] sm:$0xff] %vm573_vm3, %v6480_v11 }
 0x4ac   : > { %6154 = vst.msk [vmem:[#allocation4 + $0xe8] sm:$0xff] %vm573_vm3, %v6122_v37  ;;  %8420 = vmatmul.msk.f32.gmra.mxu1 %vm573_vm3, %v11571_v10  ;;  %v7156_v63 = vld [vmem:[#allocation4 + $0x70] sm:$0xff]  ;;  %v11882_v10 = vpop.f32.mrf.mxu0 }
 0x4ad   : > { %6882 = vst.msk [vmem:[#allocation4 + $0x78] sm:$0xff] %vm573_vm3, %v6850_v54  ;;  %v7188_v55 = vadd.f32 %v7156_v63, %v11814_v34  ;;  %v6450_v37 = vld [vmem:[#allocation4 + $0x90] sm:$0xff] }
 0x4ae   : > { %v6355_v44 = vpop.f32.mrf.mxu2  ;;  %v12712_v54 = vld [vmem:[#allocation43_spill] sm:$0xff] }
 0x4af   : > { %v6726_v17 = vpop.f32.mrf.mxu3  ;;  %v6417_v51 = vmul.f32 %v6355_v44, %v12668_v26  ;;  %7220 = vst.msk [vmem:[#allocation4 + $0x70] sm:$0xff] %vm573_vm3, %v7188_v55 }
 0x4b0   : > { %v6788_v63 = vmul.f32 %v6726_v17, %v12712_v54 }
 0x4b1   : > { %v6481_v39 = vadd.f32 %v6449_v12, %v6417_v51  ;;  %v6055_v60 = vpop.f32.mrf.mxu1  ;;  %v6092_v51 = vld [vmem:[#allocation4 + $0xf8] sm:$0xff] }
 0x4b2   : > { %v6819_v47 = vld [vmem:[#allocation4 + $0x80] sm:$0xff]  ;;  %v6123_v21 = vadd.f32 %v6091_v41, %v6055_v60 }
 0x4b3   : > { %v6851_v11 = vadd.f32 %v6819_v47, %v6787_v6  ;;  %6513 = vst.msk [vmem:[#allocation4 + $0x88] sm:$0xff] %vm573_vm3, %v6481_v39  ;;  %v6451_v47 = vld [vmem:[#allocation4 + $0x98] sm:$0xff] }
 0x4b4   : > { %6155 = vst.msk [vmem:[#allocation4 + $0xf0] sm:$0xff] %vm573_vm3, %v6123_v21  ;;  %8421 = vmatmul.msk.f32.gmra.mxu1 %vm573_vm3, %v11588_v2  ;;  %v7157_v34 = vld [vmem:[#allocation4 + $0x78] sm:$0xff]  ;;  %v11897_v6 = vpop.f32.mrf.mxu0 }
 0x4b5   : > { %6883 = vst.msk [vmem:[#allocation4 + $0x80] sm:$0xff] %vm573_vm3, %v6851_v11  ;;  %v7189_v14 = vadd.f32 %v7157_v34, %v11839_v9 }
 0x4b6   : > { %v6358_v35 = vpop.f32.mrf.mxu2 }
 0x4b7   : > { %v6729_v53 = vpop.f32.mrf.mxu3  ;;  %v6418_v36 = vmul.f32 %v6358_v35, %v12671_v52  ;;  %7221 = vst.msk [vmem:[#allocation4 + $0x78] sm:$0xff] %vm573_vm3, %v7189_v14 }
 0x4b8   : > { %v6789_v21 = vmul.f32 %v6729_v53, %v12600_v43 }
 0x4b9   : > { %v6482_v55 = vadd.f32 %v6450_v37, %v6418_v36  ;;  %v6058_v44 = vpop.f32.mrf.mxu1  ;;  %v7513_v36 = vld [vmem:[#allocation4] sm:$0xff] }
 0x4ba   : > { %v6820_v12 = vld [vmem:[#allocation4 + $0x88] sm:$0xff]  ;;  %v6124_v46 = vadd.f32 %v6092_v51, %v6058_v44 }
 0x4bb   : > { %v6852_v2 = vadd.f32 %v6820_v12, %v6788_v63  ;;  %6514 = vst.msk [vmem:[#allocation4 + $0x90] sm:$0xff] %vm573_vm3, %v6482_v55  ;;  %v6452_v55 = vld [vmem:[#allocation4 + $0xa0] sm:$0xff] }
 0x4bc   : > { %6156 = vst.msk [vmem:[#allocation4 + $0xf8] sm:$0xff] %vm573_vm3, %v6124_v46  ;;  %8422 = vmatmul.msk.f32.gmra.mxu1 %vm573_vm3, %v11605_v61  ;;  %v7158_v9 = vld [vmem:[#allocation4 + $0x80] sm:$0xff]  ;;  %v11911_v63 = vpop.f32.mrf.mxu0 }
 0x4bd   : > { %6884 = vst.msk [vmem:[#allocation4 + $0x88] sm:$0xff] %vm573_vm3, %v6852_v2  ;;  %v7190_v17 = vadd.f32 %v7158_v9, %v11857_v0  ;;  %v7514_v9 = vld [vmem:[#allocation4 + $0x8] sm:$0xff] }
 0x4be   : > { %v6361_v39 = vpop.f32.mrf.mxu2 }
 0x4bf   : > { %v6732_v60 = vpop.f32.mrf.mxu3  ;;  %v6419_v41 = vmul.f32 %v6361_v39, %v12673_v27  ;;  %7222 = vst.msk [vmem:[#allocation4 + $0x80] sm:$0xff] %vm573_vm3, %v7190_v17 }
 0x4c0   : > { %v6790_v44 = vmul.f32 %v6732_v60, %v9544_v33 }
 0x4c1   : > { %v6483_v11 = vadd.f32 %v6451_v47, %v6419_v41  ;;  %v7385_v34 = vpop.f32.mrf.mxu1 }
 0x4c2   : > { %v6821_v14 = vld [vmem:[#allocation4 + $0x90] sm:$0xff]  ;;  %v7481_v61 = vmul.f32 %v7385_v34, %v12686_v58  ;;  %v6453_v34 = vld [vmem:[#allocation4 + $0xa8] sm:$0xff] }
 0x4c3   : > { %v6853_v35 = vadd.f32 %v6821_v14, %v6789_v21  ;;  %6515 = vst.msk [vmem:[#allocation4 + $0x98] sm:$0xff] %vm573_vm3, %v6483_v11  ;;  %v12713_v21 = vld [vmem:[#allocation7_spill] sm:$0xff] }
 0x4c4   : > { %v7545_v37 = vadd.f32 %v7513_v36, %v7481_v61  ;;  %8423 = vmatmul.msk.f32.gmra.mxu1 %vm573_vm3, %v11623_v45  ;;  %v7159_v0 = vld [vmem:[#allocation4 + $0x88] sm:$0xff]  ;;  %v12714_v11 = vunpack.c.l.bf16 %v12713_v21  ;;  %v11939_v14 = vpop.f32.mrf.mxu0  ;;  %v12715_v61 = vld [vmem:[#allocation49_spill] sm:$0xff] }
 0x4c5   : > { %6885 = vst.msk [vmem:[#allocation4 + $0x90] sm:$0xff] %vm573_vm3, %v6853_v35  ;;  %v7191_v54 = vadd.f32 %v7159_v0, %v11870_v20  ;;  %v11919_v20 = vld [vmem:[%s12318_s6] ss:$0 sm:$0xff] }
 0x4c6   : > { %7577 = vst.msk [vmem:[#allocation4] sm:$0xff] %vm573_vm3, %v7545_v37  ;;  %v6364_v43 = vpop.f32.mrf.mxu2 }
 0x4c7   : > { %v6735_v53 = vpop.f32.mrf.mxu3  ;;  %v6420_v58 = vmul.f32 %v6364_v43, %v12674_v25  ;;  %7223 = vst.msk [vmem:[#allocation4 + $0x88] sm:$0xff] %vm573_vm3, %v7191_v54 }
 0x4c8   : > { %v6791_v35 = vmul.f32 %v6735_v53, %v12715_v61 }
 0x4c9   : > { %v6484_v45 = vadd.f32 %v6452_v55, %v6420_v58  ;;  %v7388_v51 = vpop.f32.mrf.mxu1  ;;  %v7515_v58 = vld [vmem:[#allocation4 + $0x10] sm:$0xff] }
 0x4ca   : > { %v6822_v12 = vld [vmem:[#allocation4 + $0x98] sm:$0xff]  ;;  %v7482_v46 = vmul.f32 %v7388_v51, %v12687_v28 }
 0x4cb   : > { %v6854_v2 = vadd.f32 %v6822_v12, %v6790_v44  ;;  %6516 = vst.msk [vmem:[#allocation4 + $0xa0] sm:$0xff] %vm573_vm3, %v6484_v45 }
 0x4cc   : > { %v7546_v17 = vadd.f32 %v7514_v9, %v7482_v46  ;;  %8424 = vmatmul.msk.f32.gmra.mxu1 %vm573_vm3, %v11641_v50  ;;  %v7160_v33 = vld [vmem:[#allocation4 + $0x90] sm:$0xff] }
 0x4cd   : > { %6886 = vst.msk [vmem:[#allocation4 + $0x98] sm:$0xff] %vm573_vm3, %v6854_v2  ;;  %v7609_v39 = vld [vmem:[#allocation4] sm:$0xff]  ;;  %v7192_v60 = vadd.f32 %v7160_v33, %v11882_v10  ;;  %v12716_v2 = vunpack.c.h.bf16 %v12713_v21  ;;  %v6454_v9 = vld [vmem:[#allocation4 + $0xb0] sm:$0xff] }
 0x4ce   : > { %v7645_v41 = vadd.f32 %v11919_v20, %v7609_v39  ;;  %7578 = vst.msk [vmem:[#allocation4 + $0x8] sm:$0xff] %vm573_vm3, %v7546_v17  ;;  %v6367_v28 = vpop.f32.mrf.mxu2  ;;  %v12717_v39 = vld [vmem:[#allocation59_spill] sm:$0xff] }
 0x4cf   : > { %v6738_v47 = vpop.f32.mrf.mxu3  ;;  %v6421_v50 = vmul.f32 %v6367_v28, %v12675_v23  ;;  %7224 = vst.msk [vmem:[#allocation4 + $0x90] sm:$0xff] %vm573_vm3, %v7192_v60 }
 0x4d0   : > { %v7677_v10 = vadd.f32 %v12714_v11, %v7645_v41 }
 0x4d1   : > { %v6485_v36 = vadd.f32 %v6453_v34, %v6421_v50  ;;  %v7391_v37 = vpop.f32.mrf.mxu1  ;;  %v7516_v50 = vld [vmem:[#allocation4 + $0x18] sm:$0xff] }
 0x4d2   : > { %7709 = vst.msk [vmem:[%s11933_s10] sm:$0xff] %vm533_vm0, %v7677_v10  ;;  %v6823_v0 = vld [vmem:[#allocation4 + $0xa0] sm:$0xff]  ;;  %v7483_v54 = vmul.f32 %v7391_v37, %v12652_v3 }
 0x4d3   : > { %7742 = vst.msk [vmem:[%s11933_s10] sm:$0xff] %vm7741_vm5, %v7645_v41  ;;  %v6855_v43 = vadd.f32 %v6823_v0, %v6791_v35  ;;  %v7112_v41 = vpop.f32.mrf.mxu0  ;;  %v12718_v37 = vld [vmem:[#allocation9_spill] sm:$0xff] }
 0x4d4   : > { %6517 = vst.msk [vmem:[#allocation4 + $0xa8] sm:$0xff] %vm573_vm3, %v6485_v36  ;;  %v7547_v55 = vadd.f32 %v7515_v58, %v7483_v54  ;;  %8425 = vmatmul.msk.f32.gmra.mxu1 %vm573_vm3, %v11660_v29  ;;  %v7161_v44 = vld [vmem:[#allocation4 + $0x98] sm:$0xff]  ;;  %v12719_v0 = vunpack.c.l.bf16 %v12718_v37 }
 0x4d5   : > { %6887 = vst.msk [vmem:[#allocation4 + $0xa0] sm:$0xff] %vm573_vm3, %v6855_v43  ;;  %v7610_v53 = vld [vmem:[#allocation4 + $0x8] sm:$0xff]  ;;  %v7193_v45 = vadd.f32 %v7161_v44, %v11897_v6  ;;  %v6792_v6 = vmul.f32 %v6738_v47, %v12717_v39  ;;  %v6455_v43 = vld [vmem:[#allocation4 + $0xb8] sm:$0xff]  ;;  %v6456_v39 = vld [vmem:[#allocation4 + $0xc0] sm:$0xff] }
 0x4d6   : > { %v7646_v3 = vadd.f32 %v11919_v20, %v7610_v53  ;;  %7579 = vst.msk [vmem:[#allocation4 + $0x10] sm:$0xff] %vm573_vm3, %v7547_v55  ;;  %v6370_v51 = vpop.f32.mrf.mxu2 }
 0x4d7   : > { %v6741_v12 = vpop.f32.mrf.mxu3  ;;  %v6422_v46 = vmul.f32 %v6370_v51, %v12676_v19  ;;  %7225 = vst.msk [vmem:[#allocation4 + $0x98] sm:$0xff] %vm573_vm3, %v7193_v45  ;;  %v7517_v45 = vld [vmem:[#allocation4 + $0x20] sm:$0xff] }
 0x4d8   : > { %v7678_v29 = vadd.f32 %v12716_v2, %v7646_v3 }
 0x4d9   : > { %v6486_v17 = vadd.f32 %v6454_v9, %v6422_v46  ;;  %v7394_v33 = vpop.f32.mrf.mxu1 }
 0x4da   : > { %7710 = vst.msk [vmem:[%s11933_s10 + $0x8] sm:$0xff] %vm533_vm0, %v7678_v29  ;;  %v7484_v60 = vmul.f32 %v7394_v33, %v12653_v8 }
 0x4db   : > { %7743 = vst.msk [vmem:[%s11933_s10 + $0x8] sm:$0xff] %vm7741_vm5, %v7646_v3  ;;  %v6824_v28 = vld [vmem:[#allocation4 + $0xa8] sm:$0xff]  ;;  %v7115_v46 = vpop.f32.mrf.mxu0 }
 0x4dc   : > { %v6856_v11 = vadd.f32 %v6824_v28, %v6792_v6  ;;  %6518 = vst.msk [vmem:[#allocation4 + $0xb0] sm:$0xff] %vm573_vm3, %v6486_v17  ;;  %v7548_v10 = vadd.f32 %v7516_v50, %v7484_v60  ;;  %8426 = vmatmul.msk.f32.gmra.mxu1 %vm573_vm3, %v11677_v48  ;;  %v7162_v21 = vld [vmem:[#allocation4 + $0xa0] sm:$0xff] }
 0x4dd   : > { %v7611_v34 = vld [vmem:[#allocation4 + $0x10] sm:$0xff]  ;;  %v7194_v47 = vadd.f32 %v7162_v21, %v11911_v63  ;;  %v12722_v50 = vld [vmem:[#allocation57_spill] sm:$0xff]  ;;  %v7518_v21 = vld [vmem:[#allocation4 + $0x28] sm:$0xff] }
 0x4de   : > { %6888 = vst.msk [vmem:[#allocation4 + $0xa8] sm:$0xff] %vm573_vm3, %v6856_v11  ;;  %v7647_v8 = vadd.f32 %v11919_v20, %v7611_v34  ;;  %v6373_v61 = vpop.f32.mrf.mxu2  ;;  %v12720_v63 = vld [vmem:[#allocation63_spill] sm:$0xff] }
 0x4df   : > { %v6744_v35 = vpop.f32.mrf.mxu3  ;;  %7580 = vst.msk [vmem:[#allocation4 + $0x18] sm:$0xff] %vm573_vm3, %v7548_v10  ;;  %v6423_v36 = vmul.f32 %v6373_v61, %v12677_v18  ;;  %v6793_v55 = vmul.f32 %v6741_v12, %v12720_v63 }
 0x4e0   : > { %v7679_v54 = vadd.f32 %v12719_v0, %v7647_v8  ;;  %7226 = vst.msk [vmem:[#allocation4 + $0xa0] sm:$0xff] %vm573_vm3, %v7194_v47  ;;  %v6794_v11 = vmul.f32 %v6744_v35, %v12722_v50  ;;  %v12723_v0 = vld [vmem:[#allocation69_spill] sm:$0xff] }
 0x4e1   : > { %v6487_v48 = vadd.f32 %v6455_v43, %v6423_v36  ;;  %v7397_v58 = vpop.f32.mrf.mxu1 }
 0x4e2   : > { %7711 = vst.msk [vmem:[%s11933_s10 + $0x10] sm:$0xff] %vm533_vm0, %v7679_v54  ;;  %v7485_v44 = vmul.f32 %v7397_v58, %v12689_v40 }
 0x4e3   : > { %7744 = vst.msk [vmem:[%s11933_s10 + $0x10] sm:$0xff] %vm7741_vm5, %v7647_v8  ;;  %v6825_v53 = vld [vmem:[#allocation4 + $0xb0] sm:$0xff]  ;;  %v7118_v43 = vpop.f32.mrf.mxu0 }
 0x4e4   : > { %v6857_v3 = vadd.f32 %v6825_v53, %v6793_v55  ;;  %6519 = vst.msk [vmem:[#allocation4 + $0xb8] sm:$0xff] %vm573_vm3, %v6487_v48  ;;  %v7549_v51 = vadd.f32 %v7517_v45, %v7485_v44  ;;  %8427 = vmatmul.msk.f32.gmra.mxu1 %vm573_vm3, %v11694_v32  ;;  %v12721_v32 = vunpack.c.h.bf16 %v12718_v37  ;;  %v6457_v48 = vld [vmem:[#allocation4 + $0xc8] sm:$0xff]  ;;  %v12726_v53 = vld [vmem:[#allocation39_spill] sm:$0xff] }
 0x4e5   : > { %v7163_v2 = vld [vmem:[#allocation4 + $0xa8] sm:$0xff] }
 0x4e6   : > { %6889 = vst.msk [vmem:[#allocation4 + $0xb0] sm:$0xff] %vm573_vm3, %v6857_v3  ;;  %v7612_v29 = vld [vmem:[#allocation4 + $0x18] sm:$0xff]  ;;  %v6376_v12 = vpop.f32.mrf.mxu2  ;;  %v7195_v9 = vadd.f32 %v7163_v2, %v11939_v14 }
 0x4e7   : > { %v6747_v40 = vpop.f32.mrf.mxu3  ;;  %v7648_v17 = vadd.f32 %v11919_v20, %v7612_v29  ;;  %7581 = vst.msk [vmem:[#allocation4 + $0x20] sm:$0xff] %vm573_vm3, %v7549_v51  ;;  %v6424_v33 = vmul.f32 %v6376_v12, %v12678_v15  ;;  %v7519_v51 = vld [vmem:[#allocation4 + $0x30] sm:$0xff] }
 0x4e8   : > { %7227 = vst.msk [vmem:[#allocation4 + $0xa8] sm:$0xff] %vm573_vm3, %v7195_v9 }
 0x4e9   : > { %v7680_v6 = vadd.f32 %v12721_v32, %v7648_v17  ;;  %v6488_v60 = vadd.f32 %v6456_v39, %v6424_v33  ;;  %v7400_v28 = vpop.f32.mrf.mxu1 }
 0x4ea   : > { %v7486_v10 = vmul.f32 %v7400_v28, %v12691_v4  ;;  %v6458_v28 = vld [vmem:[#allocation4 + $0xd0] sm:$0xff] }
 0x4eb   : > { %7712 = vst.msk [vmem:[%s11933_s10 + $0x18] sm:$0xff] %vm533_vm0, %v7680_v6  ;;  %v6826_v14 = vld [vmem:[#allocation4 + $0xb8] sm:$0xff]  ;;  %v12728_v6 = vld [vmem:[#allocation73_spill] sm:$0xff] }
 0x4ec   : > { %7745 = vst.msk [vmem:[%s11933_s10 + $0x18] sm:$0xff] %vm7741_vm5, %v7648_v17  ;;  %v6858_v34 = vadd.f32 %v6826_v14, %v6794_v11  ;;  %v7550_v47 = vadd.f32 %v7518_v21, %v7486_v10  ;;  %8428 = vmatmul.msk.f32.gmra.mxu1 %vm573_vm3, %v11711_v30  ;;  %v12724_v30 = vld [vmem:[#allocation11_spill] sm:$0xff]  ;;  %v7121_v14 = vpop.f32.mrf.mxu0  ;;  %v12730_v21 = vld [vmem:[#allocation29_spill] sm:$0xff] }
 0x4ed   : > { %6520 = vst.msk [vmem:[#allocation4 + $0xc0] sm:$0xff] %vm573_vm3, %v6488_v60  ;;  %v7164_v8 = vld [vmem:[#allocation4 + $0xb0] sm:$0xff]  ;;  %v12725_v58 = vunpack.c.l.bf16 %v12724_v30 }
 0x4ee   : > { %6890 = vst.msk [vmem:[#allocation4 + $0xb8] sm:$0xff] %vm573_vm3, %v6858_v34  ;;  %v7613_v61 = vld [vmem:[#allocation4 + $0x20] sm:$0xff]  ;;  %v6379_v35 = vpop.f32.mrf.mxu2  ;;  %v7196_v36 = vadd.f32 %v7164_v8, %v7112_v41  ;;  %v7520_v8 = vld [vmem:[#allocation4 + $0x38] sm:$0xff] }
 0x4ef   : > { %v6750_v4 = vpop.f32.mrf.mxu3  ;;  %v7649_v37 = vadd.f32 %v11919_v20, %v7613_v61  ;;  %7582 = vst.msk [vmem:[#allocation4 + $0x28] sm:$0xff] %vm573_vm3, %v7550_v47  ;;  %v6425_v54 = vmul.f32 %v6379_v35, %v12723_v0  ;;  %v12727_v41 = vld [vmem:[#allocation65_spill] sm:$0xff] }
 0x4f0   : > { %7228 = vst.msk [vmem:[#allocation4 + $0xb0] sm:$0xff] %vm573_vm3, %v7196_v36  ;;  %v6795_v3 = vmul.f32 %v6747_v40, %v12727_v41 }
 0x4f1   : > { %v7681_v63 = vadd.f32 %v12725_v58, %v7649_v37  ;;  %v6489_v55 = vadd.f32 %v6457_v48, %v6425_v54  ;;  %v7403_v44 = vpop.f32.mrf.mxu1 }
 0x4f2   : > { %v7487_v45 = vmul.f32 %v7403_v44, %v12726_v53  ;;  %v6459_v53 = vld [vmem:[#allocation4 + $0xd8] sm:$0xff] }
 0x4f3   : > { %7713 = vst.msk [vmem:[%s11933_s10 + $0x20] sm:$0xff] %vm533_vm0, %v7681_v63 }
 0x4f4   : > { %7746 = vst.msk [vmem:[%s11933_s10 + $0x20] sm:$0xff] %vm7741_vm5, %v7649_v37  ;;  %v6827_v2 = vld [vmem:[#allocation4 + $0xc0] sm:$0xff]  ;;  %v7551_v29 = vadd.f32 %v7519_v51, %v7487_v45  ;;  %8429 = vmatmul.msk.f32.gmra.mxu1 %vm573_vm3, %v11728_v7  ;;  %v12729_v7 = vunpack.c.h.bf16 %v12724_v30  ;;  %v12732_v30 = vld [vmem:[#allocation76_spill] sm:$0xff] }
 0x4f5   : > { %v6859_v12 = vadd.f32 %v6827_v2, %v6795_v3  ;;  %6521 = vst.msk [vmem:[#allocation4 + $0xc8] sm:$0xff] %vm573_vm3, %v6489_v55  ;;  %v7165_v9 = vld [vmem:[#allocation4 + $0xb8] sm:$0xff]  ;;  %v12733_v55 = vld [vmem:[#allocation13_spill] sm:$0xff] }
 0x4f6   : > { %v7614_v17 = vld [vmem:[#allocation4 + $0x28] sm:$0xff]  ;;  %7583 = vst.msk [vmem:[#allocation4 + $0x30] sm:$0xff] %vm573_vm3, %v7551_v29  ;;  %v6382_v33 = vpop.f32.mrf.mxu2  ;;  %v7197_v40 = vadd.f32 %v7165_v9, %v7115_v46  ;;  %v12731_v46 = vld [vmem:[#allocation68_spill] sm:$0xff]  ;;  %v12734_v44 = vunpack.c.l.bf16 %v12733_v55  ;;  %v12735_v51 = vld [vmem:[#allocation41_spill] sm:$0xff] }
 0x4f7   : > { %v6753_v39 = vpop.f32.mrf.mxu3  ;;  %6891 = vst.msk [vmem:[#allocation4 + $0xc0] sm:$0xff] %vm573_vm3, %v6859_v12  ;;  %v7650_v32 = vadd.f32 %v11919_v20, %v7614_v17  ;;  %v6426_v60 = vmul.f32 %v6382_v33, %v12728_v6  ;;  %v6796_v47 = vmul.f32 %v6750_v4, %v12731_v46  ;;  %v12736_v29 = vld [vmem:[#allocation64_spill] sm:$0xff]  ;;  %v7521_v9 = vld [vmem:[#allocation4 + $0x40] sm:$0xff]  ;;  %v7124_v17 = vpop.f32.mrf.mxu0 }
 0x4f8   : > { %7229 = vst.msk [vmem:[#allocation4 + $0xb8] sm:$0xff] %vm573_vm3, %v7197_v40  ;;  %v6797_v12 = vmul.f32 %v6753_v39, %v12736_v29  ;;  %v12737_v39 = vld [vmem:[#allocation75_spill] sm:$0xff] }
 0x4f9   : > { %v7682_v50 = vadd.f32 %v12729_v7, %v7650_v32  ;;  %v6490_v11 = vadd.f32 %v6458_v28, %v6426_v60  ;;  %v7406_v10 = vpop.f32.mrf.mxu1 }
 0x4fa   : > { %v7488_v34 = vmul.f32 %v7406_v10, %v12730_v21  ;;  %v12738_v10 = vunpack.c.h.bf16 %v12733_v55  ;;  %v12740_v55 = vld [vmem:[#allocation55_spill] sm:$0xff] }
 0x4fb   : > { %7714 = vst.msk [vmem:[%s11933_s10 + $0x28] sm:$0xff] %vm533_vm0, %v7682_v50 }
 0x4fc   : > { %7747 = vst.msk [vmem:[%s11933_s10 + $0x28] sm:$0xff] %vm7741_vm5, %v7650_v32  ;;  %v6828_v61 = vld [vmem:[#allocation4 + $0xc8] sm:$0xff]  ;;  %v7552_v35 = vadd.f32 %v7520_v8, %v7488_v34  ;;  %8430 = vmatmul.msk.f32.gmra.mxu1 %vm573_vm3, %v11745_v22  ;;  %v6460_v34 = vld [vmem:[#allocation4 + $0xe0] sm:$0xff] }
 0x4fd   : > { %v6860_v36 = vadd.f32 %v6828_v61, %v6796_v47  ;;  %v7615_v37 = vld [vmem:[#allocation4 + $0x30] sm:$0xff]  ;;  %6522 = vst.msk [vmem:[#allocation4 + $0xd0] sm:$0xff] %vm573_vm3, %v6490_v11  ;;  %v12739_v47 = vld [vmem:[#allocation70_spill] sm:$0xff] }
 0x4fe   : > { %v7651_v54 = vadd.f32 %v11919_v20, %v7615_v37  ;;  %7584 = vst.msk [vmem:[#allocation4 + $0x38] sm:$0xff] %vm573_vm3, %v7552_v35  ;;  %v6385_v48 = vpop.f32.mrf.mxu2  ;;  %v7166_v4 = vld [vmem:[#allocation4 + $0xc0] sm:$0xff]  ;;  %v7522_v37 = vld [vmem:[#allocation4 + $0x48] sm:$0xff] }
 0x4ff   : > { %6892 = vst.msk [vmem:[#allocation4 + $0xc8] sm:$0xff] %vm573_vm3, %v6860_v36  ;;  %v6427_v58 = vmul.f32 %v6385_v48, %v12732_v30  ;;  %v7198_v63 = vadd.f32 %v7166_v4, %v7118_v43  ;;  %v6756_v45 = vpop.f32.mrf.mxu3  ;;  %v7127_v4 = vpop.f32.mrf.mxu0 }
 0x500   : > { %v7683_v22 = vadd.f32 %v12734_v44, %v7651_v54  ;;  %v6798_v8 = vmul.f32 %v6756_v45, %v12739_v47  ;;  %v12746_v47 = vld [vmem:[#allocation72_spill] sm:$0xff] }
 0x501   : > { %v6491_v41 = vadd.f32 %v6459_v53, %v6427_v58  ;;  %v7409_v3 = vpop.f32.mrf.mxu1  ;;  %7230 = vst.msk [vmem:[#allocation4 + $0xc0] sm:$0xff] %vm573_vm3, %v7198_v63  ;;  %v12741_v53 = vld [vmem:[#allocation15_spill] sm:$0xff] }
 0x502   : > { %7715 = vst.msk [vmem:[%s11933_s10 + $0x30] sm:$0xff] %vm533_vm0, %v7683_v22  ;;  %v7489_v2 = vmul.f32 %v7409_v3, %v12735_v51  ;;  %v12742_v45 = vunpack.c.l.bf16 %v12741_v53  ;;  %v6461_v3 = vld [vmem:[#allocation4 + $0xe8] sm:$0xff] }
 0x503   : > { %7748 = vst.msk [vmem:[%s11933_s10 + $0x30] sm:$0xff] %vm7741_vm5, %v7651_v54 }
 0x504   : > { %v6829_v43 = vld [vmem:[#allocation4 + $0xd0] sm:$0xff]  ;;  %6523 = vst.msk [vmem:[#allocation4 + $0xd8] sm:$0xff] %vm573_vm3, %v6491_v41  ;;  %v7553_v33 = vadd.f32 %v7521_v9, %v7489_v2  ;;  %8431 = vmatmul.msk.f32.gmra.mxu1 %vm573_vm3, %v11762_v49  ;;  %v12743_v2 = vld [vmem:[#allocation74_spill] sm:$0xff] }
 0x505   : > { %v6861_v40 = vadd.f32 %v6829_v43, %v6797_v12  ;;  %v7616_v32 = vld [vmem:[#allocation4 + $0x38] sm:$0xff]  ;;  %v7523_v43 = vld [vmem:[#allocation4 + $0x50] sm:$0xff] }
 0x506   : > { %v7652_v60 = vadd.f32 %v11919_v20, %v7616_v32  ;;  %7585 = vst.msk [vmem:[#allocation4 + $0x40] sm:$0xff] %vm573_vm3, %v7553_v33  ;;  %v6388_v28 = vpop.f32.mrf.mxu2  ;;  %v7167_v7 = vld [vmem:[#allocation4 + $0xc8] sm:$0xff] }
 0x507   : > { %6893 = vst.msk [vmem:[#allocation4 + $0xd0] sm:$0xff] %vm573_vm3, %v6861_v40  ;;  %v6428_v50 = vmul.f32 %v6388_v28, %v12737_v39  ;;  %v7199_v11 = vadd.f32 %v7167_v7, %v7121_v14  ;;  %v6759_v61 = vpop.f32.mrf.mxu3 }
 0x508   : > { %v7684_v21 = vadd.f32 %v12738_v10, %v7652_v60  ;;  %v6799_v29 = vmul.f32 %v6759_v61, %v12743_v2  ;;  %v7130_v10 = vpop.f32.mrf.mxu0  ;;  %v12747_v61 = vld [vmem:[#allocation47_spill] sm:$0xff] }
 0x509   : > { %v6492_v46 = vadd.f32 %v6460_v34, %v6428_v50  ;;  %v7412_v49 = vpop.f32.mrf.mxu1  ;;  %7231 = vst.msk [vmem:[#allocation4 + $0xc8] sm:$0xff] %vm573_vm3, %v7199_v11  ;;  %v12744_v50 = vld [vmem:[#allocation80_spill] sm:$0xff] }
 0x50a   : > { %7716 = vst.msk [vmem:[%s11933_s10 + $0x38] sm:$0xff] %vm533_vm0, %v7684_v21  ;;  %v7490_v35 = vmul.f32 %v7412_v49, %v12699_v5  ;;  %v6462_v21 = vld [vmem:[#allocation4 + $0xf0] sm:$0xff] }
 0x50b   : > { %7749 = vst.msk [vmem:[%s11933_s10 + $0x38] sm:$0xff] %vm7741_vm5, %v7652_v60  ;;  %v6830_v36 = vld [vmem:[#allocation4 + $0xd8] sm:$0xff] }
 0x50c   : > { %v6862_v14 = vadd.f32 %v6830_v36, %v6798_v8  ;;  %6524 = vst.msk [vmem:[#allocation4 + $0xe0] sm:$0xff] %vm573_vm3, %v6492_v46  ;;  %v7554_v54 = vadd.f32 %v7522_v37, %v7490_v35  ;;  %8432 = vmatmul.msk.f32.gmra.mxu1 %vm573_vm3, %v11780_v1  ;;  %v7524_v37 = vld [vmem:[#allocation4 + $0x58] sm:$0xff] }
 0x50d   : > { %v7617_v48 = vld [vmem:[#allocation4 + $0x40] sm:$0xff] }
 0x50e   : > { %6894 = vst.msk [vmem:[#allocation4 + $0xd8] sm:$0xff] %vm573_vm3, %v6862_v14  ;;  %v7653_v58 = vadd.f32 %v11919_v20, %v7617_v48  ;;  %v6391_v5 = vpop.f32.mrf.mxu2  ;;  %v7168_v63 = vld [vmem:[#allocation4 + $0xd0] sm:$0xff] }
 0x50f   : > { %7586 = vst.msk [vmem:[#allocation4 + $0x48] sm:$0xff] %vm573_vm3, %v7554_v54  ;;  %v6429_v44 = vmul.f32 %v6391_v5, %v12740_v55  ;;  %v7200_v22 = vadd.f32 %v7168_v63, %v7124_v17  ;;  %v6762_v17 = vpop.f32.mrf.mxu3 }
 0x510   : > { %v7685_v41 = vadd.f32 %v12742_v45, %v7653_v58  ;;  %v6800_v8 = vmul.f32 %v6762_v17, %v12746_v47  ;;  %v6463_v45 = vld [vmem:[#allocation4 + $0xf8] sm:$0xff]  ;;  %v7133_v2 = vpop.f32.mrf.mxu0 }
 0x511   : > { %v6493_v51 = vadd.f32 %v6461_v3, %v6429_v44  ;;  %v7415_v1 = vpop.f32.mrf.mxu1  ;;  %7232 = vst.msk [vmem:[#allocation4 + $0xd0] sm:$0xff] %vm573_vm3, %v7200_v22  ;;  %v12748_v22 = vld [vmem:[#allocation81_spill] sm:$0xff] }
 0x512   : > { %7717 = vst.msk [vmem:[%s11933_s10 + $0x40] sm:$0xff] %vm533_vm0, %v7685_v41  ;;  %v7491_v12 = vmul.f32 %v7415_v1, %v12701_v13 }
 0x513   : > { %7750 = vst.msk [vmem:[%s11933_s10 + $0x40] sm:$0xff] %vm7741_vm5, %v7653_v58  ;;  %v6831_v9 = vld [vmem:[#allocation4 + $0xe0] sm:$0xff] }
 0x514   : > { %v6863_v33 = vadd.f32 %v6831_v9, %v6799_v29  ;;  %6525 = vst.msk [vmem:[#allocation4 + $0xe8] sm:$0xff] %vm573_vm3, %v6493_v51  ;;  %v7555_v40 = vadd.f32 %v7523_v43, %v7491_v12  ;;  %8433 = vmatmul.msk.f32.gmra.mxu1 %vm573_vm3, %v11798_v59  ;;  %v12745_v59 = vunpack.c.h.bf16 %v12741_v53  ;;  %v12751_v12 = vld [vmem:[#allocation78_spill] sm:$0xff]  ;;  %v7525_v43 = vld [vmem:[#allocation4 + $0x60] sm:$0xff] }
 0x515   : > { %v7169_v32 = vld [vmem:[#allocation4 + $0xd8] sm:$0xff] }
 0x516   : > { %6895 = vst.msk [vmem:[#allocation4 + $0xe0] sm:$0xff] %vm573_vm3, %v6863_v33  ;;  %v7618_v60 = vld [vmem:[#allocation4 + $0x48] sm:$0xff]  ;;  %v6394_v28 = vpop.f32.mrf.mxu2  ;;  %v7201_v13 = vadd.f32 %v7169_v32, %v7127_v4 }
 0x517   : > { %v7654_v7 = vadd.f32 %v11919_v20, %v7618_v60  ;;  %7587 = vst.msk [vmem:[#allocation4 + $0x50] sm:$0xff] %vm573_vm3, %v7555_v40  ;;  %v6430_v11 = vmul.f32 %v6394_v28, %v12744_v50  ;;  %v6765_v58 = vpop.f32.mrf.mxu3 }
 0x518   : > { %7233 = vst.msk [vmem:[#allocation4 + $0xd8] sm:$0xff] %vm573_vm3, %v7201_v13  ;;  %v6801_v9 = vmul.f32 %v6765_v58, %v12751_v12  ;;  %v7527_v58 = vld [vmem:[#allocation4 + $0x70] sm:$0xff] }
 0x519   : > { %v7686_v34 = vadd.f32 %v12745_v59, %v7654_v7  ;;  %v6494_v46 = vadd.f32 %v6462_v21, %v6430_v11  ;;  %v7418_v49 = vpop.f32.mrf.mxu1  ;;  %v7136_v21 = vpop.f32.mrf.mxu0  ;;  %v12753_v59 = vld [vmem:[#allocation77_spill] sm:$0xff] }
 0x51a   : > { %v7492_v35 = vmul.f32 %v7418_v49, %v12747_v61 }
 0x51b   : > { %7718 = vst.msk [vmem:[%s11933_s10 + $0x48] sm:$0xff] %vm533_vm0, %v7686_v34  ;;  %v6832_v36 = vld [vmem:[#allocation4 + $0xe8] sm:$0xff] }
 0x51c   : > { %7751 = vst.msk [vmem:[%s11933_s10 + $0x48] sm:$0xff] %vm7741_vm5, %v7654_v7  ;;  %v6864_v14 = vadd.f32 %v6832_v36, %v6800_v8  ;;  %v7556_v54 = vadd.f32 %v7524_v37, %v7492_v35  ;;  %8434 = vmatmul.msk.f32.gmra.mxu1 %vm573_vm3, %v11812_v24  ;;  %v12749_v24 = vld [vmem:[#allocation17_spill] sm:$0xff] }
 0x51d   : > { %6526 = vst.msk [vmem:[#allocation4 + $0xf0] sm:$0xff] %vm573_vm3, %v6494_v46  ;;  %v7170_v48 = vld [vmem:[#allocation4 + $0xe0] sm:$0xff]  ;;  %v12750_v41 = vunpack.c.l.bf16 %v12749_v24  ;;  %v12752_v7 = vunpack.c.h.bf16 %v12749_v24  ;;  %v7526_v46 = vld [vmem:[#allocation4 + $0x68] sm:$0xff] }
 0x51e   : > { %6896 = vst.msk [vmem:[#allocation4 + $0xe8] sm:$0xff] %vm573_vm3, %v6864_v14  ;;  %v7619_v4 = vld [vmem:[#allocation4 + $0x50] sm:$0xff]  ;;  %v6397_v5 = vpop.f32.mrf.mxu2  ;;  %v7202_v63 = vadd.f32 %v7170_v48, %v7130_v10  ;;  %v12754_v37 = vld [vmem:[#allocation5_spill] sm:$0xff] }
 0x51f   : > { %v7655_v44 = vadd.f32 %v11919_v20, %v7619_v4  ;;  %7588 = vst.msk [vmem:[#allocation4 + $0x58] sm:$0xff] %vm573_vm3, %v7556_v54  ;;  %v6431_v53 = vmul.f32 %v6397_v5, %v12748_v22  ;;  %v6768_v13 = vpop.f32.mrf.mxu3  ;;  %v12755_v14 = vunpack.c.l.bf16 %v12754_v37  ;;  %v7268_v4 = vld [vmem:[#allocation3 + $0x112] sm:$0xff] }
 0x520   : > { %7234 = vst.msk [vmem:[#allocation4 + $0xe0] sm:$0xff] %vm573_vm3, %v7202_v63  ;;  %v6802_v34 = vmul.f32 %v6768_v13, %v12753_v59 }
 0x521   : > { %v7687_v3 = vadd.f32 %v12750_v41, %v7655_v44  ;;  %v6495_v51 = vadd.f32 %v6463_v45, %v6431_v53  ;;  %v7421_v1 = vpop.f32.mrf.mxu1  ;;  %v7139_v63 = vpop.f32.mrf.mxu0  ;;  %v12756_v41 = vunpack.c.h.bf16 %v12754_v37 }
 0x522   : > { %v7493_v29 = vmul.f32 %v7421_v1, %v12705_v16 }
 0x523   : > { %7719 = vst.msk [vmem:[%s11933_s10 + $0x50] sm:$0xff] %vm533_vm0, %v7687_v3 }
 0x524   : > { %7752 = vst.msk [vmem:[%s11933_s10 + $0x50] sm:$0xff] %vm7741_vm5, %v7655_v44  ;;  %v6833_v33 = vld [vmem:[#allocation4 + $0xf0] sm:$0xff]  ;;  %v7557_v17 = vadd.f32 %v7525_v43, %v7493_v29  ;;  %8435 = vmatmul.msk.f32.gmra.mxu1 %vm573_vm3, %v11828_v62  ;;  %v12757_v43 = vld [vmem:[#allocation6_spill] sm:$0xff] }
 0x525   : > { %v6865_v40 = vadd.f32 %v6833_v33, %v6801_v9  ;;  %6527 = vst.msk [vmem:[#allocation4 + $0xf8] sm:$0xff] %vm573_vm3, %v6495_v51  ;;  %v7171_v32 = vld [vmem:[#allocation4 + $0xe8] sm:$0xff]  ;;  %v7269_v51 = vld [vmem:[#allocation3 + $0x11a] sm:$0xff]  ;;  %v12758_v33 = vunpack.c.l.bf16 %v12757_v43  ;;  %v12759_v13 = vunpack.c.h.bf16 %v12757_v43 }
 0x526   : > { %v7620_v60 = vld [vmem:[#allocation4 + $0x58] sm:$0xff]  ;;  %7589 = vst.msk [vmem:[#allocation4 + $0x60] sm:$0xff] %vm573_vm3, %v7557_v17  ;;  %v7203_v16 = vadd.f32 %v7171_v32, %v7133_v2  ;;  %v7529_v32 = vld [vmem:[#allocation4 + $0x80] sm:$0xff] }
 0x527   : > { %6897 = vst.msk [vmem:[#allocation4 + $0xf0] sm:$0xff] %vm573_vm3, %v6865_v40  ;;  %v7656_v28 = vadd.f32 %v11919_v20, %v7620_v60  ;;  %v7528_v2 = vld [vmem:[#allocation4 + $0x78] sm:$0xff] }
 0x528   : > { %7235 = vst.msk [vmem:[#allocation4 + $0xe8] sm:$0xff] %vm573_vm3, %v7203_v16 }
 0x529   : > { %v7688_v11 = vadd.f32 %v12752_v7, %v7656_v28  ;;  %v7424_v62 = vpop.f32.mrf.mxu1 }
 0x52a   : > { %v7494_v10 = vmul.f32 %v7424_v62, %v12661_v57 }
 0x52b   : > { %7720 = vst.msk [vmem:[%s11933_s10 + $0x58] sm:$0xff] %vm533_vm0, %v7688_v11 }
 0x52c   : > { %7753 = vst.msk [vmem:[%s11933_s10 + $0x58] sm:$0xff] %vm7741_vm5, %v7656_v28  ;;  %v6834_v49 = vld [vmem:[#allocation4 + $0xf8] sm:$0xff]  ;;  %v7558_v47 = vadd.f32 %v7526_v46, %v7494_v10  ;;  %8436 = vmatmul.msk.f32.gmra.mxu1 %vm573_vm3, %v11845_v38 }
 0x52d   : > { %v6866_v8 = vadd.f32 %v6834_v49, %v6802_v34  ;;  %v7621_v61 = vld [vmem:[#allocation4 + $0x60] sm:$0xff]  ;;  %v12760_v34 = vld [vmem:[#allocation8_spill] sm:$0xff] }
 0x52e   : > { %v7657_v35 = vadd.f32 %v11919_v20, %v7621_v61  ;;  %7590 = vst.msk [vmem:[#allocation4 + $0x68] sm:$0xff] %vm573_vm3, %v7558_v47  ;;  %v7172_v57 = vld [vmem:[#allocation4 + $0xf0] sm:$0xff]  ;;  %v12761_v46 = vunpack.c.l.bf16 %v12760_v34 }
 0x52f   : > { %6898 = vst.msk [vmem:[#allocation4 + $0xf8] sm:$0xff] %vm573_vm3, %v6866_v8  ;;  %v7204_v36 = vadd.f32 %v7172_v57, %v7136_v21 }
 0x530   : > { %v7689_v54 = vadd.f32 %v12755_v14, %v7657_v35 }
 0x531   : > { %7236 = vst.msk [vmem:[#allocation4 + $0xf0] sm:$0xff] %vm573_vm3, %v7204_v36  ;;  %v7427_v48 = vpop.f32.mrf.mxu1  ;;  %v12762_v36 = vunpack.c.h.bf16 %v12760_v34 }
 0x532   : > { %7721 = vst.msk [vmem:[%s11933_s10 + $0x60] sm:$0xff] %vm533_vm0, %v7689_v54  ;;  %v7495_v38 = vmul.f32 %v7427_v48, %v12662_v56 }
 0x533   : > { %7754 = vst.msk [vmem:[%s11933_s10 + $0x60] sm:$0xff] %vm7741_vm5, %v7657_v35 }
 0x534   : > { %v7559_v5 = vadd.f32 %v7527_v58, %v7495_v38  ;;  %8437 = vmatmul.msk.f32.gmra.mxu1 %vm573_vm3, %v7268_v4  ;;  %v12763_v58 = vld [vmem:[#allocation10_spill] sm:$0xff] }
 0x535   : > { %v7622_v44 = vld [vmem:[#allocation4 + $0x68] sm:$0xff] }
 0x536   : > { %v7658_v53 = vadd.f32 %v11919_v20, %v7622_v44  ;;  %7591 = vst.msk [vmem:[#allocation4 + $0x70] sm:$0xff] %vm573_vm3, %v7559_v5  ;;  %v7173_v45 = vld [vmem:[#allocation4 + $0xf8] sm:$0xff]  ;;  %v12764_v5 = vunpack.c.l.bf16 %v12763_v58 }
 0x537   : > { %v7205_v24 = vadd.f32 %v7173_v45, %v7139_v63 }
 0x538   : > { %v7690_v3 = vadd.f32 %v12756_v41, %v7658_v53 }
 0x539   : > { %7237 = vst.msk [vmem:[#allocation4 + $0xf8] sm:$0xff] %vm573_vm3, %v7205_v24  ;;  %v7430_v56 = vpop.f32.mrf.mxu1 }
 0x53a   : > { %7722 = vst.msk [vmem:[%s11933_s10 + $0x68] sm:$0xff] %vm533_vm0, %v7690_v3  ;;  %v7496_v1 = vmul.f32 %v7430_v56, %v12663_v42  ;;  %v12765_v3 = vunpack.c.h.bf16 %v12763_v58 }
 0x53b   : > { %7755 = vst.msk [vmem:[%s11933_s10 + $0x68] sm:$0xff] %vm7741_vm5, %v7658_v53 }
 0x53c   : > { %v7560_v29 = vadd.f32 %v7528_v2, %v7496_v1  ;;  %8438 = vmatmul.msk.f32.gmra.mxu1 %vm573_vm3, %v7269_v51 }
 0x53d   : > { %v7623_v12 = vld [vmem:[#allocation4 + $0x70] sm:$0xff] }
 0x53e   : > { %v7659_v9 = vadd.f32 %v11919_v20, %v7623_v12  ;;  %7592 = vst.msk [vmem:[#allocation4 + $0x78] sm:$0xff] %vm573_vm3, %v7560_v29 }
 0x540   : > { %v7691_v17 = vadd.f32 %v12758_v33, %v7659_v9 }
 0x541   : > { %v7433_v40 = vpop.f32.mrf.mxu1 }
 0x542   : > { %7723 = vst.msk [vmem:[%s11933_s10 + $0x70] sm:$0xff] %vm533_vm0, %v7691_v17  ;;  %v7497_v42 = vmul.f32 %v7433_v40, %v12709_v31  ;;  %v7530_v31 = vld [vmem:[#allocation4 + $0x88] sm:$0xff] }
 0x543   : > { %7756 = vst.msk [vmem:[%s11933_s10 + $0x70] sm:$0xff] %vm7741_vm5, %v7659_v9  ;;  %v12766_v9 = vld [vmem:[#allocation12_spill] sm:$0xff] }
 0x544   : > { %v7561_v60 = vadd.f32 %v7529_v32, %v7497_v42  ;;  %v12767_v43 = vunpack.c.l.bf16 %v12766_v9 }
 0x545   : > { %v7624_v16 = vld [vmem:[#allocation4 + $0x78] sm:$0xff] }
 0x546   : > { %v7660_v28 = vadd.f32 %v11919_v20, %v7624_v16  ;;  %7593 = vst.msk [vmem:[#allocation4 + $0x80] sm:$0xff] %vm573_vm3, %v7561_v60  ;;  %v12768_v16 = vunpack.c.h.bf16 %v12766_v9 }
 0x548   : > { %v7692_v7 = vadd.f32 %v12759_v13, %v7660_v28 }
 0x549   : > { %v7436_v11 = vpop.f32.mrf.mxu1 }
 0x54a   : > { %7724 = vst.msk [vmem:[%s11933_s10 + $0x78] sm:$0xff] %vm533_vm0, %v7692_v7  ;;  %v7498_v62 = vmul.f32 %v7436_v11, %v12668_v26  ;;  %v7531_v26 = vld [vmem:[#allocation4 + $0x90] sm:$0xff] }
 0x54b   : > { %7757 = vst.msk [vmem:[%s11933_s10 + $0x78] sm:$0xff] %vm7741_vm5, %v7660_v28 }
 0x54c   : > { %v7562_v10 = vadd.f32 %v7530_v31, %v7498_v62 }
 0x54d   : > { %v7625_v21 = vld [vmem:[#allocation4 + $0x80] sm:$0xff] }
 0x54e   : > { %v7661_v59 = vadd.f32 %v11919_v20, %v7625_v21  ;;  %7594 = vst.msk [vmem:[#allocation4 + $0x88] sm:$0xff] %vm573_vm3, %v7562_v10  ;;  %v12769_v10 = vld [vmem:[#allocation14_spill] sm:$0xff] }
 0x54f   : > { %v12770_v21 = vunpack.c.l.bf16 %v12769_v10 }
 0x550   : > { %v7693_v49 = vadd.f32 %v12761_v46, %v7661_v59 }
 0x551   : > { %v7439_v47 = vpop.f32.mrf.mxu1 }
 0x552   : > { %7725 = vst.msk [vmem:[%s11933_s10 + $0x80] sm:$0xff] %vm533_vm0, %v7693_v49  ;;  %v7499_v8 = vmul.f32 %v7439_v47, %v12671_v52  ;;  %v7532_v52 = vld [vmem:[#allocation4 + $0x98] sm:$0xff] }
 0x553   : > { %7758 = vst.msk [vmem:[%s11933_s10 + $0x80] sm:$0xff] %vm7741_vm5, %v7661_v59 }
 0x554   : > { %v7563_v61 = vadd.f32 %v7531_v26, %v7499_v8  ;;  %v12771_v26 = vunpack.c.h.bf16 %v12769_v10 }
 0x555   : > { %v7626_v35 = vld [vmem:[#allocation4 + $0x88] sm:$0xff] }
 0x556   : > { %v7662_v57 = vadd.f32 %v11919_v20, %v7626_v35  ;;  %7595 = vst.msk [vmem:[#allocation4 + $0x90] sm:$0xff] %vm573_vm3, %v7563_v61 }
 0x558   : > { %v7694_v37 = vadd.f32 %v12762_v36, %v7662_v57 }
 0x559   : > { %v7442_v14 = vpop.f32.mrf.mxu1 }
 0x55a   : > { %7726 = vst.msk [vmem:[%s11933_s10 + $0x88] sm:$0xff] %vm533_vm0, %v7694_v37  ;;  %v7500_v54 = vmul.f32 %v7442_v14, %v12673_v27  ;;  %v7533_v27 = vld [vmem:[#allocation4 + $0xa0] sm:$0xff] }
 0x55b   : > { %7759 = vst.msk [vmem:[%s11933_s10 + $0x88] sm:$0xff] %vm7741_vm5, %v7662_v57 }
 0x55c   : > { %v7564_v48 = vadd.f32 %v7532_v52, %v7500_v54  ;;  %v12772_v54 = vld [vmem:[#allocation16_spill] sm:$0xff] }
 0x55d   : > { %v7627_v4 = vld [vmem:[#allocation4 + $0x90] sm:$0xff]  ;;  %v12773_v52 = vunpack.c.l.bf16 %v12772_v54 }
 0x55e   : > { %v7663_v38 = vadd.f32 %v11919_v20, %v7627_v4  ;;  %7596 = vst.msk [vmem:[#allocation4 + $0x98] sm:$0xff] %vm573_vm3, %v7564_v48 }
 0x560   : > { %v7695_v63 = vadd.f32 %v12764_v5, %v7663_v38 }
 0x561   : > { %v7445_v44 = vpop.f32.mrf.mxu1 }
 0x562   : > { %7727 = vst.msk [vmem:[%s11933_s10 + $0x90] sm:$0xff] %vm533_vm0, %v7695_v63  ;;  %v7501_v53 = vmul.f32 %v7445_v44, %v12674_v25  ;;  %v7534_v25 = vld [vmem:[#allocation4 + $0xa8] sm:$0xff]  ;;  %v12774_v44 = vunpack.c.h.bf16 %v12772_v54 }
 0x563   : > { %7760 = vst.msk [vmem:[%s11933_s10 + $0x90] sm:$0xff] %vm7741_vm5, %v7663_v38 }
 0x564   : > { %v7565_v45 = vadd.f32 %v7533_v27, %v7501_v53 }
 0x565   : > { %v7628_v24 = vld [vmem:[#allocation4 + $0x98] sm:$0xff] }
 0x566   : > { %v7664_v41 = vadd.f32 %v11919_v20, %v7628_v24  ;;  %7597 = vst.msk [vmem:[#allocation4 + $0xa0] sm:$0xff] %vm573_vm3, %v7565_v45 }
 0x568   : > { %v7696_v56 = vadd.f32 %v12765_v3, %v7664_v41 }
 0x569   : > { %v7448_v51 = vpop.f32.mrf.mxu1 }
 0x56a   : > { %7728 = vst.msk [vmem:[%s11933_s10 + $0x98] sm:$0xff] %vm533_vm0, %v7696_v56  ;;  %v7502_v1 = vmul.f32 %v7448_v51, %v12675_v23  ;;  %v7535_v23 = vld [vmem:[#allocation4 + $0xb0] sm:$0xff]  ;;  %v12775_v56 = vld [vmem:[#allocation18_spill] sm:$0xff] }
 0x56b   : > { %7761 = vst.msk [vmem:[%s11933_s10 + $0x98] sm:$0xff] %vm7741_vm5, %v7664_v41  ;;  %v12776_v51 = vunpack.c.l.bf16 %v12775_v56 }
 0x56c   : > { %v7566_v2 = vadd.f32 %v7534_v25, %v7502_v1 }
 0x56d   : > { %v7629_v29 = vld [vmem:[#allocation4 + $0xa0] sm:$0xff] }
 0x56e   : > { %v7665_v12 = vadd.f32 %v11919_v20, %v7629_v29  ;;  %7598 = vst.msk [vmem:[#allocation4 + $0xa8] sm:$0xff] %vm573_vm3, %v7566_v2 }
 0x570   : > { %v7697_v33 = vadd.f32 %v12767_v43, %v7665_v12  ;;  %v12777_v43 = vunpack.c.h.bf16 %v12775_v56 }
 0x571   : > { %v7451_v17 = vpop.f32.mrf.mxu1 }
 0x572   : > { %7729 = vst.msk [vmem:[%s11933_s10 + $0xa0] sm:$0xff] %vm533_vm0, %v7697_v33  ;;  %v7503_v40 = vmul.f32 %v7451_v17, %v12676_v19  ;;  %v7536_v19 = vld [vmem:[#allocation4 + $0xb8] sm:$0xff] }
 0x573   : > { %7762 = vst.msk [vmem:[%s11933_s10 + $0xa0] sm:$0xff] %vm7741_vm5, %v7665_v12 }
 0x574   : > { %v7567_v42 = vadd.f32 %v7535_v23, %v7503_v40 }
 0x575   : > { %v7630_v32 = vld [vmem:[#allocation4 + $0xa8] sm:$0xff] }
 0x576   : > { %v7666_v60 = vadd.f32 %v11919_v20, %v7630_v32  ;;  %7599 = vst.msk [vmem:[#allocation4 + $0xb0] sm:$0xff] %vm573_vm3, %v7567_v42 }
 0x578   : > { %v7698_v28 = vadd.f32 %v12768_v16, %v7666_v60 }
 0x579   : > { %v7454_v13 = vpop.f32.mrf.mxu1 }
 0x57a   : > { %7730 = vst.msk [vmem:[%s11933_s10 + $0xa8] sm:$0xff] %vm533_vm0, %v7698_v28  ;;  %v7504_v7 = vmul.f32 %v7454_v13, %v12677_v18  ;;  %v7537_v18 = vld [vmem:[#allocation4 + $0xc0] sm:$0xff] }
 0x57b   : > { %7763 = vst.msk [vmem:[%s11933_s10 + $0xa8] sm:$0xff] %vm7741_vm5, %v7666_v60  ;;  %v12778_v60 = vld [vmem:[#allocation19_spill] sm:$0xff] }
 0x57c   : > { %v7568_v11 = vadd.f32 %v7536_v19, %v7504_v7  ;;  %v12779_v16 = vunpack.c.l.bf16 %v12778_v60 }
 0x57d   : > { %v7631_v62 = vld [vmem:[#allocation4 + $0xb0] sm:$0xff] }
 0x57e   : > { %v7667_v31 = vadd.f32 %v11919_v20, %v7631_v62  ;;  %7600 = vst.msk [vmem:[#allocation4 + $0xb8] sm:$0xff] %vm573_vm3, %v7568_v11 }
 0x580   : > { %v7699_v59 = vadd.f32 %v12770_v21, %v7667_v31 }
 0x581   : > { %v7457_v34 = vpop.f32.mrf.mxu1 }
 0x582   : > { %7731 = vst.msk [vmem:[%s11933_s10 + $0xb0] sm:$0xff] %vm533_vm0, %v7699_v59  ;;  %v7505_v46 = vmul.f32 %v7457_v34, %v12678_v15  ;;  %v7538_v15 = vld [vmem:[#allocation4 + $0xc8] sm:$0xff]  ;;  %v7544_v59 = vld [vmem:[#allocation4 + $0xf8] sm:$0xff] }
 0x583   : > { %7764 = vst.msk [vmem:[%s11933_s10 + $0xb0] sm:$0xff] %vm7741_vm5, %v7667_v31  ;;  %v12780_v31 = vunpack.c.h.bf16 %v12778_v60 }
 0x584   : > { %v7569_v49 = vadd.f32 %v7537_v18, %v7505_v46 }
 0x585   : > { %v7632_v47 = vld [vmem:[#allocation4 + $0xb8] sm:$0xff] }
 0x586   : > { %v7668_v8 = vadd.f32 %v11919_v20, %v7632_v47  ;;  %7601 = vst.msk [vmem:[#allocation4 + $0xc0] sm:$0xff] %vm573_vm3, %v7569_v49  ;;  %v12781_v49 = vld [vmem:[#allocation79_spill] sm:$0xff] }
 0x587   : > { %v12782_v47 = vunpack.c.l.bf16 %v12781_v49 }
 0x588   : > { %v7700_v61 = vadd.f32 %v12771_v26, %v7668_v8 }
 0x589   : > { %v7460_v35 = vpop.f32.mrf.mxu1 }
 0x58a   : > { %7732 = vst.msk [vmem:[%s11933_s10 + $0xb8] sm:$0xff] %vm533_vm0, %v7700_v61  ;;  %v7506_v57 = vmul.f32 %v7460_v35, %v12723_v0  ;;  %v7539_v0 = vld [vmem:[#allocation4 + $0xd0] sm:$0xff] }
 0x58b   : > { %7765 = vst.msk [vmem:[%s11933_s10 + $0xb8] sm:$0xff] %vm7741_vm5, %v7668_v8 }
 0x58c   : > { %v7570_v36 = vadd.f32 %v7538_v15, %v7506_v57 }
 0x58d   : > { %v7633_v37 = vld [vmem:[#allocation4 + $0xc0] sm:$0xff] }
 0x58e   : > { %v7669_v14 = vadd.f32 %v11919_v20, %v7633_v37  ;;  %7602 = vst.msk [vmem:[#allocation4 + $0xc8] sm:$0xff] %vm573_vm3, %v7570_v36 }
 0x590   : > { %v7701_v48 = vadd.f32 %v12773_v52, %v7669_v14 }
 0x591   : > { %v7463_v4 = vpop.f32.mrf.mxu1 }
 0x592   : > { %7733 = vst.msk [vmem:[%s11933_s10 + $0xc0] sm:$0xff] %vm533_vm0, %v7701_v48  ;;  %v7507_v38 = vmul.f32 %v7463_v4, %v12728_v6  ;;  %v7540_v6 = vld [vmem:[#allocation4 + $0xd8] sm:$0xff] }
 0x593   : > { %7766 = vst.msk [vmem:[%s11933_s10 + $0xc0] sm:$0xff] %vm7741_vm5, %v7669_v14 }
 0x594   : > { %v7571_v58 = vadd.f32 %v7539_v0, %v7507_v38 }
 0x595   : > { %v7634_v5 = vld [vmem:[#allocation4 + $0xc8] sm:$0xff] }
 0x596   : > { %v7670_v63 = vadd.f32 %v11919_v20, %v7634_v5  ;;  %7603 = vst.msk [vmem:[#allocation4 + $0xd0] sm:$0xff] %vm573_vm3, %v7571_v58 }
 0x598   : > { %v7702_v53 = vadd.f32 %v12774_v44, %v7670_v63 }
 0x599   : > { %v7466_v27 = vpop.f32.mrf.mxu1 }
 0x59a   : > { %7734 = vst.msk [vmem:[%s11933_s10 + $0xc8] sm:$0xff] %vm533_vm0, %v7702_v53  ;;  %v7508_v45 = vmul.f32 %v7466_v27, %v12732_v30  ;;  %v7541_v30 = vld [vmem:[#allocation4 + $0xe0] sm:$0xff] }
 0x59b   : > { %7767 = vst.msk [vmem:[%s11933_s10 + $0xc8] sm:$0xff] %vm7741_vm5, %v7670_v63 }
 0x59c   : > { %v7572_v24 = vadd.f32 %v7540_v6, %v7508_v45 }
 0x59d   : > { %v7635_v41 = vld [vmem:[#allocation4 + $0xd0] sm:$0xff] }
 0x59e   : > { %v7671_v3 = vadd.f32 %v11919_v20, %v7635_v41  ;;  %7604 = vst.msk [vmem:[#allocation4 + $0xd8] sm:$0xff] %vm573_vm3, %v7572_v24 }
 0x5a0   : > { %v7703_v1 = vadd.f32 %v12776_v51, %v7671_v3 }
 0x5a1   : > { %v7469_v25 = vpop.f32.mrf.mxu1 }
 0x5a2   : > { %7735 = vst.msk [vmem:[%s11933_s10 + $0xd0] sm:$0xff] %vm533_vm0, %v7703_v1  ;;  %v7509_v2 = vmul.f32 %v7469_v25, %v12737_v39  ;;  %v7542_v39 = vld [vmem:[#allocation4 + $0xe8] sm:$0xff] }
 0x5a3   : > { %7768 = vst.msk [vmem:[%s11933_s10 + $0xd0] sm:$0xff] %vm7741_vm5, %v7671_v3 }
 0x5a4   : > { %v7573_v29 = vadd.f32 %v7541_v30, %v7509_v2 }
 0x5a5   : > { %v7636_v12 = vld [vmem:[#allocation4 + $0xd8] sm:$0xff] }
 0x5a6   : > { %v7672_v9 = vadd.f32 %v11919_v20, %v7636_v12  ;;  %7605 = vst.msk [vmem:[#allocation4 + $0xe0] sm:$0xff] %vm573_vm3, %v7573_v29 }
 0x5a8   : > { %v7704_v33 = vadd.f32 %v12777_v43, %v7672_v9 }
 0x5a9   : > { %v7472_v17 = vpop.f32.mrf.mxu1 }
 0x5aa   : > { %7736 = vst.msk [vmem:[%s11933_s10 + $0xd8] sm:$0xff] %vm533_vm0, %v7704_v33  ;;  %v7510_v40 = vmul.f32 %v7472_v17, %v12740_v55  ;;  %v7543_v55 = vld [vmem:[#allocation4 + $0xf0] sm:$0xff] }
 0x5ab   : > { %7769 = vst.msk [vmem:[%s11933_s10 + $0xd8] sm:$0xff] %vm7741_vm5, %v7672_v9 }
 0x5ac   : > { %v7574_v23 = vadd.f32 %v7542_v39, %v7510_v40 }
 0x5ad   : > { %v7637_v42 = vld [vmem:[#allocation4 + $0xe0] sm:$0xff] }
 0x5ae   : > { %v7673_v32 = vadd.f32 %v11919_v20, %v7637_v42  ;;  %7606 = vst.msk [vmem:[#allocation4 + $0xe8] sm:$0xff] %vm573_vm3, %v7574_v23 }
 0x5b0   : > { %v7705_v28 = vadd.f32 %v12779_v16, %v7673_v32 }
 0x5b1   : > { %v7475_v13 = vpop.f32.mrf.mxu1 }
 0x5b2   : > { %7737 = vst.msk [vmem:[%s11933_s10 + $0xe0] sm:$0xff] %vm533_vm0, %v7705_v28  ;;  %v7511_v7 = vmul.f32 %v7475_v13, %v12744_v50 }
 0x5b3   : > { %7770 = vst.msk [vmem:[%s11933_s10 + $0xe0] sm:$0xff] %vm7741_vm5, %v7673_v32 }
 0x5b4   : > { %v7575_v19 = vadd.f32 %v7543_v55, %v7511_v7 }
 0x5b5   : > { %v7638_v11 = vld [vmem:[#allocation4 + $0xe8] sm:$0xff] }
 0x5b6   : > { %v7674_v62 = vadd.f32 %v11919_v20, %v7638_v11  ;;  %7607 = vst.msk [vmem:[#allocation4 + $0xf0] sm:$0xff] %vm573_vm3, %v7575_v19 }
 0x5b8   : > { %v7706_v10 = vadd.f32 %v12780_v31, %v7674_v62 }
 0x5b9   : > { %v7478_v21 = vpop.f32.mrf.mxu1 }
 0x5ba   : > { %7738 = vst.msk [vmem:[%s11933_s10 + $0xe8] sm:$0xff] %vm533_vm0, %v7706_v10  ;;  %v7512_v50 = vmul.f32 %v7478_v21, %v12748_v22  ;;  %v12783_v22 = vunpack.c.h.bf16 %v12781_v49 }
 0x5bb   : > { %7771 = vst.msk [vmem:[%s11933_s10 + $0xe8] sm:$0xff] %vm7741_vm5, %v7674_v62 }
 0x5bc   : > { %v7576_v34 = vadd.f32 %v7544_v59, %v7512_v50 }
 0x5bd   : > { %v7639_v46 = vld [vmem:[#allocation4 + $0xf0] sm:$0xff] }
 0x5be   : > { %v7675_v18 = vadd.f32 %v11919_v20, %v7639_v46  ;;  %7608 = vst.msk [vmem:[#allocation4 + $0xf8] sm:$0xff] %vm573_vm3, %v7576_v34 }
 0x5c0   : > { %v7707_v8 = vadd.f32 %v12782_v47, %v7675_v18 }
 0x5c2   : > { %7739 = vst.msk [vmem:[%s11933_s10 + $0xf0] sm:$0xff] %vm533_vm0, %v7707_v8 }
 0x5c3   : > { %7772 = vst.msk [vmem:[%s11933_s10 + $0xf0] sm:$0xff] %vm7741_vm5, %v7675_v18 }
 0x5c5   : > { %v7640_v26 = vld [vmem:[#allocation4 + $0xf8] sm:$0xff] }
 0x5c6   : > { %v7676_v61 = vadd.f32 %v11919_v20, %v7640_v26 }
 0x5c8   : > { %v7708_v35 = vadd.f32 %v12783_v22, %v7676_v61 }
 0x5ca   : > { %7740 = vst.msk [vmem:[%s11933_s10 + $0xf8] sm:$0xff] %vm533_vm0, %v7708_v35 }
 0x5cb   : > { %7773 = vst.msk [vmem:[%s11933_s10 + $0xf8] sm:$0xff] %vm7741_vm5, %v7676_v61 }
 0x5cc PF: > { %s19_s30 = sadd.s32 1, %s8552_s30  }
 0x5cd   : > { %p16_p4 = scmp.ge.s32.totalorder %s19_s30, 4  }
 0x5cf   :  { %18 = sbr.rel (!%p16_p4) target bundleno = 1 (0x1), region = 102 }

</bundles_post_ra>
